<compile_context>
chip_gen: v6e
topology: v6e:2x2x1
jax: 0.10.0
libtpu: 0.0.40
codegen_flags: <defaults>
</compile_context>

<pallas_src>
import functools

import jax
import jax.numpy as jnp
from jax import lax
from jax.experimental import pallas as pl
from jax.experimental.pallas import tpu as pltpu


_EPS = 1e-5


# ---------------------------------------------------------------------------
# Fused BasicBlock kernel (B batch elements per grid step)
# ---------------------------------------------------------------------------
def _basic_block_kernel(*refs, B, H1, W1, W1p, KH, KW, Ck, Cin, C1, has_proj):
    """relu(bn2(conv2(relu(bn1(conv1(x))))) + shortcut(x)) for B batch elements.

    refs: x, w1, s1, b1, w2, s2, b2, [wsc, ssc, bsc], out, xpad_scratch, h1pad_scratch
    """
    if has_proj:
        (x_ref, w1_ref, s1_ref, b1_ref, w2_ref, s2_ref, b2_ref,
         wsc_ref, ssc_ref, bsc_ref, o_ref, xpad_ref, h1pad_ref) = refs
    else:
        (x_ref, w1_ref, s1_ref, b1_ref, w2_ref, s2_ref, b2_ref,
         o_ref, xpad_ref, h1pad_ref) = refs
        wsc_ref = ssc_ref = bsc_ref = None

    M = B * H1 * W1p

    # Halo borders (and the >W1 padded columns) are zeroed ONCE: the scratch
    # persists across the sequential batch grid and only the interior is
    # rewritten each step, so those zeros stay valid forever.
    @pl.when(pl.program_id(0) == 0)
    def _zero_halos():
        xpad_ref[...] = jnp.zeros_like(xpad_ref)
        h1pad_ref[...] = jnp.zeros_like(h1pad_ref)

    # Interior of the padded input. f32 scratch keeps the offset-1 write on
    # 32-bit sublane granularity; MXU operands are narrowed to bf16 per tap.
    xpad_ref[:, 1:H1 + 1, 1:W1 + 1, :] = x_ref[...].astype(jnp.float32)

    # --- conv1 + BN1 + ReLU: per-tap MXU accumulation (no materialized im2col)
    acc = None
    t = 0
    for ky in range(KH):
        for kx in range(KW):
            patch = xpad_ref[:, ky:ky + H1, kx:kx + W1p, :].reshape(M, Ck)
            d = jnp.dot(patch.astype(jnp.bfloat16), w1_ref[t],
                        preferred_element_type=jnp.float32)
            acc = d if acc is None else acc + d
            t += 1
    h = jnp.maximum(acc * s1_ref[...] + b1_ref[...], 0.0)

    # Stash the conv1 activation with a fresh 1-px halo; only the W1 valid
    # columns are written so conv2's padded columns stay exactly zero.
    hsp = h.reshape(B, H1, W1p, C1)
    if W1p != W1:
        hsp = hsp[:, :, :W1, :]
    h1pad_ref[:, 1:H1 + 1, 1:W1 + 1, :] = hsp

    # --- conv2 + BN2: per-tap MXU accumulation -------------------------------
    acc2 = None
    t = 0
    for ky in range(3):
        for kx in range(3):
            patch = h1pad_ref[:, ky:ky + H1, kx:kx + W1p, :].reshape(M, C1)
            d = jnp.dot(patch.astype(jnp.bfloat16), w2_ref[t],
                        preferred_element_type=jnp.float32)
            acc2 = d if acc2 is None else acc2 + d
            t += 1
    out = acc2 * s2_ref[...] + b2_ref[...]

    # --- shortcut: identity, or 1x1 projection over the phase-(0,0) channels --
    xin = xpad_ref[:, 1:H1 + 1, 1:W1p + 1, :]
    if has_proj:
        if Cin != Ck:
            xin = xin[..., :Cin]           # space-to-depth phase (0,0) == stride-s taps
        sc = jnp.dot(xin.reshape(M, Cin).astype(jnp.bfloat16), wsc_ref[...],
                     preferred_element_type=jnp.float32)
        sc = sc * ssc_ref[...] + bsc_ref[...]
    else:
        sc = xin.reshape(M, C1)            # Ck == C1 in the identity case (f32)

    # --- residual add + ReLU; direct block store (no per-column packing) ------
    y = jnp.maximum(out + sc, 0.0)
    o_ref[...] = y.reshape(B, H1 * W1p, C1).astype(o_ref.dtype)


def _fused_basic_block(xk, w1, s1, b1, w2, s2, b2, sc_params, *,
                       B, H1, W1, W1p, KH, KW, Ck, Cin, C1):
    N = xk.shape[0]
    has_proj = sc_params is not None

    in_specs = [
        pl.BlockSpec((B, H1, W1, Ck), lambda b: (b, 0, 0, 0)),    # x (space-to-depth NHWC)
        pl.BlockSpec((KH * KW, Ck, C1), lambda b: (0, 0, 0)),     # conv1 per-tap weights
        pl.BlockSpec((1, C1), lambda b: (0, 0)),                  # bn1 scale
        pl.BlockSpec((1, C1), lambda b: (0, 0)),                  # bn1 bias
        pl.BlockSpec((9, C1, C1), lambda b: (0, 0, 0)),           # conv2 per-tap weights
        pl.BlockSpec((1, C1), lambda b: (0, 0)),                  # bn2 scale
        pl.BlockSpec((1, C1), lambda b: (0, 0)),                  # bn2 bias
    ]
    args = [xk, w1, s1, b1, w2, s2, b2]
    if has_proj:
        wsc, ssc, bsc = sc_params
        in_specs += [
            pl.BlockSpec((Cin, C1), lambda b: (0, 0)),            # shortcut weight
            pl.BlockSpec((1, C1), lambda b: (0, 0)),              # shortcut bn scale
            pl.BlockSpec((1, C1), lambda b: (0, 0)),              # shortcut bn bias
        ]
        args += [wsc, ssc, bsc]

    kernel = functools.partial(
        _basic_block_kernel, B=B, H1=H1, W1=W1, W1p=W1p, KH=KH, KW=KW,
        Ck=Ck, Cin=Cin, C1=C1, has_proj=has_proj)

    # Resident-VMEM estimate -> limit clamped to [32, 64] MiB (v7x-safe).
    # TODO(synk): raise toward ~96 MiB on v5e/v6e (128 MiB VMEM) for large blocks.
    est = (4 * B * (H1 + KH - 1) * (W1p + KW - 1) * Ck          # xpad scratch (f32)
           + 4 * B * (H1 + 2) * (W1p + 2) * C1                  # h1pad scratch (f32)
           + 2 * 2 * B * H1 * (W1 * Ck + W1p * C1)              # dbl-buffered x/out (bf16)
           + 2 * 2 * (KH * KW * Ck * C1 + 9 * C1 * C1 + Cin * C1))
    vmem_limit = int(min(64 << 20, max(32 << 20, 2 * est)))

    return pl.pallas_call(
        kernel,
        out_shape=jax.ShapeDtypeStruct((N, H1 * W1p, C1), jnp.bfloat16),
        grid=(N // B,),
        in_specs=in_specs,
        out_specs=pl.BlockSpec((B, H1 * W1p, C1), lambda b: (b, 0, 0)),
        scratch_shapes=[
            pltpu.VMEM((B, H1 + KH - 1, W1p + KW - 1, Ck), jnp.float32),  # padded input
            pltpu.VMEM((B, H1 + 2, W1p + 2, C1), jnp.float32),            # padded conv1 act
        ],
        compiler_params=pltpu.CompilerParams(
            # "arbitrary": the zero-once halo trick needs sequential, single-core
            # ownership of the scratch. Megacore parallelism should come from a
            # row-band axis (see TODO at top).
            dimension_semantics=("arbitrary",),
            vmem_limit_bytes=vmem_limit,
        ),
    )(*args)


# ---------------------------------------------------------------------------
# Parameter preparation (BN folding, space-to-depth weight rewrites)
# ---------------------------------------------------------------------------
def _fold_bn(gamma, beta, mean, var):
    s = gamma / jnp.sqrt(var + _EPS)
    b = beta - mean * s
    return (s.reshape(1, -1).astype(jnp.float32),
            b.reshape(1, -1).astype(jnp.float32))


def _conv1_as_stride1(w_oihw, stride):
    """Rewrite the 3x3 / stride-s / pad-1 conv as a stride-1 conv over the
    space-to-depth input; returns (per-tap weight (KH*KW, Ck, C1), KH, KW, Ck)."""
    C1, Cin = w_oihw.shape[0], w_oihw.shape[1]
    w = jnp.transpose(w_oihw, (2, 3, 1, 0))                 # (3,3,Cin,C1) HWIO
    if stride == 1:
        return w.reshape(9, Cin, C1), 3, 3, Cin
    s = int(stride)
    KH = KW = 2                                             # covers taps {-1,0,+1} for any s>=2
    ws = jnp.zeros((KH, KW, s, s, Cin, C1), w.dtype)
    for KY in range(KH):
        for p in range(s):
            ky = (KY - 1) * s + p + 1
            if not 0 <= ky < 3:
                continue
            for KX in range(KW):
                for q in range(s):
                    kx = (KX - 1) * s + q + 1
                    if not 0 <= kx < 3:
                        continue
                    ws = ws.at[KY, KX, p, q].set(w[ky, kx])
    return ws.reshape(KH * KW, s * s * Cin, C1), KH, KW, s * s * Cin


def _pick_batch_block(N, H1, W1, W1p, KH, KW, Ck, C1, max_batch_block=None):
    """Largest batch block that divides N and fits a conservative VMEM budget."""
    per_img = (4 * (H1 + KH - 1) * (W1p + KW - 1) * Ck
               + 4 * (H1 + 2) * (W1p + 2) * C1
               + 2 * 2 * H1 * (W1 * Ck + W1p * C1))
    budget = 24 << 20                      # conservative across v5e/v6e/v7x
    b = max(1, min(N, budget // max(per_img, 1)))
    if max_batch_block is not None:
        b = max(1, min(b, int(max_batch_block)))
    while N % b:
        b -= 1
    return b


# ---------------------------------------------------------------------------
# Forward (public wrapper: NCHW in, NCHW out — matches the PyTorch module)
# ---------------------------------------------------------------------------
def basic_block_forward(params, x_nchw, stride, *, max_batch_block=None):
    N, Cin, H, W = x_nchw.shape
    C1 = params["conv1_w"].shape[0]
    s = int(stride)
    assert H % s == 0 and W % s == 0
    H1, W1 = H // s, W // s
    W1p = -(-W1 // 8) * 8                  # sublane-align the matmul M (7->8, 14->16, ...)

    # bf16 before the wrapper-side layout transforms (halves that HBM traffic)
    x = jnp.transpose(x_nchw.astype(jnp.bfloat16), (0, 2, 3, 1))     # NHWC

    w1, KH, KW, Ck = _conv1_as_stride1(params["conv1_w"], s)
    if s == 1:
        xk = x
    else:  # space-to-depth: channel index = (p*s + q)*Cin + cin
        xk = x.reshape(N, H1, s, W1, s, Cin).transpose(0, 1, 3, 2, 4, 5)
        xk = xk.reshape(N, H1, W1, s * s * Cin)

    w2 = jnp.transpose(params["conv2_w"], (2, 3, 1, 0)).reshape(9, C1, C1)
    s1, b1 = _fold_bn(*params["bn1"])
    s2, b2 = _fold_bn(*params["bn2"])

    sc_params = None
    if "sc_w" in params:
        wsc = params["sc_w"].reshape(C1, Cin).T.astype(jnp.bfloat16)  # (Cin, C1), K=Cin only
        ssc, bsc = _fold_bn(*params["bn_sc"])
        sc_params = (wsc, ssc, bsc)

    B = _pick_batch_block(N, H1, W1, W1p, KH, KW, Ck, C1, max_batch_block)

    out = _fused_basic_block(xk, w1.astype(jnp.bfloat16), s1, b1,
                             w2.astype(jnp.bfloat16), s2, b2, sc_params,
                             B=B, H1=H1, W1=W1, W1p=W1p, KH=KH, KW=KW,
                             Ck=Ck, Cin=Cin, C1=C1)
    # (N, H1*W1p, C1) -> drop padded columns -> NCHW. Output stays bf16; chain
    # successive blocks in NHWC/bf16 to avoid this transpose entirely.
    out = out.reshape(N, H1, W1p, C1)
    if W1p != W1:
        out = out[:, :, :W1, :]
    return jnp.transpose(out, (0, 3, 1, 2))


# ---------------------------------------------------------------------------
# Deterministic synthetic parameters
# ---------------------------------------------------------------------------
def _bn_params(c, shift):
    gamma = 1.0 + 0.1 * jnp.arange(c, dtype=jnp.float32) / c
    beta = 0.05 * jnp.arange(c, dtype=jnp.float32) - shift
    mean = 0.01 * jnp.arange(c, dtype=jnp.float32)
    var = 1.0 + 0.02 * jnp.arange(c, dtype=jnp.float32)
    return gamma, beta, mean, var


def init_basic_block(key, in_planes, planes, stride):
    k1, k2, k3 = jax.random.split(key, 3)
    p = {
        "conv1_w": 0.1 * jax.random.normal(k1, (planes, in_planes, 3, 3), jnp.float32),
        "conv2_w": 0.1 * jax.random.normal(k2, (planes, planes, 3, 3), jnp.float32),
        "bn1": _bn_params(planes, 0.02),
        "bn2": _bn_params(planes, 0.03),
    }
    if stride != 1 or in_planes != planes:   # expansion == 1
        p["sc_w"] = 0.1 * jax.random.normal(k3, (planes, in_planes, 1, 1), jnp.float32)
        p["bn_sc"] = _bn_params(planes, 0.01)
    return p


# ---------------------------------------------------------------------------
# Pure-JAX reference (mirrors the PyTorch forward, eval-mode BN, all f32)
# ---------------------------------------------------------------------------
def basic_block_ref(params, x, stride):
    def conv(x, w, s, pad):
        return lax.conv_general_dilated(
            x, w, (s, s), ((pad, pad), (pad, pad)),
            dimension_numbers=("NCHW", "OIHW", "NCHW"))

    def bn(x, prm):
        g, b, m, v = (a[None, :, None, None] for a in prm)
        return (x - m) / jnp.sqrt(v + _EPS) * g + b

    out = jax.nn.relu(bn(conv(x, params["conv1_w"], stride, 1), params["bn1"]))
    out = bn(conv(out, params["conv2_w"], 1, 1), params["bn2"])
    if "sc_w" in params:
        sc = bn(conv(x, params["sc_w"], stride, 0), params["bn_sc"])
    else:
        sc = x
    return jax.nn.relu(out + sc)


if __name__ == "__main__":
    key = jax.random.PRNGKey(0)
    kx1, kx2, kp1, kp2, kp3 = jax.random.split(key, 5)

    # Tolerances reflect bf16 MXU operands, bf16 residual input and bf16 output
    # (accumulation / BN / residual epilogue are f32).
    ATOL = RTOL = 1e-1

    x = jax.random.normal(kx1, (2, 8, 16, 16), jnp.float32)   # NCHW like PyTorch

    # Case 1: identity shortcut (stride=1, in_planes == planes), batch-blocked grid.
    p1 = init_basic_block(kp1, in_planes=8, planes=8, stride=1)
    y1 = jax.block_until_ready(basic_block_forward(p1, x, stride=1))
    r1 = basic_block_ref(p1, x, stride=1)
    assert y1.shape == (2, 8, 16, 16)
    assert jnp.allclose(y1.astype(jnp.float32), r1, atol=ATOL, rtol=RTOL), \
        float(jnp.max(jnp.abs(y1.astype(jnp.float32) - r1)))

    # Case 2: projection shortcut (stride=2, 8 -> 16). Force B=1 so the grid has
    # two steps and the zero-once halo persistence across steps is exercised.
    p2 = init_basic_block(kp2, in_planes=8, planes=16, stride=2)
    y2 = jax.block_until_ready(basic_block_forward(p2, x, stride=2, max_batch_block=1))
    r2 = basic_block_ref(p2, x, stride=2)
    assert y2.shape == (2, 16, 8, 8)
    assert jnp.allclose(y2.astype(jnp.float32), r2, atol=ATOL, rtol=RTOL), \
        float(jnp.max(jnp.abs(y2.astype(jnp.float32) - r2)))

    # Case 3: 14x14 input, stride 2 -> W1=7 gets sublane-padded to 8 in-kernel.
    x3 = jax.random.normal(kx2, (2, 8, 14, 14), jnp.float32)
    p3 = init_basic_block(kp3, in_planes=8, planes=16, stride=2)
    y3 = jax.block_until_ready(basic_block_forward(p3, x3, stride=2))
    r3 = basic_block_ref(p3, x3, stride=2)
    assert y3.shape == (2, 16, 7, 7)
    assert jnp.allclose(y3.astype(jnp.float32), r3, atol=ATOL, rtol=RTOL), \
        float(jnp.max(jnp.abs(y3.astype(jnp.float32) - r3)))

    print("KERNEL_OK")
</pallas_src>

<mosaic_0001>
module attributes {stable_mosaic.version = 11 : i64} {
  func.func @_basic_block_kernel(%arg0: i32, %arg1: memref<2x16x16x8xbf16, #tpu.memory_space<vmem>>, %arg2: memref<9x8x8xbf16, #tpu.memory_space<vmem>>, %arg3: memref<1x8xf32, #tpu.memory_space<vmem>>, %arg4: memref<1x8xf32, #tpu.memory_space<vmem>>, %arg5: memref<9x8x8xbf16, #tpu.memory_space<vmem>>, %arg6: memref<1x8xf32, #tpu.memory_space<vmem>>, %arg7: memref<1x8xf32, #tpu.memory_space<vmem>>, %arg8: memref<2x256x8xbf16, #tpu.memory_space<vmem>>, %arg9: memref<2x18x18x8xf32, #tpu.memory_space<vmem>>, %arg10: memref<2x18x18x8xf32, #tpu.memory_space<vmem>>) attributes {dimension_semantics = [#tpu.dimension_semantics<arbitrary>], iteration_bounds = array<i64: 1>, scalar_prefetch = 0 : i64, scratch_operands = 2 : i64, tpu.core_type = #tpu.core_type<tc>, window_params = [{transform_indices = @transform_0, window_bounds = array<i64: 2, 16, 16, 8>}, {pipeline_mode = #tpu.pipeline_mode<synchronous>, transform_indices = @transform_1, window_bounds = array<i64: 9, 8, 8>}, {pipeline_mode = #tpu.pipeline_mode<synchronous>, transform_indices = @transform_2, window_bounds = array<i64: 1, 8>}, {pipeline_mode = #tpu.pipeline_mode<synchronous>, transform_indices = @transform_3, window_bounds = array<i64: 1, 8>}, {pipeline_mode = #tpu.pipeline_mode<synchronous>, transform_indices = @transform_4, window_bounds = array<i64: 9, 8, 8>}, {pipeline_mode = #tpu.pipeline_mode<synchronous>, transform_indices = @transform_5, window_bounds = array<i64: 1, 8>}, {pipeline_mode = #tpu.pipeline_mode<synchronous>, transform_indices = @transform_6, window_bounds = array<i64: 1, 8>}, {transform_indices = @transform_7, window_bounds = array<i64: 2, 256, 8>}]} {
    %c0_i32 = arith.constant 0 : i32
    %0 = arith.cmpi eq, %arg0, %c0_i32 : i32
    %1 = arith.extui %0 : i1 to i32
    %c0_i32_0 = arith.constant 0 : i32
    %2 = arith.cmpi ne, %1, %c0_i32_0 : i32
    scf.if %2 {
      %cst_164 = arith.constant 0.000000e+00 : f32
      %154 = vector.broadcast %cst_164 : f32 to vector<2x18x18x8xf32>
      %c0_165 = arith.constant 0 : index
      %c0_166 = arith.constant 0 : index
      %c0_167 = arith.constant 0 : index
      %c0_168 = arith.constant 0 : index
      %155 = vector.load %arg9[%c0_165, %c0_166, %c0_167, %c0_168] : memref<2x18x18x8xf32, #tpu.memory_space<vmem>>, vector<2x18x18x8xf32>
      tpu.vector_store %arg9[%c0_165, %c0_166, %c0_167, %c0_168], %154 {strides = array<i32>} : memref<2x18x18x8xf32, #tpu.memory_space<vmem>>, vector<2x18x18x8xf32>,
      %cst_169 = arith.constant 0.000000e+00 : f32
      %156 = vector.broadcast %cst_169 : f32 to vector<2x18x18x8xf32>
      %c0_170 = arith.constant 0 : index
      %c0_171 = arith.constant 0 : index
      %c0_172 = arith.constant 0 : index
      %c0_173 = arith.constant 0 : index
      %157 = vector.load %arg10[%c0_170, %c0_171, %c0_172, %c0_173] : memref<2x18x18x8xf32, #tpu.memory_space<vmem>>, vector<2x18x18x8xf32>
      tpu.vector_store %arg10[%c0_170, %c0_171, %c0_172, %c0_173], %156 {strides = array<i32>} : memref<2x18x18x8xf32, #tpu.memory_space<vmem>>, vector<2x18x18x8xf32>,
    } else {
    }
    %c0 = arith.constant 0 : index
    %c0_1 = arith.constant 0 : index
    %c0_2 = arith.constant 0 : index
    %c0_3 = arith.constant 0 : index
    %3 = vector.load %arg1[%c0, %c0_1, %c0_2, %c0_3] : memref<2x16x16x8xbf16, #tpu.memory_space<vmem>>, vector<2x16x16x8xbf16>
    %4 = arith.extf %3 : vector<2x16x16x8xbf16> to vector<2x16x16x8xf32>
    %c0_4 = arith.constant 0 : index
    %c1 = arith.constant 1 : index
    %c1_5 = arith.constant 1 : index
    %c0_6 = arith.constant 0 : index
    %5 = vector.load %arg9[%c0_4, %c1, %c1_5, %c0_6] : memref<2x18x18x8xf32, #tpu.memory_space<vmem>>, vector<2x16x16x8xf32>
    tpu.vector_store %arg9[%c0_4, %c1, %c1_5, %c0_6], %4 {strides = array<i32>} : memref<2x18x18x8xf32, #tpu.memory_space<vmem>>, vector<2x16x16x8xf32>,
    %c0_7 = arith.constant 0 : index
    %c0_8 = arith.constant 0 : index
    %c0_9 = arith.constant 0 : index
    %c0_10 = arith.constant 0 : index
    %6 = vector.load %arg9[%c0_7, %c0_8, %c0_9, %c0_10] : memref<2x18x18x8xf32, #tpu.memory_space<vmem>>, vector<2x16x16x8xf32>
    %7 = vector.shape_cast %6 : vector<2x16x16x8xf32> to vector<512x8xf32>
    %8 = arith.truncf %7 : vector<512x8xf32> to vector<512x8xbf16>
    %c0_11 = arith.constant 0 : index
    %c0_12 = arith.constant 0 : index
    %c0_13 = arith.constant 0 : index
    %9 = vector.load %arg2[%c0_11, %c0_12, %c0_13] : memref<9x8x8xbf16, #tpu.memory_space<vmem>>, vector<1x8x8xbf16>
    %10 = vector.shape_cast %9 : vector<1x8x8xbf16> to vector<8x8xbf16>
    %cst = arith.constant dense<0.000000e+00> : vector<512x8xf32>
    %11 = tpu.matmul %8, %10, %cst {dimension_numbers = #tpu.dot_dimension_numbers<[1], [0], [0], [1], [0, 0, 1, 1], [], []>} : vector<512x8xbf16>, vector<8x8xbf16>, vector<512x8xf32> -> vector<512x8xf32>
    %c0_14 = arith.constant 0 : index
    %c0_15 = arith.constant 0 : index
    %c1_16 = arith.constant 1 : index
    %c0_17 = arith.constant 0 : index
    %12 = vector.load %arg9[%c0_14, %c0_15, %c1_16, %c0_17] : memref<2x18x18x8xf32, #tpu.memory_space<vmem>>, vector<2x16x16x8xf32>
    %13 = vector.shape_cast %12 : vector<2x16x16x8xf32> to vector<512x8xf32>
    %14 = arith.truncf %13 : vector<512x8xf32> to vector<512x8xbf16>
    %c1_18 = arith.constant 1 : index
    %c0_19 = arith.constant 0 : index
    %c0_20 = arith.constant 0 : index
    %15 = vector.load %arg2[%c1_18, %c0_19, %c0_20] : memref<9x8x8xbf16, #tpu.memory_space<vmem>>, vector<1x8x8xbf16>
    %16 = vector.shape_cast %15 : vector<1x8x8xbf16> to vector<8x8xbf16>
    %cst_21 = arith.constant dense<0.000000e+00> : vector<512x8xf32>
    %17 = tpu.matmul %14, %16, %cst_21 {dimension_numbers = #tpu.dot_dimension_numbers<[1], [0], [0], [1], [0, 0, 1, 1], [], []>} : vector<512x8xbf16>, vector<8x8xbf16>, vector<512x8xf32> -> vector<512x8xf32>
    %18 = arith.addf %11, %17 : vector<512x8xf32>
    %c0_22 = arith.constant 0 : index
    %c0_23 = arith.constant 0 : index
    %c2 = arith.constant 2 : index
    %c0_24 = arith.constant 0 : index
    %19 = vector.load %arg9[%c0_22, %c0_23, %c2, %c0_24] : memref<2x18x18x8xf32, #tpu.memory_space<vmem>>, vector<2x16x16x8xf32>
    %20 = vector.shape_cast %19 : vector<2x16x16x8xf32> to vector<512x8xf32>
    %21 = arith.truncf %20 : vector<512x8xf32> to vector<512x8xbf16>
    %c2_25 = arith.constant 2 : index
    %c0_26 = arith.constant 0 : index
    %c0_27 = arith.constant 0 : index
    %22 = vector.load %arg2[%c2_25, %c0_26, %c0_27] : memref<9x8x8xbf16, #tpu.memory_space<vmem>>, vector<1x8x8xbf16>
    %23 = vector.shape_cast %22 : vector<1x8x8xbf16> to vector<8x8xbf16>
    %cst_28 = arith.constant dense<0.000000e+00> : vector<512x8xf32>
    %24 = tpu.matmul %21, %23, %cst_28 {dimension_numbers = #tpu.dot_dimension_numbers<[1], [0], [0], [1], [0, 0, 1, 1], [], []>} : vector<512x8xbf16>, vector<8x8xbf16>, vector<512x8xf32> -> vector<512x8xf32>
    %25 = arith.addf %18, %24 : vector<512x8xf32>
    %c0_29 = arith.constant 0 : index
    %c1_30 = arith.constant 1 : index
    %c0_31 = arith.constant 0 : index
    %c0_32 = arith.constant 0 : index
    %26 = vector.load %arg9[%c0_29, %c1_30, %c0_31, %c0_32] : memref<2x18x18x8xf32, #tpu.memory_space<vmem>>, vector<2x16x16x8xf32>
    %27 = vector.shape_cast %26 : vector<2x16x16x8xf32> to vector<512x8xf32>
    %28 = arith.truncf %27 : vector<512x8xf32> to vector<512x8xbf16>
    %c3 = arith.constant 3 : index
    %c0_33 = arith.constant 0 : index
    %c0_34 = arith.constant 0 : index
    %29 = vector.load %arg2[%c3, %c0_33, %c0_34] : memref<9x8x8xbf16, #tpu.memory_space<vmem>>, vector<1x8x8xbf16>
    %30 = vector.shape_cast %29 : vector<1x8x8xbf16> to vector<8x8xbf16>
    %cst_35 = arith.constant dense<0.000000e+00> : vector<512x8xf32>
    %31 = tpu.matmul %28, %30, %cst_35 {dimension_numbers = #tpu.dot_dimension_numbers<[1], [0], [0], [1], [0, 0, 1, 1], [], []>} : vector<512x8xbf16>, vector<8x8xbf16>, vector<512x8xf32> -> vector<512x8xf32>
    %32 = arith.addf %25, %31 : vector<512x8xf32>
    %c0_36 = arith.constant 0 : index
    %c1_37 = arith.constant 1 : index
    %c1_38 = arith.constant 1 : index
    %c0_39 = arith.constant 0 : index
    %33 = vector.load %arg9[%c0_36, %c1_37, %c1_38, %c0_39] : memref<2x18x18x8xf32, #tpu.memory_space<vmem>>, vector<2x16x16x8xf32>
    %34 = vector.shape_cast %33 : vector<2x16x16x8xf32> to vector<512x8xf32>
    %35 = arith.truncf %34 : vector<512x8xf32> to vector<512x8xbf16>
    %c4 = arith.constant 4 : index
    %c0_40 = arith.constant 0 : index
    %c0_41 = arith.constant 0 : index
    %36 = vector.load %arg2[%c4, %c0_40, %c0_41] : memref<9x8x8xbf16, #tpu.memory_space<vmem>>, vector<1x8x8xbf16>
    %37 = vector.shape_cast %36 : vector<1x8x8xbf16> to vector<8x8xbf16>
    %cst_42 = arith.constant dense<0.000000e+00> : vector<512x8xf32>
    %38 = tpu.matmul %35, %37, %cst_42 {dimension_numbers = #tpu.dot_dimension_numbers<[1], [0], [0], [1], [0, 0, 1, 1], [], []>} : vector<512x8xbf16>, vector<8x8xbf16>, vector<512x8xf32> -> vector<512x8xf32>
    %39 = arith.addf %32, %38 : vector<512x8xf32>
    %c0_43 = arith.constant 0 : index
    %c1_44 = arith.constant 1 : index
    %c2_45 = arith.constant 2 : index
    %c0_46 = arith.constant 0 : index
    %40 = vector.load %arg9[%c0_43, %c1_44, %c2_45, %c0_46] : memref<2x18x18x8xf32, #tpu.memory_space<vmem>>, vector<2x16x16x8xf32>
    %41 = vector.shape_cast %40 : vector<2x16x16x8xf32> to vector<512x8xf32>
    %42 = arith.truncf %41 : vector<512x8xf32> to vector<512x8xbf16>
    %c5 = arith.constant 5 : index
    %c0_47 = arith.constant 0 : index
    %c0_48 = arith.constant 0 : index
    %43 = vector.load %arg2[%c5, %c0_47, %c0_48] : memref<9x8x8xbf16, #tpu.memory_space<vmem>>, vector<1x8x8xbf16>
    %44 = vector.shape_cast %43 : vector<1x8x8xbf16> to vector<8x8xbf16>
    %cst_49 = arith.constant dense<0.000000e+00> : vector<512x8xf32>
    %45 = tpu.matmul %42, %44, %cst_49 {dimension_numbers = #tpu.dot_dimension_numbers<[1], [0], [0], [1], [0, 0, 1, 1], [], []>} : vector<512x8xbf16>, vector<8x8xbf16>, vector<512x8xf32> -> vector<512x8xf32>
    %46 = arith.addf %39, %45 : vector<512x8xf32>
    %c0_50 = arith.constant 0 : index
    %c2_51 = arith.constant 2 : index
    %c0_52 = arith.constant 0 : index
    %c0_53 = arith.constant 0 : index
    %47 = vector.load %arg9[%c0_50, %c2_51, %c0_52, %c0_53] : memref<2x18x18x8xf32, #tpu.memory_space<vmem>>, vector<2x16x16x8xf32>
    %48 = vector.shape_cast %47 : vector<2x16x16x8xf32> to vector<512x8xf32>
    %49 = arith.truncf %48 : vector<512x8xf32> to vector<512x8xbf16>
    %c6 = arith.constant 6 : index
    %c0_54 = arith.constant 0 : index
    %c0_55 = arith.constant 0 : index
    %50 = vector.load %arg2[%c6, %c0_54, %c0_55] : memref<9x8x8xbf16, #tpu.memory_space<vmem>>, vector<1x8x8xbf16>
    %51 = vector.shape_cast %50 : vector<1x8x8xbf16> to vector<8x8xbf16>
    %cst_56 = arith.constant dense<0.000000e+00> : vector<512x8xf32>
    %52 = tpu.matmul %49, %51, %cst_56 {dimension_numbers = #tpu.dot_dimension_numbers<[1], [0], [0], [1], [0, 0, 1, 1], [], []>} : vector<512x8xbf16>, vector<8x8xbf16>, vector<512x8xf32> -> vector<512x8xf32>
    %53 = arith.addf %46, %52 : vector<512x8xf32>
    %c0_57 = arith.constant 0 : index
    %c2_58 = arith.constant 2 : index
    %c1_59 = arith.constant 1 : index
    %c0_60 = arith.constant 0 : index
    %54 = vector.load %arg9[%c0_57, %c2_58, %c1_59, %c0_60] : memref<2x18x18x8xf32, #tpu.memory_space<vmem>>, vector<2x16x16x8xf32>
    %55 = vector.shape_cast %54 : vector<2x16x16x8xf32> to vector<512x8xf32>
    %56 = arith.truncf %55 : vector<512x8xf32> to vector<512x8xbf16>
    %c7 = arith.constant 7 : index
    %c0_61 = arith.constant 0 : index
    %c0_62 = arith.constant 0 : index
    %57 = vector.load %arg2[%c7, %c0_61, %c0_62] : memref<9x8x8xbf16, #tpu.memory_space<vmem>>, vector<1x8x8xbf16>
    %58 = vector.shape_cast %57 : vector<1x8x8xbf16> to vector<8x8xbf16>
    %cst_63 = arith.constant dense<0.000000e+00> : vector<512x8xf32>
    %59 = tpu.matmul %56, %58, %cst_63 {dimension_numbers = #tpu.dot_dimension_numbers<[1], [0], [0], [1], [0, 0, 1, 1], [], []>} : vector<512x8xbf16>, vector<8x8xbf16>, vector<512x8xf32> -> vector<512x8xf32>
    %60 = arith.addf %53, %59 : vector<512x8xf32>
    %c0_64 = arith.constant 0 : index
    %c2_65 = arith.constant 2 : index
    %c2_66 = arith.constant 2 : index
    %c0_67 = arith.constant 0 : index
    %61 = vector.load %arg9[%c0_64, %c2_65, %c2_66, %c0_67] : memref<2x18x18x8xf32, #tpu.memory_space<vmem>>, vector<2x16x16x8xf32>
    %62 = vector.shape_cast %61 : vector<2x16x16x8xf32> to vector<512x8xf32>
    %63 = arith.truncf %62 : vector<512x8xf32> to vector<512x8xbf16>
    %c8 = arith.constant 8 : index
    %c0_68 = arith.constant 0 : index
    %c0_69 = arith.constant 0 : index
    %64 = vector.load %arg2[%c8, %c0_68, %c0_69] : memref<9x8x8xbf16, #tpu.memory_space<vmem>>, vector<1x8x8xbf16>
    %65 = vector.shape_cast %64 : vector<1x8x8xbf16> to vector<8x8xbf16>
    %cst_70 = arith.constant dense<0.000000e+00> : vector<512x8xf32>
    %66 = tpu.matmul %63, %65, %cst_70 {dimension_numbers = #tpu.dot_dimension_numbers<[1], [0], [0], [1], [0, 0, 1, 1], [], []>} : vector<512x8xbf16>, vector<8x8xbf16>, vector<512x8xf32> -> vector<512x8xf32>
    %67 = arith.addf %60, %66 : vector<512x8xf32>
    %c0_71 = arith.constant 0 : index
    %c0_72 = arith.constant 0 : index
    %68 = vector.load %arg3[%c0_71, %c0_72] : memref<1x8xf32, #tpu.memory_space<vmem>>, vector<1x8xf32>
    %69 = vector.broadcast %68 : vector<1x8xf32> to vector<512x8xf32>
    %70 = arith.mulf %67, %69 : vector<512x8xf32>
    %c0_73 = arith.constant 0 : index
    %c0_74 = arith.constant 0 : index
    %71 = vector.load %arg4[%c0_73, %c0_74] : memref<1x8xf32, #tpu.memory_space<vmem>>, vector<1x8xf32>
    %72 = vector.broadcast %71 : vector<1x8xf32> to vector<512x8xf32>
    %73 = arith.addf %70, %72 : vector<512x8xf32>
    %cst_75 = arith.constant 0.000000e+00 : f32
    %74 = vector.broadcast %cst_75 : f32 to vector<512x8xf32>
    %75 = arith.maximumf %73, %74 : vector<512x8xf32>
    %76 = vector.shape_cast %75 : vector<512x8xf32> to vector<2x16x16x8xf32>
    %c0_76 = arith.constant 0 : index
    %c1_77 = arith.constant 1 : index
    %c1_78 = arith.constant 1 : index
    %c0_79 = arith.constant 0 : index
    %77 = vector.load %arg10[%c0_76, %c1_77, %c1_78, %c0_79] : memref<2x18x18x8xf32, #tpu.memory_space<vmem>>, vector<2x16x16x8xf32>
    tpu.vector_store %arg10[%c0_76, %c1_77, %c1_78, %c0_79], %76 {strides = array<i32>} : memref<2x18x18x8xf32, #tpu.memory_space<vmem>>, vector<2x16x16x8xf32>,
    %c0_80 = arith.constant 0 : index
    %c0_81 = arith.constant 0 : index
    %c0_82 = arith.constant 0 : index
    %c0_83 = arith.constant 0 : index
    %78 = vector.load %arg10[%c0_80, %c0_81, %c0_82, %c0_83] : memref<2x18x18x8xf32, #tpu.memory_space<vmem>>, vector<2x16x16x8xf32>
    %79 = vector.shape_cast %78 : vector<2x16x16x8xf32> to vector<512x8xf32>
    %80 = arith.truncf %79 : vector<512x8xf32> to vector<512x8xbf16>
    %c0_84 = arith.constant 0 : index
    %c0_85 = arith.constant 0 : index
    %c0_86 = arith.constant 0 : index
    %81 = vector.load %arg5[%c0_84, %c0_85, %c0_86] : memref<9x8x8xbf16, #tpu.memory_space<vmem>>, vector<1x8x8xbf16>
    %82 = vector.shape_cast %81 : vector<1x8x8xbf16> to vector<8x8xbf16>
    %cst_87 = arith.constant dense<0.000000e+00> : vector<512x8xf32>
    %83 = tpu.matmul %80, %82, %cst_87 {dimension_numbers = #tpu.dot_dimension_numbers<[1], [0], [0], [1], [0, 0, 1, 1], [], []>} : vector<512x8xbf16>, vector<8x8xbf16>, vector<512x8xf32> -> vector<512x8xf32>
    %c0_88 = arith.constant 0 : index
    %c0_89 = arith.constant 0 : index
    %c1_90 = arith.constant 1 : index
    %c0_91 = arith.constant 0 : index
    %84 = vector.load %arg10[%c0_88, %c0_89, %c1_90, %c0_91] : memref<2x18x18x8xf32, #tpu.memory_space<vmem>>, vector<2x16x16x8xf32>
    %85 = vector.shape_cast %84 : vector<2x16x16x8xf32> to vector<512x8xf32>
    %86 = arith.truncf %85 : vector<512x8xf32> to vector<512x8xbf16>
    %c1_92 = arith.constant 1 : index
    %c0_93 = arith.constant 0 : index
    %c0_94 = arith.constant 0 : index
    %87 = vector.load %arg5[%c1_92, %c0_93, %c0_94] : memref<9x8x8xbf16, #tpu.memory_space<vmem>>, vector<1x8x8xbf16>
    %88 = vector.shape_cast %87 : vector<1x8x8xbf16> to vector<8x8xbf16>
    %cst_95 = arith.constant dense<0.000000e+00> : vector<512x8xf32>
    %89 = tpu.matmul %86, %88, %cst_95 {dimension_numbers = #tpu.dot_dimension_numbers<[1], [0], [0], [1], [0, 0, 1, 1], [], []>} : vector<512x8xbf16>, vector<8x8xbf16>, vector<512x8xf32> -> vector<512x8xf32>
    %90 = arith.addf %83, %89 : vector<512x8xf32>
    %c0_96 = arith.constant 0 : index
    %c0_97 = arith.constant 0 : index
    %c2_98 = arith.constant 2 : index
    %c0_99 = arith.constant 0 : index
    %91 = vector.load %arg10[%c0_96, %c0_97, %c2_98, %c0_99] : memref<2x18x18x8xf32, #tpu.memory_space<vmem>>, vector<2x16x16x8xf32>
    %92 = vector.shape_cast %91 : vector<2x16x16x8xf32> to vector<512x8xf32>
    %93 = arith.truncf %92 : vector<512x8xf32> to vector<512x8xbf16>
    %c2_100 = arith.constant 2 : index
    %c0_101 = arith.constant 0 : index
    %c0_102 = arith.constant 0 : index
    %94 = vector.load %arg5[%c2_100, %c0_101, %c0_102] : memref<9x8x8xbf16, #tpu.memory_space<vmem>>, vector<1x8x8xbf16>
    %95 = vector.shape_cast %94 : vector<1x8x8xbf16> to vector<8x8xbf16>
    %cst_103 = arith.constant dense<0.000000e+00> : vector<512x8xf32>
    %96 = tpu.matmul %93, %95, %cst_103 {dimension_numbers = #tpu.dot_dimension_numbers<[1], [0], [0], [1], [0, 0, 1, 1], [], []>} : vector<512x8xbf16>, vector<8x8xbf16>, vector<512x8xf32> -> vector<512x8xf32>
    %97 = arith.addf %90, %96 : vector<512x8xf32>
    %c0_104 = arith.constant 0 : index
    %c1_105 = arith.constant 1 : index
    %c0_106 = arith.constant 0 : index
    %c0_107 = arith.constant 0 : index
    %98 = vector.load %arg10[%c0_104, %c1_105, %c0_106, %c0_107] : memref<2x18x18x8xf32, #tpu.memory_space<vmem>>, vector<2x16x16x8xf32>
    %99 = vector.shape_cast %98 : vector<2x16x16x8xf32> to vector<512x8xf32>
    %100 = arith.truncf %99 : vector<512x8xf32> to vector<512x8xbf16>
    %c3_108 = arith.constant 3 : index
    %c0_109 = arith.constant 0 : index
    %c0_110 = arith.constant 0 : index
    %101 = vector.load %arg5[%c3_108, %c0_109, %c0_110] : memref<9x8x8xbf16, #tpu.memory_space<vmem>>, vector<1x8x8xbf16>
    %102 = vector.shape_cast %101 : vector<1x8x8xbf16> to vector<8x8xbf16>
    %cst_111 = arith.constant dense<0.000000e+00> : vector<512x8xf32>
    %103 = tpu.matmul %100, %102, %cst_111 {dimension_numbers = #tpu.dot_dimension_numbers<[1], [0], [0], [1], [0, 0, 1, 1], [], []>} : vector<512x8xbf16>, vector<8x8xbf16>, vector<512x8xf32> -> vector<512x8xf32>
    %104 = arith.addf %97, %103 : vector<512x8xf32>
    %c0_112 = arith.constant 0 : index
    %c1_113 = arith.constant 1 : index
    %c1_114 = arith.constant 1 : index
    %c0_115 = arith.constant 0 : index
    %105 = vector.load %arg10[%c0_112, %c1_113, %c1_114, %c0_115] : memref<2x18x18x8xf32, #tpu.memory_space<vmem>>, vector<2x16x16x8xf32>
    %106 = vector.shape_cast %105 : vector<2x16x16x8xf32> to vector<512x8xf32>
    %107 = arith.truncf %106 : vector<512x8xf32> to vector<512x8xbf16>
    %c4_116 = arith.constant 4 : index
    %c0_117 = arith.constant 0 : index
    %c0_118 = arith.constant 0 : index
    %108 = vector.load %arg5[%c4_116, %c0_117, %c0_118] : memref<9x8x8xbf16, #tpu.memory_space<vmem>>, vector<1x8x8xbf16>
    %109 = vector.shape_cast %108 : vector<1x8x8xbf16> to vector<8x8xbf16>
    %cst_119 = arith.constant dense<0.000000e+00> : vector<512x8xf32>
    %110 = tpu.matmul %107, %109, %cst_119 {dimension_numbers = #tpu.dot_dimension_numbers<[1], [0], [0], [1], [0, 0, 1, 1], [], []>} : vector<512x8xbf16>, vector<8x8xbf16>, vector<512x8xf32> -> vector<512x8xf32>
    %111 = arith.addf %104, %110 : vector<512x8xf32>
    %c0_120 = arith.constant 0 : index
    %c1_121 = arith.constant 1 : index
    %c2_122 = arith.constant 2 : index
    %c0_123 = arith.constant 0 : index
    %112 = vector.load %arg10[%c0_120, %c1_121, %c2_122, %c0_123] : memref<2x18x18x8xf32, #tpu.memory_space<vmem>>, vector<2x16x16x8xf32>
    %113 = vector.shape_cast %112 : vector<2x16x16x8xf32> to vector<512x8xf32>
    %114 = arith.truncf %113 : vector<512x8xf32> to vector<512x8xbf16>
    %c5_124 = arith.constant 5 : index
    %c0_125 = arith.constant 0 : index
    %c0_126 = arith.constant 0 : index
    %115 = vector.load %arg5[%c5_124, %c0_125, %c0_126] : memref<9x8x8xbf16, #tpu.memory_space<vmem>>, vector<1x8x8xbf16>
    %116 = vector.shape_cast %115 : vector<1x8x8xbf16> to vector<8x8xbf16>
    %cst_127 = arith.constant dense<0.000000e+00> : vector<512x8xf32>
    %117 = tpu.matmul %114, %116, %cst_127 {dimension_numbers = #tpu.dot_dimension_numbers<[1], [0], [0], [1], [0, 0, 1, 1], [], []>} : vector<512x8xbf16>, vector<8x8xbf16>, vector<512x8xf32> -> vector<512x8xf32>
    %118 = arith.addf %111, %117 : vector<512x8xf32>
    %c0_128 = arith.constant 0 : index
    %c2_129 = arith.constant 2 : index
    %c0_130 = arith.constant 0 : index
    %c0_131 = arith.constant 0 : index
    %119 = vector.load %arg10[%c0_128, %c2_129, %c0_130, %c0_131] : memref<2x18x18x8xf32, #tpu.memory_space<vmem>>, vector<2x16x16x8xf32>
    %120 = vector.shape_cast %119 : vector<2x16x16x8xf32> to vector<512x8xf32>
    %121 = arith.truncf %120 : vector<512x8xf32> to vector<512x8xbf16>
    %c6_132 = arith.constant 6 : index
    %c0_133 = arith.constant 0 : index
    %c0_134 = arith.constant 0 : index
    %122 = vector.load %arg5[%c6_132, %c0_133, %c0_134] : memref<9x8x8xbf16, #tpu.memory_space<vmem>>, vector<1x8x8xbf16>
    %123 = vector.shape_cast %122 : vector<1x8x8xbf16> to vector<8x8xbf16>
    %cst_135 = arith.constant dense<0.000000e+00> : vector<512x8xf32>
    %124 = tpu.matmul %121, %123, %cst_135 {dimension_numbers = #tpu.dot_dimension_numbers<[1], [0], [0], [1], [0, 0, 1, 1], [], []>} : vector<512x8xbf16>, vector<8x8xbf16>, vector<512x8xf32> -> vector<512x8xf32>
    %125 = arith.addf %118, %124 : vector<512x8xf32>
    %c0_136 = arith.constant 0 : index
    %c2_137 = arith.constant 2 : index
    %c1_138 = arith.constant 1 : index
    %c0_139 = arith.constant 0 : index
    %126 = vector.load %arg10[%c0_136, %c2_137, %c1_138, %c0_139] : memref<2x18x18x8xf32, #tpu.memory_space<vmem>>, vector<2x16x16x8xf32>
    %127 = vector.shape_cast %126 : vector<2x16x16x8xf32> to vector<512x8xf32>
    %128 = arith.truncf %127 : vector<512x8xf32> to vector<512x8xbf16>
    %c7_140 = arith.constant 7 : index
    %c0_141 = arith.constant 0 : index
    %c0_142 = arith.constant 0 : index
    %129 = vector.load %arg5[%c7_140, %c0_141, %c0_142] : memref<9x8x8xbf16, #tpu.memory_space<vmem>>, vector<1x8x8xbf16>
    %130 = vector.shape_cast %129 : vector<1x8x8xbf16> to vector<8x8xbf16>
    %cst_143 = arith.constant dense<0.000000e+00> : vector<512x8xf32>
    %131 = tpu.matmul %128, %130, %cst_143 {dimension_numbers = #tpu.dot_dimension_numbers<[1], [0], [0], [1], [0, 0, 1, 1], [], []>} : vector<512x8xbf16>, vector<8x8xbf16>, vector<512x8xf32> -> vector<512x8xf32>
    %132 = arith.addf %125, %131 : vector<512x8xf32>
    %c0_144 = arith.constant 0 : index
    %c2_145 = arith.constant 2 : index
    %c2_146 = arith.constant 2 : index
    %c0_147 = arith.constant 0 : index
    %133 = vector.load %arg10[%c0_144, %c2_145, %c2_146, %c0_147] : memref<2x18x18x8xf32, #tpu.memory_space<vmem>>, vector<2x16x16x8xf32>
    %134 = vector.shape_cast %133 : vector<2x16x16x8xf32> to vector<512x8xf32>
    %135 = arith.truncf %134 : vector<512x8xf32> to vector<512x8xbf16>
    %c8_148 = arith.constant 8 : index
    %c0_149 = arith.constant 0 : index
    %c0_150 = arith.constant 0 : index
    %136 = vector.load %arg5[%c8_148, %c0_149, %c0_150] : memref<9x8x8xbf16, #tpu.memory_space<vmem>>, vector<1x8x8xbf16>
    %137 = vector.shape_cast %136 : vector<1x8x8xbf16> to vector<8x8xbf16>
    %cst_151 = arith.constant dense<0.000000e+00> : vector<512x8xf32>
    %138 = tpu.matmul %135, %137, %cst_151 {dimension_numbers = #tpu.dot_dimension_numbers<[1], [0], [0], [1], [0, 0, 1, 1], [], []>} : vector<512x8xbf16>, vector<8x8xbf16>, vector<512x8xf32> -> vector<512x8xf32>
    %139 = arith.addf %132, %138 : vector<512x8xf32>
    %c0_152 = arith.constant 0 : index
    %c0_153 = arith.constant 0 : index
    %140 = vector.load %arg6[%c0_152, %c0_153] : memref<1x8xf32, #tpu.memory_space<vmem>>, vector<1x8xf32>
    %141 = vector.broadcast %140 : vector<1x8xf32> to vector<512x8xf32>
    %142 = arith.mulf %139, %141 : vector<512x8xf32>
    %c0_154 = arith.constant 0 : index
    %c0_155 = arith.constant 0 : index
    %143 = vector.load %arg7[%c0_154, %c0_155] : memref<1x8xf32, #tpu.memory_space<vmem>>, vector<1x8xf32>
    %144 = vector.broadcast %143 : vector<1x8xf32> to vector<512x8xf32>
    %145 = arith.addf %142, %144 : vector<512x8xf32>
    %c0_156 = arith.constant 0 : index
    %c1_157 = arith.constant 1 : index
    %c1_158 = arith.constant 1 : index
    %c0_159 = arith.constant 0 : index
    %146 = vector.load %arg9[%c0_156, %c1_157, %c1_158, %c0_159] : memref<2x18x18x8xf32, #tpu.memory_space<vmem>>, vector<2x16x16x8xf32>
    %147 = vector.shape_cast %146 : vector<2x16x16x8xf32> to vector<512x8xf32>
    %148 = arith.addf %145, %147 : vector<512x8xf32>
    %cst_160 = arith.constant 0.000000e+00 : f32
    %149 = vector.broadcast %cst_160 : f32 to vector<512x8xf32>
    %150 = arith.maximumf %148, %149 : vector<512x8xf32>
    %151 = vector.shape_cast %150 : vector<512x8xf32> to vector<2x256x8xf32>
    %152 = arith.truncf %151 : vector<2x256x8xf32> to vector<2x256x8xbf16>
    %c0_161 = arith.constant 0 : index
    %c0_162 = arith.constant 0 : index
    %c0_163 = arith.constant 0 : index
    %153 = vector.load %arg8[%c0_161, %c0_162, %c0_163] : memref<2x256x8xbf16, #tpu.memory_space<vmem>>, vector<2x256x8xbf16>
    tpu.vector_store %arg8[%c0_161, %c0_162, %c0_163], %152 {strides = array<i32>} : memref<2x256x8xbf16, #tpu.memory_space<vmem>>, vector<2x256x8xbf16>,
    return
  }
  func.func @transform_0(%arg0: i32) -> (i32, i32, i32, i32) {
    %c0_i32 = arith.constant 0 : i32
    %c0_i32_0 = arith.constant 0 : i32
    %c0_i32_1 = arith.constant 0 : i32
    %c0_i32_2 = arith.constant 0 : i32
    return %arg0, %c0_i32, %c0_i32_0, %c0_i32_1 : i32, i32, i32, i32
  }
  func.func @transform_1(%arg0: i32) -> (i32, i32, i32) {
    %c0_i32 = arith.constant 0 : i32
    %c0_i32_0 = arith.constant 0 : i32
    %c0_i32_1 = arith.constant 0 : i32
    %c0_i32_2 = arith.constant 0 : i32
    return %c0_i32, %c0_i32_0, %c0_i32_1 : i32, i32, i32
  }
  func.func @transform_2(%arg0: i32) -> (i32, i32) {
    %c0_i32 = arith.constant 0 : i32
    %c0_i32_0 = arith.constant 0 : i32
    %c0_i32_1 = arith.constant 0 : i32
    return %c0_i32, %c0_i32_0 : i32, i32
  }
  func.func @transform_3(%arg0: i32) -> (i32, i32) {
    %c0_i32 = arith.constant 0 : i32
    %c0_i32_0 = arith.constant 0 : i32
    %c0_i32_1 = arith.constant 0 : i32
    return %c0_i32, %c0_i32_0 : i32, i32
  }
  func.func @transform_4(%arg0: i32) -> (i32, i32, i32) {
    %c0_i32 = arith.constant 0 : i32
    %c0_i32_0 = arith.constant 0 : i32
    %c0_i32_1 = arith.constant 0 : i32
    %c0_i32_2 = arith.constant 0 : i32
    return %c0_i32, %c0_i32_0, %c0_i32_1 : i32, i32, i32
  }
  func.func @transform_5(%arg0: i32) -> (i32, i32) {
    %c0_i32 = arith.constant 0 : i32
    %c0_i32_0 = arith.constant 0 : i32
    %c0_i32_1 = arith.constant 0 : i32
    return %c0_i32, %c0_i32_0 : i32, i32
  }
  func.func @transform_6(%arg0: i32) -> (i32, i32) {
    %c0_i32 = arith.constant 0 : i32
    %c0_i32_0 = arith.constant 0 : i32
    %c0_i32_1 = arith.constant 0 : i32
    return %c0_i32, %c0_i32_0 : i32, i32
  }
  func.func @transform_7(%arg0: i32) -> (i32, i32, i32) {
    %c0_i32 = arith.constant 0 : i32
    %c0_i32_0 = arith.constant 0 : i32
    %c0_i32_1 = arith.constant 0 : i32
    return %arg0, %c0_i32, %c0_i32_0 : i32, i32, i32
  }
}

</mosaic_0001>

<bundles_post_ra>
// kernel: tpu_custom_call.1
= control target key start
LH: loop header
LB: loop body
LE: loop exit
PB: predicated region body
PF: predicated region fallthrough
CT: control target
= control target key end

     0   :  { %vm734_vm0 = vcmask 1043456   ;;  %vm31_vm1 = vcmask 64512   ;;  %vm34_vm2 = vcmask 58368   ;;  %v13707_v2 = vmov 0.0   ;;  %s18222_s1 = inlined_call_operand.vmem [shape: bf16[9,8,8], index: 1, kind: input, shape index: {}]   ;;  %s18223_s0 = inlined_call_operand.vmem [shape: bf16[2,16,16,8], index: 0, kind: input, shape index: {}]   ;;  %s18224_s4 = inlined_call_operand.vmem [shape: bf16[9,8,8], index: 4, kind: input, shape index: {}]   ;;  %s18225_s2 = inlined_call_operand.vmem [shape: f32[1,8], index: 2, kind: input, shape index: {}]   ;;  %s18226_s3 = inlined_call_operand.vmem [shape: f32[1,8], index: 3, kind: input, shape index: {}]   ;;  %s18227_s5 = inlined_call_operand.vmem [shape: f32[1,8], index: 5, kind: input, shape index: {}]   ;;  %s18228_s6 = inlined_call_operand.vmem [shape: f32[1,8], index: 6, kind: input, shape index: {}]   ;;  %s18229_s7 = inlined_call_operand.vmem [shape: bf16[2,256,8], index: 7, kind: output, shape index: {}]  }
   0x1   :  { %v13751_v0 = vld [vmem:[%s18222_s1 + $0x4] sm:$0xf]  ;;  %v13756_v1 = vld [vmem:[%s18222_s1] sm:$0xf]  ;;  %32 = vst.msk [vmem:[#allocation2] sm:$0xff] %vm31_vm1, %v13707_v2  ;;  %33 = vst.msk [vmem:[#allocation2 + $0x8] sm:$0xff] %vm31_vm1, %v13707_v2 }
   0x2   :  { %35 = vst.msk [vmem:[#allocation2 + $0x10] sm:$0x3] %vm34_vm2, %v13707_v2  ;;  %38 = vst.msk [vmem:[#allocation2 + $0x28] sm:$0x3] %vm34_vm2, %v13707_v2  ;;  %v14193_v3 = vld [vmem:[%s18222_s1 + $0x8] sm:$0xf]  ;;  %13683 = vmatprep.subr.msk.bf16.mxu0 %vm734_vm0, %v13751_v0  ;;  %13684 = vmatprep.subr.msk.bf16.mxu1 %vm734_vm0, %v13756_v1 }
   0x3   :  { %36 = vst.msk [vmem:[#allocation2 + $0x18] sm:$0xff] %vm31_vm1, %v13707_v2  ;;  %37 = vst.msk [vmem:[#allocation2 + $0x20] sm:$0xff] %vm31_vm1, %v13707_v2  ;;  %v736_v4 = vsel %vm734_vm0, %v13751_v0, 0  ;;  %v1124_v5 = vsel %vm734_vm0, %v13756_v1, 0  ;;  %v11743_v6 = vld [vmem:[%s18223_s0] sm:$0xff]   ;;  %v11870_v7 = vld [vmem:[%s18223_s0 + $0x8] sm:$0xff]  }
   0x4   :  { %39 = vst.msk [vmem:[#allocation2 + $0x30] sm:$0xff] %vm31_vm1, %v13707_v2  ;;  %40 = vst.msk [vmem:[#allocation2 + $0x38] sm:$0xff] %vm31_vm1, %v13707_v2  ;;  %v11871_v8 = vld [vmem:[%s18223_s0 + $0x10] sm:$0xff]   ;;  %12496 = vmatpush3.bf16.msra.mxu0 %v736_v4  ;;  %12562 = vmatpush3.bf16.msra.mxu1 %v1124_v5  ;;  %v11744_v9 = vunpack.c.l.bf16 %v11743_v6  ;;  %v11745_v10 = vunpack.c.h.bf16 %v11743_v6  ;;  %v11748_v11 = vunpack.c.l.bf16 %v11870_v7  ;;  %v11749_v12 = vunpack.c.h.bf16 %v11870_v7  ;;  %v11872_v13 = vld [vmem:[%s18223_s0 + $0x18] sm:$0xff]  }
   0x5   :  { %41 = vst.msk [vmem:[#allocation2 + $0x40] sm:$0x3] %vm34_vm2, %v13707_v2  ;;  %44 = vst.msk [vmem:[#allocation2 + $0x58] sm:$0x3] %vm34_vm2, %v13707_v2  ;;  %v11873_v14 = vld [vmem:[%s18223_s0 + $0x20] sm:$0xff]   ;;  %v11874_v15 = vld [vmem:[%s18223_s0 + $0x28] sm:$0xff]   ;;  %13685 = vmatprep.subr.msk.bf16.mxu0 %vm734_vm0, %v14193_v3  ;;  %v11752_v16 = vunpack.c.l.bf16 %v11871_v8  ;;  %v11753_v17 = vunpack.c.h.bf16 %v11871_v8  ;;  %v11756_v18 = vunpack.c.l.bf16 %v11872_v13  ;;  %v11757_v19 = vunpack.c.h.bf16 %v11872_v13 }
   0x6   :  { %42 = vst.msk [vmem:[#allocation2 + $0x48] sm:$0xff] %vm31_vm1, %v13707_v2  ;;  %43 = vst.msk [vmem:[#allocation2 + $0x50] sm:$0xff] %vm31_vm1, %v13707_v2  ;;  %v11875_v20 = vld [vmem:[%s18223_s0 + $0x30] sm:$0xff]   ;;  %v11876_v21 = vld [vmem:[%s18223_s0 + $0x38] sm:$0xff]   ;;  %v11760_v23 = vunpack.c.l.bf16 %v11873_v14  ;;  %v11761_v24 = vunpack.c.h.bf16 %v11873_v14  ;;  %v11764_v25 = vunpack.c.l.bf16 %v11874_v15  ;;  %v11765_v26 = vunpack.c.h.bf16 %v11874_v15 }
   0x7   :  { %45 = vst.msk [vmem:[#allocation2 + $0x60] sm:$0xff] %vm31_vm1, %v13707_v2  ;;  %46 = vst.msk [vmem:[#allocation2 + $0x68] sm:$0xff] %vm31_vm1, %v13707_v2  ;;  %v11877_v22 = vld [vmem:[%s18223_s0 + $0x40] sm:$0xff]   ;;  %v11878_v27 = vld [vmem:[%s18223_s0 + $0x48] sm:$0xff]   ;;  %v11768_v30 = vunpack.c.l.bf16 %v11875_v20  ;;  %v11769_v31 = vunpack.c.h.bf16 %v11875_v20  ;;  %v11772_v32 = vunpack.c.l.bf16 %v11876_v21  ;;  %v11773_v33 = vunpack.c.h.bf16 %v11876_v21 }
   0x8   :  { %47 = vst.msk [vmem:[#allocation2 + $0x70] sm:$0x3] %vm34_vm2, %v13707_v2  ;;  %50 = vst.msk [vmem:[#allocation2 + $0x88] sm:$0x3] %vm34_vm2, %v13707_v2  ;;  %v11879_v28 = vld [vmem:[%s18223_s0 + $0x50] sm:$0xff]   ;;  %v11880_v29 = vld [vmem:[%s18223_s0 + $0x58] sm:$0xff]   ;;  %v11776_v36 = vunpack.c.l.bf16 %v11877_v22  ;;  %v11777_v37 = vunpack.c.h.bf16 %v11877_v22  ;;  %v11780_v38 = vunpack.c.l.bf16 %v11878_v27  ;;  %v11781_v39 = vunpack.c.h.bf16 %v11878_v27 }
   0x9   :  { %48 = vst.msk [vmem:[#allocation2 + $0x78] sm:$0xff] %vm31_vm1, %v13707_v2  ;;  %49 = vst.msk [vmem:[#allocation2 + $0x80] sm:$0xff] %vm31_vm1, %v13707_v2  ;;  %v11881_v34 = vld [vmem:[%s18223_s0 + $0x60] sm:$0xff]   ;;  %v11882_v35 = vld [vmem:[%s18223_s0 + $0x68] sm:$0xff]   ;;  %v11784_v45 = vunpack.c.l.bf16 %v11879_v28  ;;  %v11785_v46 = vunpack.c.h.bf16 %v11879_v28  ;;  %v11788_v47 = vunpack.c.l.bf16 %v11880_v29  ;;  %v11789_v48 = vunpack.c.h.bf16 %v11880_v29 }
   0xa   :  { %51 = vst.msk [vmem:[#allocation2 + $0x90] sm:$0xff] %vm31_vm1, %v13707_v2  ;;  %52 = vst.msk [vmem:[#allocation2 + $0x98] sm:$0xff] %vm31_vm1, %v13707_v2  ;;  %v11883_v40 = vld [vmem:[%s18223_s0 + $0x70] sm:$0xff]   ;;  %v11885_v41 = vld [vmem:[%s18223_s0 + $0x80] sm:$0xff]   ;;  %v11792_v51 = vunpack.c.l.bf16 %v11881_v34  ;;  %v11793_v52 = vunpack.c.h.bf16 %v11881_v34  ;;  %v11796_v53 = vunpack.c.l.bf16 %v11882_v35  ;;  %v11797_v57 = vunpack.c.h.bf16 %v11882_v35 }
   0xb   :  { %53 = vst.msk [vmem:[#allocation2 + $0xa0] sm:$0x3] %vm34_vm2, %v13707_v2  ;;  %56 = vst.msk [vmem:[#allocation2 + $0xb8] sm:$0x3] %vm34_vm2, %v13707_v2  ;;  %v540_v42 = vld [vmem:[#allocation2 + $0x1] sm:$0xff]  ;;  %v541_v43 = vld [vmem:[#allocation2 + $0x9] sm:$0xff]  ;;  %v11800_v58 = vunpack.c.l.bf16 %v11883_v40  ;;  %v11801_v59 = vunpack.c.h.bf16 %v11883_v40  ;;  %v11808_v62 = vunpack.c.l.bf16 %v11885_v41  ;;  %v11809_v63 = vunpack.c.h.bf16 %v11885_v41 }
   0xc   :  { %54 = vst.msk [vmem:[#allocation2 + $0xa8] sm:$0xff] %vm31_vm1, %v13707_v2  ;;  %55 = vst.msk [vmem:[#allocation2 + $0xb0] sm:$0xff] %vm31_vm1, %v13707_v2  ;;  %v443_v44 = vld [vmem:[#allocation2] sm:$0xff]  ;;  %v604_v49 = vpack.c.bf16 %v541_v43, %v540_v42  ;;  %v444_v50 = vld [vmem:[#allocation2 + $0x8] sm:$0xff]  ;;  %v1610_v61 = vsel %vm734_vm0, %v14193_v3, 0  ;;  %vm10949_vm3 = vcmask 60416  }
   0xd   :  { %57 = vst.msk [vmem:[#allocation2 + $0xc0] sm:$0xff] %vm31_vm1, %v13707_v2  ;;  %58 = vst.msk [vmem:[#allocation2 + $0xc8] sm:$0xff] %vm31_vm1, %v13707_v2  ;;  %v11886_v54 = vld [vmem:[%s18223_s0 + $0x88] sm:$0xff]   ;;  %v11887_v55 = vld [vmem:[%s18223_s0 + $0x90] sm:$0xff]   ;;  %v507_v56 = vpack.c.bf16 %v444_v50, %v443_v44 }
   0xe   :  { %59 = vst.msk [vmem:[#allocation2 + $0xd0] sm:$0x3] %vm34_vm2, %v13707_v2  ;;  %62 = vst.msk [vmem:[#allocation2 + $0xe8] sm:$0x3] %vm34_vm2, %v13707_v2  ;;  %v11888_v60 = vld [vmem:[%s18223_s0 + $0x98] sm:$0xff]   ;;  %12497 = vmatprep.mubr.msk.bf16.mxu0 %vm31_vm1, %v604_v49  ;;  %v11889_v0 = vld [vmem:[%s18223_s0 + $0xa0] sm:$0xff]   ;;  %v11812_v6 = vunpack.c.l.bf16 %v11886_v54  ;;  %v11813_v7 = vunpack.c.h.bf16 %v11886_v54  ;;  %v11816_v8 = vunpack.c.l.bf16 %v11887_v55 }
   0xf   :  { %60 = vst.msk [vmem:[#allocation2 + $0xd8] sm:$0xff] %vm31_vm1, %v13707_v2  ;;  %61 = vst.msk [vmem:[#allocation2 + $0xe0] sm:$0xff] %vm31_vm1, %v13707_v2  ;;  %v11890_v1 = vld [vmem:[%s18223_s0 + $0xa8] sm:$0xff]   ;;  %12563 = vmatprep.mubr.msk.bf16.mxu1 %vm31_vm1, %v507_v56  ;;  %v11820_v14 = vunpack.c.l.bf16 %v11888_v60  ;;  %v11821_v15 = vunpack.c.h.bf16 %v11888_v60  ;;  %v11825_v21 = vunpack.c.h.bf16 %v11889_v0 }
  0x10   :  { %63 = vst.msk [vmem:[#allocation2 + $0xf0] sm:$0xff] %vm31_vm1, %v13707_v2  ;;  %64 = vst.msk [vmem:[#allocation2 + $0xf8] sm:$0xff] %vm31_vm1, %v13707_v2  ;;  %v11828_v22 = vunpack.c.l.bf16 %v11890_v1 }
  0x11   :  { %65 = vst.msk [vmem:[#allocation2 + $0x100] sm:$0x3] %vm34_vm2, %v13707_v2  ;;  %68 = vst.msk [vmem:[#allocation2 + $0x118] sm:$0x3] %vm34_vm2, %v13707_v2 }
  0x12   :  { %66 = vst.msk [vmem:[#allocation2 + $0x108] sm:$0xff] %vm31_vm1, %v13707_v2  ;;  %67 = vst.msk [vmem:[#allocation2 + $0x110] sm:$0xff] %vm31_vm1, %v13707_v2 }
  0x13   :  { %69 = vst.msk [vmem:[#allocation2 + $0x120] sm:$0xff] %vm31_vm1, %v13707_v2  ;;  %70 = vst.msk [vmem:[#allocation2 + $0x128] sm:$0xff] %vm31_vm1, %v13707_v2 }
  0x14   :  { %71 = vst.msk [vmem:[#allocation2 + $0x130] sm:$0x3] %vm34_vm2, %v13707_v2  ;;  %74 = vst.msk [vmem:[#allocation2 + $0x148] sm:$0x3] %vm34_vm2, %v13707_v2 }
  0x15   :  { %72 = vst.msk [vmem:[#allocation2 + $0x138] sm:$0xff] %vm31_vm1, %v13707_v2  ;;  %73 = vst.msk [vmem:[#allocation2 + $0x140] sm:$0xff] %vm31_vm1, %v13707_v2 }
  0x16   :  { %75 = vst.msk [vmem:[#allocation2 + $0x150] sm:$0xff] %vm31_vm1, %v13707_v2  ;;  %76 = vst.msk [vmem:[#allocation2 + $0x158] sm:$0xff] %vm31_vm1, %v13707_v2 }
  0x17   :  { %77 = vst.msk [vmem:[#allocation2 + $0x160] sm:$0x3] %vm34_vm2, %v13707_v2  ;;  %80 = vst.msk [vmem:[#allocation2 + $0x178] sm:$0x3] %vm34_vm2, %v13707_v2 }
  0x18   :  { %78 = vst.msk [vmem:[#allocation2 + $0x168] sm:$0xff] %vm31_vm1, %v13707_v2  ;;  %79 = vst.msk [vmem:[#allocation2 + $0x170] sm:$0xff] %vm31_vm1, %v13707_v2 }
  0x19   :  { %81 = vst.msk [vmem:[#allocation2 + $0x180] sm:$0xff] %vm31_vm1, %v13707_v2  ;;  %82 = vst.msk [vmem:[#allocation2 + $0x188] sm:$0xff] %vm31_vm1, %v13707_v2 }
  0x1a   :  { %83 = vst.msk [vmem:[#allocation2 + $0x190] sm:$0x3] %vm34_vm2, %v13707_v2  ;;  %86 = vst.msk [vmem:[#allocation2 + $0x1a8] sm:$0x3] %vm34_vm2, %v13707_v2 }
  0x1b   :  { %84 = vst.msk [vmem:[#allocation2 + $0x198] sm:$0xff] %vm31_vm1, %v13707_v2  ;;  %85 = vst.msk [vmem:[#allocation2 + $0x1a0] sm:$0xff] %vm31_vm1, %v13707_v2 }
  0x1c   :  { %87 = vst.msk [vmem:[#allocation2 + $0x1b0] sm:$0xff] %vm31_vm1, %v13707_v2  ;;  %88 = vst.msk [vmem:[#allocation2 + $0x1b8] sm:$0xff] %vm31_vm1, %v13707_v2 }
  0x1d   :  { %89 = vst.msk [vmem:[#allocation2 + $0x1c0] sm:$0x3] %vm34_vm2, %v13707_v2  ;;  %92 = vst.msk [vmem:[#allocation2 + $0x1d8] sm:$0x3] %vm34_vm2, %v13707_v2 }
  0x1e   :  { %90 = vst.msk [vmem:[#allocation2 + $0x1c8] sm:$0xff] %vm31_vm1, %v13707_v2  ;;  %91 = vst.msk [vmem:[#allocation2 + $0x1d0] sm:$0xff] %vm31_vm1, %v13707_v2 }
  0x1f   :  { %93 = vst.msk [vmem:[#allocation2 + $0x1e0] sm:$0xff] %vm31_vm1, %v13707_v2  ;;  %94 = vst.msk [vmem:[#allocation2 + $0x1e8] sm:$0xff] %vm31_vm1, %v13707_v2 }
  0x20   :  { %95 = vst.msk [vmem:[#allocation2 + $0x1f0] sm:$0x3] %vm34_vm2, %v13707_v2  ;;  %98 = vst.msk [vmem:[#allocation2 + $0x208] sm:$0x3] %vm34_vm2, %v13707_v2 }
  0x21   :  { %96 = vst.msk [vmem:[#allocation2 + $0x1f8] sm:$0xff] %vm31_vm1, %v13707_v2  ;;  %97 = vst.msk [vmem:[#allocation2 + $0x200] sm:$0xff] %vm31_vm1, %v13707_v2 }
  0x22   :  { %99 = vst.msk [vmem:[#allocation2 + $0x210] sm:$0xff] %vm31_vm1, %v13707_v2  ;;  %100 = vst.msk [vmem:[#allocation2 + $0x218] sm:$0xff] %vm31_vm1, %v13707_v2 }
  0x23   :  { %101 = vst.msk [vmem:[#allocation2 + $0x220] sm:$0x3] %vm34_vm2, %v13707_v2  ;;  %104 = vst.msk [vmem:[#allocation2 + $0x238] sm:$0x3] %vm34_vm2, %v13707_v2 }
  0x24   :  { %102 = vst.msk [vmem:[#allocation2 + $0x228] sm:$0xff] %vm31_vm1, %v13707_v2  ;;  %103 = vst.msk [vmem:[#allocation2 + $0x230] sm:$0xff] %vm31_vm1, %v13707_v2 }
  0x25   :  { %105 = vst.msk [vmem:[#allocation2 + $0x240] sm:$0xff] %vm31_vm1, %v13707_v2  ;;  %106 = vst.msk [vmem:[#allocation2 + $0x248] sm:$0xff] %vm31_vm1, %v13707_v2 }
  0x26   :  { %107 = vst.msk [vmem:[#allocation2 + $0x250] sm:$0x3] %vm34_vm2, %v13707_v2  ;;  %110 = vst.msk [vmem:[#allocation2 + $0x268] sm:$0x3] %vm34_vm2, %v13707_v2 }
  0x27   :  { %108 = vst.msk [vmem:[#allocation2 + $0x258] sm:$0xff] %vm31_vm1, %v13707_v2  ;;  %109 = vst.msk [vmem:[#allocation2 + $0x260] sm:$0xff] %vm31_vm1, %v13707_v2 }
  0x28   :  { %111 = vst.msk [vmem:[#allocation2 + $0x270] sm:$0xff] %vm31_vm1, %v13707_v2  ;;  %112 = vst.msk [vmem:[#allocation2 + $0x278] sm:$0xff] %vm31_vm1, %v13707_v2 }
  0x29   :  { %113 = vst.msk [vmem:[#allocation2 + $0x280] sm:$0x3] %vm34_vm2, %v13707_v2  ;;  %116 = vst.msk [vmem:[#allocation2 + $0x298] sm:$0x3] %vm34_vm2, %v13707_v2 }
  0x2a   :  { %114 = vst.msk [vmem:[#allocation2 + $0x288] sm:$0xff] %vm31_vm1, %v13707_v2  ;;  %115 = vst.msk [vmem:[#allocation2 + $0x290] sm:$0xff] %vm31_vm1, %v13707_v2 }
  0x2b   :  { %117 = vst.msk [vmem:[#allocation2 + $0x2a0] sm:$0xff] %vm31_vm1, %v13707_v2  ;;  %118 = vst.msk [vmem:[#allocation2 + $0x2a8] sm:$0xff] %vm31_vm1, %v13707_v2 }
  0x2c   :  { %119 = vst.msk [vmem:[#allocation2 + $0x2b0] sm:$0x3] %vm34_vm2, %v13707_v2  ;;  %122 = vst.msk [vmem:[#allocation2 + $0x2c8] sm:$0x3] %vm34_vm2, %v13707_v2 }
  0x2d   :  { %120 = vst.msk [vmem:[#allocation2 + $0x2b8] sm:$0xff] %vm31_vm1, %v13707_v2  ;;  %121 = vst.msk [vmem:[#allocation2 + $0x2c0] sm:$0xff] %vm31_vm1, %v13707_v2 }
  0x2e   :  { %123 = vst.msk [vmem:[#allocation2 + $0x2d0] sm:$0xff] %vm31_vm1, %v13707_v2  ;;  %124 = vst.msk [vmem:[#allocation2 + $0x2d8] sm:$0xff] %vm31_vm1, %v13707_v2 }
  0x2f   :  { %125 = vst.msk [vmem:[#allocation2 + $0x2e0] sm:$0x3] %vm34_vm2, %v13707_v2  ;;  %128 = vst.msk [vmem:[#allocation2 + $0x2f8] sm:$0x3] %vm34_vm2, %v13707_v2 }
  0x30   :  { %126 = vst.msk [vmem:[#allocation2 + $0x2e8] sm:$0xff] %vm31_vm1, %v13707_v2  ;;  %127 = vst.msk [vmem:[#allocation2 + $0x2f0] sm:$0xff] %vm31_vm1, %v13707_v2 }
  0x31   :  { %129 = vst.msk [vmem:[#allocation2 + $0x300] sm:$0xff] %vm31_vm1, %v13707_v2  ;;  %130 = vst.msk [vmem:[#allocation2 + $0x308] sm:$0xff] %vm31_vm1, %v13707_v2 }
  0x32   :  { %131 = vst.msk [vmem:[#allocation2 + $0x310] sm:$0x3] %vm34_vm2, %v13707_v2  ;;  %134 = vst.msk [vmem:[#allocation2 + $0x328] sm:$0x3] %vm34_vm2, %v13707_v2 }
  0x33   :  { %132 = vst.msk [vmem:[#allocation2 + $0x318] sm:$0xff] %vm31_vm1, %v13707_v2  ;;  %133 = vst.msk [vmem:[#allocation2 + $0x320] sm:$0xff] %vm31_vm1, %v13707_v2 }
  0x34   :  { %135 = vst.msk [vmem:[#allocation2 + $0x330] sm:$0xff] %vm31_vm1, %v13707_v2  ;;  %136 = vst.msk [vmem:[#allocation2 + $0x338] sm:$0xff] %vm31_vm1, %v13707_v2 }
  0x35   :  { %137 = vst.msk [vmem:[#allocation2 + $0x340] sm:$0x3] %vm34_vm2, %v13707_v2  ;;  %140 = vst.msk [vmem:[#allocation2 + $0x358] sm:$0x3] %vm34_vm2, %v13707_v2 }
  0x36   :  { %138 = vst.msk [vmem:[#allocation2 + $0x348] sm:$0xff] %vm31_vm1, %v13707_v2  ;;  %139 = vst.msk [vmem:[#allocation2 + $0x350] sm:$0xff] %vm31_vm1, %v13707_v2 }
  0x37   :  { %141 = vst.msk [vmem:[#allocation3] sm:$0xff] %vm31_vm1, %v13707_v2  ;;  %142 = vst.msk [vmem:[#allocation3 + $0x8] sm:$0xff] %vm31_vm1, %v13707_v2 }
  0x38   :  { %143 = vst.msk [vmem:[#allocation3 + $0x10] sm:$0x3] %vm34_vm2, %v13707_v2  ;;  %146 = vst.msk [vmem:[#allocation3 + $0x28] sm:$0x3] %vm34_vm2, %v13707_v2 }
  0x39   :  { %144 = vst.msk [vmem:[#allocation3 + $0x18] sm:$0xff] %vm31_vm1, %v13707_v2  ;;  %145 = vst.msk [vmem:[#allocation3 + $0x20] sm:$0xff] %vm31_vm1, %v13707_v2 }
  0x3a   :  { %147 = vst.msk [vmem:[#allocation3 + $0x30] sm:$0xff] %vm31_vm1, %v13707_v2  ;;  %148 = vst.msk [vmem:[#allocation3 + $0x38] sm:$0xff] %vm31_vm1, %v13707_v2 }
  0x3b   :  { %149 = vst.msk [vmem:[#allocation3 + $0x40] sm:$0x3] %vm34_vm2, %v13707_v2  ;;  %152 = vst.msk [vmem:[#allocation3 + $0x58] sm:$0x3] %vm34_vm2, %v13707_v2 }
  0x3c   :  { %150 = vst.msk [vmem:[#allocation3 + $0x48] sm:$0xff] %vm31_vm1, %v13707_v2  ;;  %151 = vst.msk [vmem:[#allocation3 + $0x50] sm:$0xff] %vm31_vm1, %v13707_v2 }
  0x3d   :  { %153 = vst.msk [vmem:[#allocation3 + $0x60] sm:$0xff] %vm31_vm1, %v13707_v2  ;;  %154 = vst.msk [vmem:[#allocation3 + $0x68] sm:$0xff] %vm31_vm1, %v13707_v2 }
  0x3e   :  { %155 = vst.msk [vmem:[#allocation3 + $0x70] sm:$0x3] %vm34_vm2, %v13707_v2  ;;  %158 = vst.msk [vmem:[#allocation3 + $0x88] sm:$0x3] %vm34_vm2, %v13707_v2 }
  0x3f   :  { %156 = vst.msk [vmem:[#allocation3 + $0x78] sm:$0xff] %vm31_vm1, %v13707_v2  ;;  %157 = vst.msk [vmem:[#allocation3 + $0x80] sm:$0xff] %vm31_vm1, %v13707_v2 }
  0x40   :  { %159 = vst.msk [vmem:[#allocation3 + $0x90] sm:$0xff] %vm31_vm1, %v13707_v2  ;;  %160 = vst.msk [vmem:[#allocation3 + $0x98] sm:$0xff] %vm31_vm1, %v13707_v2 }
  0x41   :  { %161 = vst.msk [vmem:[#allocation3 + $0xa0] sm:$0x3] %vm34_vm2, %v13707_v2  ;;  %164 = vst.msk [vmem:[#allocation3 + $0xb8] sm:$0x3] %vm34_vm2, %v13707_v2 }
  0x42   :  { %162 = vst.msk [vmem:[#allocation3 + $0xa8] sm:$0xff] %vm31_vm1, %v13707_v2  ;;  %163 = vst.msk [vmem:[#allocation3 + $0xb0] sm:$0xff] %vm31_vm1, %v13707_v2 }
  0x43   :  { %165 = vst.msk [vmem:[#allocation3 + $0xc0] sm:$0xff] %vm31_vm1, %v13707_v2  ;;  %166 = vst.msk [vmem:[#allocation3 + $0xc8] sm:$0xff] %vm31_vm1, %v13707_v2 }
  0x44   :  { %167 = vst.msk [vmem:[#allocation3 + $0xd0] sm:$0x3] %vm34_vm2, %v13707_v2  ;;  %170 = vst.msk [vmem:[#allocation3 + $0xe8] sm:$0x3] %vm34_vm2, %v13707_v2 }
  0x45   :  { %168 = vst.msk [vmem:[#allocation3 + $0xd8] sm:$0xff] %vm31_vm1, %v13707_v2  ;;  %169 = vst.msk [vmem:[#allocation3 + $0xe0] sm:$0xff] %vm31_vm1, %v13707_v2 }
  0x46   :  { %171 = vst.msk [vmem:[#allocation3 + $0xf0] sm:$0xff] %vm31_vm1, %v13707_v2  ;;  %172 = vst.msk [vmem:[#allocation3 + $0xf8] sm:$0xff] %vm31_vm1, %v13707_v2 }
  0x47   :  { %173 = vst.msk [vmem:[#allocation3 + $0x100] sm:$0x3] %vm34_vm2, %v13707_v2  ;;  %176 = vst.msk [vmem:[#allocation3 + $0x118] sm:$0x3] %vm34_vm2, %v13707_v2 }
  0x48   :  { %174 = vst.msk [vmem:[#allocation3 + $0x108] sm:$0xff] %vm31_vm1, %v13707_v2  ;;  %175 = vst.msk [vmem:[#allocation3 + $0x110] sm:$0xff] %vm31_vm1, %v13707_v2 }
  0x49   :  { %177 = vst.msk [vmem:[#allocation3 + $0x120] sm:$0xff] %vm31_vm1, %v13707_v2  ;;  %178 = vst.msk [vmem:[#allocation3 + $0x128] sm:$0xff] %vm31_vm1, %v13707_v2 }
  0x4a   :  { %179 = vst.msk [vmem:[#allocation3 + $0x130] sm:$0x3] %vm34_vm2, %v13707_v2  ;;  %182 = vst.msk [vmem:[#allocation3 + $0x148] sm:$0x3] %vm34_vm2, %v13707_v2 }
  0x4b   :  { %180 = vst.msk [vmem:[#allocation3 + $0x138] sm:$0xff] %vm31_vm1, %v13707_v2  ;;  %181 = vst.msk [vmem:[#allocation3 + $0x140] sm:$0xff] %vm31_vm1, %v13707_v2 }
  0x4c   :  { %183 = vst.msk [vmem:[#allocation3 + $0x150] sm:$0xff] %vm31_vm1, %v13707_v2  ;;  %184 = vst.msk [vmem:[#allocation3 + $0x158] sm:$0xff] %vm31_vm1, %v13707_v2 }
  0x4d   :  { %185 = vst.msk [vmem:[#allocation3 + $0x160] sm:$0x3] %vm34_vm2, %v13707_v2  ;;  %188 = vst.msk [vmem:[#allocation3 + $0x178] sm:$0x3] %vm34_vm2, %v13707_v2 }
  0x4e   :  { %186 = vst.msk [vmem:[#allocation3 + $0x168] sm:$0xff] %vm31_vm1, %v13707_v2  ;;  %187 = vst.msk [vmem:[#allocation3 + $0x170] sm:$0xff] %vm31_vm1, %v13707_v2 }
  0x4f   :  { %189 = vst.msk [vmem:[#allocation3 + $0x180] sm:$0xff] %vm31_vm1, %v13707_v2  ;;  %190 = vst.msk [vmem:[#allocation3 + $0x188] sm:$0xff] %vm31_vm1, %v13707_v2 }
  0x50   :  { %191 = vst.msk [vmem:[#allocation3 + $0x190] sm:$0x3] %vm34_vm2, %v13707_v2  ;;  %194 = vst.msk [vmem:[#allocation3 + $0x1a8] sm:$0x3] %vm34_vm2, %v13707_v2 }
  0x51   :  { %192 = vst.msk [vmem:[#allocation3 + $0x198] sm:$0xff] %vm31_vm1, %v13707_v2  ;;  %193 = vst.msk [vmem:[#allocation3 + $0x1a0] sm:$0xff] %vm31_vm1, %v13707_v2 }
  0x52   :  { %195 = vst.msk [vmem:[#allocation3 + $0x1b0] sm:$0xff] %vm31_vm1, %v13707_v2  ;;  %196 = vst.msk [vmem:[#allocation3 + $0x1b8] sm:$0xff] %vm31_vm1, %v13707_v2 }
  0x53   :  { %197 = vst.msk [vmem:[#allocation3 + $0x1c0] sm:$0x3] %vm34_vm2, %v13707_v2  ;;  %200 = vst.msk [vmem:[#allocation3 + $0x1d8] sm:$0x3] %vm34_vm2, %v13707_v2 }
  0x54   :  { %198 = vst.msk [vmem:[#allocation3 + $0x1c8] sm:$0xff] %vm31_vm1, %v13707_v2  ;;  %199 = vst.msk [vmem:[#allocation3 + $0x1d0] sm:$0xff] %vm31_vm1, %v13707_v2 }
  0x55   :  { %201 = vst.msk [vmem:[#allocation3 + $0x1e0] sm:$0xff] %vm31_vm1, %v13707_v2  ;;  %202 = vst.msk [vmem:[#allocation3 + $0x1e8] sm:$0xff] %vm31_vm1, %v13707_v2 }
  0x56   :  { %203 = vst.msk [vmem:[#allocation3 + $0x1f0] sm:$0x3] %vm34_vm2, %v13707_v2  ;;  %206 = vst.msk [vmem:[#allocation3 + $0x208] sm:$0x3] %vm34_vm2, %v13707_v2 }
  0x57   :  { %204 = vst.msk [vmem:[#allocation3 + $0x1f8] sm:$0xff] %vm31_vm1, %v13707_v2  ;;  %205 = vst.msk [vmem:[#allocation3 + $0x200] sm:$0xff] %vm31_vm1, %v13707_v2 }
  0x58   :  { %207 = vst.msk [vmem:[#allocation3 + $0x210] sm:$0xff] %vm31_vm1, %v13707_v2  ;;  %208 = vst.msk [vmem:[#allocation3 + $0x218] sm:$0xff] %vm31_vm1, %v13707_v2 }
  0x59   :  { %209 = vst.msk [vmem:[#allocation3 + $0x220] sm:$0x3] %vm34_vm2, %v13707_v2  ;;  %212 = vst.msk [vmem:[#allocation3 + $0x238] sm:$0x3] %vm34_vm2, %v13707_v2 }
  0x5a   :  { %210 = vst.msk [vmem:[#allocation3 + $0x228] sm:$0xff] %vm31_vm1, %v13707_v2  ;;  %211 = vst.msk [vmem:[#allocation3 + $0x230] sm:$0xff] %vm31_vm1, %v13707_v2 }
  0x5b   :  { %213 = vst.msk [vmem:[#allocation3 + $0x240] sm:$0xff] %vm31_vm1, %v13707_v2  ;;  %214 = vst.msk [vmem:[#allocation3 + $0x248] sm:$0xff] %vm31_vm1, %v13707_v2 }
  0x5c   :  { %215 = vst.msk [vmem:[#allocation3 + $0x250] sm:$0x3] %vm34_vm2, %v13707_v2  ;;  %218 = vst.msk [vmem:[#allocation3 + $0x268] sm:$0x3] %vm34_vm2, %v13707_v2 }
  0x5d   :  { %216 = vst.msk [vmem:[#allocation3 + $0x258] sm:$0xff] %vm31_vm1, %v13707_v2  ;;  %217 = vst.msk [vmem:[#allocation3 + $0x260] sm:$0xff] %vm31_vm1, %v13707_v2 }
  0x5e   :  { %219 = vst.msk [vmem:[#allocation3 + $0x270] sm:$0xff] %vm31_vm1, %v13707_v2  ;;  %220 = vst.msk [vmem:[#allocation3 + $0x278] sm:$0xff] %vm31_vm1, %v13707_v2 }
  0x5f   :  { %221 = vst.msk [vmem:[#allocation3 + $0x280] sm:$0x3] %vm34_vm2, %v13707_v2  ;;  %224 = vst.msk [vmem:[#allocation3 + $0x298] sm:$0x3] %vm34_vm2, %v13707_v2 }
  0x60   :  { %222 = vst.msk [vmem:[#allocation3 + $0x288] sm:$0xff] %vm31_vm1, %v13707_v2  ;;  %223 = vst.msk [vmem:[#allocation3 + $0x290] sm:$0xff] %vm31_vm1, %v13707_v2 }
  0x61   :  { %225 = vst.msk [vmem:[#allocation3 + $0x2a0] sm:$0xff] %vm31_vm1, %v13707_v2  ;;  %226 = vst.msk [vmem:[#allocation3 + $0x2a8] sm:$0xff] %vm31_vm1, %v13707_v2 }
  0x62   :  { %227 = vst.msk [vmem:[#allocation3 + $0x2b0] sm:$0x3] %vm34_vm2, %v13707_v2  ;;  %230 = vst.msk [vmem:[#allocation3 + $0x2c8] sm:$0x3] %vm34_vm2, %v13707_v2 }
  0x63   :  { %228 = vst.msk [vmem:[#allocation3 + $0x2b8] sm:$0xff] %vm31_vm1, %v13707_v2  ;;  %229 = vst.msk [vmem:[#allocation3 + $0x2c0] sm:$0xff] %vm31_vm1, %v13707_v2 }
  0x64   :  { %231 = vst.msk [vmem:[#allocation3 + $0x2d0] sm:$0xff] %vm31_vm1, %v13707_v2  ;;  %232 = vst.msk [vmem:[#allocation3 + $0x2d8] sm:$0xff] %vm31_vm1, %v13707_v2 }
  0x65   :  { %233 = vst.msk [vmem:[#allocation3 + $0x2e0] sm:$0x3] %vm34_vm2, %v13707_v2  ;;  %236 = vst.msk [vmem:[#allocation3 + $0x2f8] sm:$0x3] %vm34_vm2, %v13707_v2 }
  0x66   :  { %234 = vst.msk [vmem:[#allocation3 + $0x2e8] sm:$0xff] %vm31_vm1, %v13707_v2  ;;  %235 = vst.msk [vmem:[#allocation3 + $0x2f0] sm:$0xff] %vm31_vm1, %v13707_v2 }
  0x67   :  { %237 = vst.msk [vmem:[#allocation3 + $0x300] sm:$0xff] %vm31_vm1, %v13707_v2  ;;  %238 = vst.msk [vmem:[#allocation3 + $0x308] sm:$0xff] %vm31_vm1, %v13707_v2 }
  0x68   :  { %239 = vst.msk [vmem:[#allocation3 + $0x310] sm:$0x3] %vm34_vm2, %v13707_v2  ;;  %242 = vst.msk [vmem:[#allocation3 + $0x328] sm:$0x3] %vm34_vm2, %v13707_v2 }
  0x69   :  { %240 = vst.msk [vmem:[#allocation3 + $0x318] sm:$0xff] %vm31_vm1, %v13707_v2  ;;  %241 = vst.msk [vmem:[#allocation3 + $0x320] sm:$0xff] %vm31_vm1, %v13707_v2 }
  0x6a   :  { %243 = vst.msk [vmem:[#allocation3 + $0x330] sm:$0xff] %vm31_vm1, %v13707_v2  ;;  %244 = vst.msk [vmem:[#allocation3 + $0x338] sm:$0xff] %vm31_vm1, %v13707_v2 }
  0x6b   :  { %245 = vst.msk [vmem:[#allocation3 + $0x340] sm:$0x3] %vm34_vm2, %v13707_v2  ;;  %248 = vst.msk [vmem:[#allocation3 + $0x358] sm:$0x3] %vm34_vm2, %v13707_v2 }
  0x6c   :  { %246 = vst.msk [vmem:[#allocation3 + $0x348] sm:$0xff] %vm31_vm1, %v13707_v2  ;;  %247 = vst.msk [vmem:[#allocation3 + $0x350] sm:$0xff] %vm31_vm1, %v13707_v2  ;;  %v11891_v2 = vld [vmem:[%s18223_s0 + $0xb0] sm:$0xff]  }
  0x6d   :  { %379 = vst.msk [vmem:[#allocation2 + $0x19] sm:$0xff] %vm31_vm1, %v11744_v9  ;;  %380 = vst.msk [vmem:[#allocation2 + $0x21] sm:$0xff] %vm31_vm1, %v11745_v10  ;;  %v11817_v9 = vunpack.c.h.bf16 %v11887_v55 }
  0x6e   :  { %381 = vst.msk [vmem:[#allocation2 + $0x31] sm:$0xff] %vm31_vm1, %v11748_v11  ;;  %382 = vst.msk [vmem:[#allocation2 + $0x39] sm:$0xff] %vm31_vm1, %v11749_v12 }
  0x6f   :  { %383 = vst.msk [vmem:[#allocation2 + $0x49] sm:$0xff] %vm31_vm1, %v11752_v16  ;;  %384 = vst.msk [vmem:[#allocation2 + $0x51] sm:$0xff] %vm31_vm1, %v11753_v17  ;;  %v11824_v16 = vunpack.c.l.bf16 %v11889_v0 }
  0x70   :  { %385 = vst.msk [vmem:[#allocation2 + $0x61] sm:$0xff] %vm31_vm1, %v11756_v18  ;;  %386 = vst.msk [vmem:[#allocation2 + $0x69] sm:$0xff] %vm31_vm1, %v11757_v19 }
  0x71   :  { %387 = vst.msk [vmem:[#allocation2 + $0x79] sm:$0xff] %vm31_vm1, %v11760_v23  ;;  %388 = vst.msk [vmem:[#allocation2 + $0x81] sm:$0xff] %vm31_vm1, %v11761_v24  ;;  %v11829_v24 = vunpack.c.h.bf16 %v11890_v1 }
  0x72   :  { %389 = vst.msk [vmem:[#allocation2 + $0x91] sm:$0xff] %vm31_vm1, %v11764_v25  ;;  %390 = vst.msk [vmem:[#allocation2 + $0x99] sm:$0xff] %vm31_vm1, %v11765_v26  ;;  %v11832_v25 = vunpack.c.l.bf16 %v11891_v2  ;;  %v11833_v26 = vunpack.c.h.bf16 %v11891_v2 }
  0x73   :  { %391 = vst.msk [vmem:[#allocation2 + $0xa9] sm:$0xff] %vm31_vm1, %v11768_v30  ;;  %392 = vst.msk [vmem:[#allocation2 + $0xb1] sm:$0xff] %vm31_vm1, %v11769_v31 }
  0x74   :  { %393 = vst.msk [vmem:[#allocation2 + $0xc1] sm:$0xff] %vm31_vm1, %v11772_v32  ;;  %394 = vst.msk [vmem:[#allocation2 + $0xc9] sm:$0xff] %vm31_vm1, %v11773_v33  ;;  %v542_v3 = vld [vmem:[#allocation2 + $0x19] sm:$0xff]  ;;  %v543_v4 = vld [vmem:[#allocation2 + $0x21] sm:$0xff] }
  0x75   :  { %395 = vst.msk [vmem:[#allocation2 + $0xd9] sm:$0xff] %vm31_vm1, %v11776_v36  ;;  %396 = vst.msk [vmem:[#allocation2 + $0xe1] sm:$0xff] %vm31_vm1, %v11777_v37  ;;  %v445_v5 = vld [vmem:[#allocation2 + $0x18] sm:$0xff]  ;;  %v605_v10 = vpack.c.bf16 %v543_v4, %v542_v3  ;;  %v446_v11 = vld [vmem:[#allocation2 + $0x20] sm:$0xff] }
  0x76   :  { %397 = vst.msk [vmem:[#allocation2 + $0xf1] sm:$0xff] %vm31_vm1, %v11780_v38  ;;  %398 = vst.msk [vmem:[#allocation2 + $0xf9] sm:$0xff] %vm31_vm1, %v11781_v39  ;;  %v544_v12 = vld [vmem:[#allocation2 + $0x31] sm:$0xff]  ;;  %v545_v13 = vld [vmem:[#allocation2 + $0x39] sm:$0xff]  ;;  %v14307_v17 = vpack.c.bf16 %v446_v11, %v445_v5 }
  0x77   :  { %399 = vst.msk [vmem:[#allocation2 + $0x109] sm:$0xff] %vm31_vm1, %v11784_v45  ;;  %400 = vst.msk [vmem:[#allocation2 + $0x111] sm:$0xff] %vm31_vm1, %v11785_v46  ;;  %v606_v18 = vpack.c.bf16 %v545_v13, %v544_v12  ;;  %v447_v19 = vld [vmem:[#allocation2 + $0x30] sm:$0xff]  ;;  %v448_v20 = vld [vmem:[#allocation2 + $0x38] sm:$0xff]  ;;  %12498 = vmatmul.mubr.msk.bf16.vlgmr.msra.gmra.mxu0 %vm31_vm1, %v605_v10 }
  0x78   :  { %401 = vst.msk [vmem:[#allocation2 + $0x121] sm:$0xff] %vm31_vm1, %v11788_v47  ;;  %402 = vst.msk [vmem:[#allocation2 + $0x129] sm:$0xff] %vm31_vm1, %v11789_v48  ;;  %v14314_v23 = vpack.c.bf16 %v448_v20, %v447_v19  ;;  %12564 = vmatmul.mubr.msk.bf16.vlgmr.msra.gmra.mxu1 %vm31_vm1, %v14307_v17  ;;  %12628 = vmatpush3.bf16.msra.mxu0 %v1610_v61  ;;  %v546_v27 = vld [vmem:[#allocation2 + $0x49] sm:$0xff]  ;;  %v547_v28 = vld [vmem:[#allocation2 + $0x51] sm:$0xff] }
  0x79   :  { %403 = vst.msk [vmem:[#allocation2 + $0x139] sm:$0xff] %vm31_vm1, %v11792_v51  ;;  %404 = vst.msk [vmem:[#allocation2 + $0x141] sm:$0xff] %vm31_vm1, %v11793_v52  ;;  %v449_v29 = vld [vmem:[#allocation2 + $0x48] sm:$0xff]  ;;  %12501 = vmatprep.mubr.msk.bf16.mxu0 %vm31_vm1, %v606_v18  ;;  %v450_v30 = vld [vmem:[#allocation2 + $0x50] sm:$0xff]  ;;  %v607_v35 = vpack.c.bf16 %v547_v28, %v546_v27 }
  0x7a   :  { %405 = vst.msk [vmem:[#allocation2 + $0x151] sm:$0xff] %vm31_vm1, %v11796_v53  ;;  %406 = vst.msk [vmem:[#allocation2 + $0x159] sm:$0xff] %vm31_vm1, %v11797_v57  ;;  %12567 = vmatprep.mubr.msk.bf16.mxu1 %vm31_vm1, %v14314_v23  ;;  %v548_v31 = vld [vmem:[#allocation2 + $0x61] sm:$0xff]  ;;  %v549_v32 = vld [vmem:[#allocation2 + $0x69] sm:$0xff]  ;;  %v14329_v36 = vpack.c.bf16 %v450_v30, %v449_v29 }
  0x7b   :  { %407 = vst.msk [vmem:[#allocation2 + $0x169] sm:$0xff] %vm31_vm1, %v11800_v58  ;;  %408 = vst.msk [vmem:[#allocation2 + $0x171] sm:$0xff] %vm31_vm1, %v11801_v59  ;;  %v451_v33 = vld [vmem:[#allocation2 + $0x60] sm:$0xff]  ;;  %v452_v34 = vld [vmem:[#allocation2 + $0x68] sm:$0xff]  ;;  %v608_v37 = vpack.c.bf16 %v549_v32, %v548_v31 }
  0x7c   :  { %411 = vst.msk [vmem:[#allocation2 + $0x1c9] sm:$0xff] %vm31_vm1, %v11808_v62  ;;  %412 = vst.msk [vmem:[#allocation2 + $0x1d1] sm:$0xff] %vm31_vm1, %v11809_v63  ;;  %v14331_v38 = vpack.c.bf16 %v452_v34, %v451_v33  ;;  %v550_v39 = vld [vmem:[#allocation2 + $0x79] sm:$0xff]  ;;  %v551_v40 = vld [vmem:[#allocation2 + $0x81] sm:$0xff] }
  0x7d   :  { %413 = vst.msk [vmem:[#allocation2 + $0x1e1] sm:$0xff] %vm31_vm1, %v11812_v6  ;;  %414 = vst.msk [vmem:[#allocation2 + $0x1e9] sm:$0xff] %vm31_vm1, %v11813_v7  ;;  %v453_v41 = vld [vmem:[#allocation2 + $0x78] sm:$0xff]  ;;  %v454_v42 = vld [vmem:[#allocation2 + $0x80] sm:$0xff]  ;;  %v609_v47 = vpack.c.bf16 %v551_v40, %v550_v39 }
  0x7e   :  { %415 = vst.msk [vmem:[#allocation2 + $0x1f9] sm:$0xff] %vm31_vm1, %v11816_v8  ;;  %416 = vst.msk [vmem:[#allocation2 + $0x201] sm:$0xff] %vm31_vm1, %v11817_v9  ;;  %v552_v43 = vld [vmem:[#allocation2 + $0x91] sm:$0xff]  ;;  %v553_v44 = vld [vmem:[#allocation2 + $0x99] sm:$0xff]  ;;  %v14339_v48 = vpack.c.bf16 %v454_v42, %v453_v41 }
  0x7f   :  { %417 = vst.msk [vmem:[#allocation2 + $0x211] sm:$0xff] %vm31_vm1, %v11820_v14  ;;  %418 = vst.msk [vmem:[#allocation2 + $0x219] sm:$0xff] %vm31_vm1, %v11821_v15  ;;  %12502 = vmatmul.mubr.msk.bf16.gmra.mxu0 %vm31_vm1, %v607_v35  ;;  %v455_v45 = vld [vmem:[#allocation2 + $0x90] sm:$0xff]  ;;  %v456_v46 = vld [vmem:[#allocation2 + $0x98] sm:$0xff]  ;;  %v610_v49 = vpack.c.bf16 %v553_v44, %v552_v43 }
  0x80   :  { %419 = vst.msk [vmem:[#allocation2 + $0x229] sm:$0xff] %vm31_vm1, %v11824_v16  ;;  %420 = vst.msk [vmem:[#allocation2 + $0x231] sm:$0xff] %vm31_vm1, %v11825_v21  ;;  %12568 = vmatmul.mubr.msk.bf16.gmra.mxu1 %vm31_vm1, %v14329_v36  ;;  %12505 = vmatprep.mubr.msk.bf16.mxu0 %vm31_vm1, %v608_v37  ;;  %v14341_v50 = vpack.c.bf16 %v456_v46, %v455_v45  ;;  %v554_v51 = vld [vmem:[#allocation2 + $0xa9] sm:$0xff]  ;;  %v555_v52 = vld [vmem:[#allocation2 + $0xb1] sm:$0xff] }
  0x81   :  { %421 = vst.msk [vmem:[#allocation2 + $0x241] sm:$0xff] %vm31_vm1, %v11828_v22  ;;  %422 = vst.msk [vmem:[#allocation2 + $0x249] sm:$0xff] %vm31_vm1, %v11829_v24  ;;  %12571 = vmatprep.mubr.msk.bf16.mxu1 %vm31_vm1, %v14331_v38  ;;  %v457_v53 = vld [vmem:[#allocation2 + $0xa8] sm:$0xff]  ;;  %v458_v54 = vld [vmem:[#allocation2 + $0xb0] sm:$0xff]  ;;  %v611_v59 = vpack.c.bf16 %v555_v52, %v554_v51 }
  0x82   :  { %423 = vst.msk [vmem:[#allocation2 + $0x259] sm:$0xff] %vm31_vm1, %v11832_v25  ;;  %424 = vst.msk [vmem:[#allocation2 + $0x261] sm:$0xff] %vm31_vm1, %v11833_v26  ;;  %v556_v55 = vld [vmem:[#allocation2 + $0xc1] sm:$0xff]  ;;  %v557_v56 = vld [vmem:[#allocation2 + $0xc9] sm:$0xff]  ;;  %v14349_v60 = vpack.c.bf16 %v458_v54, %v457_v53 }
  0x83   :  { %v459_v57 = vld [vmem:[#allocation2 + $0xc0] sm:$0xff]  ;;  %v460_v58 = vld [vmem:[#allocation2 + $0xc8] sm:$0xff]  ;;  %v612_v61 = vpack.c.bf16 %v557_v56, %v556_v55  ;;  %v461_v1 = vld [vmem:[#allocation2 + $0xd8] sm:$0xff] }
  0x84   :  { %v14351_v62 = vpack.c.bf16 %v460_v58, %v459_v57  ;;  %v558_v63 = vld [vmem:[#allocation2 + $0xd9] sm:$0xff]  ;;  %v559_v0 = vld [vmem:[#allocation2 + $0xe1] sm:$0xff]  ;;  %v560_v3 = vld [vmem:[#allocation2 + $0xf1] sm:$0xff] }
  0x85   :  { %v462_v2 = vld [vmem:[#allocation2 + $0xe0] sm:$0xff]  ;;  %v463_v5 = vld [vmem:[#allocation2 + $0xf0] sm:$0xff]  ;;  %v464_v6 = vld [vmem:[#allocation2 + $0xf8] sm:$0xff]  ;;  %v613_v7 = vpack.c.bf16 %v559_v0, %v558_v63 }
  0x86   :  { %v561_v4 = vld [vmem:[#allocation2 + $0xf9] sm:$0xff]  ;;  %v14359_v8 = vpack.c.bf16 %v462_v2, %v461_v1  ;;  %v14367_v12 = vpack.c.bf16 %v464_v6, %v463_v5  ;;  %v11894_v16 = vld [vmem:[%s18223_s0 + $0xc8] sm:$0xff]   ;;  %v11895_v18 = vld [vmem:[%s18223_s0 + $0xd0] sm:$0xff]  }
  0x87   :  { %12506 = vmatmul.mubr.msk.bf16.gmra.mxu0 %vm31_vm1, %v609_v47  ;;  %v614_v9 = vpack.c.bf16 %v561_v4, %v560_v3  ;;  %v11892_v10 = vld [vmem:[%s18223_s0 + $0xb8] sm:$0xff]   ;;  %v11893_v11 = vld [vmem:[%s18223_s0 + $0xc0] sm:$0xff]   ;;  %v11844_v21 = vunpack.c.l.bf16 %v11894_v16  ;;  %v11845_v22 = vunpack.c.h.bf16 %v11894_v16  ;;  %v11848_v24 = vunpack.c.l.bf16 %v11895_v18  ;;  %v11898_v26 = vld [vmem:[%s18223_s0 + $0xe8] sm:$0xff]  }
  0x88   :  { %12572 = vmatmul.mubr.msk.bf16.gmra.mxu1 %vm31_vm1, %v14339_v48  ;;  %12509 = vmatprep.mubr.msk.bf16.mxu0 %vm31_vm1, %v610_v49  ;;  %v11836_v13 = vunpack.c.l.bf16 %v11892_v10  ;;  %v11837_v14 = vunpack.c.h.bf16 %v11892_v10  ;;  %v11840_v15 = vunpack.c.l.bf16 %v11893_v11  ;;  %v11896_v19 = vld [vmem:[%s18223_s0 + $0xd8] sm:$0xff]   ;;  %v11841_v20 = vunpack.c.h.bf16 %v11893_v11  ;;  %v11897_v25 = vld [vmem:[%s18223_s0 + $0xe0] sm:$0xff]   ;;  %v11899_v27 = vld [vmem:[%s18223_s0 + $0xf0] sm:$0xff]  }
  0x89   :  { %12575 = vmatprep.mubr.msk.bf16.mxu1 %vm31_vm1, %v14341_v50  ;;  %v11849_v28 = vunpack.c.h.bf16 %v11895_v18  ;;  %v11852_v29 = vunpack.c.l.bf16 %v11896_v19  ;;  %v11853_v30 = vunpack.c.h.bf16 %v11896_v19  ;;  %v11856_v31 = vunpack.c.l.bf16 %v11897_v25  ;;  %v11116_v32 = vld [vmem:[%s18222_s1 + $0xc] sm:$0xf]  ;;  %429 = vst.msk [vmem:[#allocation2 + $0x2a1] sm:$0xff] %vm31_vm1, %v11844_v21  ;;  %430 = vst.msk [vmem:[#allocation2 + $0x2a9] sm:$0xff] %vm31_vm1, %v11845_v22  ;;  %v14401_v39 = vld [vmem:[%s18222_s1 + $0x10] sm:$0xf] }
  0x8a   :  { %425 = vst.msk [vmem:[#allocation2 + $0x271] sm:$0xff] %vm31_vm1, %v11836_v13  ;;  %426 = vst.msk [vmem:[#allocation2 + $0x279] sm:$0xff] %vm31_vm1, %v11837_v14  ;;  %v11857_v33 = vunpack.c.h.bf16 %v11897_v25  ;;  %v11860_v34 = vunpack.c.l.bf16 %v11898_v26  ;;  %v11861_v35 = vunpack.c.h.bf16 %v11898_v26  ;;  %v11864_v37 = vunpack.c.l.bf16 %v11899_v27  ;;  %13686 = vmatprep.subr.msk.bf16.mxu1 %vm734_vm0, %v11116_v32  ;;  %13687 = vmatprep.subr.msk.bf16.mxu0 %vm734_vm0, %v14401_v39  ;;  %v562_v42 = vld [vmem:[#allocation2 + $0x109] sm:$0xff]  ;;  %v563_v43 = vld [vmem:[#allocation2 + $0x111] sm:$0xff] }
  0x8b   :  { %427 = vst.msk [vmem:[#allocation2 + $0x289] sm:$0xff] %vm31_vm1, %v11840_v15  ;;  %428 = vst.msk [vmem:[#allocation2 + $0x291] sm:$0xff] %vm31_vm1, %v11841_v20  ;;  %v11865_v40 = vunpack.c.h.bf16 %v11899_v27  ;;  %v2160_v41 = vsel %vm734_vm0, %v11116_v32, 0  ;;  %v465_v44 = vld [vmem:[#allocation2 + $0x108] sm:$0xff]  ;;  %v466_v45 = vld [vmem:[#allocation2 + $0x110] sm:$0xff]  ;;  %v615_v52 = vpack.c.bf16 %v563_v43, %v562_v42 }
  0x8c   :  { %431 = vst.msk [vmem:[#allocation2 + $0x2b9] sm:$0xff] %vm31_vm1, %v11848_v24  ;;  %432 = vst.msk [vmem:[#allocation2 + $0x2c1] sm:$0xff] %vm31_vm1, %v11849_v28  ;;  %12694 = vmatpush3.bf16.msra.mxu1 %v2160_v41  ;;  %v564_v46 = vld [vmem:[#allocation2 + $0x121] sm:$0xff]  ;;  %v565_v47 = vld [vmem:[#allocation2 + $0x129] sm:$0xff]  ;;  %v14421_v53 = vpack.c.bf16 %v466_v45, %v465_v44 }
  0x8d   :  { %433 = vst.msk [vmem:[#allocation2 + $0x2d1] sm:$0xff] %vm31_vm1, %v11852_v29  ;;  %434 = vst.msk [vmem:[#allocation2 + $0x2d9] sm:$0xff] %vm31_vm1, %v11853_v30  ;;  %v467_v49 = vld [vmem:[#allocation2 + $0x120] sm:$0xff]  ;;  %v468_v51 = vld [vmem:[#allocation2 + $0x128] sm:$0xff]  ;;  %v616_v54 = vpack.c.bf16 %v565_v47, %v564_v46 }
  0x8e   :  { %435 = vst.msk [vmem:[#allocation2 + $0x2e9] sm:$0xff] %vm31_vm1, %v11856_v31  ;;  %436 = vst.msk [vmem:[#allocation2 + $0x2f1] sm:$0xff] %vm31_vm1, %v11857_v33  ;;  %v14423_v55 = vpack.c.bf16 %v468_v51, %v467_v49  ;;  %v566_v56 = vld [vmem:[#allocation2 + $0x139] sm:$0xff]  ;;  %v567_v57 = vld [vmem:[#allocation2 + $0x141] sm:$0xff] }
  0x8f   :  { %12510 = vmatmul.mubr.msk.bf16.gmra.mxu0 %vm31_vm1, %v611_v59  ;;  %437 = vst.msk [vmem:[#allocation2 + $0x301] sm:$0xff] %vm31_vm1, %v11860_v34  ;;  %438 = vst.msk [vmem:[#allocation2 + $0x309] sm:$0xff] %vm31_vm1, %v11861_v35  ;;  %v469_v58 = vld [vmem:[#allocation2 + $0x138] sm:$0xff]  ;;  %v470_v59 = vld [vmem:[#allocation2 + $0x140] sm:$0xff]  ;;  %v617_v2 = vpack.c.bf16 %v567_v57, %v566_v56 }
  0x90   :  { %12576 = vmatmul.mubr.msk.bf16.gmra.mxu1 %vm31_vm1, %v14349_v60  ;;  %12513 = vmatprep.mubr.msk.bf16.mxu0 %vm31_vm1, %v612_v61  ;;  %439 = vst.msk [vmem:[#allocation2 + $0x319] sm:$0xff] %vm31_vm1, %v11864_v37  ;;  %440 = vst.msk [vmem:[#allocation2 + $0x321] sm:$0xff] %vm31_vm1, %v11865_v40  ;;  %v568_v61 = vld [vmem:[#allocation2 + $0x151] sm:$0xff]  ;;  %v569_v63 = vld [vmem:[#allocation2 + $0x159] sm:$0xff]  ;;  %v14431_v3 = vpack.c.bf16 %v470_v59, %v469_v58 }
  0x91   :  { %12579 = vmatprep.mubr.msk.bf16.mxu1 %vm31_vm1, %v14351_v62  ;;  %v471_v0 = vld [vmem:[#allocation2 + $0x150] sm:$0xff]  ;;  %v472_v1 = vld [vmem:[#allocation2 + $0x158] sm:$0xff]  ;;  %v618_v4 = vpack.c.bf16 %v569_v63, %v568_v61  ;;  %v473_v10 = vld [vmem:[#allocation2 + $0x168] sm:$0xff] }
  0x92   :  { %v14433_v5 = vpack.c.bf16 %v472_v1, %v471_v0  ;;  %v570_v6 = vld [vmem:[#allocation2 + $0x169] sm:$0xff]  ;;  %v573_v13 = vld [vmem:[#allocation2 + $0x1b9] sm:$0xff]  ;;  %v575_v26 = vld [vmem:[#allocation2 + $0x1d1] sm:$0xff] }
  0x93   :  { %v474_v11 = vld [vmem:[#allocation2 + $0x170] sm:$0xff]  ;;  %v476_v15 = vld [vmem:[#allocation2 + $0x1b8] sm:$0xff]  ;;  %v477_v27 = vld [vmem:[#allocation2 + $0x1c8] sm:$0xff] }
  0x94   :  { %v475_v14 = vld [vmem:[#allocation2 + $0x1b0] sm:$0xff]  ;;  %v11884_v16 = vld [vmem:[%s18223_s0 + $0x78] sm:$0xff]   ;;  %v14444_v21 = vpack.c.bf16 %v474_v11, %v473_v10  ;;  %v576_v29 = vld [vmem:[#allocation2 + $0x1e1] sm:$0xff] }
  0x95   :  { %v11804_v19 = vunpack.c.l.bf16 %v11884_v16  ;;  %v11805_v20 = vunpack.c.h.bf16 %v11884_v16  ;;  %v523_v24 = vpack.c.bf16 %v476_v15, %v475_v14  ;;  %v574_v25 = vld [vmem:[#allocation2 + $0x1c9] sm:$0xff]  ;;  %v479_v31 = vld [vmem:[#allocation2 + $0x1e0] sm:$0xff]  ;;  %v481_v42 = vld [vmem:[#allocation2 + $0x1f8] sm:$0xff] }
  0x96   :  { %v478_v28 = vld [vmem:[#allocation2 + $0x1d0] sm:$0xff]  ;;  %v480_v32 = vld [vmem:[#allocation2 + $0x1e8] sm:$0xff]  ;;  %v621_v33 = vpack.c.bf16 %v575_v26, %v574_v25  ;;  %v578_v40 = vld [vmem:[#allocation2 + $0x1f9] sm:$0xff] }
  0x97   :  { %12514 = vmatmul.mubr.msk.bf16.gmra.mxu0 %vm31_vm1, %v613_v7  ;;  %v571_v7 = vld [vmem:[#allocation2 + $0x171] sm:$0xff]  ;;  %409 = vst.msk [vmem:[#allocation2 + $0x181] sm:$0xff] %vm31_vm1, %v11804_v19  ;;  %410 = vst.msk [vmem:[#allocation2 + $0x189] sm:$0xff] %vm31_vm1, %v11805_v20  ;;  %v577_v30 = vld [vmem:[#allocation2 + $0x1e9] sm:$0xff]  ;;  %v14453_v34 = vpack.c.bf16 %v478_v28, %v477_v27  ;;  %v14455_v37 = vpack.c.bf16 %v480_v32, %v479_v31 }
  0x98   :  { %12580 = vmatmul.mubr.msk.bf16.gmra.mxu1 %vm31_vm1, %v14359_v8  ;;  %12517 = vmatprep.mubr.msk.bf16.mxu0 %vm31_vm1, %v614_v9  ;;  %v572_v9 = vld [vmem:[#allocation2 + $0x1b1] sm:$0xff]  ;;  %v619_v18 = vpack.c.bf16 %v571_v7, %v570_v6  ;;  %v622_v35 = vpack.c.bf16 %v577_v30, %v576_v29  ;;  %v579_v41 = vld [vmem:[#allocation2 + $0x201] sm:$0xff]  ;;  %v581_v45 = vld [vmem:[#allocation2 + $0x219] sm:$0xff] }
  0x99   :  { %12583 = vmatprep.mubr.msk.bf16.mxu1 %vm31_vm1, %v14367_v12  ;;  %v620_v22 = vpack.c.bf16 %v573_v13, %v572_v9  ;;  %v482_v43 = vld [vmem:[#allocation2 + $0x200] sm:$0xff]  ;;  %v580_v44 = vld [vmem:[#allocation2 + $0x211] sm:$0xff]  ;;  %v623_v49 = vpack.c.bf16 %v579_v41, %v578_v40  ;;  %v582_v56 = vld [vmem:[#allocation2 + $0x229] sm:$0xff] }
  0x9a   :  { %v483_v46 = vld [vmem:[#allocation2 + $0x210] sm:$0xff]  ;;  %v484_v47 = vld [vmem:[#allocation2 + $0x218] sm:$0xff]  ;;  %v14463_v51 = vpack.c.bf16 %v482_v43, %v481_v42  ;;  %v485_v58 = vld [vmem:[#allocation2 + $0x228] sm:$0xff] }
  0x9b   :  { %v583_v57 = vld [vmem:[#allocation2 + $0x231] sm:$0xff]  ;;  %v584_v61 = vld [vmem:[#allocation2 + $0x241] sm:$0xff]  ;;  %v585_v63 = vld [vmem:[#allocation2 + $0x249] sm:$0xff] }
  0x9c   :  { %v486_v59 = vld [vmem:[#allocation2 + $0x230] sm:$0xff]  ;;  %v487_v0 = vld [vmem:[#allocation2 + $0x240] sm:$0xff]  ;;  %v488_v1 = vld [vmem:[#allocation2 + $0x248] sm:$0xff]  ;;  %v626_v6 = vpack.c.bf16 %v585_v63, %v584_v61 }
  0x9d   :  { %v14475_v7 = vpack.c.bf16 %v488_v1, %v487_v0  ;;  %v586_v9 = vld [vmem:[#allocation2 + $0x259] sm:$0xff]  ;;  %v587_v10 = vld [vmem:[#allocation2 + $0x261] sm:$0xff]  ;;  %v588_v14 = vld [vmem:[#allocation2 + $0x271] sm:$0xff] }
  0x9e   :  { %v489_v11 = vld [vmem:[#allocation2 + $0x258] sm:$0xff]  ;;  %v490_v13 = vld [vmem:[#allocation2 + $0x260] sm:$0xff]  ;;  %v491_v16 = vld [vmem:[#allocation2 + $0x270] sm:$0xff]  ;;  %v627_v19 = vpack.c.bf16 %v587_v10, %v586_v9 }
  0x9f   :  { %12518 = vmatmul.mubr.msk.bf16.gmra.mxu0 %vm31_vm1, %v615_v52  ;;  %v624_v52 = vpack.c.bf16 %v581_v45, %v580_v44  ;;  %v589_v15 = vld [vmem:[#allocation2 + $0x279] sm:$0xff]  ;;  %v14483_v20 = vpack.c.bf16 %v490_v13, %v489_v11  ;;  %v590_v25 = vld [vmem:[#allocation2 + $0x289] sm:$0xff]  ;;  %v591_v26 = vld [vmem:[#allocation2 + $0x291] sm:$0xff] }
  0xa0   :  { %12584 = vmatmul.mubr.msk.bf16.gmra.mxu1 %vm31_vm1, %v14421_v53  ;;  %12521 = vmatprep.mubr.msk.bf16.mxu0 %vm31_vm1, %v616_v54  ;;  %v14465_v54 = vpack.c.bf16 %v484_v47, %v483_v46  ;;  %v493_v27 = vld [vmem:[#allocation2 + $0x288] sm:$0xff]  ;;  %v494_v28 = vld [vmem:[#allocation2 + $0x290] sm:$0xff]  ;;  %v495_v31 = vld [vmem:[#allocation2 + $0x2a0] sm:$0xff] }
  0xa1   :  { %12587 = vmatprep.mubr.msk.bf16.mxu1 %vm31_vm1, %v14423_v55  ;;  %v592_v29 = vld [vmem:[#allocation2 + $0x2a1] sm:$0xff]  ;;  %v593_v30 = vld [vmem:[#allocation2 + $0x2a9] sm:$0xff]  ;;  %v594_v42 = vld [vmem:[#allocation2 + $0x2b9] sm:$0xff] }
  0xa2   :  { %v496_v32 = vld [vmem:[#allocation2 + $0x2a8] sm:$0xff]  ;;  %v630_v40 = vpack.c.bf16 %v593_v30, %v592_v29  ;;  %v497_v44 = vld [vmem:[#allocation2 + $0x2b8] sm:$0xff]  ;;  %v498_v45 = vld [vmem:[#allocation2 + $0x2c0] sm:$0xff] }
  0xa3   :  { %v14495_v41 = vpack.c.bf16 %v496_v32, %v495_v31  ;;  %v595_v43 = vld [vmem:[#allocation2 + $0x2c1] sm:$0xff]  ;;  %v596_v46 = vld [vmem:[#allocation2 + $0x2d1] sm:$0xff]  ;;  %v597_v47 = vld [vmem:[#allocation2 + $0x2d9] sm:$0xff] }
  0xa4   :  { %v598_v61 = vld [vmem:[#allocation2 + $0x2e9] sm:$0xff]  ;;  %v599_v63 = vld [vmem:[#allocation2 + $0x2f1] sm:$0xff]  ;;  %v503_v9 = vld [vmem:[#allocation2 + $0x300] sm:$0xff] }
  0xa5   :  { %v501_v0 = vld [vmem:[#allocation2 + $0x2e8] sm:$0xff]  ;;  %v502_v1 = vld [vmem:[#allocation2 + $0x2f0] sm:$0xff]  ;;  %v633_v11 = vpack.c.bf16 %v599_v63, %v598_v61 }
  0xa6   :  { %v504_v10 = vld [vmem:[#allocation2 + $0x308] sm:$0xff]  ;;  %v14513_v13 = vpack.c.bf16 %v502_v1, %v501_v0  ;;  %v1427_v0 = vld [vmem:[#allocation2 + $0x92] sm:$0xff]  ;;  %v1428_v1 = vld [vmem:[#allocation2 + $0x9a] sm:$0xff] }
  0xa7   :  { %12522 = vmatmul.mubr.msk.bf16.gmra.mxu0 %vm31_vm1, %v617_v2  ;;  %v625_v2 = vpack.c.bf16 %v583_v57, %v582_v56  ;;  %v631_v56 = vpack.c.bf16 %v595_v43, %v594_v42  ;;  %v14503_v57 = vpack.c.bf16 %v498_v45, %v497_v44  ;;  %v1416_v29 = vld [vmem:[#allocation2 + $0xa] sm:$0xff]  ;;  %v1419_v42 = vld [vmem:[#allocation2 + $0x32] sm:$0xff]  ;;  %v1420_v43 = vld [vmem:[#allocation2 + $0x3a] sm:$0xff]  ;;  %v2710_v45 = vsel %vm734_vm0, %v14401_v39, 0 }
  0xa8   :  { %12588 = vmatmul.mubr.msk.bf16.gmra.mxu1 %vm31_vm1, %v14431_v3  ;;  %12525 = vmatprep.mubr.msk.bf16.mxu0 %vm31_vm1, %v618_v4  ;;  %v14473_v4 = vpack.c.bf16 %v486_v59, %v485_v58  ;;  %v632_v58 = vpack.c.bf16 %v597_v47, %v596_v46  ;;  %v14540_v46 = vpack.c.bf16 %v1420_v43, %v1419_v42  ;;  %v11182_v47 = vld [vmem:[%s18222_s1 + $0x14] sm:$0xf]  ;;  %v1421_v39 = vld [vmem:[#allocation2 + $0x4a] sm:$0xff] }
  0xa9   :  { %12591 = vmatprep.mubr.msk.bf16.mxu1 %vm31_vm1, %v14433_v5  ;;  %13688 = vmatprep.subr.msk.bf16.mxu1 %vm734_vm0, %v11182_v47  ;;  %v1447_v42 = vld [vmem:[#allocation2 + $0x1b2] sm:$0xff]  ;;  %v1996_v43 = vld [vmem:[#allocation2 + $0x188] sm:$0xff] }
  0xaf   :  { %12526 = vmatmul.mubr.msk.bf16.gmra.mxu0 %vm31_vm1, %v619_v18  ;;  %v492_v18 = vld [vmem:[#allocation2 + $0x278] sm:$0xff] }
  0xb0   :  { %12592 = vmatmul.mubr.msk.bf16.gmra.mxu1 %vm31_vm1, %v14444_v21  ;;  %12529 = vmatprep.mubr.msk.bf16.mxu0 %vm31_vm1, %v620_v22  ;;  %v628_v22 = vpack.c.bf16 %v589_v15, %v588_v14  ;;  %v14515_v15 = vpack.c.bf16 %v504_v10, %v503_v9  ;;  %v1430_v9 = vld [vmem:[#allocation2 + $0xb2] sm:$0xff]  ;;  %v1432_v10 = vld [vmem:[#allocation2 + $0xca] sm:$0xff] }
  0xb1   :  { %12595 = vmatprep.mubr.msk.bf16.mxu1 %vm31_vm1, %v523_v24  ;;  %v14485_v24 = vpack.c.bf16 %v492_v18, %v491_v16  ;;  %v11900_v16 = vld [vmem:[%s18223_s0 + $0xf8] sm:$0xff]  }
  0xb2   :  { %v11868_v18 = vunpack.c.l.bf16 %v11900_v16 }
  0xb4   :  { %441 = vst.msk [vmem:[#allocation2 + $0x331] sm:$0xff] %vm31_vm1, %v11868_v18  ;;  %v1436_v18 = vld [vmem:[#allocation2 + $0xfa] sm:$0xff] }
  0xb7   :  { %12530 = vmatmul.mubr.msk.bf16.gmra.mxu0 %vm31_vm1, %v621_v33  ;;  %v629_v33 = vpack.c.bf16 %v591_v26, %v590_v25  ;;  %v603_v25 = vld [vmem:[#allocation2 + $0x321] sm:$0xff] }
  0xb8   :  { %12596 = vmatmul.mubr.msk.bf16.gmra.mxu1 %vm31_vm1, %v14453_v34  ;;  %12533 = vmatprep.mubr.msk.bf16.mxu0 %vm31_vm1, %v622_v35  ;;  %v14493_v35 = vpack.c.bf16 %v494_v28, %v493_v27  ;;  %v1415_v26 = vld [vmem:[#allocation2 + $0x2] sm:$0xff]  ;;  %v505_v27 = vld [vmem:[#allocation2 + $0x318] sm:$0xff] }
  0xb9   :  { %12599 = vmatprep.mubr.msk.bf16.mxu1 %vm31_vm1, %v14455_v37  ;;  %v506_v28 = vld [vmem:[#allocation2 + $0x320] sm:$0xff]  ;;  %v1479_v32 = vpack.c.bf16 %v1416_v29, %v1415_v26  ;;  %v1440_v26 = vld [vmem:[#allocation2 + $0x12a] sm:$0xff] }
  0xba   :  { %v14528_v31 = vpack.c.bf16 %v506_v28, %v505_v27  ;;  %v1442_v29 = vld [vmem:[#allocation2 + $0x142] sm:$0xff] }
  0xbf   :  { %12534 = vmatmul.mubr.msk.bf16.gmra.mxu0 %vm31_vm1, %v623_v49  ;;  %v499_v49 = vld [vmem:[#allocation2 + $0x2d0] sm:$0xff] }
  0xc0   :  { %12600 = vmatmul.mubr.msk.bf16.gmra.mxu1 %vm31_vm1, %v14463_v51  ;;  %12537 = vmatprep.mubr.msk.bf16.mxu0 %vm31_vm1, %v624_v52  ;;  %v500_v52 = vld [vmem:[#allocation2 + $0x2d8] sm:$0xff] }
  0xc1   :  { %12603 = vmatprep.mubr.msk.bf16.mxu1 %vm31_vm1, %v14465_v54  ;;  %v14505_v59 = vpack.c.bf16 %v500_v52, %v499_v49  ;;  %v14552_v49 = vld [vmem:[%s18222_s1 + $0x18] sm:$0xf] }
  0xc2   :  { %v1422_v52 = vld [vmem:[#allocation2 + $0x52] sm:$0xff] }
  0xc3   :  { %v14562_v61 = vpack.c.bf16 %v1422_v52, %v1421_v39  ;;  %v1450_v52 = vld [vmem:[#allocation2 + $0x1d2] sm:$0xff] }
  0xc7   :  { %12538 = vmatmul.mubr.msk.bf16.gmra.mxu0 %vm31_vm1, %v625_v2  ;;  %v600_v2 = vld [vmem:[#allocation2 + $0x301] sm:$0xff] }
  0xc8   :  { %12604 = vmatmul.mubr.msk.bf16.gmra.mxu1 %vm31_vm1, %v14473_v4  ;;  %12541 = vmatprep.mubr.msk.bf16.mxu0 %vm31_vm1, %v626_v6  ;;  %v601_v6 = vld [vmem:[#allocation2 + $0x309] sm:$0xff] }
  0xc9   :  { %12607 = vmatprep.mubr.msk.bf16.mxu1 %vm31_vm1, %v14475_v7  ;;  %v634_v14 = vpack.c.bf16 %v601_v6, %v600_v2  ;;  %v14576_v6 = vpack.c.bf16 %v1428_v1, %v1427_v0  ;;  %v1453_v1 = vld [vmem:[#allocation2 + $0x1fa] sm:$0xff] }
  0xcf   :  { %12542 = vmatmul.mubr.msk.bf16.gmra.mxu0 %vm31_vm1, %v627_v19  ;;  %v11869_v19 = vunpack.c.h.bf16 %v11900_v16  ;;  %v1434_v16 = vld [vmem:[#allocation2 + $0xe2] sm:$0xff] }
  0xd0   :  { %12608 = vmatmul.mubr.msk.bf16.gmra.mxu1 %vm31_vm1, %v14483_v20  ;;  %12545 = vmatprep.mubr.msk.bf16.mxu0 %vm31_vm1, %v628_v22  ;;  %v602_v22 = vld [vmem:[#allocation2 + $0x319] sm:$0xff] }
  0xd1   :  { %12611 = vmatprep.mubr.msk.bf16.mxu1 %vm31_vm1, %v14485_v24  ;;  %442 = vst.msk [vmem:[#allocation2 + $0x339] sm:$0xff] %vm31_vm1, %v11869_v19  ;;  %v635_v30 = vpack.c.bf16 %v603_v25, %v602_v22  ;;  %v1438_v25 = vld [vmem:[#allocation2 + $0x112] sm:$0xff] }
  0xd7   :  { %12546 = vmatmul.mubr.msk.bf16.gmra.mxu0 %vm31_vm1, %v629_v33  ;;  %v1417_v33 = vld [vmem:[#allocation2 + $0x1a] sm:$0xff] }
  0xd8   :  { %12612 = vmatmul.mubr.msk.bf16.gmra.mxu1 %vm31_vm1, %v14493_v35  ;;  %12549 = vmatprep.mubr.msk.bf16.mxu0 %vm31_vm1, %v630_v40  ;;  %v1418_v40 = vld [vmem:[#allocation2 + $0x22] sm:$0xff] }
  0xd9   :  { %12615 = vmatprep.mubr.msk.bf16.mxu1 %vm31_vm1, %v14495_v41  ;;  %v14536_v44 = vpack.c.bf16 %v1418_v40, %v1417_v33  ;;  %v1446_v40 = vld [vmem:[#allocation2 + $0x172] sm:$0xff] }
  0xdf   :  { %12550 = vmatmul.mubr.msk.bf16.gmra.mxu0 %vm31_vm1, %v631_v56  ;;  %v1423_v56 = vld [vmem:[#allocation2 + $0x62] sm:$0xff] }
  0xe0   :  { %12616 = vmatmul.mubr.msk.bf16.gmra.mxu1 %vm31_vm1, %v14503_v57  ;;  %12553 = vmatprep.mubr.msk.bf16.mxu0 %vm31_vm1, %v632_v58  ;;  %v1424_v58 = vld [vmem:[#allocation2 + $0x6a] sm:$0xff] }
  0xe1   :  { %12619 = vmatprep.mubr.msk.bf16.mxu1 %vm31_vm1, %v14505_v59  ;;  %v14564_v63 = vpack.c.bf16 %v1424_v58, %v1423_v56  ;;  %v1452_v56 = vld [vmem:[#allocation2 + $0x1ea] sm:$0xff] }
  0xe7   :  { %12554 = vmatmul.mubr.msk.bf16.gmra.mxu0 %vm31_vm1, %v633_v11 }
  0xe8   :  { %12620 = vmatmul.mubr.msk.bf16.gmra.mxu1 %vm31_vm1, %v14513_v13  ;;  %12557 = vmatprep.mubr.msk.bf16.mxu0 %vm31_vm1, %v634_v14 }
  0xe9   :  { %12623 = vmatprep.mubr.msk.bf16.mxu1 %vm31_vm1, %v14515_v15 }
  0xef   :  { %12558 = vmatmul.mubr.msk.bf16.gmra.mxu0 %vm31_vm1, %v635_v30  ;;  %v1444_v30 = vld [vmem:[#allocation2 + $0x15a] sm:$0xff] }
  0xf0   :  { %12624 = vmatmul.mubr.msk.bf16.gmra.mxu1 %vm31_vm1, %v14528_v31  ;;  %12629 = vmatprep.mubr.msk.bf16.mxu0 %vm31_vm1, %v1479_v32 }
  0xf1   :  { %12695 = vmatprep.mubr.msk.bf16.mxu1 %vm31_vm1, %v14307_v17  ;;  %v3260_v17 = vsel %vm734_vm0, %v11182_v47, 0 }
  0xf7   :  { %12630 = vmatmul.mubr.msk.bf16.vlgmr.msra.gmra.mxu0 %vm31_vm1, %v14536_v44 }
  0xf8   :  { %12760 = vmatpush3.bf16.msra.mxu0 %v2710_v45  ;;  %12696 = vmatmul.mubr.msk.bf16.vlgmr.msra.gmra.mxu1 %vm31_vm1, %v14314_v23  ;;  %v1425_v23 = vld [vmem:[#allocation2 + $0x7a] sm:$0xff] }
  0xf9   :  { %12633 = vmatprep.mubr.msk.bf16.mxu0 %vm31_vm1, %v14540_v46  ;;  %12699 = vmatprep.mubr.msk.bf16.mxu1 %vm31_vm1, %v14329_v36  ;;  %v1426_v36 = vld [vmem:[#allocation2 + $0x82] sm:$0xff]  ;;  %v1448_v45 = vld [vmem:[#allocation2 + $0x1ba] sm:$0xff] }
  0xfa   :  { %12826 = vmatpush3.bf16.msra.mxu1 %v3260_v17  ;;  %13689 = vmatprep.subr.msk.bf16.mxu0 %vm734_vm0, %v14552_v49  ;;  %v14574_v2 = vpack.c.bf16 %v1426_v36, %v1425_v23  ;;  %v1495_v39 = vpack.c.bf16 %v1448_v45, %v1447_v42  ;;  %v1459_v42 = vld [vmem:[#allocation2 + $0x242] sm:$0xff] }
  0xff   :  { %12634 = vmatmul.mubr.msk.bf16.gmra.mxu0 %vm31_vm1, %v14562_v61 }
 0x100   :  { %12700 = vmatmul.mubr.msk.bf16.gmra.mxu1 %vm31_vm1, %v14331_v38  ;;  %12637 = vmatprep.mubr.msk.bf16.mxu0 %vm31_vm1, %v14564_v63  ;;  %v1429_v38 = vld [vmem:[#allocation2 + $0xaa] sm:$0xff] }
 0x101   :  { %12703 = vmatprep.mubr.msk.bf16.mxu1 %vm31_vm1, %v14339_v48  ;;  %v1431_v48 = vld [vmem:[#allocation2 + $0xc2] sm:$0xff]  ;;  %v14586_v11 = vpack.c.bf16 %v1430_v9, %v1429_v38 }
 0x102   :  { %v14588_v14 = vpack.c.bf16 %v1432_v10, %v1431_v48  ;;  %v1454_v38 = vld [vmem:[#allocation2 + $0x202] sm:$0xff]  ;;  %v1455_v48 = vld [vmem:[#allocation2 + $0x212] sm:$0xff]  ;;  %v1456_v10 = vld [vmem:[#allocation2 + $0x21a] sm:$0xff] }
 0x107   :  { %12638 = vmatmul.mubr.msk.bf16.gmra.mxu0 %vm31_vm1, %v14574_v2 }
 0x108   :  { %12704 = vmatmul.mubr.msk.bf16.gmra.mxu1 %vm31_vm1, %v14341_v50  ;;  %12641 = vmatprep.mubr.msk.bf16.mxu0 %vm31_vm1, %v14576_v6  ;;  %v1433_v50 = vld [vmem:[#allocation2 + $0xda] sm:$0xff] }
 0x109   :  { %12707 = vmatprep.mubr.msk.bf16.mxu1 %vm31_vm1, %v14349_v60  ;;  %v1435_v60 = vld [vmem:[#allocation2 + $0xf2] sm:$0xff]  ;;  %v14598_v19 = vpack.c.bf16 %v1434_v16, %v1433_v50 }
 0x10a   :  { %v14600_v22 = vpack.c.bf16 %v1436_v18, %v1435_v60  ;;  %v14658_v18 = vpack.c.bf16 %v1454_v38, %v1453_v1  ;;  %v1461_v1 = vld [vmem:[#allocation2 + $0x25a] sm:$0xff]  ;;  %v1462_v38 = vld [vmem:[#allocation2 + $0x262] sm:$0xff] }
 0x10f   :  { %12642 = vmatmul.mubr.msk.bf16.gmra.mxu0 %vm31_vm1, %v14586_v11 }
 0x110   :  { %12708 = vmatmul.mubr.msk.bf16.gmra.mxu1 %vm31_vm1, %v14351_v62  ;;  %12645 = vmatprep.mubr.msk.bf16.mxu0 %vm31_vm1, %v14588_v14  ;;  %v1437_v62 = vld [vmem:[#allocation2 + $0x10a] sm:$0xff] }
 0x111   :  { %12711 = vmatprep.mubr.msk.bf16.mxu1 %vm31_vm1, %v14359_v8  ;;  %v1439_v8 = vld [vmem:[#allocation2 + $0x122] sm:$0xff]  ;;  %v14610_v27 = vpack.c.bf16 %v1438_v25, %v1437_v62  ;;  %v14660_v62 = vpack.c.bf16 %v1456_v10, %v1455_v48  ;;  %v1463_v10 = vld [vmem:[#allocation2 + $0x272] sm:$0xff] }
 0x112   :  { %v14612_v28 = vpack.c.bf16 %v1440_v26, %v1439_v8 }
 0x117   :  { %12646 = vmatmul.mubr.msk.bf16.gmra.mxu0 %vm31_vm1, %v14598_v19 }
 0x118   :  { %12712 = vmatmul.mubr.msk.bf16.gmra.mxu1 %vm31_vm1, %v14367_v12  ;;  %12649 = vmatprep.mubr.msk.bf16.mxu0 %vm31_vm1, %v14600_v22  ;;  %v1441_v12 = vld [vmem:[#allocation2 + $0x13a] sm:$0xff] }
 0x119   :  { %12715 = vmatprep.mubr.msk.bf16.mxu1 %vm31_vm1, %v14421_v53  ;;  %v1443_v53 = vld [vmem:[#allocation2 + $0x152] sm:$0xff]  ;;  %v14622_v32 = vpack.c.bf16 %v1442_v29, %v1441_v12 }
 0x11a   :  { %v14624_v33 = vpack.c.bf16 %v1444_v30, %v1443_v53  ;;  %v1457_v53 = vld [vmem:[#allocation2 + $0x22a] sm:$0xff]  ;;  %v1458_v30 = vld [vmem:[#allocation2 + $0x232] sm:$0xff] }
 0x11f   :  { %12650 = vmatmul.mubr.msk.bf16.gmra.mxu0 %vm31_vm1, %v14610_v27 }
 0x120   :  { %12716 = vmatmul.mubr.msk.bf16.gmra.mxu1 %vm31_vm1, %v14423_v55  ;;  %12653 = vmatprep.mubr.msk.bf16.mxu0 %vm31_vm1, %v14612_v28  ;;  %v1445_v55 = vld [vmem:[#allocation2 + $0x16a] sm:$0xff] }
 0x121   :  { %12719 = vmatprep.mubr.msk.bf16.mxu1 %vm31_vm1, %v14431_v3  ;;  %v1995_v3 = vld [vmem:[#allocation2 + $0x180] sm:$0xff]  ;;  %v14634_v47 = vpack.c.bf16 %v1446_v40, %v1445_v55 }
 0x122   :  { %v2044_v17 = vpack.c.bf16 %v1996_v43, %v1995_v3  ;;  %v1460_v3 = vld [vmem:[#allocation2 + $0x24a] sm:$0xff] }
 0x127   :  { %12654 = vmatmul.mubr.msk.bf16.gmra.mxu0 %vm31_vm1, %v14622_v32 }
 0x128   :  { %12720 = vmatmul.mubr.msk.bf16.gmra.mxu1 %vm31_vm1, %v14433_v5  ;;  %12657 = vmatprep.mubr.msk.bf16.mxu0 %vm31_vm1, %v14624_v33  ;;  %v1449_v5 = vld [vmem:[#allocation2 + $0x1ca] sm:$0xff] }
 0x129   :  { %12723 = vmatprep.mubr.msk.bf16.mxu1 %vm31_vm1, %v14444_v21  ;;  %v1451_v21 = vld [vmem:[#allocation2 + $0x1e2] sm:$0xff]  ;;  %v14642_v58 = vpack.c.bf16 %v1450_v52, %v1449_v5  ;;  %v14680_v5 = vpack.c.bf16 %v1460_v3, %v1459_v42  ;;  %v1465_v3 = vld [vmem:[#allocation2 + $0x28a] sm:$0xff] }
 0x12a   :  { %v14644_v23 = vpack.c.bf16 %v1452_v56, %v1451_v21 }
 0x12f   :  { %12658 = vmatmul.mubr.msk.bf16.gmra.mxu0 %vm31_vm1, %v14634_v47 }
 0x130   :  { %12724 = vmatmul.mubr.msk.bf16.gmra.mxu1 %vm31_vm1, %v2044_v17  ;;  %12661 = vmatprep.mubr.msk.bf16.mxu0 %vm31_vm1, %v1495_v39  ;;  %v14678_v39 = vpack.c.bf16 %v1458_v30, %v1457_v53 }
 0x131   :  { %12727 = vmatprep.mubr.msk.bf16.mxu1 %vm31_vm1, %v14453_v34 }
 0x137   :  { %v12499_v36 = vpop.f32.mrf.mxu0  ;;  %12662 = vmatmul.mubr.msk.bf16.gmra.mxu0 %vm31_vm1, %v14642_v58 }
 0x138   :  { %v12565_v0 = vpop.f32.mrf.mxu1  ;;  %12728 = vmatmul.mubr.msk.bf16.gmra.mxu1 %vm31_vm1, %v14455_v37  ;;  %12665 = vmatprep.mubr.msk.bf16.mxu0 %vm31_vm1, %v14644_v23 }
 0x139   :  { %v14652_v34 = vadd.f32 %v12565_v0, %v12499_v36  ;;  %v772_v9 = vpop.f32.mrf.mxu0  ;;  %12731 = vmatprep.mubr.msk.bf16.mxu1 %vm31_vm1, %v14463_v51 }
 0x13a   :  { %v1160_v50 = vpop.f32.mrf.mxu1 }
 0x13b   :  { %v14656_v16 = vadd.f32 %v1160_v50, %v772_v9  ;;  %v12500_v60 = vpop.f32.mrf.mxu0  ;;  %v1464_v50 = vld [vmem:[#allocation2 + $0x27a] sm:$0xff] }
 0x13c   :  { %v12566_v37 = vpop.f32.mrf.mxu1 }
 0x13d   :  { %v14662_v25 = vadd.f32 %v12566_v37, %v12500_v60  ;;  %v775_v8 = vpop.f32.mrf.mxu0 }
 0x13e   :  { %v1163_v26 = vpop.f32.mrf.mxu1 }
 0x13f   :  { %v14664_v12 = vadd.f32 %v1163_v26, %v775_v8  ;;  %v12503_v29 = vpop.f32.mrf.mxu0  ;;  %12666 = vmatmul.mubr.msk.bf16.gmra.mxu0 %vm31_vm1, %v14658_v18  ;;  %v14698_v26 = vpack.c.bf16 %v1462_v38, %v1461_v1 }
 0x140   :  { %v12569_v51 = vpop.f32.mrf.mxu1  ;;  %12732 = vmatmul.mubr.msk.bf16.gmra.mxu1 %vm31_vm1, %v14465_v54  ;;  %12669 = vmatprep.mubr.msk.bf16.mxu0 %vm31_vm1, %v14660_v62 }
 0x141   :  { %v14672_v55 = vadd.f32 %v12569_v51, %v12503_v29  ;;  %v788_v40 = vpop.f32.mrf.mxu0  ;;  %12735 = vmatprep.mubr.msk.bf16.mxu1 %vm31_vm1, %v14473_v4  ;;  %v14700_v29 = vpack.c.bf16 %v1464_v50, %v1463_v10 }
 0x142   :  { %v1176_v43 = vpop.f32.mrf.mxu1 }
 0x143   :  { %v14676_v45 = vadd.f32 %v1176_v43, %v788_v40  ;;  %v12504_v17 = vpop.f32.mrf.mxu0  ;;  %v1466_v43 = vld [vmem:[#allocation2 + $0x292] sm:$0xff] }
 0x144   :  { %v12570_v54 = vpop.f32.mrf.mxu1  ;;  %v14718_v38 = vpack.c.bf16 %v1466_v43, %v1465_v3  ;;  %v1471_v3 = vld [vmem:[#allocation2 + $0x2d2] sm:$0xff]  ;;  %v1472_v43 = vld [vmem:[#allocation2 + $0x2da] sm:$0xff] }
 0x145   :  { %v14682_v52 = vadd.f32 %v12570_v54, %v12504_v17  ;;  %v791_v21 = vpop.f32.mrf.mxu0 }
 0x146   :  { %v1179_v56 = vpop.f32.mrf.mxu1 }
 0x147   :  { %v14684_v36 = vadd.f32 %v1179_v56, %v791_v21  ;;  %v12507_v0 = vpop.f32.mrf.mxu0  ;;  %12670 = vmatmul.mubr.msk.bf16.gmra.mxu0 %vm31_vm1, %v14678_v39  ;;  %v1467_v21 = vld [vmem:[#allocation2 + $0x2a2] sm:$0xff]  ;;  %v1468_v56 = vld [vmem:[#allocation2 + $0x2aa] sm:$0xff] }
 0x148   :  { %v12573_v4 = vpop.f32.mrf.mxu1  ;;  %12736 = vmatmul.mubr.msk.bf16.gmra.mxu1 %vm31_vm1, %v14475_v7  ;;  %12673 = vmatprep.mubr.msk.bf16.mxu0 %vm31_vm1, %v14680_v5 }
 0x149   :  { %v14692_v9 = vadd.f32 %v12573_v4, %v12507_v0  ;;  %v804_v48 = vpop.f32.mrf.mxu0  ;;  %12739 = vmatprep.mubr.msk.bf16.mxu1 %vm31_vm1, %v14483_v20 }
 0x14a   :  { %v1192_v60 = vpop.f32.mrf.mxu1 }
 0x14b   :  { %v14696_v37 = vadd.f32 %v1192_v60, %v804_v48  ;;  %v12508_v8 = vpop.f32.mrf.mxu0  ;;  %v14720_v48 = vpack.c.bf16 %v1468_v56, %v1467_v21 }
 0x14c   :  { %v12574_v7 = vpop.f32.mrf.mxu1 }
 0x14d   :  { %v14702_v51 = vadd.f32 %v12574_v7, %v12508_v8  ;;  %v807_v53 = vpop.f32.mrf.mxu0 }
 0x14e   :  { %v1195_v30 = vpop.f32.mrf.mxu1 }
 0x14f   :  { %v14704_v40 = vadd.f32 %v1195_v30, %v807_v53  ;;  %v12511_v42 = vpop.f32.mrf.mxu0  ;;  %12674 = vmatmul.mubr.msk.bf16.gmra.mxu0 %vm31_vm1, %v14698_v26  ;;  %v1469_v53 = vld [vmem:[#allocation2 + $0x2ba] sm:$0xff]  ;;  %v1470_v30 = vld [vmem:[#allocation2 + $0x2c2] sm:$0xff] }
 0x150   :  { %v12577_v20 = vpop.f32.mrf.mxu1  ;;  %12740 = vmatmul.mubr.msk.bf16.gmra.mxu1 %vm31_vm1, %v14485_v24  ;;  %12677 = vmatprep.mubr.msk.bf16.mxu0 %vm31_vm1, %v14700_v29 }
 0x151   :  { %v14712_v17 = vadd.f32 %v12577_v20, %v12511_v42  ;;  %v820_v54 = vpop.f32.mrf.mxu0  ;;  %12743 = vmatprep.mubr.msk.bf16.mxu1 %vm31_vm1, %v14493_v35 }
 0x152   :  { %v1208_v0 = vpop.f32.mrf.mxu1 }
 0x153   :  { %v14716_v4 = vadd.f32 %v1208_v0, %v820_v54  ;;  %v12512_v1 = vpop.f32.mrf.mxu0  ;;  %v14738_v0 = vpack.c.bf16 %v1470_v30, %v1469_v53  ;;  %v1473_v53 = vld [vmem:[#allocation2 + $0x2ea] sm:$0xff]  ;;  %v1474_v30 = vld [vmem:[#allocation2 + $0x2f2] sm:$0xff] }
 0x154   :  { %v12578_v24 = vpop.f32.mrf.mxu1 }
 0x155   :  { %v14722_v10 = vadd.f32 %v12578_v24, %v12512_v1  ;;  %v823_v50 = vpop.f32.mrf.mxu0  ;;  %v14740_v1 = vpack.c.bf16 %v1472_v43, %v1471_v3  ;;  %v1475_v43 = vld [vmem:[#allocation2 + $0x302] sm:$0xff] }
 0x156   :  { %v1211_v60 = vpop.f32.mrf.mxu1 }
 0x157   :  { %v14724_v8 = vadd.f32 %v1211_v60, %v823_v50  ;;  %v12515_v7 = vpop.f32.mrf.mxu0  ;;  %12678 = vmatmul.mubr.msk.bf16.gmra.mxu0 %vm31_vm1, %v14718_v38  ;;  %18255 = vst [vmem:[#allocation5_spill] sm:$0xff] %v14740_v1 }
 0x158   :  { %v12581_v35 = vpop.f32.mrf.mxu1  ;;  %12744 = vmatmul.mubr.msk.bf16.gmra.mxu1 %vm31_vm1, %v14495_v41  ;;  %12681 = vmatprep.mubr.msk.bf16.mxu0 %vm31_vm1, %v14720_v48 }
 0x159   :  { %v14732_v42 = vadd.f32 %v12581_v35, %v12515_v7  ;;  %v836_v20 = vpop.f32.mrf.mxu0  ;;  %12747 = vmatprep.mubr.msk.bf16.mxu1 %vm31_vm1, %v14503_v57 }
 0x15a   :  { %v1224_v54 = vpop.f32.mrf.mxu1 }
 0x15b   :  { %v14736_v21 = vadd.f32 %v1224_v54, %v836_v20  ;;  %v12516_v56 = vpop.f32.mrf.mxu0  ;;  %v1476_v54 = vld [vmem:[#allocation2 + $0x30a] sm:$0xff] }
 0x15c   :  { %v12582_v41 = vpop.f32.mrf.mxu1 }
 0x15d   :  { %18254 = vst [vmem:[#allocation4_spill] sm:$0xff] %v14736_v21  ;;  %v14742_v24 = vadd.f32 %v12582_v41, %v12516_v56  ;;  %v839_v50 = vpop.f32.mrf.mxu0 }
 0x15e   :  { %v1227_v60 = vpop.f32.mrf.mxu1 }
 0x15f   :  { %18256 = vst [vmem:[#allocation6_spill] sm:$0xff] %v14742_v24  ;;  %v14744_v7 = vadd.f32 %v1227_v60, %v839_v50  ;;  %v12519_v35 = vpop.f32.mrf.mxu0  ;;  %12682 = vmatmul.mubr.msk.bf16.gmra.mxu0 %vm31_vm1, %v14738_v0  ;;  %v14758_v60 = vpack.c.bf16 %v1474_v30, %v1473_v53  ;;  %v1477_v53 = vld [vmem:[#allocation2 + $0x31a] sm:$0xff]  ;;  %v1478_v30 = vld [vmem:[#allocation2 + $0x322] sm:$0xff] }
 0x160   :  { %v12585_v57 = vpop.f32.mrf.mxu1  ;;  %12748 = vmatmul.mubr.msk.bf16.gmra.mxu1 %vm31_vm1, %v14505_v59  ;;  %12685 = vmatprep.mubr.msk.bf16.mxu0 %vm31_vm1, %v14740_v1 }
 0x161   :  { %18257 = vst [vmem:[#allocation7_spill] sm:$0xff] %v14744_v7  ;;  %v14752_v20 = vadd.f32 %v12585_v57, %v12519_v35  ;;  %v852_v3 = vpop.f32.mrf.mxu0  ;;  %12751 = vmatprep.mubr.msk.bf16.mxu1 %vm31_vm1, %v14513_v13  ;;  %18260 = vst [vmem:[#allocation10_spill] sm:$0xff] %v14758_v60  ;;  %v14760_v7 = vpack.c.bf16 %v1476_v54, %v1475_v43 }
 0x162   :  { %v1240_v56 = vpop.f32.mrf.mxu1 }
 0x163   :  { %18258 = vst [vmem:[#allocation8_spill] sm:$0xff] %v14752_v20  ;;  %v14756_v41 = vadd.f32 %v1240_v56, %v852_v3  ;;  %v12520_v50 = vpop.f32.mrf.mxu0  ;;  %18261 = vst [vmem:[#allocation11_spill] sm:$0xff] %v14760_v7  ;;  %v2027_v3 = vld [vmem:[#allocation2 + $0x330] sm:$0xff]  ;;  %v2515_v56 = vld [vmem:[#allocation2 + $0x19] sm:$0xff] }
 0x164   :  { %v12586_v59 = vpop.f32.mrf.mxu1 }
 0x165   :  { %18259 = vst [vmem:[#allocation9_spill] sm:$0xff] %v14756_v41  ;;  %v14762_v1 = vadd.f32 %v12586_v59, %v12520_v50  ;;  %v855_v24 = vpop.f32.mrf.mxu0  ;;  %v2516_v50 = vld [vmem:[#allocation2 + $0x21] sm:$0xff] }
 0x166   :  { %v1243_v35 = vpop.f32.mrf.mxu1  ;;  %v2579_v41 = vpack.c.bf16 %v2516_v50, %v2515_v56 }
 0x167   :  { %18262 = vst [vmem:[#allocation12_spill] sm:$0xff] %v14762_v1  ;;  %v14764_v57 = vadd.f32 %v1243_v35, %v855_v24  ;;  %v12523_v20 = vpop.f32.mrf.mxu0  ;;  %12686 = vmatmul.mubr.msk.bf16.gmra.mxu0 %vm31_vm1, %v14758_v60  ;;  %v2028_v24 = vld [vmem:[#allocation2 + $0x338] sm:$0xff] }
 0x168   :  { %v12589_v13 = vpop.f32.mrf.mxu1  ;;  %12752 = vmatmul.mubr.msk.bf16.gmra.mxu1 %vm31_vm1, %v14515_v15  ;;  %12689 = vmatprep.mubr.msk.bf16.mxu0 %vm31_vm1, %v14760_v7  ;;  %v14778_v15 = vpack.c.bf16 %v1478_v30, %v1477_v53  ;;  %v2060_v7 = vpack.c.bf16 %v2028_v24, %v2027_v3  ;;  %v2517_v53 = vld [vmem:[#allocation2 + $0x31] sm:$0xff]  ;;  %v2518_v30 = vld [vmem:[#allocation2 + $0x39] sm:$0xff] }
 0x169   :  { %18263 = vst [vmem:[#allocation13_spill] sm:$0xff] %v14764_v57  ;;  %v14772_v43 = vadd.f32 %v12589_v13, %v12523_v20  ;;  %v868_v54 = vpop.f32.mrf.mxu0  ;;  %12755 = vmatprep.mubr.msk.bf16.mxu1 %vm31_vm1, %v14528_v31  ;;  %v2520_v24 = vld [vmem:[#allocation2 + $0x51] sm:$0xff] }
 0x16a   :  { %v1256_v59 = vpop.f32.mrf.mxu1 }
 0x16b   :  { %18264 = vst [vmem:[#allocation14_spill] sm:$0xff] %v14772_v43  ;;  %v14776_v35 = vadd.f32 %v1256_v59, %v868_v54  ;;  %v12524_v57 = vpop.f32.mrf.mxu0  ;;  %v14794_v59 = vpack.c.bf16 %v2518_v30, %v2517_v53 }
 0x16c   :  { %v12590_v1 = vpop.f32.mrf.mxu1 }
 0x16d   :  { %v14780_v60 = vadd.f32 %v12590_v1, %v12524_v57  ;;  %v871_v20 = vpop.f32.mrf.mxu0  ;;  %v2519_v57 = vld [vmem:[#allocation2 + $0x49] sm:$0xff] }
 0x16e   :  { %v1259_v13 = vpop.f32.mrf.mxu1 }
 0x16f   :  { %v14782_v43 = vadd.f32 %v1259_v13, %v871_v20  ;;  %v12527_v21 = vpop.f32.mrf.mxu0  ;;  %12690 = vmatmul.mubr.msk.bf16.gmra.mxu0 %vm31_vm1, %v14778_v15  ;;  %v3811_v13 = vsel %vm734_vm0, %v14552_v49, 0  ;;  %v2521_v49 = vld [vmem:[#allocation2 + $0x61] sm:$0xff] }
 0x170   :  { %v12593_v31 = vpop.f32.mrf.mxu1  ;;  %12756 = vmatmul.mubr.msk.bf16.gmra.mxu1 %vm31_vm1, %v2060_v7  ;;  %12761 = vmatprep.mubr.msk.bf16.mxu0 %vm31_vm1, %v2579_v41  ;;  %v11248_v7 = vld [vmem:[%s18222_s1 + $0x1c] sm:$0xf] }
 0x171   :  { %v14788_v54 = vadd.f32 %v12593_v31, %v12527_v21  ;;  %v884_v3 = vpop.f32.mrf.mxu0  ;;  %12827 = vmatprep.mubr.msk.bf16.mxu1 %vm31_vm1, %v14536_v44  ;;  %v14803_v44 = vpack.c.bf16 %v2520_v24, %v2519_v57  ;;  %13690 = vmatprep.subr.msk.bf16.mxu1 %vm734_vm0, %v11248_v7  ;;  %v4361_v30 = vsel %vm734_vm0, %v11248_v7, 0  ;;  %v2522_v57 = vld [vmem:[#allocation2 + $0x69] sm:$0xff]  ;;  %v2523_v7 = vld [vmem:[#allocation2 + $0x79] sm:$0xff] }
 0x172   :  { %v1272_v1 = vpop.f32.mrf.mxu1 }
 0x173   :  { %v14792_v56 = vadd.f32 %v1272_v1, %v884_v3  ;;  %v12528_v50 = vpop.f32.mrf.mxu0  ;;  %18267 = vst [vmem:[#allocation17_spill] sm:$0xff] %v14803_v44  ;;  %v14814_v1 = vld [vmem:[%s18222_s1 + $0x20] sm:$0xf] }
 0x174   :  { %v12594_v20 = vpop.f32.mrf.mxu1 }
 0x175   :  { %18265 = vst [vmem:[#allocation15_spill] sm:$0xff] %v14792_v56  ;;  %v14799_v41 = vadd.f32 %v12594_v20, %v12528_v50  ;;  %v887_v21 = vpop.f32.mrf.mxu0 }
 0x176   :  { %v1275_v31 = vpop.f32.mrf.mxu1 }
 0x177   :  { %18266 = vst [vmem:[#allocation16_spill] sm:$0xff] %v14799_v41  ;;  %v14806_v3 = vadd.f32 %v1275_v31, %v887_v21  ;;  %v12531_v53 = vpop.f32.mrf.mxu0  ;;  %12762 = vmatmul.mubr.msk.bf16.vlgmr.msra.gmra.mxu0 %vm31_vm1, %v14794_v59  ;;  %v2524_v21 = vld [vmem:[#allocation2 + $0x81] sm:$0xff] }
 0x178   :  { %v12597_v50 = vpop.f32.mrf.mxu1  ;;  %12892 = vmatpush3.bf16.msra.mxu0 %v3811_v13  ;;  %12828 = vmatmul.mubr.msk.bf16.vlgmr.msra.gmra.mxu1 %vm31_vm1, %v14540_v46 }
 0x179   :  { %18268 = vst [vmem:[#allocation18_spill] sm:$0xff] %v14806_v3  ;;  %v14818_v24 = vadd.f32 %v12597_v50, %v12531_v53  ;;  %v900_v20 = vpop.f32.mrf.mxu0  ;;  %12765 = vmatprep.mubr.msk.bf16.mxu0 %vm31_vm1, %v14803_v44  ;;  %12831 = vmatprep.mubr.msk.bf16.mxu1 %vm31_vm1, %v14562_v61  ;;  %v14828_v3 = vpack.c.bf16 %v2522_v57, %v2521_v49  ;;  %v2525_v49 = vld [vmem:[#allocation2 + $0x91] sm:$0xff]  ;;  %v2526_v57 = vld [vmem:[#allocation2 + $0x99] sm:$0xff] }
 0x17a   :  { %v1288_v31 = vpop.f32.mrf.mxu1  ;;  %12958 = vmatpush3.bf16.msra.mxu1 %v4361_v30  ;;  %13691 = vmatprep.subr.msk.bf16.mxu0 %vm734_vm0, %v14814_v1  ;;  %v14830_v50 = vpack.c.bf16 %v2524_v21, %v2523_v7 }
 0x17b   :  { %18269 = vst [vmem:[#allocation19_spill] sm:$0xff] %v14818_v24  ;;  %v14826_v13 = vadd.f32 %v1288_v31, %v900_v20  ;;  %v12532_v46 = vpop.f32.mrf.mxu0 }
 0x17c   :  { %v12598_v53 = vpop.f32.mrf.mxu1  ;;  %18270 = vst [vmem:[#allocation20_spill] sm:$0xff] %v14830_v50 }
 0x17d   :  { %v14832_v24 = vadd.f32 %v12598_v53, %v12532_v46  ;;  %v903_v44 = vpop.f32.mrf.mxu0  ;;  %v14848_v53 = vpack.c.bf16 %v2526_v57, %v2525_v49  ;;  %v2529_v49 = vld [vmem:[#allocation2 + $0xc1] sm:$0xff]  ;;  %v2530_v57 = vld [vmem:[#allocation2 + $0xc9] sm:$0xff] }
 0x17e   :  { %v1291_v41 = vpop.f32.mrf.mxu1 }
 0x17f   :  { %18271 = vst [vmem:[#allocation21_spill] sm:$0xff] %v14832_v24  ;;  %v14834_v61 = vadd.f32 %v1291_v41, %v903_v44  ;;  %v12535_v56 = vpop.f32.mrf.mxu0  ;;  %12766 = vmatmul.mubr.msk.bf16.gmra.mxu0 %vm31_vm1, %v14828_v3  ;;  %v2527_v41 = vld [vmem:[#allocation2 + $0xa9] sm:$0xff]  ;;  %v2528_v44 = vld [vmem:[#allocation2 + $0xb1] sm:$0xff] }
 0x180   :  { %v12601_v30 = vpop.f32.mrf.mxu1  ;;  %12832 = vmatmul.mubr.msk.bf16.gmra.mxu1 %vm31_vm1, %v14564_v63  ;;  %12769 = vmatprep.mubr.msk.bf16.mxu0 %vm31_vm1, %v14830_v50 }
 0x181   :  { %18272 = vst [vmem:[#allocation22_spill] sm:$0xff] %v14834_v61  ;;  %v14842_v20 = vadd.f32 %v12601_v30, %v12535_v56  ;;  %v916_v7 = vpop.f32.mrf.mxu0  ;;  %12835 = vmatprep.mubr.msk.bf16.mxu1 %vm31_vm1, %v14574_v2  ;;  %v14850_v61 = vpack.c.bf16 %v2528_v44, %v2527_v41  ;;  %v2532_v44 = vld [vmem:[#allocation2 + $0xe1] sm:$0xff] }
 0x182   :  { %v1304_v21 = vpop.f32.mrf.mxu1 }
 0x183   :  { %18273 = vst [vmem:[#allocation23_spill] sm:$0xff] %v14842_v20  ;;  %v14846_v31 = vadd.f32 %v1304_v21, %v916_v7  ;;  %v12536_v46 = vpop.f32.mrf.mxu0  ;;  %18274 = vst [vmem:[#allocation24_spill] sm:$0xff] %v14850_v61 }
 0x184   :  { %v12602_v63 = vpop.f32.mrf.mxu1 }
 0x185   :  { %v14852_v50 = vadd.f32 %v12602_v63, %v12536_v46  ;;  %v919_v24 = vpop.f32.mrf.mxu0 }
 0x186   :  { %v1307_v56 = vpop.f32.mrf.mxu1 }
 0x187   :  { %18275 = vst [vmem:[#allocation25_spill] sm:$0xff] %v14852_v50  ;;  %v14854_v30 = vadd.f32 %v1307_v56, %v919_v24  ;;  %v12539_v20 = vpop.f32.mrf.mxu0  ;;  %12770 = vmatmul.mubr.msk.bf16.gmra.mxu0 %vm31_vm1, %v14848_v53  ;;  %v2531_v24 = vld [vmem:[#allocation2 + $0xd9] sm:$0xff]  ;;  %v14868_v56 = vpack.c.bf16 %v2530_v57, %v2529_v49  ;;  %v2533_v49 = vld [vmem:[#allocation2 + $0xf1] sm:$0xff] }
 0x188   :  { %v12605_v2 = vpop.f32.mrf.mxu1  ;;  %12836 = vmatmul.mubr.msk.bf16.gmra.mxu1 %vm31_vm1, %v14576_v6  ;;  %12773 = vmatprep.mubr.msk.bf16.mxu0 %vm31_vm1, %v14850_v61  ;;  %v2534_v57 = vld [vmem:[#allocation2 + $0xf9] sm:$0xff] }
 0x189   :  { %18276 = vst [vmem:[#allocation26_spill] sm:$0xff] %v14854_v30  ;;  %v14862_v7 = vadd.f32 %v12605_v2, %v12539_v20  ;;  %v932_v41 = vpop.f32.mrf.mxu0  ;;  %12839 = vmatprep.mubr.msk.bf16.mxu1 %vm31_vm1, %v14586_v11  ;;  %v14870_v30 = vpack.c.bf16 %v2532_v44, %v2531_v24  ;;  %v2536_v44 = vld [vmem:[#allocation2 + $0x111] sm:$0xff] }
 0x18a   :  { %v1320_v21 = vpop.f32.mrf.mxu1 }
 0x18b   :  { %18277 = vst [vmem:[#allocation27_spill] sm:$0xff] %v14862_v7  ;;  %v14866_v46 = vadd.f32 %v1320_v21, %v932_v41  ;;  %v12540_v63 = vpop.f32.mrf.mxu0  ;;  %18278 = vst [vmem:[#allocation28_spill] sm:$0xff] %v14870_v30 }
 0x18c   :  { %v12606_v6 = vpop.f32.mrf.mxu1 }
 0x18d   :  { %v14872_v61 = vadd.f32 %v12606_v6, %v12540_v63  ;;  %v935_v50 = vpop.f32.mrf.mxu0 }
 0x18e   :  { %v1323_v20 = vpop.f32.mrf.mxu1 }
 0x18f   :  { %18279 = vst [vmem:[#allocation29_spill] sm:$0xff] %v14872_v61  ;;  %v14874_v2 = vadd.f32 %v1323_v20, %v935_v50  ;;  %v12543_v7 = vpop.f32.mrf.mxu0  ;;  %12774 = vmatmul.mubr.msk.bf16.gmra.mxu0 %vm31_vm1, %v14868_v56  ;;  %v2535_v50 = vld [vmem:[#allocation2 + $0x109] sm:$0xff]  ;;  %v14888_v20 = vpack.c.bf16 %v2534_v57, %v2533_v49  ;;  %v2537_v49 = vld [vmem:[#allocation2 + $0x121] sm:$0xff] }
 0x190   :  { %v12609_v11 = vpop.f32.mrf.mxu1  ;;  %12840 = vmatmul.mubr.msk.bf16.gmra.mxu1 %vm31_vm1, %v14588_v14  ;;  %12777 = vmatprep.mubr.msk.bf16.mxu0 %vm31_vm1, %v14870_v30  ;;  %v2538_v57 = vld [vmem:[#allocation2 + $0x129] sm:$0xff] }
 0x191   :  { %18280 = vst [vmem:[#allocation30_spill] sm:$0xff] %v14874_v2  ;;  %v14882_v41 = vadd.f32 %v12609_v11, %v12543_v7  ;;  %v948_v24 = vpop.f32.mrf.mxu0  ;;  %12843 = vmatprep.mubr.msk.bf16.mxu1 %vm31_vm1, %v14598_v19  ;;  %v14890_v2 = vpack.c.bf16 %v2536_v44, %v2535_v50  ;;  %v2540_v44 = vld [vmem:[#allocation2 + $0x141] sm:$0xff] }
 0x192   :  { %v1336_v21 = vpop.f32.mrf.mxu1 }
 0x193   :  { %18281 = vst [vmem:[#allocation31_spill] sm:$0xff] %v14882_v41  ;;  %v14886_v63 = vadd.f32 %v1336_v21, %v948_v24  ;;  %v12544_v6 = vpop.f32.mrf.mxu0  ;;  %18282 = vst [vmem:[#allocation32_spill] sm:$0xff] %v14890_v2 }
 0x194   :  { %v12610_v14 = vpop.f32.mrf.mxu1 }
 0x195   :  { %v14892_v30 = vadd.f32 %v12610_v14, %v12544_v6  ;;  %v951_v61 = vpop.f32.mrf.mxu0 }
 0x196   :  { %v1339_v7 = vpop.f32.mrf.mxu1 }
 0x197   :  { %18283 = vst [vmem:[#allocation33_spill] sm:$0xff] %v14892_v30  ;;  %v14894_v11 = vadd.f32 %v1339_v7, %v951_v61  ;;  %v12547_v41 = vpop.f32.mrf.mxu0  ;;  %12778 = vmatmul.mubr.msk.bf16.gmra.mxu0 %vm31_vm1, %v14888_v20  ;;  %v2539_v61 = vld [vmem:[#allocation2 + $0x139] sm:$0xff]  ;;  %v14908_v7 = vpack.c.bf16 %v2538_v57, %v2537_v49  ;;  %v2541_v49 = vld [vmem:[#allocation2 + $0x151] sm:$0xff] }
 0x198   :  { %v12613_v19 = vpop.f32.mrf.mxu1  ;;  %12844 = vmatmul.mubr.msk.bf16.gmra.mxu1 %vm31_vm1, %v14600_v22  ;;  %12781 = vmatprep.mubr.msk.bf16.mxu0 %vm31_vm1, %v14890_v2  ;;  %v2542_v57 = vld [vmem:[#allocation2 + $0x159] sm:$0xff] }
 0x199   :  { %18284 = vst [vmem:[#allocation34_spill] sm:$0xff] %v14894_v11  ;;  %v14902_v24 = vadd.f32 %v12613_v19, %v12547_v41  ;;  %v964_v50 = vpop.f32.mrf.mxu0  ;;  %12847 = vmatprep.mubr.msk.bf16.mxu1 %vm31_vm1, %v14610_v27  ;;  %v14910_v11 = vpack.c.bf16 %v2540_v44, %v2539_v61  ;;  %v2544_v44 = vld [vmem:[#allocation2 + $0x171] sm:$0xff] }
 0x19a   :  { %v1352_v21 = vpop.f32.mrf.mxu1 }
 0x19b   :  { %18285 = vst [vmem:[#allocation35_spill] sm:$0xff] %v14902_v24  ;;  %v14906_v6 = vadd.f32 %v1352_v21, %v964_v50  ;;  %v12548_v14 = vpop.f32.mrf.mxu0  ;;  %18287 = vst [vmem:[#allocation37_spill] sm:$0xff] %v14910_v11 }
 0x19c   :  { %v12614_v22 = vpop.f32.mrf.mxu1 }
 0x19d   :  { %18286 = vst [vmem:[#allocation36_spill] sm:$0xff] %v14906_v6  ;;  %v14912_v2 = vadd.f32 %v12614_v22, %v12548_v14  ;;  %v967_v30 = vpop.f32.mrf.mxu0 }
 0x19e   :  { %v1355_v41 = vpop.f32.mrf.mxu1 }
 0x19f   :  { %18288 = vst [vmem:[#allocation38_spill] sm:$0xff] %v14912_v2  ;;  %v14914_v19 = vadd.f32 %v1355_v41, %v967_v30  ;;  %v12551_v24 = vpop.f32.mrf.mxu0  ;;  %12782 = vmatmul.mubr.msk.bf16.gmra.mxu0 %vm31_vm1, %v14908_v7  ;;  %v2543_v30 = vld [vmem:[#allocation2 + $0x169] sm:$0xff]  ;;  %v2592_v41 = vpack.c.bf16 %v2542_v57, %v2541_v49  ;;  %v2545_v49 = vld [vmem:[#allocation2 + $0x181] sm:$0xff] }
 0x1a0   :  { %v12617_v27 = vpop.f32.mrf.mxu1  ;;  %12848 = vmatmul.mubr.msk.bf16.gmra.mxu1 %vm31_vm1, %v14612_v28  ;;  %12785 = vmatprep.mubr.msk.bf16.mxu0 %vm31_vm1, %v14910_v11  ;;  %v14928_v28 = vpack.c.bf16 %v2544_v44, %v2543_v30  ;;  %v2546_v57 = vld [vmem:[#allocation2 + $0x189] sm:$0xff]  ;;  %v2548_v44 = vld [vmem:[#allocation2 + $0x1d1] sm:$0xff] }
 0x1a1   :  { %18289 = vst [vmem:[#allocation39_spill] sm:$0xff] %v14914_v19  ;;  %v14922_v50 = vadd.f32 %v12617_v27, %v12551_v24  ;;  %v980_v61 = vpop.f32.mrf.mxu0  ;;  %12851 = vmatprep.mubr.msk.bf16.mxu1 %vm31_vm1, %v14622_v32 }
 0x1a2   :  { %v1368_v21 = vpop.f32.mrf.mxu1  ;;  %18292 = vst [vmem:[#allocation42_spill] sm:$0xff] %v14928_v28 }
 0x1a3   :  { %18290 = vst [vmem:[#allocation40_spill] sm:$0xff] %v14922_v50  ;;  %v14926_v14 = vadd.f32 %v1368_v21, %v980_v61  ;;  %v12552_v22 = vpop.f32.mrf.mxu0  ;;  %v3095_v61 = vld [vmem:[#allocation2 + $0x182] sm:$0xff] }
 0x1a4   :  { %v12618_v19 = vpop.f32.mrf.mxu1 }
 0x1a5   :  { %18291 = vst [vmem:[#allocation41_spill] sm:$0xff] %v14926_v14  ;;  %v14930_v2 = vadd.f32 %v12618_v19, %v12552_v22  ;;  %v983_v11 = vpop.f32.mrf.mxu0 }
 0x1a6   :  { %v1371_v6 = vpop.f32.mrf.mxu1 }
 0x1a7   :  { %18293 = vst [vmem:[#allocation43_spill] sm:$0xff] %v14930_v2  ;;  %v14932_v24 = vadd.f32 %v1371_v6, %v983_v11  ;;  %v12555_v27 = vpop.f32.mrf.mxu0  ;;  %12786 = vmatmul.mubr.msk.bf16.gmra.mxu0 %vm31_vm1, %v2592_v41  ;;  %v3096_v11 = vld [vmem:[#allocation2 + $0x18a] sm:$0xff] }
 0x1a8   :  { %v12621_v32 = vpop.f32.mrf.mxu1  ;;  %12852 = vmatmul.mubr.msk.bf16.gmra.mxu1 %vm31_vm1, %v14624_v33  ;;  %12789 = vmatprep.mubr.msk.bf16.mxu0 %vm31_vm1, %v14928_v28  ;;  %v2547_v6 = vld [vmem:[#allocation2 + $0x1c9] sm:$0xff]  ;;  %v2594_v33 = vpack.c.bf16 %v2546_v57, %v2545_v49  ;;  %v3144_v2 = vpack.c.bf16 %v3096_v11, %v3095_v61  ;;  %v2552_v61 = vld [vmem:[#allocation2 + $0x201] sm:$0xff] }
 0x1a9   :  { %18294 = vst [vmem:[#allocation44_spill] sm:$0xff] %v14932_v24  ;;  %v14939_v30 = vadd.f32 %v12621_v32, %v12555_v27  ;;  %v996_v19 = vpop.f32.mrf.mxu0  ;;  %12855 = vmatprep.mubr.msk.bf16.mxu1 %vm31_vm1, %v14634_v47  ;;  %v2595_v28 = vpack.c.bf16 %v2548_v44, %v2547_v6 }
 0x1aa   :  { %v1384_v21 = vpop.f32.mrf.mxu1 }
 0x1ab   :  { %18295 = vst [vmem:[#allocation45_spill] sm:$0xff] %v14939_v30  ;;  %v14943_v22 = vadd.f32 %v1384_v21, %v996_v19  ;;  %v12556_v41 = vpop.f32.mrf.mxu0  ;;  %v2549_v19 = vld [vmem:[#allocation2 + $0x1e1] sm:$0xff]  ;;  %v2550_v21 = vld [vmem:[#allocation2 + $0x1e9] sm:$0xff] }
 0x1ac   :  { %v12622_v24 = vpop.f32.mrf.mxu1  ;;  %v2596_v44 = vpack.c.bf16 %v2550_v21, %v2549_v19  ;;  %v2553_v19 = vld [vmem:[#allocation2 + $0x211] sm:$0xff]  ;;  %v2554_v21 = vld [vmem:[#allocation2 + $0x219] sm:$0xff] }
 0x1ad   :  { %v14945_v14 = vadd.f32 %v12622_v24, %v12556_v41  ;;  %v999_v50 = vpop.f32.mrf.mxu0  ;;  %v2551_v24 = vld [vmem:[#allocation2 + $0x1f9] sm:$0xff] }
 0x1ae   :  { %v1387_v27 = vpop.f32.mrf.mxu1 }
 0x1af   :  { %v14947_v32 = vadd.f32 %v1387_v27, %v999_v50  ;;  %v12559_v30 = vpop.f32.mrf.mxu0  ;;  %12790 = vmatmul.mubr.msk.bf16.gmra.mxu0 %vm31_vm1, %v2594_v33  ;;  %v14958_v33 = vpack.c.bf16 %v2552_v61, %v2551_v24  ;;  %v2555_v24 = vld [vmem:[#allocation2 + $0x229] sm:$0xff]  ;;  %v2556_v61 = vld [vmem:[#allocation2 + $0x231] sm:$0xff] }
 0x1b0   :  { %v12625_v47 = vpop.f32.mrf.mxu1  ;;  %12856 = vmatmul.mubr.msk.bf16.gmra.mxu1 %vm31_vm1, %v3144_v2  ;;  %12793 = vmatprep.mubr.msk.bf16.mxu0 %vm31_vm1, %v2595_v28 }
 0x1b1   :  { %v14952_v49 = vadd.f32 %v12625_v47, %v12559_v30  ;;  %v1012_v57 = vpop.f32.mrf.mxu0  ;;  %12859 = vmatprep.mubr.msk.bf16.mxu1 %vm31_vm1, %v14642_v58  ;;  %18298 = vst [vmem:[#allocation48_spill] sm:$0xff] %v14958_v33 }
 0x1b2   :  { %v1400_v50 = vpop.f32.mrf.mxu1 }
 0x1b3   :  { %18296 = vst [vmem:[#allocation46_spill] sm:$0xff] %v14952_v49  ;;  %v14956_v11 = vadd.f32 %v1400_v50, %v1012_v57  ;;  %v12560_v6 = vpop.f32.mrf.mxu0 }
 0x1b4   :  { %v12626_v41 = vpop.f32.mrf.mxu1 }
 0x1b5   :  { %18297 = vst [vmem:[#allocation47_spill] sm:$0xff] %v14956_v11  ;;  %v14960_v2 = vadd.f32 %v12626_v41, %v12560_v6  ;;  %v1015_v28 = vpop.f32.mrf.mxu0  ;;  %v2598_v41 = vpack.c.bf16 %v2554_v21, %v2553_v19  ;;  %v2558_v19 = vld [vmem:[#allocation2 + $0x249] sm:$0xff]  ;;  %v2560_v21 = vld [vmem:[#allocation2 + $0x261] sm:$0xff] }
 0x1b6   :  { %v1403_v27 = vpop.f32.mrf.mxu1 }
 0x1b7   :  { %18299 = vst [vmem:[#allocation49_spill] sm:$0xff] %v14960_v2  ;;  %v14962_v30 = vadd.f32 %v1403_v27, %v1015_v28  ;;  %v12631_v47 = vpop.f32.mrf.mxu0  ;;  %12794 = vmatmul.mubr.msk.bf16.gmra.mxu0 %vm31_vm1, %v2596_v44 }
 0x1b8   :  { %v1903_v58 = vadd.f32 %v12631_v47, %v14652_v34  ;;  %v12697_v49 = vpop.f32.mrf.mxu1  ;;  %12860 = vmatmul.mubr.msk.bf16.gmra.mxu1 %vm31_vm1, %v14644_v23  ;;  %12797 = vmatprep.mubr.msk.bf16.mxu0 %vm31_vm1, %v14958_v33  ;;  %v14978_v47 = vpack.c.bf16 %v2556_v61, %v2555_v24 }
 0x1b9   :  { %18300 = vst [vmem:[#allocation50_spill] sm:$0xff] %v14962_v30  ;;  %v1646_v57 = vpop.f32.mrf.mxu0  ;;  %12863 = vmatprep.mubr.msk.bf16.mxu1 %vm31_vm1, %v14658_v18 }
 0x1ba   :  { %v1901_v50 = vadd.f32 %v1646_v57, %v14656_v16  ;;  %v14973_v6 = vadd.f32 %v12697_v49, %v1903_v58  ;;  %v2196_v34 = vpop.f32.mrf.mxu1 }
 0x1bb   :  { %v12632_v44 = vpop.f32.mrf.mxu0 }
 0x1bc   :  { %v1904_v23 = vadd.f32 %v12632_v44, %v14662_v25  ;;  %v14976_v28 = vadd.f32 %v2196_v34, %v1901_v50  ;;  %v12698_v27 = vpop.f32.mrf.mxu1  ;;  %v2557_v25 = vld [vmem:[#allocation2 + $0x241] sm:$0xff] }
 0x1bd   :  { %v1649_v33 = vpop.f32.mrf.mxu0 }
 0x1be   :  { %v1902_v30 = vadd.f32 %v1649_v33, %v14664_v12  ;;  %v14981_v18 = vadd.f32 %v12698_v27, %v1904_v23  ;;  %v2199_v2 = vpop.f32.mrf.mxu1  ;;  %v2559_v33 = vld [vmem:[#allocation2 + $0x259] sm:$0xff] }
 0x1bf   :  { %v12635_v11 = vpop.f32.mrf.mxu0  ;;  %12798 = vmatmul.mubr.msk.bf16.gmra.mxu0 %vm31_vm1, %v2598_v41  ;;  %v14999_v50 = vpack.c.bf16 %v2560_v21, %v2559_v33 }
 0x1c0   :  { %v1907_v16 = vadd.f32 %v12635_v11, %v14672_v55  ;;  %v14985_v49 = vadd.f32 %v2199_v2, %v1902_v30  ;;  %v12701_v58 = vpop.f32.mrf.mxu1  ;;  %12864 = vmatmul.mubr.msk.bf16.gmra.mxu1 %vm31_vm1, %v14660_v62  ;;  %12801 = vmatprep.mubr.msk.bf16.mxu0 %vm31_vm1, %v14978_v47  ;;  %v2600_v30 = vpack.c.bf16 %v2558_v19, %v2557_v25  ;;  %v2563_v25 = vld [vmem:[#allocation2 + $0x289] sm:$0xff]  ;;  %v2564_v19 = vld [vmem:[#allocation2 + $0x291] sm:$0xff] }
 0x1c1   :  { %v1662_v12 = vpop.f32.mrf.mxu0  ;;  %12867 = vmatprep.mubr.msk.bf16.mxu1 %vm31_vm1, %v14678_v39 }
 0x1c2   :  { %v1905_v57 = vadd.f32 %v1662_v12, %v14676_v45  ;;  %v14994_v55 = vadd.f32 %v12701_v58, %v1907_v16  ;;  %v2212_v11 = vpop.f32.mrf.mxu1  ;;  %v2562_v58 = vld [vmem:[#allocation2 + $0x279] sm:$0xff] }
 0x1c3   :  { %v12636_v2 = vpop.f32.mrf.mxu0 }
 0x1c4   :  { %v1908_v62 = vadd.f32 %v12636_v2, %v14682_v52  ;;  %v14997_v24 = vadd.f32 %v2212_v11, %v1905_v57  ;;  %v12702_v61 = vpop.f32.mrf.mxu1  ;;  %v2561_v52 = vld [vmem:[#allocation2 + $0x271] sm:$0xff] }
 0x1c5   :  { %v1665_v34 = vpop.f32.mrf.mxu0  ;;  %v2602_v57 = vpack.c.bf16 %v2562_v58, %v2561_v52  ;;  %v2568_v52 = vld [vmem:[#allocation2 + $0x2c1] sm:$0xff] }
 0x1c6   :  { %v1906_v44 = vadd.f32 %v1665_v34, %v14684_v36  ;;  %v15002_v39 = vadd.f32 %v12702_v61, %v1908_v62  ;;  %v2215_v41 = vpop.f32.mrf.mxu1 }
 0x1c7   :  { %v12639_v23 = vpop.f32.mrf.mxu0  ;;  %12802 = vmatmul.mubr.msk.bf16.gmra.mxu0 %vm31_vm1, %v2600_v30  ;;  %v15020_v30 = vpack.c.bf16 %v2564_v19, %v2563_v25 }
 0x1c8   :  { %v1911_v45 = vadd.f32 %v12639_v23, %v14692_v9  ;;  %v15006_v27 = vadd.f32 %v2215_v41, %v1906_v44  ;;  %v12705_v16 = vpop.f32.mrf.mxu1  ;;  %12868 = vmatmul.mubr.msk.bf16.gmra.mxu1 %vm31_vm1, %v14680_v5  ;;  %12805 = vmatprep.mubr.msk.bf16.mxu0 %vm31_vm1, %v14999_v50 }
 0x1c9   :  { %v1678_v36 = vpop.f32.mrf.mxu0  ;;  %12871 = vmatprep.mubr.msk.bf16.mxu1 %vm31_vm1, %v14698_v26 }
 0x1ca   :  { %v1909_v12 = vadd.f32 %v1678_v36, %v14696_v37  ;;  %v15015_v9 = vadd.f32 %v12705_v16, %v1911_v45  ;;  %v2228_v33 = vpop.f32.mrf.mxu1  ;;  %v2566_v45 = vld [vmem:[#allocation2 + $0x2a9] sm:$0xff]  ;;  %v2567_v16 = vld [vmem:[#allocation2 + $0x2b9] sm:$0xff] }
 0x1cb   :  { %v12640_v21 = vpop.f32.mrf.mxu0 }
 0x1cc   :  { %v1912_v5 = vadd.f32 %v12640_v21, %v14702_v51  ;;  %v15018_v11 = vadd.f32 %v2228_v33, %v1909_v12  ;;  %v12706_v2 = vpop.f32.mrf.mxu1  ;;  %v2565_v51 = vld [vmem:[#allocation2 + $0x2a1] sm:$0xff]  ;;  %v15041_v21 = vpack.c.bf16 %v2568_v52, %v2567_v16 }
 0x1cd   :  { %v1681_v62 = vpop.f32.mrf.mxu0  ;;  %v2604_v19 = vpack.c.bf16 %v2566_v45, %v2565_v51  ;;  %v18301_v51 = vld [vmem:[#allocation4_spill] sm:$0xff] }
 0x1ce   :  { %v1910_v61 = vadd.f32 %v1681_v62, %v14704_v40  ;;  %v15023_v26 = vadd.f32 %v12706_v2, %v1912_v5  ;;  %v2231_v34 = vpop.f32.mrf.mxu1 }
 0x1cf   :  { %v12643_v44 = vpop.f32.mrf.mxu0  ;;  %12806 = vmatmul.mubr.msk.bf16.gmra.mxu0 %vm31_vm1, %v2602_v57 }
 0x1d0   :  { %v1915_v37 = vadd.f32 %v12643_v44, %v14712_v17  ;;  %v15027_v41 = vadd.f32 %v2231_v34, %v1910_v61  ;;  %v12709_v23 = vpop.f32.mrf.mxu1  ;;  %12872 = vmatmul.mubr.msk.bf16.gmra.mxu1 %vm31_vm1, %v14700_v29  ;;  %12809 = vmatprep.mubr.msk.bf16.mxu0 %vm31_vm1, %v15020_v30  ;;  %v2570_v44 = vld [vmem:[#allocation2 + $0x2d9] sm:$0xff] }
 0x1d1   :  { %v1694_v40 = vpop.f32.mrf.mxu0  ;;  %12875 = vmatprep.mubr.msk.bf16.mxu1 %vm31_vm1, %v14718_v38 }
 0x1d2   :  { %v1913_v58 = vadd.f32 %v1694_v40, %v14716_v4  ;;  %v15036_v17 = vadd.f32 %v12709_v23, %v1915_v37  ;;  %v2244_v36 = vpop.f32.mrf.mxu1  ;;  %v2571_v37 = vld [vmem:[#allocation2 + $0x2e9] sm:$0xff]  ;;  %v2572_v23 = vld [vmem:[#allocation2 + $0x2f1] sm:$0xff] }
 0x1d3   :  { %v12644_v25 = vpop.f32.mrf.mxu0 }
 0x1d4   :  { %v1916_v29 = vadd.f32 %v12644_v25, %v14722_v10  ;;  %v15039_v12 = vadd.f32 %v2244_v36, %v1913_v58  ;;  %v12710_v33 = vpop.f32.mrf.mxu1  ;;  %v2569_v10 = vld [vmem:[#allocation2 + $0x2d1] sm:$0xff] }
 0x1d5   :  { %v1697_v57 = vpop.f32.mrf.mxu0  ;;  %v2606_v52 = vpack.c.bf16 %v2570_v44, %v2569_v10  ;;  %v18302_v58 = vld [vmem:[#allocation6_spill] sm:$0xff]  ;;  %v18309_v44 = vld [vmem:[#allocation5_spill] sm:$0xff] }
 0x1d6   :  { %v1914_v5 = vadd.f32 %v1697_v57, %v14724_v8  ;;  %v15044_v38 = vadd.f32 %v12710_v33, %v1916_v29  ;;  %v2247_v2 = vpop.f32.mrf.mxu1  ;;  %v18305_v33 = vld [vmem:[#allocation7_spill] sm:$0xff] }
 0x1d7   :  { %v12647_v62 = vpop.f32.mrf.mxu0  ;;  %12810 = vmatmul.mubr.msk.bf16.gmra.mxu0 %vm31_vm1, %v2604_v19  ;;  %v15062_v19 = vpack.c.bf16 %v2572_v23, %v2571_v37  ;;  %v2574_v37 = vld [vmem:[#allocation2 + $0x309] sm:$0xff] }
 0x1d8   :  { %v1919_v4 = vadd.f32 %v12647_v62, %v14732_v42  ;;  %v15048_v61 = vadd.f32 %v2247_v2, %v1914_v5  ;;  %v12713_v34 = vpop.f32.mrf.mxu1  ;;  %12876 = vmatmul.mubr.msk.bf16.gmra.mxu1 %vm31_vm1, %v14720_v48  ;;  %12813 = vmatprep.mubr.msk.bf16.mxu0 %vm31_vm1, %v15041_v21  ;;  %v18307_v62 = vld [vmem:[#allocation8_spill] sm:$0xff] }
 0x1d9   :  { %v1710_v8 = vpop.f32.mrf.mxu0  ;;  %12879 = vmatprep.mubr.msk.bf16.mxu1 %vm31_vm1, %v14738_v0  ;;  %18304 = vst [vmem:[#allocation6_spill] sm:$0xff] %v15062_v19 }
 0x1da   :  { %v1917_v45 = vadd.f32 %v1710_v8, %v18301_v51  ;;  %v15057_v42 = vadd.f32 %v12713_v34, %v1919_v4  ;;  %v2260_v40 = vpop.f32.mrf.mxu1  ;;  %v2573_v8 = vld [vmem:[#allocation2 + $0x301] sm:$0xff]  ;;  %v18310_v51 = vld [vmem:[#allocation10_spill] sm:$0xff] }
 0x1db   :  { %v12648_v16 = vpop.f32.mrf.mxu0 }
 0x1dc   :  { %v1920_v48 = vadd.f32 %v12648_v16, %v18302_v58  ;;  %v15060_v36 = vadd.f32 %v2260_v40, %v1917_v45  ;;  %v12714_v25 = vpop.f32.mrf.mxu1  ;;  %v2575_v45 = vld [vmem:[#allocation2 + $0x319] sm:$0xff]  ;;  %v2576_v40 = vld [vmem:[#allocation2 + $0x321] sm:$0xff] }
 0x1dd   :  { %v1713_v29 = vpop.f32.mrf.mxu0  ;;  %v18311_v16 = vld [vmem:[#allocation9_spill] sm:$0xff] }
 0x1de   :  { %18303 = vst [vmem:[#allocation4_spill] sm:$0xff] %v15060_v36  ;;  %v1918_v57 = vadd.f32 %v1713_v29, %v18305_v33  ;;  %v15065_v0 = vadd.f32 %v12714_v25, %v1920_v48  ;;  %v2263_v5 = vpop.f32.mrf.mxu1  ;;  %v2608_v29 = vpack.c.bf16 %v2574_v37, %v2573_v8  ;;  %v18312_v33 = vld [vmem:[#allocation12_spill] sm:$0xff]  ;;  %v18319_v37 = vld [vmem:[#allocation11_spill] sm:$0xff] }
 0x1df   :  { %v12651_v2 = vpop.f32.mrf.mxu0  ;;  %12814 = vmatmul.mubr.msk.bf16.gmra.mxu0 %vm31_vm1, %v2606_v52 }
 0x1e0   :  { %18306 = vst [vmem:[#allocation7_spill] sm:$0xff] %v15065_v0  ;;  %v1923_v4 = vadd.f32 %v12651_v2, %v18307_v62  ;;  %v15069_v34 = vadd.f32 %v2263_v5, %v1918_v57  ;;  %v12717_v10 = vpop.f32.mrf.mxu1  ;;  %12880 = vmatmul.mubr.msk.bf16.gmra.mxu1 %vm31_vm1, %v18309_v44  ;;  %12817 = vmatprep.mubr.msk.bf16.mxu0 %vm31_vm1, %v15062_v19  ;;  %v18315_v19 = vld [vmem:[#allocation13_spill] sm:$0xff] }
 0x1e1   :  { %v1726_v23 = vpop.f32.mrf.mxu0  ;;  %12883 = vmatprep.mubr.msk.bf16.mxu1 %vm31_vm1, %v18310_v51  ;;  %v15083_v62 = vpack.c.bf16 %v2576_v40, %v2575_v45  ;;  %v2577_v45 = vld [vmem:[#allocation2 + $0x331] sm:$0xff]  ;;  %v2578_v40 = vld [vmem:[#allocation2 + $0x339] sm:$0xff] }
 0x1e2   :  { %18308 = vst [vmem:[#allocation8_spill] sm:$0xff] %v15069_v34  ;;  %v1921_v52 = vadd.f32 %v1726_v23, %v18311_v16  ;;  %v15078_v58 = vadd.f32 %v12717_v10, %v1923_v4  ;;  %v2276_v48 = vpop.f32.mrf.mxu1  ;;  %v18317_v4 = vld [vmem:[#allocation14_spill] sm:$0xff] }
 0x1e3   :  { %v12652_v25 = vpop.f32.mrf.mxu0  ;;  %18314 = vst [vmem:[#allocation10_spill] sm:$0xff] %v15083_v62 }
 0x1e4   :  { %v1924_v57 = vadd.f32 %v12652_v25, %v18312_v33  ;;  %v15081_v5 = vadd.f32 %v2276_v48, %v1921_v52  ;;  %v12718_v2 = vpop.f32.mrf.mxu1  ;;  %v3128_v52 = vld [vmem:[#allocation2 + $0x33a] sm:$0xff]  ;;  %v3616_v48 = vld [vmem:[#allocation2 + $0x30] sm:$0xff]  ;;  %v2610_v33 = vpack.c.bf16 %v2578_v40, %v2577_v45 }
 0x1e5   :  { %v1729_v44 = vpop.f32.mrf.mxu0  ;;  %v3617_v25 = vld [vmem:[#allocation2 + $0x38] sm:$0xff]  ;;  %v3619_v45 = vld [vmem:[#allocation2 + $0x50] sm:$0xff] }
 0x1e6   :  { %18313 = vst [vmem:[#allocation5_spill] sm:$0xff] %v15081_v5  ;;  %v1922_v34 = vadd.f32 %v1729_v44, %v18315_v19  ;;  %v15086_v51 = vadd.f32 %v12718_v2, %v1924_v57  ;;  %v2279_v0 = vpop.f32.mrf.mxu1  ;;  %v3127_v19 = vld [vmem:[#allocation2 + $0x332] sm:$0xff] }
 0x1e7   :  { %v12655_v36 = vpop.f32.mrf.mxu0  ;;  %12818 = vmatmul.mubr.msk.bf16.gmra.mxu0 %vm31_vm1, %v2608_v29 }
 0x1e8   :  { %18316 = vst [vmem:[#allocation9_spill] sm:$0xff] %v15086_v51  ;;  %v1927_v10 = vadd.f32 %v12655_v36, %v18317_v4  ;;  %v15090_v23 = vadd.f32 %v2279_v0, %v1922_v34  ;;  %v12721_v8 = vpop.f32.mrf.mxu1  ;;  %12884 = vmatmul.mubr.msk.bf16.gmra.mxu1 %vm31_vm1, %v18319_v37  ;;  %12821 = vmatprep.mubr.msk.bf16.mxu0 %vm31_vm1, %v15083_v62 }
 0x1e9   :  { %v1742_v16 = vpop.f32.mrf.mxu0  ;;  %12887 = vmatprep.mubr.msk.bf16.mxu1 %vm31_vm1, %v14778_v15  ;;  %v3160_v4 = vpack.c.bf16 %v3128_v52, %v3127_v19  ;;  %v3680_v37 = vpack.c.bf16 %v3617_v25, %v3616_v48  ;;  %v3620_v52 = vld [vmem:[#allocation2 + $0x60] sm:$0xff] }
 0x1ea   :  { %18318 = vst [vmem:[#allocation12_spill] sm:$0xff] %v15090_v23  ;;  %v1925_v36 = vadd.f32 %v1742_v16, %v14776_v35  ;;  %v15099_v0 = vadd.f32 %v12721_v8, %v1927_v10  ;;  %v2292_v34 = vpop.f32.mrf.mxu1  ;;  %v18321_v48 = vld [vmem:[#allocation16_spill] sm:$0xff] }
 0x1eb   :  { %v12656_v29 = vpop.f32.mrf.mxu0 }
 0x1ec   :  { %v1928_v57 = vadd.f32 %v12656_v29, %v14780_v60  ;;  %v15102_v2 = vadd.f32 %v2292_v34, %v1925_v36  ;;  %v12722_v44 = vpop.f32.mrf.mxu1  ;;  %v3618_v60 = vld [vmem:[#allocation2 + $0x48] sm:$0xff] }
 0x1ed   :  { %v1745_v62 = vpop.f32.mrf.mxu0 }
 0x1ee   :  { %v1926_v15 = vadd.f32 %v1745_v62, %v14782_v43  ;;  %v15105_v23 = vadd.f32 %v12722_v44, %v1928_v57  ;;  %v2295_v51 = vpop.f32.mrf.mxu1  ;;  %v18320_v43 = vld [vmem:[#allocation15_spill] sm:$0xff] }
 0x1ef   :  { %v12659_v5 = vpop.f32.mrf.mxu0  ;;  %12822 = vmatmul.mubr.msk.bf16.gmra.mxu0 %vm31_vm1, %v2610_v33  ;;  %v4911_v33 = vsel %vm734_vm0, %v14814_v1, 0  ;;  %v3623_v1 = vld [vmem:[#allocation2 + $0x80] sm:$0xff] }
 0x1f0   :  { %v1931_v35 = vadd.f32 %v12659_v5, %v14788_v54  ;;  %v15109_v10 = vadd.f32 %v2295_v51, %v1926_v15  ;;  %v12725_v8 = vpop.f32.mrf.mxu1  ;;  %12888 = vmatmul.mubr.msk.bf16.gmra.mxu1 %vm31_vm1, %v3160_v4  ;;  %12893 = vmatprep.mubr.msk.bf16.mxu0 %vm31_vm1, %v3680_v37  ;;  %v3621_v54 = vld [vmem:[#allocation2 + $0x68] sm:$0xff]  ;;  %v3681_v51 = vpack.c.bf16 %v3619_v45, %v3618_v60 }
 0x1f1   :  { %v1758_v40 = vpop.f32.mrf.mxu0  ;;  %12959 = vmatprep.mubr.msk.bf16.mxu1 %vm31_vm1, %v14794_v59  ;;  %v3682_v57 = vpack.c.bf16 %v3621_v54, %v3620_v52  ;;  %v18322_v59 = vld [vmem:[#allocation18_spill] sm:$0xff]  ;;  %v3625_v52 = vld [vmem:[#allocation2 + $0x98] sm:$0xff] }
 0x1f2   :  { %v1929_v62 = vadd.f32 %v1758_v40, %v18320_v43  ;;  %v15116_v19 = vadd.f32 %v12725_v8, %v1931_v35  ;;  %v2308_v16 = vpop.f32.mrf.mxu1  ;;  %v18323_v35 = vld [vmem:[#allocation19_spill] sm:$0xff]  ;;  %v18324_v40 = vld [vmem:[#allocation17_spill] sm:$0xff] }
 0x1f3   :  { %v12660_v5 = vpop.f32.mrf.mxu0  ;;  %v3622_v43 = vld [vmem:[#allocation2 + $0x78] sm:$0xff] }
 0x1f4   :  { %v1932_v25 = vadd.f32 %v12660_v5, %v18321_v48  ;;  %v15119_v36 = vadd.f32 %v2308_v16, %v1929_v62  ;;  %v12726_v34 = vpop.f32.mrf.mxu1  ;;  %v3624_v16 = vld [vmem:[#allocation2 + $0x90] sm:$0xff] }
 0x1f5   :  { %v1761_v29 = vpop.f32.mrf.mxu0 }
 0x1f6   :  { %v1930_v44 = vadd.f32 %v1761_v29, %v18322_v59  ;;  %v15124_v4 = vadd.f32 %v12726_v34, %v1932_v25  ;;  %v2311_v37 = vpop.f32.mrf.mxu1  ;;  %v3683_v25 = vpack.c.bf16 %v3623_v1, %v3622_v43  ;;  %v18325_v34 = vld [vmem:[#allocation21_spill] sm:$0xff]  ;;  %v18330_v1 = vld [vmem:[#allocation20_spill] sm:$0xff] }
 0x1f7   :  { %v12663_v15 = vpop.f32.mrf.mxu0  ;;  %12894 = vmatmul.mubr.msk.bf16.vlgmr.msra.gmra.mxu0 %vm31_vm1, %v3681_v51 }
 0x1f8   :  { %v1935_v8 = vadd.f32 %v12663_v15, %v18323_v35  ;;  %v15128_v60 = vadd.f32 %v2311_v37, %v1930_v44  ;;  %13024 = vmatpush3.bf16.msra.mxu0 %v4911_v33  ;;  %v12729_v45 = vpop.f32.mrf.mxu1  ;;  %12960 = vmatmul.mubr.msk.bf16.vlgmr.msra.gmra.mxu1 %vm31_vm1, %v18324_v40  ;;  %v3684_v44 = vpack.c.bf16 %v3625_v52, %v3624_v16  ;;  %v3627_v16 = vld [vmem:[#allocation2 + $0xb0] sm:$0xff] }
 0x1f9   :  { %v1774_v62 = vpop.f32.mrf.mxu0  ;;  %12897 = vmatprep.mubr.msk.bf16.mxu0 %vm31_vm1, %v3682_v57  ;;  %12963 = vmatprep.mubr.msk.bf16.mxu1 %vm31_vm1, %v14828_v3  ;;  %v18326_v57 = vld [vmem:[#allocation22_spill] sm:$0xff] }
 0x1fa   :  { %v1933_v54 = vadd.f32 %v1774_v62, %v14826_v13  ;;  %v15136_v5 = vadd.f32 %v12729_v45, %v1935_v8  ;;  %v2324_v51 = vpop.f32.mrf.mxu1  ;;  %v18328_v13 = vld [vmem:[#allocation23_spill] sm:$0xff]  ;;  %v3626_v62 = vld [vmem:[#allocation2 + $0xa8] sm:$0xff] }
 0x1fb   :  { %v12664_v48 = vpop.f32.mrf.mxu0 }
 0x1fc   :  { %v1936_v29 = vadd.f32 %v12664_v48, %v18325_v34  ;;  %v15139_v33 = vadd.f32 %v2324_v51, %v1933_v54  ;;  %v12730_v59 = vpop.f32.mrf.mxu1  ;;  %v3628_v54 = vld [vmem:[#allocation2 + $0xc0] sm:$0xff]  ;;  %v3629_v51 = vld [vmem:[#allocation2 + $0xc8] sm:$0xff] }
 0x1fd   :  { %v1777_v37 = vpop.f32.mrf.mxu0 }
 0x1fe   :  { %v1934_v15 = vadd.f32 %v1777_v37, %v18326_v57  ;;  %v15142_v35 = vadd.f32 %v12730_v59, %v1936_v29  ;;  %v2327_v3 = vpop.f32.mrf.mxu1  ;;  %v3685_v59 = vpack.c.bf16 %v3627_v16, %v3626_v62  ;;  %v18331_v37 = vld [vmem:[#allocation25_spill] sm:$0xff]  ;;  %v18336_v16 = vld [vmem:[#allocation24_spill] sm:$0xff] }
 0x1ff   :  { %v12667_v40 = vpop.f32.mrf.mxu0  ;;  %12898 = vmatmul.mubr.msk.bf16.gmra.mxu0 %vm31_vm1, %v3683_v25 }
 0x200   :  { %18327 = vst [vmem:[#allocation13_spill] sm:$0xff] %v15142_v35  ;;  %v1939_v8 = vadd.f32 %v12667_v40, %v18328_v13  ;;  %v15146_v45 = vadd.f32 %v2327_v3, %v1934_v15  ;;  %v12733_v43 = vpop.f32.mrf.mxu1  ;;  %12964 = vmatmul.mubr.msk.bf16.gmra.mxu1 %vm31_vm1, %v18330_v1  ;;  %12901 = vmatprep.mubr.msk.bf16.mxu0 %vm31_vm1, %v3684_v44  ;;  %v18332_v13 = vld [vmem:[#allocation26_spill] sm:$0xff] }
 0x201   :  { %v1790_v52 = vpop.f32.mrf.mxu0  ;;  %12967 = vmatprep.mubr.msk.bf16.mxu1 %vm31_vm1, %v14848_v53  ;;  %v3686_v3 = vpack.c.bf16 %v3629_v51, %v3628_v54  ;;  %v3631_v54 = vld [vmem:[#allocation2 + $0xe0] sm:$0xff] }
 0x202   :  { %18329 = vst [vmem:[#allocation14_spill] sm:$0xff] %v15146_v45  ;;  %v1937_v48 = vadd.f32 %v1790_v52, %v14846_v31  ;;  %v15154_v25 = vadd.f32 %v12733_v43, %v1939_v8  ;;  %v2340_v34 = vpop.f32.mrf.mxu1  ;;  %v18334_v31 = vld [vmem:[#allocation27_spill] sm:$0xff] }
 0x203   :  { %v12668_v29 = vpop.f32.mrf.mxu0  ;;  %v3630_v52 = vld [vmem:[#allocation2 + $0xd8] sm:$0xff] }
 0x204   :  { %v1940_v57 = vadd.f32 %v12668_v29, %v18331_v37  ;;  %v15157_v15 = vadd.f32 %v2340_v34, %v1937_v48  ;;  %v12734_v44 = vpop.f32.mrf.mxu1  ;;  %v3632_v48 = vld [vmem:[#allocation2 + $0xf0] sm:$0xff]  ;;  %v3633_v34 = vld [vmem:[#allocation2 + $0xf8] sm:$0xff] }
 0x205   :  { %v1793_v40 = vpop.f32.mrf.mxu0 }
 0x206   :  { %v1938_v1 = vadd.f32 %v1793_v40, %v18332_v13  ;;  %v15160_v45 = vadd.f32 %v12734_v44, %v1940_v57  ;;  %v2343_v53 = vpop.f32.mrf.mxu1  ;;  %v3687_v57 = vpack.c.bf16 %v3631_v54, %v3630_v52  ;;  %v18337_v44 = vld [vmem:[#allocation29_spill] sm:$0xff]  ;;  %v18342_v54 = vld [vmem:[#allocation28_spill] sm:$0xff] }
 0x207   :  { %v12671_v35 = vpop.f32.mrf.mxu0  ;;  %12902 = vmatmul.mubr.msk.bf16.gmra.mxu0 %vm31_vm1, %v3685_v59 }
 0x208   :  { %18333 = vst [vmem:[#allocation11_spill] sm:$0xff] %v15160_v45  ;;  %v1943_v8 = vadd.f32 %v12671_v35, %v18334_v31  ;;  %v15164_v43 = vadd.f32 %v2343_v53, %v1938_v1  ;;  %v12737_v62 = vpop.f32.mrf.mxu1  ;;  %12968 = vmatmul.mubr.msk.bf16.gmra.mxu1 %vm31_vm1, %v18336_v16  ;;  %12905 = vmatprep.mubr.msk.bf16.mxu0 %vm31_vm1, %v3686_v3  ;;  %v18338_v31 = vld [vmem:[#allocation30_spill] sm:$0xff] }
 0x209   :  { %v1806_v51 = vpop.f32.mrf.mxu0  ;;  %12971 = vmatprep.mubr.msk.bf16.mxu1 %vm31_vm1, %v14868_v56  ;;  %v3688_v1 = vpack.c.bf16 %v3633_v34, %v3632_v48  ;;  %v3635_v48 = vld [vmem:[#allocation2 + $0x110] sm:$0xff] }
 0x20a   :  { %18335 = vst [vmem:[#allocation15_spill] sm:$0xff] %v15164_v43  ;;  %v1941_v29 = vadd.f32 %v1806_v51, %v14866_v46  ;;  %v15172_v59 = vadd.f32 %v12737_v62, %v1943_v8  ;;  %v2356_v35 = vpop.f32.mrf.mxu1  ;;  %v18340_v46 = vld [vmem:[#allocation31_spill] sm:$0xff]  ;;  %v3634_v51 = vld [vmem:[#allocation2 + $0x108] sm:$0xff] }
 0x20b   :  { %v12672_v37 = vpop.f32.mrf.mxu0 }
 0x20c   :  { %v1944_v40 = vadd.f32 %v12672_v37, %v18337_v44  ;;  %v15175_v13 = vadd.f32 %v2356_v35, %v1941_v29  ;;  %v12738_v3 = vpop.f32.mrf.mxu1  ;;  %v3636_v29 = vld [vmem:[#allocation2 + $0x120] sm:$0xff]  ;;  %v3637_v35 = vld [vmem:[#allocation2 + $0x128] sm:$0xff] }
 0x20d   :  { %v1809_v53 = vpop.f32.mrf.mxu0 }
 0x20e   :  { %v1942_v16 = vadd.f32 %v1809_v53, %v18338_v31  ;;  %v15178_v43 = vadd.f32 %v12738_v3, %v1944_v40  ;;  %v2359_v56 = vpop.f32.mrf.mxu1  ;;  %v3689_v40 = vpack.c.bf16 %v3635_v48, %v3634_v51  ;;  %v18344_v3 = vld [vmem:[#allocation33_spill] sm:$0xff]  ;;  %v18350_v48 = vld [vmem:[#allocation32_spill] sm:$0xff] }
 0x20f   :  { %v12675_v45 = vpop.f32.mrf.mxu0  ;;  %12906 = vmatmul.mubr.msk.bf16.gmra.mxu0 %vm31_vm1, %v3687_v57 }
 0x210   :  { %18339 = vst [vmem:[#allocation16_spill] sm:$0xff] %v15178_v43  ;;  %v1947_v8 = vadd.f32 %v12675_v45, %v18340_v46  ;;  %v15182_v62 = vadd.f32 %v2359_v56, %v1942_v16  ;;  %v12741_v52 = vpop.f32.mrf.mxu1  ;;  %12972 = vmatmul.mubr.msk.bf16.gmra.mxu1 %vm31_vm1, %v18342_v54  ;;  %12909 = vmatprep.mubr.msk.bf16.mxu0 %vm31_vm1, %v3688_v1  ;;  %v18346_v46 = vld [vmem:[#allocation34_spill] sm:$0xff] }
 0x211   :  { %v1822_v34 = vpop.f32.mrf.mxu0  ;;  %12975 = vmatprep.mubr.msk.bf16.mxu1 %vm31_vm1, %v14888_v20  ;;  %v3690_v16 = vpack.c.bf16 %v3637_v35, %v3636_v29  ;;  %v3639_v29 = vld [vmem:[#allocation2 + $0x140] sm:$0xff] }
 0x212   :  { %18341 = vst [vmem:[#allocation18_spill] sm:$0xff] %v15182_v62  ;;  %v1945_v37 = vadd.f32 %v1822_v34, %v14886_v63  ;;  %v15190_v57 = vadd.f32 %v12741_v52, %v1947_v8  ;;  %v2372_v45 = vpop.f32.mrf.mxu1  ;;  %v18348_v63 = vld [vmem:[#allocation35_spill] sm:$0xff] }
 0x213   :  { %v12676_v44 = vpop.f32.mrf.mxu0  ;;  %v3638_v34 = vld [vmem:[#allocation2 + $0x138] sm:$0xff] }
 0x214   :  { %18343 = vst [vmem:[#allocation19_spill] sm:$0xff] %v15190_v57  ;;  %v1948_v53 = vadd.f32 %v12676_v44, %v18344_v3  ;;  %v15193_v31 = vadd.f32 %v2372_v45, %v1945_v37  ;;  %v12742_v1 = vpop.f32.mrf.mxu1  ;;  %v3640_v37 = vld [vmem:[#allocation2 + $0x150] sm:$0xff]  ;;  %v3641_v45 = vld [vmem:[#allocation2 + $0x158] sm:$0xff]  ;;  %v18351_v44 = vld [vmem:[#allocation36_spill] sm:$0xff] }
 0x215   :  { %v1825_v56 = vpop.f32.mrf.mxu0 }
 0x216   :  { %18345 = vst [vmem:[#allocation17_spill] sm:$0xff] %v15193_v31  ;;  %v1946_v54 = vadd.f32 %v1825_v56, %v18346_v46  ;;  %v15196_v62 = vadd.f32 %v12742_v1, %v1948_v53  ;;  %v2375_v20 = vpop.f32.mrf.mxu1  ;;  %v4190_v53 = vld [vmem:[#allocation2 + $0x151] sm:$0xff]  ;;  %v4191_v1 = vld [vmem:[#allocation2 + $0x159] sm:$0xff]  ;;  %v3691_v46 = vpack.c.bf16 %v3639_v29, %v3638_v34  ;;  %v18359_v29 = vld [vmem:[#allocation37_spill] sm:$0xff] }
 0x217   :  { %v12679_v43 = vpop.f32.mrf.mxu0  ;;  %12910 = vmatmul.mubr.msk.bf16.gmra.mxu0 %vm31_vm1, %v3689_v40 }
 0x218   :  { %18347 = vst [vmem:[#allocation21_spill] sm:$0xff] %v15196_v62  ;;  %v1951_v8 = vadd.f32 %v12679_v43, %v18348_v63  ;;  %v15200_v52 = vadd.f32 %v2375_v20, %v1946_v54  ;;  %v12745_v51 = vpop.f32.mrf.mxu1  ;;  %12976 = vmatmul.mubr.msk.bf16.gmra.mxu1 %vm31_vm1, %v18350_v48  ;;  %12913 = vmatprep.mubr.msk.bf16.mxu0 %vm31_vm1, %v3690_v16  ;;  %v18353_v54 = vld [vmem:[#allocation38_spill] sm:$0xff] }
 0x219   :  { %v1838_v35 = vpop.f32.mrf.mxu0  ;;  %12979 = vmatprep.mubr.msk.bf16.mxu1 %vm31_vm1, %v14908_v7  ;;  %v3692_v48 = vpack.c.bf16 %v3641_v45, %v3640_v37  ;;  %v4242_v62 = vpack.c.bf16 %v4191_v1, %v4190_v53  ;;  %v18355_v7 = vld [vmem:[#allocation39_spill] sm:$0xff]  ;;  %v3642_v37 = vld [vmem:[#allocation2 + $0x168] sm:$0xff]  ;;  %v3643_v45 = vld [vmem:[#allocation2 + $0x170] sm:$0xff] }
 0x21a   :  { %18349 = vst [vmem:[#allocation22_spill] sm:$0xff] %v15200_v52  ;;  %v1949_v40 = vadd.f32 %v1838_v35, %v18351_v44  ;;  %v15208_v3 = vadd.f32 %v12745_v51, %v1951_v8  ;;  %v2388_v43 = vpop.f32.mrf.mxu1  ;;  %v18357_v51 = vld [vmem:[#allocation40_spill] sm:$0xff]  ;;  %v18360_v53 = vld [vmem:[#allocation41_spill] sm:$0xff] }
 0x21b   :  { %v12680_v56 = vpop.f32.mrf.mxu0 }
 0x21c   :  { %18352 = vst [vmem:[#allocation23_spill] sm:$0xff] %v15208_v3  ;;  %v1952_v20 = vadd.f32 %v12680_v56, %v18353_v54  ;;  %v15211_v16 = vadd.f32 %v2388_v43, %v1949_v40  ;;  %v12746_v63 = vpop.f32.mrf.mxu1  ;;  %v3645_v43 = vld [vmem:[#allocation2 + $0x188] sm:$0xff] }
 0x21d   :  { %v1841_v52 = vpop.f32.mrf.mxu0  ;;  %v4195_v54 = vld [vmem:[#allocation2 + $0x189] sm:$0xff] }
 0x21e   :  { %18354 = vst [vmem:[#allocation20_spill] sm:$0xff] %v15211_v16  ;;  %v1950_v31 = vadd.f32 %v1841_v52, %v18355_v7  ;;  %v15214_v57 = vadd.f32 %v12746_v63, %v1952_v20  ;;  %v2391_v35 = vpop.f32.mrf.mxu1  ;;  %v3644_v52 = vld [vmem:[#allocation2 + $0x180] sm:$0xff]  ;;  %v3693_v63 = vpack.c.bf16 %v3643_v45, %v3642_v37  ;;  %v18362_v7 = vld [vmem:[#allocation43_spill] sm:$0xff]  ;;  %v18368_v45 = vld [vmem:[#allocation42_spill] sm:$0xff] }
 0x21f   :  { %v12683_v8 = vpop.f32.mrf.mxu0  ;;  %12914 = vmatmul.mubr.msk.bf16.gmra.mxu0 %vm31_vm1, %v3691_v46 }
 0x220   :  { %18356 = vst [vmem:[#allocation25_spill] sm:$0xff] %v15214_v57  ;;  %v1955_v44 = vadd.f32 %v12683_v8, %v18357_v51  ;;  %v15218_v3 = vadd.f32 %v2391_v35, %v1950_v31  ;;  %v12749_v34 = vpop.f32.mrf.mxu1  ;;  %12980 = vmatmul.mubr.msk.bf16.gmra.mxu1 %vm31_vm1, %v18359_v29  ;;  %12917 = vmatprep.mubr.msk.bf16.mxu0 %vm31_vm1, %v3692_v48  ;;  %v4194_v31 = vld [vmem:[#allocation2 + $0x181] sm:$0xff] }
 0x221   :  { %v1854_v40 = vpop.f32.mrf.mxu0  ;;  %12983 = vmatprep.mubr.msk.bf16.mxu1 %vm31_vm1, %v4242_v62  ;;  %v3694_v51 = vpack.c.bf16 %v3645_v43, %v3644_v52  ;;  %v18364_v62 = vld [vmem:[#allocation44_spill] sm:$0xff]  ;;  %v3646_v52 = vld [vmem:[#allocation2 + $0x198] sm:$0xff] }
 0x222   :  { %18358 = vst [vmem:[#allocation26_spill] sm:$0xff] %v15218_v3  ;;  %v1953_v1 = vadd.f32 %v1854_v40, %v18360_v53  ;;  %v15225_v56 = vadd.f32 %v12749_v34, %v1955_v44  ;;  %v2404_v46 = vpop.f32.mrf.mxu1  ;;  %v4244_v3 = vpack.c.bf16 %v4195_v54, %v4194_v31  ;;  %v18366_v34 = vld [vmem:[#allocation45_spill] sm:$0xff]  ;;  %v3647_v43 = vld [vmem:[#allocation2 + $0x1a0] sm:$0xff] }
 0x223   :  { %v12684_v20 = vpop.f32.mrf.mxu0  ;;  %v4197_v31 = vld [vmem:[#allocation2 + $0x1a1] sm:$0xff] }
 0x224   :  { %18361 = vst [vmem:[#allocation27_spill] sm:$0xff] %v15225_v56  ;;  %v1956_v35 = vadd.f32 %v12684_v20, %v18362_v7  ;;  %v15228_v8 = vadd.f32 %v2404_v46, %v1953_v1  ;;  %v12750_v48 = vpop.f32.mrf.mxu1  ;;  %v4196_v1 = vld [vmem:[#allocation2 + $0x199] sm:$0xff]  ;;  %v3649_v20 = vld [vmem:[#allocation2 + $0x1e8] sm:$0xff] }
 0x225   :  { %v1857_v29 = vpop.f32.mrf.mxu0  ;;  %v3648_v54 = vld [vmem:[#allocation2 + $0x1e0] sm:$0xff] }
 0x226   :  { %18363 = vst [vmem:[#allocation24_spill] sm:$0xff] %v15228_v8  ;;  %v1954_v57 = vadd.f32 %v1857_v29, %v18364_v62  ;;  %v15231_v16 = vadd.f32 %v12750_v48, %v1956_v35  ;;  %v2407_v40 = vpop.f32.mrf.mxu1  ;;  %v4198_v35 = vld [vmem:[#allocation2 + $0x1e1] sm:$0xff]  ;;  %v4199_v48 = vld [vmem:[#allocation2 + $0x1e9] sm:$0xff]  ;;  %v3695_v62 = vpack.c.bf16 %v3647_v43, %v3646_v52  ;;  %v3650_v43 = vld [vmem:[#allocation2 + $0x1f8] sm:$0xff] }
 0x227   :  { %v12687_v44 = vpop.f32.mrf.mxu0  ;;  %12918 = vmatmul.mubr.msk.bf16.gmra.mxu0 %vm31_vm1, %v3693_v63 }
 0x228   :  { %18365 = vst [vmem:[#allocation29_spill] sm:$0xff] %v15231_v16  ;;  %v1959_v53 = vadd.f32 %v12687_v44, %v18366_v34  ;;  %v15235_v56 = vadd.f32 %v2407_v40, %v1954_v57  ;;  %v12753_v37 = vpop.f32.mrf.mxu1  ;;  %12984 = vmatmul.mubr.msk.bf16.gmra.mxu1 %vm31_vm1, %v18368_v45  ;;  %12921 = vmatprep.mubr.msk.bf16.mxu0 %vm31_vm1, %v3694_v51 }
 0x229   :  { %v1870_v46 = vpop.f32.mrf.mxu0  ;;  %12987 = vmatprep.mubr.msk.bf16.mxu1 %vm31_vm1, %v4244_v3  ;;  %v4245_v34 = vpack.c.bf16 %v4197_v31, %v4196_v1  ;;  %v3696_v45 = vpack.c.bf16 %v3649_v20, %v3648_v54  ;;  %v3651_v1 = vld [vmem:[#allocation2 + $0x200] sm:$0xff]  ;;  %v3653_v54 = vld [vmem:[#allocation2 + $0x218] sm:$0xff] }
 0x22a   :  { %18367 = vst [vmem:[#allocation30_spill] sm:$0xff] %v15235_v56  ;;  %v1957_v63 = vadd.f32 %v1870_v46, %v14943_v22  ;;  %v15242_v7 = vadd.f32 %v12753_v37, %v1959_v53  ;;  %v2420_v57 = vpop.f32.mrf.mxu1  ;;  %v4246_v56 = vpack.c.bf16 %v4199_v48, %v4198_v35  ;;  %v18369_v37 = vld [vmem:[#allocation46_spill] sm:$0xff]  ;;  %v18371_v20 = vld [vmem:[#allocation47_spill] sm:$0xff] }
 0x22b   :  { %v12688_v29 = vpop.f32.mrf.mxu0  ;;  %v4202_v48 = vld [vmem:[#allocation2 + $0x211] sm:$0xff] }
 0x22c   :  { %v1960_v51 = vadd.f32 %v12688_v29, %v14945_v14  ;;  %v15245_v40 = vadd.f32 %v2420_v57, %v1957_v63  ;;  %v12754_v44 = vpop.f32.mrf.mxu1 }
 0x22d   :  { %v1873_v3 = vpop.f32.mrf.mxu0 }
 0x22e   :  { %v1958_v16 = vadd.f32 %v1873_v3, %v14947_v32  ;;  %v15248_v8 = vadd.f32 %v12754_v44, %v1960_v51  ;;  %v2423_v22 = vpop.f32.mrf.mxu1  ;;  %v3652_v32 = vld [vmem:[#allocation2 + $0x210] sm:$0xff]  ;;  %v18372_v51 = vld [vmem:[#allocation49_spill] sm:$0xff] }
 0x22f   :  { %v12691_v53 = vpop.f32.mrf.mxu0  ;;  %12922 = vmatmul.mubr.msk.bf16.gmra.mxu0 %vm31_vm1, %v3695_v62  ;;  %v3697_v62 = vpack.c.bf16 %v3651_v1, %v3650_v43  ;;  %v3698_v3 = vpack.c.bf16 %v3653_v54, %v3652_v32  ;;  %v3654_v32 = vld [vmem:[#allocation2 + $0x228] sm:$0xff]  ;;  %v3655_v54 = vld [vmem:[#allocation2 + $0x230] sm:$0xff] }
 0x230   :  { %v1963_v46 = vadd.f32 %v12691_v53, %v18369_v37  ;;  %v15252_v52 = vadd.f32 %v2423_v22, %v1958_v16  ;;  %v12757_v14 = vpop.f32.mrf.mxu1  ;;  %12988 = vmatmul.mubr.msk.bf16.gmra.mxu1 %vm31_vm1, %v4245_v34  ;;  %12925 = vmatprep.mubr.msk.bf16.mxu0 %vm31_vm1, %v3696_v45  ;;  %v4203_v16 = vld [vmem:[#allocation2 + $0x219] sm:$0xff] }
 0x231   :  { %v1886_v31 = vpop.f32.mrf.mxu0  ;;  %12991 = vmatprep.mubr.msk.bf16.mxu1 %vm31_vm1, %v4246_v56  ;;  %v4248_v53 = vpack.c.bf16 %v4203_v16, %v4202_v48  ;;  %v18373_v56 = vld [vmem:[#allocation50_spill] sm:$0xff]  ;;  %v3657_v48 = vld [vmem:[#allocation2 + $0x248] sm:$0xff] }
 0x232   :  { %18370 = vst [vmem:[#allocation31_spill] sm:$0xff] %v15252_v52  ;;  %v1961_v63 = vadd.f32 %v1886_v31, %v18371_v20  ;;  %v15258_v57 = vadd.f32 %v12757_v14, %v1963_v46  ;;  %v2436_v35 = vpop.f32.mrf.mxu1  ;;  %v18374_v20 = vld [vmem:[#allocation48_spill] sm:$0xff] }
 0x233   :  { %v12692_v29 = vpop.f32.mrf.mxu0 }
 0x234   :  { %v1964_v44 = vadd.f32 %v12692_v29, %v18372_v51  ;;  %v15261_v34 = vadd.f32 %v2436_v35, %v1961_v63  ;;  %v12758_v45 = vpop.f32.mrf.mxu1  ;;  %v3656_v35 = vld [vmem:[#allocation2 + $0x240] sm:$0xff] }
 0x235   :  { %v1889_v22 = vpop.f32.mrf.mxu0  ;;  %v4206_v51 = vld [vmem:[#allocation2 + $0x241] sm:$0xff] }
 0x236   :  { %v1962_v37 = vadd.f32 %v1889_v22, %v18373_v56  ;;  %v15264_v52 = vadd.f32 %v12758_v45, %v1964_v44  ;;  %v2439_v31 = vpop.f32.mrf.mxu1  ;;  %v3699_v45 = vpack.c.bf16 %v3655_v54, %v3654_v32  ;;  %v3659_v54 = vld [vmem:[#allocation2 + $0x260] sm:$0xff] }
 0x237   :  { %v12763_v46 = vpop.f32.mrf.mxu0  ;;  %12926 = vmatmul.mubr.msk.bf16.gmra.mxu0 %vm31_vm1, %v3697_v62 }
 0x238   :  { %v15267_v14 = vadd.f32 %v2439_v31, %v1962_v37  ;;  %v3003_v43 = vadd.f32 %v12763_v46, %v14973_v6  ;;  %v12829_v1 = vpop.f32.mrf.mxu1  ;;  %12992 = vmatmul.mubr.msk.bf16.gmra.mxu1 %vm31_vm1, %v18374_v20  ;;  %12929 = vmatprep.mubr.msk.bf16.mxu0 %vm31_vm1, %v3698_v3  ;;  %v4207_v6 = vld [vmem:[#allocation2 + $0x249] sm:$0xff]  ;;  %v3700_v37 = vpack.c.bf16 %v3657_v48, %v3656_v35  ;;  %v3661_v48 = vld [vmem:[#allocation2 + $0x278] sm:$0xff] }
 0x239   :  { %v2746_v63 = vpop.f32.mrf.mxu0  ;;  %12995 = vmatprep.mubr.msk.bf16.mxu1 %vm31_vm1, %v4248_v53  ;;  %v4250_v46 = vpack.c.bf16 %v4207_v6, %v4206_v51  ;;  %v4210_v51 = vld [vmem:[#allocation2 + $0x271] sm:$0xff]  ;;  %v4211_v6 = vld [vmem:[#allocation2 + $0x279] sm:$0xff] }
 0x23a   :  { %v3001_v16 = vadd.f32 %v2746_v63, %v14976_v28  ;;  %v15275_v29 = vadd.f32 %v12829_v1, %v3003_v43  ;;  %v3296_v62 = vpop.f32.mrf.mxu1 }
 0x23b   :  { %v12764_v44 = vpop.f32.mrf.mxu0 }
 0x23c   :  { %v3004_v22 = vadd.f32 %v12764_v44, %v14981_v18  ;;  %v15278_v56 = vadd.f32 %v3296_v62, %v3001_v16  ;;  %v12830_v3 = vpop.f32.mrf.mxu1  ;;  %v3658_v18 = vld [vmem:[#allocation2 + $0x258] sm:$0xff] }
 0x23d   :  { %v2749_v31 = vpop.f32.mrf.mxu0 }
 0x23e   :  { %v3002_v53 = vadd.f32 %v2749_v31, %v14985_v49  ;;  %v15281_v20 = vadd.f32 %v12830_v3, %v3004_v22  ;;  %v3299_v28 = vpop.f32.mrf.mxu1  ;;  %v3660_v49 = vld [vmem:[#allocation2 + $0x270] sm:$0xff] }
 0x23f   :  { %v12767_v43 = vpop.f32.mrf.mxu0  ;;  %12930 = vmatmul.mubr.msk.bf16.gmra.mxu0 %vm31_vm1, %v3699_v45  ;;  %v3701_v45 = vpack.c.bf16 %v3659_v54, %v3658_v18  ;;  %v3663_v54 = vld [vmem:[#allocation2 + $0x290] sm:$0xff] }
 0x240   :  { %v3007_v1 = vadd.f32 %v12767_v43, %v14994_v55  ;;  %v15285_v63 = vadd.f32 %v3299_v28, %v3002_v53  ;;  %v12833_v32 = vpop.f32.mrf.mxu1  ;;  %12996 = vmatmul.mubr.msk.bf16.gmra.mxu1 %vm31_vm1, %v14978_v47  ;;  %12933 = vmatprep.mubr.msk.bf16.mxu0 %vm31_vm1, %v3700_v37  ;;  %v3702_v37 = vpack.c.bf16 %v3661_v48, %v3660_v49  ;;  %v3665_v49 = vld [vmem:[#allocation2 + $0x2a8] sm:$0xff] }
 0x241   :  { %v2762_v35 = vpop.f32.mrf.mxu0  ;;  %12999 = vmatprep.mubr.msk.bf16.mxu1 %vm31_vm1, %v4250_v46  ;;  %v4252_v53 = vpack.c.bf16 %v4211_v6, %v4210_v51  ;;  %v4215_v51 = vld [vmem:[#allocation2 + $0x2a9] sm:$0xff] }
 0x242   :  { %v3005_v16 = vadd.f32 %v2762_v35, %v14997_v24  ;;  %v15292_v62 = vadd.f32 %v12833_v32, %v3007_v1  ;;  %v3312_v55 = vpop.f32.mrf.mxu1 }
 0x243   :  { %v12768_v44 = vpop.f32.mrf.mxu0 }
 0x244   :  { %v3008_v47 = vadd.f32 %v12768_v44, %v15002_v39  ;;  %v15295_v22 = vadd.f32 %v3312_v55, %v3005_v16  ;;  %v12834_v3 = vpop.f32.mrf.mxu1  ;;  %v3662_v39 = vld [vmem:[#allocation2 + $0x288] sm:$0xff] }
 0x245   :  { %v2765_v31 = vpop.f32.mrf.mxu0  ;;  %v4214_v55 = vld [vmem:[#allocation2 + $0x2a1] sm:$0xff]  ;;  %v3703_v44 = vpack.c.bf16 %v3663_v54, %v3662_v39 }
 0x246   :  { %v3006_v46 = vadd.f32 %v2765_v31, %v15006_v27  ;;  %v15298_v28 = vadd.f32 %v12834_v3, %v3008_v47  ;;  %v3315_v24 = vpop.f32.mrf.mxu1  ;;  %v3664_v27 = vld [vmem:[#allocation2 + $0x2a0] sm:$0xff]  ;;  %v4254_v31 = vpack.c.bf16 %v4215_v51, %v4214_v55 }
 0x247   :  { %v12771_v43 = vpop.f32.mrf.mxu0  ;;  %12934 = vmatmul.mubr.msk.bf16.gmra.mxu0 %vm31_vm1, %v3701_v45  ;;  %v3704_v3 = vpack.c.bf16 %v3665_v49, %v3664_v27  ;;  %v3667_v39 = vld [vmem:[#allocation2 + $0x2c0] sm:$0xff] }
 0x248   :  { %v3011_v1 = vadd.f32 %v12771_v43, %v15015_v9  ;;  %v15302_v32 = vadd.f32 %v3315_v24, %v3006_v46  ;;  %v12837_v18 = vpop.f32.mrf.mxu1  ;;  %13000 = vmatmul.mubr.msk.bf16.gmra.mxu1 %vm31_vm1, %v14999_v50  ;;  %12937 = vmatprep.mubr.msk.bf16.mxu0 %vm31_vm1, %v3702_v37  ;;  %v11316_v27 = vld [vmem:[%s18224_s4 + $0x4] sm:$0xf] }
 0x249   :  { %v2778_v35 = vpop.f32.mrf.mxu0  ;;  %13003 = vmatprep.mubr.msk.bf16.mxu1 %vm31_vm1, %v4252_v53  ;;  %13692 = vmatprep.subr.msk.bf16.mxu1 %vm734_vm0, %v11316_v27  ;;  %v5829_v55 = vsel %vm734_vm0, %v11316_v27, 0 }
 0x24a   :  { %v3009_v48 = vadd.f32 %v2778_v35, %v15018_v11  ;;  %v15309_v16 = vadd.f32 %v12837_v18, %v3011_v1  ;;  %v3328_v9 = vpop.f32.mrf.mxu1  ;;  %v3669_v35 = vld [vmem:[#allocation2 + $0x2d8] sm:$0xff]  ;;  %13090 = vmatpush3.bf16.msra.mxu1 %v5829_v55 }
 0x24b   :  { %v12772_v6 = vpop.f32.mrf.mxu0 }
 0x24c   :  { %v3012_v50 = vadd.f32 %v12772_v6, %v15023_v26  ;;  %v15312_v45 = vadd.f32 %v3328_v9, %v3009_v48  ;;  %v12838_v47 = vpop.f32.mrf.mxu1  ;;  %v3666_v26 = vld [vmem:[#allocation2 + $0x2b8] sm:$0xff] }
 0x24d   :  { %v2781_v37 = vpop.f32.mrf.mxu0  ;;  %v4218_v9 = vld [vmem:[#allocation2 + $0x2d1] sm:$0xff]  ;;  %v3705_v6 = vpack.c.bf16 %v3667_v39, %v3666_v26 }
 0x24e   :  { %v3010_v53 = vadd.f32 %v2781_v37, %v15027_v41  ;;  %v15315_v46 = vadd.f32 %v12838_v47, %v3012_v50  ;;  %v3331_v11 = vpop.f32.mrf.mxu1  ;;  %v3668_v41 = vld [vmem:[#allocation2 + $0x2d0] sm:$0xff] }
 0x24f   :  { %v12775_v24 = vpop.f32.mrf.mxu0  ;;  %12938 = vmatmul.mubr.msk.bf16.gmra.mxu0 %vm31_vm1, %v3703_v44  ;;  %v3671_v39 = vld [vmem:[#allocation2 + $0x2f0] sm:$0xff] }
 0x250   :  { %v3015_v43 = vadd.f32 %v12775_v24, %v15036_v17  ;;  %v15319_v1 = vadd.f32 %v3331_v11, %v3010_v53  ;;  %v12841_v18 = vpop.f32.mrf.mxu1  ;;  %13004 = vmatmul.mubr.msk.bf16.gmra.mxu1 %vm31_vm1, %v15020_v30  ;;  %12941 = vmatprep.mubr.msk.bf16.mxu0 %vm31_vm1, %v3704_v3  ;;  %v4219_v30 = vld [vmem:[#allocation2 + $0x2d9] sm:$0xff]  ;;  %v3706_v3 = vpack.c.bf16 %v3669_v35, %v3668_v41  ;;  %v3673_v41 = vld [vmem:[#allocation2 + $0x308] sm:$0xff] }
 0x251   :  { %v2794_v54 = vpop.f32.mrf.mxu0  ;;  %13007 = vmatprep.mubr.msk.bf16.mxu1 %vm31_vm1, %v4254_v31  ;;  %v18375_v35 = vld [vmem:[#allocation4_spill] sm:$0xff] }
 0x252   :  { %v3013_v17 = vadd.f32 %v2794_v54, %v15039_v12  ;;  %v15329_v49 = vadd.f32 %v12841_v18, %v3015_v43  ;;  %v3344_v48 = vpop.f32.mrf.mxu1  ;;  %v4256_v12 = vpack.c.bf16 %v4219_v30, %v4218_v9  ;;  %v4223_v9 = vld [vmem:[#allocation2 + $0x309] sm:$0xff] }
 0x253   :  { %v12776_v51 = vpop.f32.mrf.mxu0 }
 0x254   :  { %v3016_v44 = vadd.f32 %v12776_v51, %v15044_v38  ;;  %v15334_v50 = vadd.f32 %v3344_v48, %v3013_v17  ;;  %v12842_v47 = vpop.f32.mrf.mxu1  ;;  %v3670_v38 = vld [vmem:[#allocation2 + $0x2e8] sm:$0xff]  ;;  %v18376_v51 = vld [vmem:[#allocation7_spill] sm:$0xff] }
 0x255   :  { %v2797_v37 = vpop.f32.mrf.mxu0  ;;  %v4222_v48 = vld [vmem:[#allocation2 + $0x301] sm:$0xff]  ;;  %v3707_v55 = vpack.c.bf16 %v3671_v39, %v3670_v38  ;;  %v18381_v39 = vld [vmem:[#allocation6_spill] sm:$0xff] }
 0x256   :  { %v3014_v31 = vadd.f32 %v2797_v37, %v15048_v61  ;;  %v15337_v53 = vadd.f32 %v12842_v47, %v3016_v44  ;;  %v3347_v11 = vpop.f32.mrf.mxu1  ;;  %v3672_v61 = vld [vmem:[#allocation2 + $0x300] sm:$0xff]  ;;  %v4258_v37 = vpack.c.bf16 %v4223_v9, %v4222_v48 }
 0x257   :  { %v12779_v24 = vpop.f32.mrf.mxu0  ;;  %12942 = vmatmul.mubr.msk.bf16.gmra.mxu0 %vm31_vm1, %v3705_v6  ;;  %v3708_v47 = vpack.c.bf16 %v3673_v41, %v3672_v61  ;;  %v3675_v61 = vld [vmem:[#allocation2 + $0x320] sm:$0xff] }
 0x258   :  { %v3019_v43 = vadd.f32 %v12779_v24, %v15057_v42  ;;  %v15341_v18 = vadd.f32 %v3347_v11, %v3014_v31  ;;  %v12845_v26 = vpop.f32.mrf.mxu1  ;;  %13008 = vmatmul.mubr.msk.bf16.gmra.mxu1 %vm31_vm1, %v15041_v21  ;;  %12945 = vmatprep.mubr.msk.bf16.mxu0 %vm31_vm1, %v3706_v3 }
 0x259   :  { %v2810_v54 = vpop.f32.mrf.mxu0  ;;  %13011 = vmatprep.mubr.msk.bf16.mxu1 %vm31_vm1, %v4256_v12  ;;  %v18377_v12 = vld [vmem:[#allocation8_spill] sm:$0xff] }
 0x25a   :  { %v3017_v27 = vadd.f32 %v2810_v54, %v18375_v35  ;;  %v15348_v17 = vadd.f32 %v12845_v26, %v3019_v43  ;;  %v3360_v42 = vpop.f32.mrf.mxu1  ;;  %v3674_v54 = vld [vmem:[#allocation2 + $0x318] sm:$0xff]  ;;  %v3676_v35 = vld [vmem:[#allocation2 + $0x330] sm:$0xff] }
 0x25b   :  { %v12780_v30 = vpop.f32.mrf.mxu0 }
 0x25c   :  { %v3020_v21 = vadd.f32 %v12780_v30, %v18376_v51  ;;  %v15351_v6 = vadd.f32 %v3360_v42, %v3017_v27  ;;  %v12846_v44 = vpop.f32.mrf.mxu1  ;;  %v3677_v27 = vld [vmem:[#allocation2 + $0x338] sm:$0xff]  ;;  %v18382_v42 = vld [vmem:[#allocation5_spill] sm:$0xff] }
 0x25d   :  { %v2813_v3 = vpop.f32.mrf.mxu0 }
 0x25e   :  { %v15354_v31 = vadd.f32 %v2813_v3, %v18377_v12  ;;  %v15356_v11 = vadd.f32 %v12846_v44, %v3020_v21  ;;  %v15358_v24 = vpop.f32.mrf.mxu1  ;;  %v3709_v21 = vpack.c.bf16 %v3675_v61, %v3674_v54  ;;  %v18383_v44 = vld [vmem:[#allocation9_spill] sm:$0xff] }
 0x25f   :  { %18380 = vst [vmem:[#allocation34_spill] sm:$0xff] %v15358_v24  ;;  %v12783_v43 = vpop.f32.mrf.mxu0  ;;  %12946 = vmatmul.mubr.msk.bf16.gmra.mxu0 %vm31_vm1, %v3707_v55  ;;  %v4226_v55 = vld [vmem:[#allocation2 + $0x331] sm:$0xff] }
 0x260   :  { %18378 = vst [vmem:[#allocation28_spill] sm:$0xff] %v15354_v31  ;;  %18379 = vst [vmem:[#allocation33_spill] sm:$0xff] %v15356_v11  ;;  %v3023_v26 = vadd.f32 %v12783_v43, %v15078_v58  ;;  %v12849_v38 = vpop.f32.mrf.mxu1  ;;  %13012 = vmatmul.mubr.msk.bf16.gmra.mxu1 %vm31_vm1, %v18381_v39  ;;  %12949 = vmatprep.mubr.msk.bf16.mxu0 %vm31_vm1, %v3708_v47  ;;  %v4227_v58 = vld [vmem:[#allocation2 + $0x339] sm:$0xff]  ;;  %v3710_v43 = vpack.c.bf16 %v3677_v27, %v3676_v35  ;;  %v3678_v35 = vld [vmem:[#allocation2 + $0x348] sm:$0xff] }
 0x261   :  { %v2826_v41 = vpop.f32.mrf.mxu0  ;;  %13015 = vmatprep.mubr.msk.bf16.mxu1 %vm31_vm1, %v4258_v37  ;;  %v4260_v24 = vpack.c.bf16 %v4227_v58, %v4226_v55  ;;  %v18384_v37 = vld [vmem:[#allocation12_spill] sm:$0xff]  ;;  %v3679_v27 = vld [vmem:[#allocation2 + $0x350] sm:$0xff] }
 0x262   :  { %v3021_v48 = vadd.f32 %v2826_v41, %v18382_v42  ;;  %v15367_v9 = vadd.f32 %v12849_v38, %v3023_v26  ;;  %v3376_v30 = vpop.f32.mrf.mxu1  ;;  %v18387_v41 = vld [vmem:[#allocation10_spill] sm:$0xff]  ;;  %v4717_v58 = vld [vmem:[#allocation2 + $0x3a] sm:$0xff] }
 0x263   :  { %v12784_v51 = vpop.f32.mrf.mxu0  ;;  %v4228_v42 = vld [vmem:[#allocation2 + $0x349] sm:$0xff]  ;;  %v4716_v55 = vld [vmem:[#allocation2 + $0x32] sm:$0xff] }
 0x264   :  { %v3024_v3 = vadd.f32 %v12784_v51, %v18383_v44  ;;  %v15370_v12 = vadd.f32 %v3376_v30, %v3021_v48  ;;  %v12850_v47 = vpop.f32.mrf.mxu1  ;;  %v4229_v30 = vld [vmem:[#allocation2 + $0x351] sm:$0xff] }
 0x265   :  { %v2829_v39 = vpop.f32.mrf.mxu0 }
 0x266   :  { %v15373_v31 = vadd.f32 %v2829_v39, %v18384_v37  ;;  %v15375_v11 = vadd.f32 %v12850_v47, %v3024_v3  ;;  %v15377_v26 = vpop.f32.mrf.mxu1  ;;  %v3711_v3 = vpack.c.bf16 %v3679_v27, %v3678_v35  ;;  %v4261_v37 = vpack.c.bf16 %v4229_v30, %v4228_v42  ;;  %v4719_v35 = vld [vmem:[#allocation2 + $0x52] sm:$0xff]  ;;  %v4720_v42 = vld [vmem:[#allocation2 + $0x62] sm:$0xff] }
 0x267   :  { %18386 = vst [vmem:[#allocation32_spill] sm:$0xff] %v15377_v26  ;;  %v12787_v38 = vpop.f32.mrf.mxu0  ;;  %12950 = vmatmul.mubr.msk.bf16.gmra.mxu0 %vm31_vm1, %v3709_v21 }
 0x268   :  { %18385 = vst [vmem:[#allocation35_spill] sm:$0xff] %v15373_v31  ;;  %v3027_v54 = vadd.f32 %v12787_v38, %v15099_v0  ;;  %v12853_v61 = vpop.f32.mrf.mxu1  ;;  %13016 = vmatmul.mubr.msk.bf16.gmra.mxu1 %vm31_vm1, %v18387_v41  ;;  %12953 = vmatprep.mubr.msk.bf16.mxu0 %vm31_vm1, %v3710_v43  ;;  %v4780_v38 = vpack.c.bf16 %v4717_v58, %v4716_v55 }
 0x269   :  { %v2842_v48 = vpop.f32.mrf.mxu0  ;;  %13019 = vmatprep.mubr.msk.bf16.mxu1 %vm31_vm1, %v4260_v24 }
 0x26a   :  { %v3025_v51 = vadd.f32 %v2842_v48, %v15102_v2  ;;  %v15386_v21 = vadd.f32 %v12853_v61, %v3027_v54  ;;  %v3392_v0 = vpop.f32.mrf.mxu1 }
 0x26b   :  { %v12788_v44 = vpop.f32.mrf.mxu0 }
 0x26c   :  { %v3028_v47 = vadd.f32 %v12788_v44, %v15105_v23  ;;  %v15389_v39 = vadd.f32 %v3392_v0, %v3025_v51  ;;  %v12854_v43 = vpop.f32.mrf.mxu1  ;;  %v4718_v23 = vld [vmem:[#allocation2 + $0x4a] sm:$0xff] }
 0x26d   :  { %v2845_v41 = vpop.f32.mrf.mxu0  ;;  %v4781_v51 = vpack.c.bf16 %v4719_v35, %v4718_v23  ;;  %v4724_v23 = vld [vmem:[#allocation2 + $0x92] sm:$0xff]  ;;  %v4725_v35 = vld [vmem:[#allocation2 + $0x9a] sm:$0xff] }
 0x26e   :  { %v15392_v24 = vadd.f32 %v2845_v41, %v15109_v10  ;;  %v15394_v26 = vadd.f32 %v12854_v43, %v3028_v47  ;;  %v15396_v31 = vpop.f32.mrf.mxu1  ;;  %v4721_v10 = vld [vmem:[#allocation2 + $0x6a] sm:$0xff] }
 0x26f   :  { %18389 = vst [vmem:[#allocation38_spill] sm:$0xff] %v15396_v31  ;;  %v12791_v2 = vpop.f32.mrf.mxu0  ;;  %12954 = vmatmul.mubr.msk.bf16.gmra.mxu0 %vm31_vm1, %v3711_v3  ;;  %v4782_v3 = vpack.c.bf16 %v4721_v10, %v4720_v42 }
 0x270   :  { %18388 = vst [vmem:[#allocation36_spill] sm:$0xff] %v15392_v24  ;;  %v3031_v54 = vadd.f32 %v12791_v2, %v15116_v19  ;;  %v12857_v61 = vpop.f32.mrf.mxu1  ;;  %13020 = vmatmul.mubr.msk.bf16.gmra.mxu1 %vm31_vm1, %v4261_v37  ;;  %13025 = vmatprep.mubr.msk.bf16.mxu0 %vm31_vm1, %v4780_v38 }
 0x271   :  { %v2858_v27 = vpop.f32.mrf.mxu0 }
 0x272   :  { %v3029_v48 = vadd.f32 %v2858_v27, %v15119_v36  ;;  %v15403_v30 = vadd.f32 %v12857_v61, %v3031_v54  ;;  %v3408_v55 = vpop.f32.mrf.mxu1  ;;  %v4723_v54 = vld [vmem:[#allocation2 + $0x82] sm:$0xff] }
 0x273   :  { %v12792_v58 = vpop.f32.mrf.mxu0 }
 0x274   :  { %v3032_v0 = vadd.f32 %v12792_v58, %v15124_v4  ;;  %v15406_v19 = vadd.f32 %v3408_v55, %v3029_v48  ;;  %v12858_v44 = vpop.f32.mrf.mxu1  ;;  %v4722_v4 = vld [vmem:[#allocation2 + $0x7a] sm:$0xff]  ;;  %v18392_v55 = vld [vmem:[#allocation13_spill] sm:$0xff] }
 0x275   :  { %v2861_v47 = vpop.f32.mrf.mxu0  ;;  %v4783_v48 = vpack.c.bf16 %v4723_v54, %v4722_v4  ;;  %v4726_v4 = vld [vmem:[#allocation2 + $0xaa] sm:$0xff]  ;;  %v4727_v54 = vld [vmem:[#allocation2 + $0xb2] sm:$0xff] }
 0x276   :  { %v15409_v43 = vadd.f32 %v2861_v47, %v15128_v60  ;;  %v15411_v37 = vadd.f32 %v12858_v44, %v3032_v0  ;;  %v15413_v38 = vpop.f32.mrf.mxu1  ;;  %v4784_v0 = vpack.c.bf16 %v4725_v35, %v4724_v23  ;;  %v4728_v23 = vld [vmem:[#allocation2 + $0xc2] sm:$0xff]  ;;  %v4729_v35 = vld [vmem:[#allocation2 + $0xca] sm:$0xff] }
 0x277   :  { %18391 = vst [vmem:[#allocation40_spill] sm:$0xff] %v15413_v38  ;;  %v12795_v36 = vpop.f32.mrf.mxu0  ;;  %13026 = vmatmul.mubr.msk.bf16.vlgmr.msra.gmra.mxu0 %vm31_vm1, %v4781_v51 }
 0x278   :  { %18390 = vst [vmem:[#allocation39_spill] sm:$0xff] %v15409_v43  ;;  %v3035_v41 = vadd.f32 %v12795_v36, %v15136_v5  ;;  %v12861_v2 = vpop.f32.mrf.mxu1  ;;  %13029 = vmatprep.mubr.msk.bf16.mxu0 %vm31_vm1, %v4782_v3  ;;  %v18393_v3 = vld [vmem:[#allocation14_spill] sm:$0xff] }
 0x279   :  { %v2874_v61 = vpop.f32.mrf.mxu0 }
 0x27a   :  { %v3033_v60 = vadd.f32 %v2874_v61, %v15139_v33  ;;  %v15419_v27 = vadd.f32 %v12861_v2, %v3035_v41  ;;  %v3424_v42 = vpop.f32.mrf.mxu1 }
 0x27b   :  { %v12796_v10 = vpop.f32.mrf.mxu0 }
 0x27c   :  { %v3036_v58 = vadd.f32 %v12796_v10, %v18392_v55  ;;  %v15422_v51 = vadd.f32 %v3424_v42, %v3033_v60  ;;  %v12862_v5 = vpop.f32.mrf.mxu1 }
 0x27d   :  { %v2877_v44 = vpop.f32.mrf.mxu0 }
 0x27e   :  { %v15425_v47 = vadd.f32 %v2877_v44, %v18393_v3  ;;  %v15427_v36 = vadd.f32 %v12862_v5, %v3036_v58  ;;  %v15429_v38 = vpop.f32.mrf.mxu1  ;;  %v4785_v58 = vpack.c.bf16 %v4727_v54, %v4726_v4  ;;  %v18396_v5 = vld [vmem:[#allocation11_spill] sm:$0xff]  ;;  %v4786_v3 = vpack.c.bf16 %v4729_v35, %v4728_v23  ;;  %v4731_v54 = vld [vmem:[#allocation2 + $0xe2] sm:$0xff] }
 0x27f   :  { %18395 = vst [vmem:[#allocation41_spill] sm:$0xff] %v15429_v38  ;;  %v12799_v33 = vpop.f32.mrf.mxu0  ;;  %13030 = vmatmul.mubr.msk.bf16.gmra.mxu0 %vm31_vm1, %v4783_v48  ;;  %v4730_v4 = vld [vmem:[#allocation2 + $0xda] sm:$0xff]  ;;  %v4732_v23 = vld [vmem:[#allocation2 + $0xf2] sm:$0xff] }
 0x280   :  { %18394 = vst [vmem:[#allocation37_spill] sm:$0xff] %v15425_v47  ;;  %v3039_v41 = vadd.f32 %v12799_v33, %v15154_v25  ;;  %v12865_v2 = vpop.f32.mrf.mxu1  ;;  %13033 = vmatprep.mubr.msk.bf16.mxu0 %vm31_vm1, %v4784_v0  ;;  %v18397_v0 = vld [vmem:[#allocation15_spill] sm:$0xff] }
 0x281   :  { %v2890_v61 = vpop.f32.mrf.mxu0  ;;  %v4733_v35 = vld [vmem:[#allocation2 + $0xfa] sm:$0xff] }
 0x282   :  { %v3037_v60 = vadd.f32 %v2890_v61, %v15157_v15  ;;  %v15435_v42 = vadd.f32 %v12865_v2, %v3039_v41  ;;  %v3440_v10 = vpop.f32.mrf.mxu1 }
 0x283   :  { %v12800_v55 = vpop.f32.mrf.mxu0 }
 0x284   :  { %v3040_v44 = vadd.f32 %v12800_v55, %v18396_v5  ;;  %v15438_v48 = vadd.f32 %v3440_v10, %v3037_v60  ;;  %v12866_v25 = vpop.f32.mrf.mxu1 }
 0x285   :  { %v2893_v33 = vpop.f32.mrf.mxu0 }
 0x286   :  { %v15441_v38 = vadd.f32 %v2893_v33, %v18397_v0  ;;  %v15443_v47 = vadd.f32 %v12866_v25, %v3040_v44  ;;  %v15445_v43 = vpop.f32.mrf.mxu1  ;;  %v4787_v44 = vpack.c.bf16 %v4731_v54, %v4730_v4  ;;  %v18400_v25 = vld [vmem:[#allocation16_spill] sm:$0xff]  ;;  %v4788_v0 = vpack.c.bf16 %v4733_v35, %v4732_v23  ;;  %v4734_v54 = vld [vmem:[#allocation2 + $0x10a] sm:$0xff] }
 0x287   :  { %18399 = vst [vmem:[#allocation44_spill] sm:$0xff] %v15445_v43  ;;  %v12803_v15 = vpop.f32.mrf.mxu0  ;;  %13034 = vmatmul.mubr.msk.bf16.gmra.mxu0 %vm31_vm1, %v4785_v58  ;;  %v4736_v23 = vld [vmem:[#allocation2 + $0x122] sm:$0xff]  ;;  %v4737_v35 = vld [vmem:[#allocation2 + $0x12a] sm:$0xff] }
 0x288   :  { %18398 = vst [vmem:[#allocation43_spill] sm:$0xff] %v15441_v38  ;;  %v3043_v41 = vadd.f32 %v12803_v15, %v15172_v59  ;;  %v12869_v2 = vpop.f32.mrf.mxu1  ;;  %13037 = vmatprep.mubr.msk.bf16.mxu0 %vm31_vm1, %v4786_v3  ;;  %v18402_v3 = vld [vmem:[#allocation18_spill] sm:$0xff] }
 0x289   :  { %v2906_v61 = vpop.f32.mrf.mxu0 }
 0x28a   :  { %v3041_v60 = vadd.f32 %v2906_v61, %v15175_v13  ;;  %v15451_v10 = vadd.f32 %v12869_v2, %v3043_v41  ;;  %v3456_v55 = vpop.f32.mrf.mxu1  ;;  %v18406_v41 = vld [vmem:[#allocation19_spill] sm:$0xff] }
 0x28b   :  { %v12804_v5 = vpop.f32.mrf.mxu0  ;;  %v4735_v61 = vld [vmem:[#allocation2 + $0x112] sm:$0xff] }
 0x28c   :  { %v3044_v33 = vadd.f32 %v12804_v5, %v18400_v25  ;;  %v15454_v58 = vadd.f32 %v3456_v55, %v3041_v60  ;;  %v12870_v59 = vpop.f32.mrf.mxu1  ;;  %v18407_v55 = vld [vmem:[#allocation17_spill] sm:$0xff] }
 0x28d   :  { %v2909_v15 = vpop.f32.mrf.mxu0 }
 0x28e   :  { %18401 = vst [vmem:[#allocation45_spill] sm:$0xff] %v15454_v58  ;;  %v15457_v43 = vadd.f32 %v2909_v15, %v18402_v3  ;;  %v15459_v38 = vadd.f32 %v12870_v59, %v3044_v33  ;;  %v15461_v31 = vpop.f32.mrf.mxu1  ;;  %v4789_v15 = vpack.c.bf16 %v4735_v61, %v4734_v54  ;;  %v18409_v3 = vld [vmem:[#allocation21_spill] sm:$0xff]  ;;  %v4738_v61 = vld [vmem:[#allocation2 + $0x13a] sm:$0xff] }
 0x28f   :  { %18405 = vst [vmem:[#allocation47_spill] sm:$0xff] %v15461_v31  ;;  %v12807_v13 = vpop.f32.mrf.mxu0  ;;  %13038 = vmatmul.mubr.msk.bf16.gmra.mxu0 %vm31_vm1, %v4787_v44 }
 0x290   :  { %18403 = vst [vmem:[#allocation42_spill] sm:$0xff] %v15457_v43  ;;  %18404 = vst [vmem:[#allocation46_spill] sm:$0xff] %v15459_v38  ;;  %v3047_v2 = vadd.f32 %v12807_v13, %v18406_v41  ;;  %v12873_v4 = vpop.f32.mrf.mxu1  ;;  %13041 = vmatprep.mubr.msk.bf16.mxu0 %vm31_vm1, %v4788_v0  ;;  %v4790_v41 = vpack.c.bf16 %v4737_v35, %v4736_v23  ;;  %v18411_v0 = vld [vmem:[#allocation22_spill] sm:$0xff]  ;;  %v4741_v35 = vld [vmem:[#allocation2 + $0x15a] sm:$0xff] }
 0x291   :  { %v2922_v60 = vpop.f32.mrf.mxu0  ;;  %v4740_v23 = vld [vmem:[#allocation2 + $0x152] sm:$0xff] }
 0x292   :  { %v3045_v5 = vadd.f32 %v2922_v60, %v18407_v55  ;;  %v15467_v25 = vadd.f32 %v12873_v4, %v3047_v2  ;;  %v3472_v33 = vpop.f32.mrf.mxu1  ;;  %v18415_v2 = vld [vmem:[#allocation23_spill] sm:$0xff]  ;;  %v4739_v55 = vld [vmem:[#allocation2 + $0x142] sm:$0xff] }
 0x293   :  { %v12808_v59 = vpop.f32.mrf.mxu0 }
 0x294   :  { %18408 = vst [vmem:[#allocation49_spill] sm:$0xff] %v15467_v25  ;;  %v3048_v31 = vadd.f32 %v12808_v59, %v18409_v3  ;;  %v15470_v44 = vadd.f32 %v3472_v33, %v3045_v5  ;;  %v12874_v13 = vpop.f32.mrf.mxu1  ;;  %v18416_v33 = vld [vmem:[#allocation20_spill] sm:$0xff] }
 0x295   :  { %v2925_v43 = vpop.f32.mrf.mxu0 }
 0x296   :  { %18410 = vst [vmem:[#allocation50_spill] sm:$0xff] %v15470_v44  ;;  %v15473_v24 = vadd.f32 %v2925_v43, %v18411_v0  ;;  %v15475_v38 = vadd.f32 %v12874_v13, %v3048_v31  ;;  %v15477_v58 = vpop.f32.mrf.mxu1  ;;  %v4791_v13 = vpack.c.bf16 %v4739_v55, %v4738_v61  ;;  %v18418_v0 = vld [vmem:[#allocation25_spill] sm:$0xff] }
 0x297   :  { %18414 = vst [vmem:[#allocation7_spill] sm:$0xff] %v15477_v58  ;;  %v12811_v60 = vpop.f32.mrf.mxu0  ;;  %13042 = vmatmul.mubr.msk.bf16.gmra.mxu0 %vm31_vm1, %v4789_v15  ;;  %v4742_v55 = vld [vmem:[#allocation2 + $0x16a] sm:$0xff] }
 0x298   :  { %18412 = vst [vmem:[#allocation48_spill] sm:$0xff] %v15473_v24  ;;  %18413 = vst [vmem:[#allocation4_spill] sm:$0xff] %v15475_v38  ;;  %v3051_v4 = vadd.f32 %v12811_v60, %v18415_v2  ;;  %v12877_v54 = vpop.f32.mrf.mxu1  ;;  %13045 = vmatprep.mubr.msk.bf16.mxu0 %vm31_vm1, %v4790_v41  ;;  %v4792_v2 = vpack.c.bf16 %v4741_v35, %v4740_v23  ;;  %v18420_v41 = vld [vmem:[#allocation26_spill] sm:$0xff]  ;;  %v4744_v23 = vld [vmem:[#allocation2 + $0x182] sm:$0xff] }
 0x299   :  { %v2938_v5 = vpop.f32.mrf.mxu0  ;;  %v4745_v35 = vld [vmem:[#allocation2 + $0x18a] sm:$0xff] }
 0x29a   :  { %v3049_v43 = vadd.f32 %v2938_v5, %v18416_v33  ;;  %v15483_v59 = vadd.f32 %v12877_v54, %v3051_v4  ;;  %v3488_v31 = vpop.f32.mrf.mxu1  ;;  %v18424_v4 = vld [vmem:[#allocation27_spill] sm:$0xff] }
 0x29b   :  { %v12812_v3 = vpop.f32.mrf.mxu0  ;;  %v4743_v33 = vld [vmem:[#allocation2 + $0x172] sm:$0xff] }
 0x29c   :  { %18417 = vst [vmem:[#allocation8_spill] sm:$0xff] %v15483_v59  ;;  %v3052_v58 = vadd.f32 %v12812_v3, %v18418_v0  ;;  %v15486_v15 = vadd.f32 %v3488_v31, %v3049_v43  ;;  %v12878_v60 = vpop.f32.mrf.mxu1  ;;  %v18425_v31 = vld [vmem:[#allocation24_spill] sm:$0xff] }
 0x29d   :  { %v2941_v24 = vpop.f32.mrf.mxu0 }
 0x29e   :  { %18419 = vst [vmem:[#allocation6_spill] sm:$0xff] %v15486_v15  ;;  %v15489_v38 = vadd.f32 %v2941_v24, %v18420_v41  ;;  %v15491_v44 = vadd.f32 %v12878_v60, %v3052_v58  ;;  %v15493_v25 = vpop.f32.mrf.mxu1  ;;  %v4793_v60 = vpack.c.bf16 %v4743_v33, %v4742_v55  ;;  %v18426_v41 = vld [vmem:[#allocation29_spill] sm:$0xff]  ;;  %v4746_v55 = vld [vmem:[#allocation2 + $0x19a] sm:$0xff] }
 0x29f   :  { %18423 = vst [vmem:[#allocation12_spill] sm:$0xff] %v15493_v25  ;;  %v12815_v5 = vpop.f32.mrf.mxu0  ;;  %13046 = vmatmul.mubr.msk.bf16.gmra.mxu0 %vm31_vm1, %v4791_v13  ;;  %v4747_v33 = vld [vmem:[#allocation2 + $0x1a2] sm:$0xff] }
 0x2a0   :  { %18421 = vst [vmem:[#allocation5_spill] sm:$0xff] %v15489_v38  ;;  %18422 = vst [vmem:[#allocation9_spill] sm:$0xff] %v15491_v44  ;;  %v3055_v54 = vadd.f32 %v12815_v5, %v18424_v4  ;;  %v12881_v61 = vpop.f32.mrf.mxu1  ;;  %13049 = vmatprep.mubr.msk.bf16.mxu0 %vm31_vm1, %v4792_v2  ;;  %v4794_v4 = vpack.c.bf16 %v4745_v35, %v4744_v23  ;;  %v18427_v2 = vld [vmem:[#allocation30_spill] sm:$0xff]  ;;  %v4748_v23 = vld [vmem:[#allocation2 + $0x1e2] sm:$0xff] }
 0x2a1   :  { %v2954_v43 = vpop.f32.mrf.mxu0  ;;  %v4749_v35 = vld [vmem:[#allocation2 + $0x1ea] sm:$0xff] }
 0x2a2   :  { %v3053_v24 = vadd.f32 %v2954_v43, %v18425_v31  ;;  %v15499_v3 = vadd.f32 %v12881_v61, %v3055_v54  ;;  %v3504_v58 = vpop.f32.mrf.mxu1 }
 0x2a3   :  { %v12816_v0 = vpop.f32.mrf.mxu0 }
 0x2a4   :  { %v3056_v25 = vadd.f32 %v12816_v0, %v18426_v41  ;;  %v15502_v13 = vadd.f32 %v3504_v58, %v3053_v24  ;;  %v12882_v5 = vpop.f32.mrf.mxu1  ;;  %v4795_v0 = vpack.c.bf16 %v4747_v33, %v4746_v55  ;;  %v4751_v55 = vld [vmem:[#allocation2 + $0x202] sm:$0xff] }
 0x2a5   :  { %v2957_v38 = vpop.f32.mrf.mxu0 }
 0x2a6   :  { %v15505_v44 = vadd.f32 %v2957_v38, %v18427_v2  ;;  %v15507_v15 = vadd.f32 %v12882_v5, %v3056_v25  ;;  %v15509_v59 = vpop.f32.mrf.mxu1  ;;  %v4796_v5 = vpack.c.bf16 %v4749_v35, %v4748_v23  ;;  %v4753_v23 = vld [vmem:[#allocation2 + $0x21a] sm:$0xff] }
 0x2a7   :  { %18429 = vst [vmem:[#allocation13_spill] sm:$0xff] %v15509_v59  ;;  %v12819_v43 = vpop.f32.mrf.mxu0  ;;  %13050 = vmatmul.mubr.msk.bf16.gmra.mxu0 %vm31_vm1, %v4793_v60 }
 0x2a8   :  { %18428 = vst [vmem:[#allocation10_spill] sm:$0xff] %v15505_v44  ;;  %v3059_v54 = vadd.f32 %v12819_v43, %v15242_v7  ;;  %v12885_v61 = vpop.f32.mrf.mxu1  ;;  %13053 = vmatprep.mubr.msk.bf16.mxu0 %vm31_vm1, %v4794_v4  ;;  %v18430_v4 = vld [vmem:[#allocation31_spill] sm:$0xff] }
 0x2a9   :  { %v2970_v31 = vpop.f32.mrf.mxu0 }
 0x2aa   :  { %v3057_v38 = vadd.f32 %v2970_v31, %v15245_v40  ;;  %v15515_v24 = vadd.f32 %v12885_v61, %v3059_v54  ;;  %v3520_v25 = vpop.f32.mrf.mxu1  ;;  %v4752_v31 = vld [vmem:[#allocation2 + $0x212] sm:$0xff] }
 0x2ab   :  { %v12820_v58 = vpop.f32.mrf.mxu0 }
 0x2ac   :  { %v3060_v41 = vadd.f32 %v12820_v58, %v15248_v8  ;;  %v15518_v60 = vadd.f32 %v3520_v25, %v3057_v38  ;;  %v12886_v7 = vpop.f32.mrf.mxu1  ;;  %v4750_v8 = vld [vmem:[#allocation2 + $0x1fa] sm:$0xff] }
 0x2ad   :  { %v2973_v2 = vpop.f32.mrf.mxu0 }
 0x2ae   :  { %v15521_v43 = vadd.f32 %v2973_v2, %v18430_v4  ;;  %v15523_v59 = vadd.f32 %v12886_v7, %v3060_v41  ;;  %v15525_v44 = vpop.f32.mrf.mxu1  ;;  %v4797_v41 = vpack.c.bf16 %v4751_v55, %v4750_v8  ;;  %v4798_v2 = vpack.c.bf16 %v4753_v23, %v4752_v31  ;;  %v4755_v8 = vld [vmem:[#allocation2 + $0x232] sm:$0xff] }
 0x2af   :  { %18432 = vst [vmem:[#allocation11_spill] sm:$0xff] %v15525_v44  ;;  %v12823_v40 = vpop.f32.mrf.mxu0  ;;  %13054 = vmatmul.mubr.msk.bf16.gmra.mxu0 %vm31_vm1, %v4795_v0 }
 0x2b0   :  { %18431 = vst [vmem:[#allocation14_spill] sm:$0xff] %v15521_v43  ;;  %v3063_v54 = vadd.f32 %v12823_v40, %v15258_v57  ;;  %v12889_v61 = vpop.f32.mrf.mxu1  ;;  %13057 = vmatprep.mubr.msk.bf16.mxu0 %vm31_vm1, %v4796_v5  ;;  %v5634_v43 = vld [vmem:[#allocation3 + $0x1] sm:$0xff] }
 0x2b1   :  { %v2986_v33 = vpop.f32.mrf.mxu0 }
 0x2b2   :  { %v3061_v35 = vadd.f32 %v2986_v33, %v15261_v34  ;;  %v15531_v38 = vadd.f32 %v12889_v61, %v3063_v54  ;;  %v3536_v25 = vpop.f32.mrf.mxu1  ;;  %v4756_v33 = vld [vmem:[#allocation2 + $0x242] sm:$0xff] }
 0x2b3   :  { %v12824_v58 = vpop.f32.mrf.mxu0 }
 0x2b4   :  { %v3064_v7 = vadd.f32 %v12824_v58, %v15264_v52  ;;  %v15534_v0 = vadd.f32 %v3536_v25, %v3061_v35  ;;  %v12890_v57 = vpop.f32.mrf.mxu1  ;;  %v4754_v52 = vld [vmem:[#allocation2 + $0x22a] sm:$0xff] }
 0x2b5   :  { %v2989_v4 = vpop.f32.mrf.mxu0  ;;  %v4799_v25 = vpack.c.bf16 %v4755_v8, %v4754_v52  ;;  %v4760_v8 = vld [vmem:[#allocation2 + $0x272] sm:$0xff] }
 0x2b6   :  { %v15537_v5 = vadd.f32 %v2989_v4, %v15267_v14  ;;  %v15539_v40 = vadd.f32 %v12890_v57, %v3064_v7  ;;  %v15541_v44 = vpop.f32.mrf.mxu1  ;;  %v4757_v14 = vld [vmem:[#allocation2 + $0x24a] sm:$0xff] }
 0x2b7   :  { %18434 = vst [vmem:[#allocation16_spill] sm:$0xff] %v15541_v44  ;;  %v12895_v34 = vpop.f32.mrf.mxu0  ;;  %13058 = vmatmul.mubr.msk.bf16.gmra.mxu0 %vm31_vm1, %v4797_v41  ;;  %v4800_v41 = vpack.c.bf16 %v4757_v14, %v4756_v33 }
 0x2b8   :  { %18433 = vst [vmem:[#allocation15_spill] sm:$0xff] %v15537_v5  ;;  %v15545_v54 = vadd.f32 %v12895_v34, %v15275_v29  ;;  %v15547_v61 = vpop.f32.mrf.mxu1  ;;  %13061 = vmatprep.mubr.msk.bf16.mxu0 %vm31_vm1, %v4798_v2  ;;  %v4758_v34 = vld [vmem:[#allocation2 + $0x25a] sm:$0xff] }
 0x2b9   :  { %v3847_v55 = vpop.f32.mrf.mxu0 }
 0x2ba   :  { %v15551_v31 = vadd.f32 %v3847_v55, %v15278_v56  ;;  %v15553_v23 = vpop.f32.mrf.mxu1  ;;  %v4761_v55 = vld [vmem:[#allocation2 + $0x27a] sm:$0xff] }
 0x2bb   :  { %v12896_v35 = vpop.f32.mrf.mxu0 }
 0x2bc   :  { %v15556_v58 = vadd.f32 %v12896_v35, %v15281_v20  ;;  %v15558_v29 = vpop.f32.mrf.mxu1  ;;  %v4759_v20 = vld [vmem:[#allocation2 + $0x262] sm:$0xff] }
 0x2bd   :  { %v3850_v7 = vpop.f32.mrf.mxu0  ;;  %v4801_v14 = vpack.c.bf16 %v4759_v20, %v4758_v34  ;;  %v4762_v34 = vld [vmem:[#allocation2 + $0x28a] sm:$0xff]  ;;  %v4763_v20 = vld [vmem:[#allocation2 + $0x292] sm:$0xff] }
 0x2be   :  { %v15561_v57 = vadd.f32 %v3850_v7, %v15285_v63  ;;  %v15567_v4 = vpop.f32.mrf.mxu1 }
 0x2bf   :  { %v12899_v2 = vpop.f32.mrf.mxu0  ;;  %13062 = vmatmul.mubr.msk.bf16.gmra.mxu0 %vm31_vm1, %v4799_v25 }
 0x2c0   :  { %v15565_v56 = vadd.f32 %v12899_v2, %v15292_v62  ;;  %13065 = vmatprep.mubr.msk.bf16.mxu0 %vm31_vm1, %v4800_v41  ;;  %v15573_v35 = vpop.f32.mrf.mxu1  ;;  %v4802_v62 = vpack.c.bf16 %v4761_v55, %v4760_v8  ;;  %v4803_v55 = vpack.c.bf16 %v4763_v20, %v4762_v34 }
 0x2c1   :  { %v3863_v52 = vpop.f32.mrf.mxu0 }
 0x2c2   :  { %v15571_v33 = vadd.f32 %v3863_v52, %v15295_v22  ;;  %v15582_v44 = vpop.f32.mrf.mxu1 }
 0x2c3   :  { %v12900_v63 = vpop.f32.mrf.mxu0 }
 0x2c4   :  { %v15576_v25 = vadd.f32 %v12900_v63, %v15298_v28  ;;  %v4764_v28 = vld [vmem:[#allocation2 + $0x2a2] sm:$0xff]  ;;  %v4765_v63 = vld [vmem:[#allocation2 + $0x2aa] sm:$0xff] }
 0x2c5   :  { %v3866_v7 = vpop.f32.mrf.mxu0  ;;  %v4804_v5 = vpack.c.bf16 %v4765_v63, %v4764_v28  ;;  %v4766_v63 = vld [vmem:[#allocation2 + $0x2ba] sm:$0xff] }
 0x2c6   :  { %v15579_v2 = vadd.f32 %v3866_v7, %v15302_v32  ;;  %v15591_v7 = vpop.f32.mrf.mxu1 }
 0x2c7   :  { %v12903_v41 = vpop.f32.mrf.mxu0  ;;  %13066 = vmatmul.mubr.msk.bf16.gmra.mxu0 %vm31_vm1, %v4801_v14 }
 0x2c8   :  { %v15585_v22 = vadd.f32 %v12903_v41, %v15309_v16  ;;  %13069 = vmatprep.mubr.msk.bf16.mxu0 %vm31_vm1, %v4802_v62  ;;  %v5633_v16 = vld [vmem:[%s18224_s4] sm:$0xf] }
 0x2c9   :  { %v3879_v52 = vpop.f32.mrf.mxu0  ;;  %13693 = vmatprep.subr.msk.bf16.mxu0 %vm734_vm0, %v5633_v16  ;;  %v6217_v41 = vsel %vm734_vm0, %v5633_v16, 0 }
 0x2ca   :  { %v15589_v8 = vadd.f32 %v3879_v52, %v15312_v45  ;;  %v5635_v45 = vld [vmem:[#allocation3 + $0x9] sm:$0xff]  ;;  %13156 = vmatpush3.bf16.msra.mxu0 %v6217_v41 }
 0x2cb   :  { %v12904_v32 = vpop.f32.mrf.mxu0  ;;  %v5698_v34 = vpack.c.bf16 %v5635_v45, %v5634_v43 }
 0x2cc   :  { %v15594_v14 = vadd.f32 %v12904_v32, %v15315_v46  ;;  %v15605_v46 = vpop.f32.mrf.mxu1  ;;  %v4767_v32 = vld [vmem:[#allocation2 + $0x2c2] sm:$0xff] }
 0x2cd   :  { %v3882_v62 = vpop.f32.mrf.mxu0  ;;  %13091 = vmatprep.mubr.msk.bf16.mxu1 %vm31_vm1, %v5698_v34  ;;  %v4805_v41 = vpack.c.bf16 %v4767_v32, %v4766_v63  ;;  %v4770_v63 = vld [vmem:[#allocation2 + $0x2ea] sm:$0xff]  ;;  %v4771_v32 = vld [vmem:[#allocation2 + $0x2f2] sm:$0xff] }
 0x2ce   :  { %18435 = vst [vmem:[#allocation18_spill] sm:$0xff] %v15594_v14  ;;  %v15602_v52 = vadd.f32 %v3882_v62, %v15319_v1  ;;  %v4768_v14 = vld [vmem:[#allocation2 + $0x2d2] sm:$0xff]  ;;  %v4769_v1 = vld [vmem:[#allocation2 + $0x2da] sm:$0xff] }
 0x2cf   :  { %v12907_v20 = vpop.f32.mrf.mxu0  ;;  %13070 = vmatmul.mubr.msk.bf16.gmra.mxu0 %vm31_vm1, %v4803_v55  ;;  %v15615_v55 = vpop.f32.mrf.mxu1 }
 0x2d0   :  { %v15608_v28 = vadd.f32 %v12907_v20, %v15329_v49  ;;  %13073 = vmatprep.mubr.msk.bf16.mxu0 %vm31_vm1, %v4804_v5  ;;  %v4806_v49 = vpack.c.bf16 %v4769_v1, %v4768_v14 }
 0x2d1   :  { %v3895_v16 = vpop.f32.mrf.mxu0  ;;  %v15624_v34 = vpop.f32.mrf.mxu1 }
 0x2d2   :  { %18436 = vst [vmem:[#allocation19_spill] sm:$0xff] %v15608_v28  ;;  %v15613_v62 = vadd.f32 %v3895_v16, %v15334_v50  ;;  %v4773_v16 = vld [vmem:[#allocation2 + $0x30a] sm:$0xff] }
 0x2d3   :  { %v12908_v43 = vpop.f32.mrf.mxu0 }
 0x2d4   :  { %v15618_v45 = vadd.f32 %v12908_v43, %v15337_v53  ;;  %v15633_v53 = vld [vmem:[%s18224_s4 + $0x8] sm:$0xf]  ;;  %v15640_v43 = vpop.f32.mrf.mxu1 }
 0x2d5   :  { %v3898_v20 = vpop.f32.mrf.mxu0  ;;  %18440 = vst [vmem:[#allocation23_spill] sm:$0xff] %v15633_v53  ;;  %13694 = vmatprep.subr.msk.bf16.mxu1 %vm734_vm0, %v15633_v53 }
 0x2d6   :  { %18437 = vst [vmem:[#allocation17_spill] sm:$0xff] %v15618_v45  ;;  %v15621_v5 = vadd.f32 %v3898_v20, %v15341_v18  ;;  %v4772_v18 = vld [vmem:[#allocation2 + $0x302] sm:$0xff]  ;;  %v15648_v45 = vpop.f32.mrf.mxu1 }
 0x2d7   :  { %v12911_v28 = vpop.f32.mrf.mxu0  ;;  %13074 = vmatmul.mubr.msk.bf16.gmra.mxu0 %vm31_vm1, %v4805_v41  ;;  %v18442_v41 = vld [vmem:[#allocation33_spill] sm:$0xff]  ;;  %v4808_v20 = vpack.c.bf16 %v4773_v16, %v4772_v18 }
 0x2d8   :  { %18438 = vst [vmem:[#allocation21_spill] sm:$0xff] %v15621_v5  ;;  %v15627_v50 = vadd.f32 %v12911_v28, %v15348_v17  ;;  %13077 = vmatprep.mubr.msk.bf16.mxu0 %vm31_vm1, %v4806_v49  ;;  %v4807_v28 = vpack.c.bf16 %v4771_v32, %v4770_v63  ;;  %v4775_v63 = vld [vmem:[#allocation2 + $0x322] sm:$0xff] }
 0x2d9   :  { %v3911_v14 = vpop.f32.mrf.mxu0 }
 0x2da   :  { %18439 = vst [vmem:[#allocation22_spill] sm:$0xff] %v15627_v50  ;;  %v15638_v1 = vadd.f32 %v3911_v14, %v15351_v6  ;;  %v4774_v6 = vld [vmem:[#allocation2 + $0x31a] sm:$0xff]  ;;  %v4776_v14 = vld [vmem:[#allocation2 + $0x332] sm:$0xff] }
 0x2db   :  { %v12912_v17 = vpop.f32.mrf.mxu0  ;;  %v4809_v16 = vpack.c.bf16 %v4775_v63, %v4774_v6  ;;  %v4779_v6 = vld [vmem:[#allocation2 + $0x352] sm:$0xff] }
 0x2dc   :  { %18441 = vst [vmem:[#allocation20_spill] sm:$0xff] %v15638_v1  ;;  %v15643_v49 = vadd.f32 %v12912_v17, %v18442_v41  ;;  %v4777_v1 = vld [vmem:[#allocation2 + $0x33a] sm:$0xff]  ;;  %v15657_v41 = vpop.f32.mrf.mxu1 }
 0x2dd   :  { %v15645_v50 = vpop.f32.mrf.mxu0 }
 0x2de   :  { %18443 = vst [vmem:[#allocation25_spill] sm:$0xff] %v15643_v49  ;;  %v4810_v49 = vpack.c.bf16 %v4777_v1, %v4776_v14 }
 0x2df   :  { %v12915_v5 = vpop.f32.mrf.mxu0  ;;  %13078 = vmatmul.mubr.msk.bf16.gmra.mxu0 %vm31_vm1, %v4807_v28 }
 0x2e0   :  { %v15651_v53 = vadd.f32 %v12915_v5, %v15367_v9  ;;  %13081 = vmatprep.mubr.msk.bf16.mxu0 %vm31_vm1, %v4808_v20  ;;  %v15665_v20 = vpop.f32.mrf.mxu1 }
 0x2e1   :  { %v3927_v32 = vpop.f32.mrf.mxu0 }
 0x2e2   :  { %18444 = vst [vmem:[#allocation26_spill] sm:$0xff] %v15651_v53  ;;  %v15655_v17 = vadd.f32 %v3927_v32, %v15370_v12  ;;  %v4778_v12 = vld [vmem:[#allocation2 + $0x34a] sm:$0xff]  ;;  %v5537_v32 = vld [vmem:[#allocation3] sm:$0xff] }
 0x2e3   :  { %v12916_v18 = vpop.f32.mrf.mxu0  ;;  %v4811_v14 = vpack.c.bf16 %v4779_v6, %v4778_v12 }
 0x2e4   :  { %18445 = vst [vmem:[#allocation27_spill] sm:$0xff] %v15655_v17  ;;  %v15660_v28 = vadd.f32 %v12916_v18, %v15375_v11  ;;  %v5538_v17 = vld [vmem:[#allocation3 + $0x8] sm:$0xff]  ;;  %v15674_v18 = vpop.f32.mrf.mxu1 }
 0x2e5   :  { %v15662_v9 = vpop.f32.mrf.mxu0 }
 0x2e6   :  { %18446 = vst [vmem:[#allocation24_spill] sm:$0xff] %v15660_v28  ;;  %v5601_v28 = vpack.c.bf16 %v5538_v17, %v5537_v32 }
 0x2e7   :  { %v12919_v5 = vpop.f32.mrf.mxu0  ;;  %13082 = vmatmul.mubr.msk.bf16.gmra.mxu0 %vm31_vm1, %v4809_v16 }
 0x2e8   :  { %v15668_v53 = vadd.f32 %v12919_v5, %v15386_v21  ;;  %13085 = vmatprep.mubr.msk.bf16.mxu0 %vm31_vm1, %v4810_v49  ;;  %v15682_v49 = vpop.f32.mrf.mxu1 }
 0x2e9   :  { %v3943_v63 = vpop.f32.mrf.mxu0 }
 0x2ea   :  { %18447 = vst [vmem:[#allocation29_spill] sm:$0xff] %v15668_v53  ;;  %v15672_v11 = vadd.f32 %v3943_v63, %v15389_v39 }
 0x2eb   :  { %v12920_v1 = vpop.f32.mrf.mxu0 }
 0x2ec   :  { %v15677_v16 = vadd.f32 %v12920_v1, %v15394_v26  ;;  %v15691_v26 = vpop.f32.mrf.mxu1 }
 0x2ed   :  { %v15679_v21 = vpop.f32.mrf.mxu0 }
 0x2ee   :  { %18448 = vst [vmem:[#allocation30_spill] sm:$0xff] %v15677_v16  ;;  %18449 = vst [vmem:[#allocation31_spill] sm:$0xff] %v15679_v21  ;;  %v15698_v1 = vpop.f32.mrf.mxu1 }
 0x2ef   :  { %v12923_v5 = vpop.f32.mrf.mxu0  ;;  %13086 = vmatmul.mubr.msk.bf16.gmra.mxu0 %vm31_vm1, %v4811_v14 }
 0x2f0   :  { %v15685_v53 = vadd.f32 %v12923_v5, %v15403_v30  ;;  %13157 = vmatprep.mubr.msk.bf16.mxu0 %vm31_vm1, %v5601_v28  ;;  %v15706_v5 = vpop.f32.mrf.mxu1 }
 0x2f1   :  { %v3959_v39 = vpop.f32.mrf.mxu0 }
 0x2f2   :  { %18450 = vst [vmem:[#allocation33_spill] sm:$0xff] %v15685_v53  ;;  %v15689_v12 = vadd.f32 %v3959_v39, %v15406_v19 }
 0x2f3   :  { %v12924_v6 = vpop.f32.mrf.mxu0 }
 0x2f4   :  { %18451 = vst [vmem:[#allocation51_spill] sm:$0xff] %v15689_v12  ;;  %v15694_v17 = vadd.f32 %v12924_v6, %v15411_v37 }
 0x2f5   :  { %v15696_v63 = vpop.f32.mrf.mxu0 }
 0x2f6   :  { %18452 = vst [vmem:[#allocation52_spill] sm:$0xff] %v15694_v17  ;;  %18453 = vst [vmem:[#allocation53_spill] sm:$0xff] %v15696_v63  ;;  %v15713_v17 = vpop.f32.mrf.mxu1 }
 0x2f7   :  { %v12927_v32 = vpop.f32.mrf.mxu0 }
 0x2f8   :  { %v15701_v30 = vadd.f32 %v12927_v32, %v15419_v27 }
 0x2f9   :  { %v3975_v14 = vpop.f32.mrf.mxu0 }
 0x2fa   :  { %18454 = vst [vmem:[#allocation54_spill] sm:$0xff] %v15701_v30  ;;  %v15704_v28 = vadd.f32 %v3975_v14, %v15422_v51  ;;  %v15721_v14 = vpop.f32.mrf.mxu1 }
 0x2fb   :  { %v12928_v19 = vpop.f32.mrf.mxu0 }
 0x2fc   :  { %18455 = vst [vmem:[#allocation55_spill] sm:$0xff] %v15704_v28  ;;  %v15709_v39 = vadd.f32 %v12928_v19, %v15427_v36 }
 0x2fd   :  { %v15711_v37 = vpop.f32.mrf.mxu0 }
 0x2fe   :  { %18456 = vst [vmem:[#allocation56_spill] sm:$0xff] %v15709_v39  ;;  %18457 = vst [vmem:[#allocation57_spill] sm:$0xff] %v15711_v37  ;;  %v15728_v39 = vpop.f32.mrf.mxu1 }
 0x2ff   :  { %v12931_v6 = vpop.f32.mrf.mxu0 }
 0x300   :  { %v15716_v63 = vadd.f32 %v12931_v6, %v15435_v42  ;;  %v18463_v6 = vld [vmem:[#allocation45_spill] sm:$0xff] }
 0x301   :  { %v3991_v27 = vpop.f32.mrf.mxu0 }
 0x302   :  { %18458 = vst [vmem:[#allocation58_spill] sm:$0xff] %v15716_v63  ;;  %v15719_v32 = vadd.f32 %v3991_v27, %v15438_v48  ;;  %v15736_v27 = vpop.f32.mrf.mxu1 }
 0x303   :  { %v12932_v51 = vpop.f32.mrf.mxu0 }
 0x304   :  { %18459 = vst [vmem:[#allocation59_spill] sm:$0xff] %v15719_v32  ;;  %v15724_v28 = vadd.f32 %v12932_v51, %v15443_v47  ;;  %v18465_v32 = vld [vmem:[#allocation46_spill] sm:$0xff] }
 0x305   :  { %v15726_v36 = vpop.f32.mrf.mxu0 }
 0x306   :  { %18460 = vst [vmem:[#allocation60_spill] sm:$0xff] %v15724_v28  ;;  %18461 = vst [vmem:[#allocation61_spill] sm:$0xff] %v15726_v36  ;;  %v15743_v28 = vpop.f32.mrf.mxu1  ;;  %v18468_v36 = vld [vmem:[#allocation49_spill] sm:$0xff] }
 0x307   :  { %v12935_v19 = vpop.f32.mrf.mxu0 }
 0x308   :  { %v15731_v37 = vadd.f32 %v12935_v19, %v15451_v10  ;;  %v18470_v19 = vld [vmem:[#allocation50_spill] sm:$0xff] }
 0x309   :  { %v4007_v42 = vpop.f32.mrf.mxu0 }
 0x30a   :  { %18462 = vst [vmem:[#allocation62_spill] sm:$0xff] %v15731_v37  ;;  %v15734_v63 = vadd.f32 %v4007_v42, %v18463_v6  ;;  %v15751_v6 = vpop.f32.mrf.mxu1 }
 0x30b   :  { %v12936_v48 = vpop.f32.mrf.mxu0 }
 0x30c   :  { %18464 = vst [vmem:[#allocation45_spill] sm:$0xff] %v15734_v63  ;;  %v15739_v30 = vadd.f32 %v12936_v48, %v18465_v32  ;;  %v18472_v63 = vld [vmem:[#allocation4_spill] sm:$0xff] }
 0x30d   :  { %v15741_v47 = vpop.f32.mrf.mxu0 }
 0x30e   :  { %18466 = vst [vmem:[#allocation46_spill] sm:$0xff] %v15739_v30  ;;  %18467 = vst [vmem:[#allocation63_spill] sm:$0xff] %v15741_v47  ;;  %v15758_v30 = vpop.f32.mrf.mxu1  ;;  %v18475_v47 = vld [vmem:[#allocation8_spill] sm:$0xff] }
 0x30f   :  { %v12939_v51 = vpop.f32.mrf.mxu0 }
 0x310   :  { %v15746_v12 = vadd.f32 %v12939_v51, %v18468_v36  ;;  %v18476_v51 = vld [vmem:[#allocation6_spill] sm:$0xff] }
 0x311   :  { %v4023_v10 = vpop.f32.mrf.mxu0 }
 0x312   :  { %18469 = vst [vmem:[#allocation49_spill] sm:$0xff] %v15746_v12  ;;  %v15749_v37 = vadd.f32 %v4023_v10, %v18470_v19  ;;  %v15766_v19 = vpop.f32.mrf.mxu1 }
 0x313   :  { %v12940_v42 = vpop.f32.mrf.mxu0 }
 0x314   :  { %18471 = vst [vmem:[#allocation50_spill] sm:$0xff] %v15749_v37  ;;  %v15754_v53 = vadd.f32 %v12940_v42, %v18472_v63  ;;  %v18478_v37 = vld [vmem:[#allocation9_spill] sm:$0xff] }
 0x315   :  { %v15756_v32 = vpop.f32.mrf.mxu0 }
 0x316   :  { %18473 = vst [vmem:[#allocation4_spill] sm:$0xff] %v15754_v53  ;;  %18474 = vst [vmem:[#allocation64_spill] sm:$0xff] %v15756_v32  ;;  %v15773_v53 = vpop.f32.mrf.mxu1 }
 0x317   :  { %v12943_v48 = vpop.f32.mrf.mxu0 }
 0x318   :  { %v15761_v16 = vadd.f32 %v12943_v48, %v18475_v47 }
 0x319   :  { %v4039_v36 = vpop.f32.mrf.mxu0 }
 0x31a   :  { %v15764_v12 = vadd.f32 %v4039_v36, %v18476_v51  ;;  %v15781_v51 = vpop.f32.mrf.mxu1 }
 0x31b   :  { %v12944_v10 = vpop.f32.mrf.mxu0 }
 0x31c   :  { %18477 = vst [vmem:[#allocation8_spill] sm:$0xff] %v15764_v12  ;;  %v15769_v21 = vadd.f32 %v12944_v10, %v18478_v37 }
 0x31d   :  { %v15771_v63 = vpop.f32.mrf.mxu0 }
 0x31e   :  { %18479 = vst [vmem:[#allocation6_spill] sm:$0xff] %v15769_v21  ;;  %18480 = vst [vmem:[#allocation9_spill] sm:$0xff] %v15771_v63  ;;  %v15788_v21 = vpop.f32.mrf.mxu1 }
 0x31f   :  { %v12947_v42 = vpop.f32.mrf.mxu0 }
 0x320   :  { %v15776_v32 = vadd.f32 %v12947_v42, %v15499_v3 }
 0x321   :  { %v4055_v47 = vpop.f32.mrf.mxu0 }
 0x322   :  { %v15779_v48 = vadd.f32 %v4055_v47, %v15502_v13  ;;  %v15796_v47 = vpop.f32.mrf.mxu1 }
 0x323   :  { %v12948_v36 = vpop.f32.mrf.mxu0 }
 0x324   :  { %18481 = vst [vmem:[#allocation65_spill] sm:$0xff] %v15779_v48  ;;  %v15784_v12 = vadd.f32 %v12948_v36, %v15507_v15 }
 0x325   :  { %v15786_v37 = vpop.f32.mrf.mxu0 }
 0x326   :  { %18482 = vst [vmem:[#allocation66_spill] sm:$0xff] %v15784_v12  ;;  %18483 = vst [vmem:[#allocation67_spill] sm:$0xff] %v15786_v37  ;;  %v15803_v12 = vpop.f32.mrf.mxu1 }
 0x327   :  { %v12951_v10 = vpop.f32.mrf.mxu0 }
 0x328   :  { %v15791_v63 = vadd.f32 %v12951_v10, %v15515_v24 }
 0x329   :  { %v4071_v3 = vpop.f32.mrf.mxu0 }
 0x32a   :  { %18484 = vst [vmem:[#allocation68_spill] sm:$0xff] %v15791_v63  ;;  %v15794_v42 = vadd.f32 %v4071_v3, %v15518_v60  ;;  %v15811_v3 = vpop.f32.mrf.mxu1 }
 0x32b   :  { %v12952_v13 = vpop.f32.mrf.mxu0 }
 0x32c   :  { %18485 = vst [vmem:[#allocation69_spill] sm:$0xff] %v15794_v42  ;;  %v15799_v48 = vadd.f32 %v12952_v13, %v15523_v59  ;;  %v4654_v13 = vadd.f32 %v15547_v61, %v15545_v54  ;;  %v4655_v54 = vadd.f32 %v15558_v29, %v15556_v58 }
 0x32d   :  { %v15801_v15 = vpop.f32.mrf.mxu0 }
 0x32e   :  { %18486 = vst [vmem:[#allocation70_spill] sm:$0xff] %v15799_v48  ;;  %18487 = vst [vmem:[#allocation71_spill] sm:$0xff] %v15801_v15 }
 0x32f   :  { %v12955_v36 = vpop.f32.mrf.mxu0 }
 0x330   :  { %v15806_v37 = vadd.f32 %v12955_v36, %v15531_v38  ;;  %v15823_v38 = vld [vmem:[%s18225_s2] ss:$0 sm:$0xff]  ;;  %v15827_v36 = vpop.f32.mrf.mxu1 }
 0x331   :  { %v4087_v24 = vpop.f32.mrf.mxu0 }
 0x332   :  { %18488 = vst [vmem:[#allocation72_spill] sm:$0xff] %v15806_v37  ;;  %v15809_v10 = vadd.f32 %v4087_v24, %v15534_v0  ;;  %v4652_v0 = vadd.f32 %v15553_v23, %v15551_v31  ;;  %v15839_v31 = vpop.f32.mrf.mxu1  ;;  %v4658_v37 = vadd.f32 %v15573_v35, %v15565_v56 }
 0x333   :  { %v12956_v60 = vpop.f32.mrf.mxu0 }
 0x334   :  { %18489 = vst [vmem:[#allocation73_spill] sm:$0xff] %v15809_v10  ;;  %v15814_v42 = vadd.f32 %v12956_v60, %v15539_v40  ;;  %v15832_v40 = vld [vmem:[%s18226_s3] ss:$0 sm:$0xff]  ;;  %v4653_v10 = vadd.f32 %v15567_v4, %v15561_v57  ;;  %v4656_v57 = vadd.f32 %v15582_v44, %v15571_v33 }
 0x335   :  { %v15816_v59 = vpop.f32.mrf.mxu0 }
 0x336   :  { %18490 = vst [vmem:[#allocation74_spill] sm:$0xff] %v15814_v42  ;;  %18491 = vst [vmem:[#allocation75_spill] sm:$0xff] %v15816_v59 }
 0x337   :  { %v13027_v48 = vpop.f32.mrf.mxu0 }
 0x338   :  { %v5204_v24 = vadd.f32 %v13027_v48, %v4654_v13 }
 0x339   :  { %v4947_v60 = vpop.f32.mrf.mxu0 }
 0x33a   :  { %v5275_v61 = vmul.f32 %v15823_v38, %v5204_v24  ;;  %v5202_v42 = vadd.f32 %v4947_v60, %v4652_v0  ;;  %v15849_v24 = vpop.f32.mrf.mxu1  ;;  %v4659_v60 = vadd.f32 %v15591_v7, %v15576_v25 }
 0x33b   :  { %v13028_v59 = vpop.f32.mrf.mxu0 }
 0x33c   :  { %v5346_v23 = vadd.f32 %v15832_v40, %v5275_v61  ;;  %v5273_v48 = vmul.f32 %v15823_v38, %v5202_v42  ;;  %v5205_v13 = vadd.f32 %v13028_v59, %v4655_v54 }
 0x33d   :  { %v4950_v15 = vpop.f32.mrf.mxu0 }
 0x33e   :  { %v5410_v63 = vmax.f32 %v5346_v23, 0.0  ;;  %v5344_v58 = vadd.f32 %v15832_v40, %v5273_v48  ;;  %v5276_v29 = vmul.f32 %v15823_v38, %v5205_v13  ;;  %v5203_v0 = vadd.f32 %v4950_v15, %v4653_v10  ;;  %v15861_v23 = vpop.f32.mrf.mxu1 }
 0x33f   :  { %v13031_v4 = vpop.f32.mrf.mxu0  ;;  %v4662_v13 = vadd.f32 %v15615_v55, %v15585_v22 }
 0x340   :  { %5475 = vst.msk [vmem:[#allocation3 + $0x31] sm:$0xff] %vm31_vm1, %v5410_v63  ;;  %v5408_v42 = vmax.f32 %v5344_v58, 0.0  ;;  %v5347_v59 = vadd.f32 %v15832_v40, %v5276_v29  ;;  %v5274_v56 = vmul.f32 %v15823_v38, %v5203_v0  ;;  %v5208_v35 = vadd.f32 %v13031_v4, %v4658_v37 }
 0x341   :  { %v4963_v54 = vpop.f32.mrf.mxu0  ;;  %v4657_v63 = vadd.f32 %v15605_v46, %v15579_v2 }
 0x342   :  { %5473 = vst.msk [vmem:[#allocation3 + $0x19] sm:$0xff] %vm31_vm1, %v5408_v42  ;;  %v5411_v15 = vmax.f32 %v5347_v59, 0.0  ;;  %v5345_v44 = vadd.f32 %v15832_v40, %v5274_v56  ;;  %v5279_v33 = vmul.f32 %v15823_v38, %v5208_v35  ;;  %v5206_v10 = vadd.f32 %v4963_v54, %v4656_v57  ;;  %v15873_v42 = vpop.f32.mrf.mxu1  ;;  %v18492_v35 = vld [vmem:[#allocation18_spill] sm:$0xff] }
 0x343   :  { %v13032_v61 = vpop.f32.mrf.mxu0  ;;  %v4660_v57 = vadd.f32 %v15624_v34, %v15589_v8 }
 0x344   :  { %5476 = vst.msk [vmem:[#allocation3 + $0x39] sm:$0xff] %vm31_vm1, %v5411_v15  ;;  %v5409_v37 = vmax.f32 %v5345_v44, 0.0  ;;  %v5350_v25 = vadd.f32 %v15832_v40, %v5279_v33  ;;  %v5277_v7 = vmul.f32 %v15823_v38, %v5206_v10  ;;  %v5209_v48 = vadd.f32 %v13032_v61, %v4659_v60  ;;  %v11414_v33 = vld [vmem:[%s18224_s4 + $0xc] sm:$0xf] }
 0x345   :  { %v4966_v58 = vpop.f32.mrf.mxu0  ;;  %v4663_v60 = vadd.f32 %v15640_v43, %v18492_v35  ;;  %v4661_v10 = vadd.f32 %v15648_v45, %v15602_v52  ;;  %13695 = vmatprep.subr.msk.bf16.mxu0 %vm734_vm0, %v11414_v33  ;;  %v15889_v43 = vpop.f32.mrf.mxu1  ;;  %v4664_v52 = vadd.f32 %v15665_v20, %v15613_v62 }
 0x346   :  { %5474 = vst.msk [vmem:[#allocation3 + $0x21] sm:$0xff] %vm31_vm1, %v5409_v37  ;;  %v5414_v29 = vmax.f32 %v5350_v25, 0.0  ;;  %v5348_v2 = vadd.f32 %v15832_v40, %v5277_v7  ;;  %v5280_v46 = vmul.f32 %v15823_v38, %v5209_v48  ;;  %v5207_v0 = vadd.f32 %v4966_v58, %v4657_v63 }
 0x347   :  { %v13035_v4 = vpop.f32.mrf.mxu0 }
 0x348   :  { %5479 = vst.msk [vmem:[#allocation3 + $0x61] sm:$0xff] %vm31_vm1, %v5414_v29  ;;  %v5412_v59 = vmax.f32 %v5348_v2, 0.0  ;;  %v5351_v22 = vadd.f32 %v15832_v40, %v5280_v46  ;;  %v5278_v55 = vmul.f32 %v15823_v38, %v5207_v0  ;;  %v5212_v56 = vadd.f32 %v13035_v4, %v4662_v13  ;;  %v18493_v13 = vld [vmem:[#allocation19_spill] sm:$0xff] }
 0x349   :  { %v4979_v54 = vpop.f32.mrf.mxu0  ;;  %v4666_v58 = vadd.f32 %v15657_v41, %v18493_v13  ;;  %v18494_v46 = vld [vmem:[#allocation23_spill] sm:$0xff] }
 0x34a   :  { %5477 = vst.msk [vmem:[#allocation3 + $0x49] sm:$0xff] %vm31_vm1, %v5412_v59  ;;  %v5415_v15 = vmax.f32 %v5351_v22, 0.0  ;;  %v5349_v8 = vadd.f32 %v15832_v40, %v5278_v55  ;;  %v5283_v34 = vmul.f32 %v15823_v38, %v5212_v56  ;;  %v5210_v44 = vadd.f32 %v4979_v54, %v4660_v57  ;;  %v5638_v57 = vld [vmem:[#allocation3 + $0x31] sm:$0xff]  ;;  %v5636_v56 = vld [vmem:[#allocation3 + $0x19] sm:$0xff] }
 0x34b   :  { %v13036_v63 = vpop.f32.mrf.mxu0  ;;  %v5639_v48 = vld [vmem:[#allocation3 + $0x39] sm:$0xff]  ;;  %v6703_v0 = vsel %vm734_vm0, %v18494_v46, 0 }
 0x34c   :  { %5480 = vst.msk [vmem:[#allocation3 + $0x69] sm:$0xff] %vm31_vm1, %v5415_v15  ;;  %v5413_v61 = vmax.f32 %v5349_v8, 0.0  ;;  %v5354_v37 = vadd.f32 %v15832_v40, %v5283_v34  ;;  %v5281_v25 = vmul.f32 %v15823_v38, %v5210_v44  ;;  %v5213_v7 = vadd.f32 %v13036_v63, %v4663_v60  ;;  %v5539_v41 = vld [vmem:[#allocation3 + $0x18] sm:$0xff]  ;;  %v15904_v8 = vpop.f32.mrf.mxu1 }
 0x34d   :  { %v4982_v45 = vpop.f32.mrf.mxu0  ;;  %v5637_v29 = vld [vmem:[#allocation3 + $0x21] sm:$0xff]  ;;  %v5542_v35 = vld [vmem:[#allocation3 + $0x38] sm:$0xff]  ;;  %v5700_v54 = vpack.c.bf16 %v5639_v48, %v5638_v57  ;;  %v7253_v15 = vsel %vm734_vm0, %v11414_v33, 0  ;;  %v11447_v48 = vld [vmem:[%s18224_s4 + $0x10] sm:$0xf] }
 0x34e   :  { %v5540_v2 = vld [vmem:[#allocation3 + $0x20] sm:$0xff]  ;;  %5478 = vst.msk [vmem:[#allocation3 + $0x51] sm:$0xff] %vm31_vm1, %v5413_v61  ;;  %v5418_v4 = vmax.f32 %v5354_v37, 0.0  ;;  %v5352_v59 = vadd.f32 %v15832_v40, %v5281_v25  ;;  %v5284_v22 = vmul.f32 %v15823_v38, %v5213_v7  ;;  %v5211_v55 = vadd.f32 %v4982_v45, %v4661_v10  ;;  %v5541_v10 = vld [vmem:[#allocation3 + $0x30] sm:$0xff]  ;;  %v18495_v37 = vld [vmem:[#allocation17_spill] sm:$0xff] }
 0x34f   :  { %v13039_v60 = vpop.f32.mrf.mxu0  ;;  %v5699_v62 = vpack.c.bf16 %v5637_v29, %v5636_v56  ;;  %v5602_v20 = vpack.c.bf16 %v5540_v2, %v5539_v41  ;;  %v4667_v25 = vadd.f32 %v15674_v18, %v18495_v37  ;;  %v5603_v33 = vpack.c.bf16 %v5542_v35, %v5541_v10  ;;  %v18496_v18 = vld [vmem:[#allocation28_spill] sm:$0xff]  ;;  %v18497_v2 = vld [vmem:[#allocation34_spill] sm:$0xff]  ;;  %v18498_v57 = vld [vmem:[#allocation21_spill] sm:$0xff] }
 0x350   :  { %5483 = vst.msk [vmem:[#allocation3 + $0x91] sm:$0xff] %vm31_vm1, %v5418_v4  ;;  %v5416_v34 = vmax.f32 %v5352_v59, 0.0  ;;  %v5355_v44 = vadd.f32 %v15832_v40, %v5284_v22  ;;  %v5282_v63 = vmul.f32 %v15823_v38, %v5211_v55  ;;  %v5216_v61 = vadd.f32 %v13039_v60, %v4666_v58  ;;  %v15925_v22 = vpop.f32.mrf.mxu1  ;;  %v18499_v60 = vld [vmem:[#allocation22_spill] sm:$0xff] }
 0x351   :  { %13092 = vmatmul.mubr.msk.bf16.vlgmr.msra.gmra.mxu1 %vm31_vm1, %v5699_v62  ;;  %13158 = vmatmul.mubr.msk.bf16.vlgmr.msra.gmra.mxu0 %vm31_vm1, %v5602_v20  ;;  %v4995_v7 = vpop.f32.mrf.mxu0  ;;  %v3568_v46 = vadd.f32 %v18497_v2, %v18496_v18  ;;  %v4665_v4 = vadd.f32 %v15682_v49, %v18498_v57  ;;  %v4670_v49 = vadd.f32 %v15691_v26, %v18499_v60  ;;  %v18500_v62 = vld [vmem:[#allocation20_spill] sm:$0xff]  ;;  %v18501_v57 = vld [vmem:[#allocation25_spill] sm:$0xff] }
 0x352   :  { %5481 = vst.msk [vmem:[#allocation3 + $0x79] sm:$0xff] %vm31_vm1, %v5416_v34  ;;  %v5419_v13 = vmax.f32 %v5355_v44, 0.0  ;;  %v5353_v45 = vadd.f32 %v15832_v40, %v5282_v63  ;;  %v5287_v58 = vmul.f32 %v15823_v38, %v5216_v61  ;;  %13222 = vmatpush3.bf16.msra.mxu1 %v6703_v0  ;;  %v5214_v29 = vadd.f32 %v4995_v7, %v4664_v52  ;;  %v5642_v63 = vld [vmem:[#allocation3 + $0x61] sm:$0xff]  ;;  %v5640_v7 = vld [vmem:[#allocation3 + $0x49] sm:$0xff] }
 0x353   :  { %13095 = vmatprep.mubr.msk.bf16.mxu1 %vm31_vm1, %v5700_v54  ;;  %13161 = vmatprep.mubr.msk.bf16.mxu0 %vm31_vm1, %v5603_v33  ;;  %v13040_v59 = vpop.f32.mrf.mxu0  ;;  %v5643_v41 = vld [vmem:[#allocation3 + $0x69] sm:$0xff]  ;;  %v4668_v20 = vadd.f32 %v15698_v1, %v18500_v62  ;;  %v4119_v54 = vadd.f32 %v15645_v50, %v3568_v46  ;;  %v5545_v26 = vld [vmem:[#allocation3 + $0x60] sm:$0xff] }
 0x354   :  { %13288 = vmatpush3.bf16.msra.mxu0 %v7253_v15  ;;  %5484 = vst.msk [vmem:[#allocation3 + $0x99] sm:$0xff] %vm31_vm1, %v5419_v13  ;;  %v5417_v55 = vmax.f32 %v5353_v45, 0.0  ;;  %v5358_v0 = vadd.f32 %v15832_v40, %v5287_v58  ;;  %v5285_v52 = vmul.f32 %v15823_v38, %v5214_v29  ;;  %v5217_v56 = vadd.f32 %v13040_v59, %v4667_v25  ;;  %v5546_v35 = vld [vmem:[#allocation3 + $0x68] sm:$0xff]  ;;  %v15939_v58 = vpop.f32.mrf.mxu1 }
 0x355   :  { %13696 = vmatprep.subr.msk.bf16.mxu1 %vm734_vm0, %v11447_v48  ;;  %v4998_v15 = vpop.f32.mrf.mxu0  ;;  %v5641_v34 = vld [vmem:[#allocation3 + $0x51] sm:$0xff]  ;;  %v5543_v33 = vld [vmem:[#allocation3 + $0x48] sm:$0xff]  ;;  %v5702_v45 = vpack.c.bf16 %v5643_v41, %v5642_v63  ;;  %v5605_v50 = vpack.c.bf16 %v5546_v35, %v5545_v26  ;;  %v18503_v35 = vld [vmem:[#allocation32_spill] sm:$0xff]  ;;  %v4669_v60 = vadd.f32 %v15713_v17, %v4119_v54 }
 0x356   :  { %v5544_v44 = vld [vmem:[#allocation3 + $0x50] sm:$0xff]  ;;  %5482 = vst.msk [vmem:[#allocation3 + $0x81] sm:$0xff] %vm31_vm1, %v5417_v55  ;;  %v5422_v61 = vmax.f32 %v5358_v0, 0.0  ;;  %v5356_v10 = vadd.f32 %v15832_v40, %v5285_v52  ;;  %v5288_v37 = vmul.f32 %v15823_v38, %v5217_v56  ;;  %v5215_v25 = vadd.f32 %v4998_v15, %v4665_v4  ;;  %v18502_v41 = vld [vmem:[#allocation35_spill] sm:$0xff]  ;;  %v15956_v62 = vpop.f32.mrf.mxu1 }
 0x357   :  { %v13043_v48 = vpop.f32.mrf.mxu0  ;;  %v5701_v13 = vpack.c.bf16 %v5641_v34, %v5640_v7  ;;  %v5604_v1 = vpack.c.bf16 %v5544_v44, %v5543_v33  ;;  %v4671_v4 = vadd.f32 %v15706_v5, %v18501_v57  ;;  %v3572_v5 = vadd.f32 %v18503_v35, %v18502_v41 }
 0x358   :  { %5487 = vst.msk [vmem:[#allocation3 + $0xc1] sm:$0xff] %vm31_vm1, %v5422_v61  ;;  %v5420_v29 = vmax.f32 %v5356_v10, 0.0  ;;  %v5359_v18 = vadd.f32 %v15832_v40, %v5288_v37  ;;  %v5286_v2 = vmul.f32 %v15823_v38, %v5215_v25  ;;  %v5220_v46 = vadd.f32 %v13043_v48, %v4670_v49  ;;  %v18504_v10 = vld [vmem:[#allocation26_spill] sm:$0xff]  ;;  %v18505_v25 = vld [vmem:[#allocation27_spill] sm:$0xff] }
 0x359   :  { %13096 = vmatmul.mubr.msk.bf16.gmra.mxu1 %vm31_vm1, %v5701_v13  ;;  %13162 = vmatmul.mubr.msk.bf16.gmra.mxu0 %vm31_vm1, %v5604_v1  ;;  %v5011_v59 = vpop.f32.mrf.mxu0  ;;  %v4674_v37 = vadd.f32 %v15721_v14, %v18504_v10  ;;  %v4672_v7 = vadd.f32 %v15728_v39, %v18505_v25  ;;  %v4123_v17 = vadd.f32 %v15662_v9, %v3572_v5  ;;  %v5646_v48 = vld [vmem:[#allocation3 + $0x91] sm:$0xff] }
 0x35a   :  { %5485 = vst.msk [vmem:[#allocation3 + $0xa9] sm:$0xff] %vm31_vm1, %v5420_v29  ;;  %v5423_v55 = vmax.f32 %v5359_v18, 0.0  ;;  %v5357_v0 = vadd.f32 %v15832_v40, %v5286_v2  ;;  %v5291_v52 = vmul.f32 %v15823_v38, %v5220_v46  ;;  %v5218_v56 = vadd.f32 %v5011_v59, %v4668_v20  ;;  %13099 = vmatprep.mubr.msk.bf16.mxu1 %vm31_vm1, %v5702_v45  ;;  %v5644_v29 = vld [vmem:[#allocation3 + $0x79] sm:$0xff]  ;;  %v5549_v14 = vld [vmem:[#allocation3 + $0x90] sm:$0xff] }
 0x35b   :  { %13165 = vmatprep.mubr.msk.bf16.mxu0 %vm31_vm1, %v5605_v50  ;;  %v13044_v49 = vpop.f32.mrf.mxu0  ;;  %v5647_v63 = vld [vmem:[#allocation3 + $0x99] sm:$0xff] }
 0x35c   :  { %5488 = vst.msk [vmem:[#allocation3 + $0xc9] sm:$0xff] %vm31_vm1, %v5423_v55  ;;  %v5421_v15 = vmax.f32 %v5357_v0, 0.0  ;;  %v5362_v34 = vadd.f32 %v15832_v40, %v5291_v52  ;;  %v5289_v44 = vmul.f32 %v15823_v38, %v5218_v56  ;;  %v5221_v20 = vadd.f32 %v13044_v49, %v4671_v4  ;;  %v5550_v61 = vld [vmem:[#allocation3 + $0x98] sm:$0xff]  ;;  %v15971_v4 = vpop.f32.mrf.mxu1  ;;  %v18506_v56 = vld [vmem:[#allocation24_spill] sm:$0xff] }
 0x35d   :  { %v5014_v54 = vpop.f32.mrf.mxu0  ;;  %v5645_v33 = vld [vmem:[#allocation3 + $0x81] sm:$0xff]  ;;  %v5547_v18 = vld [vmem:[#allocation3 + $0x78] sm:$0xff]  ;;  %v5704_v57 = vpack.c.bf16 %v5647_v63, %v5646_v48  ;;  %v15969_v9 = vpack.c.bf16 %v5550_v61, %v5549_v14  ;;  %v4675_v41 = vadd.f32 %v15736_v27, %v18506_v56  ;;  %v18508_v27 = vld [vmem:[#allocation38_spill] sm:$0xff] }
 0x35e   :  { %v5548_v26 = vld [vmem:[#allocation3 + $0x80] sm:$0xff]  ;;  %5486 = vst.msk [vmem:[#allocation3 + $0xb1] sm:$0xff] %vm31_vm1, %v5421_v15  ;;  %v5426_v13 = vmax.f32 %v5362_v34, 0.0  ;;  %v5360_v1 = vadd.f32 %v15832_v40, %v5289_v44  ;;  %v5292_v45 = vmul.f32 %v15823_v38, %v5221_v20  ;;  %v5219_v50 = vadd.f32 %v5014_v54, %v4669_v60  ;;  %v15989_v61 = vpop.f32.mrf.mxu1 }
 0x35f   :  { %v13047_v2 = vpop.f32.mrf.mxu0  ;;  %v5703_v46 = vpack.c.bf16 %v5645_v33, %v5644_v29  ;;  %v5606_v39 = vpack.c.bf16 %v5548_v26, %v5547_v18  ;;  %v18507_v34 = vld [vmem:[#allocation36_spill] sm:$0xff]  ;;  %v4673_v20 = vadd.f32 %v15743_v28, %v4123_v17  ;;  %v18509_v26 = vld [vmem:[#allocation29_spill] sm:$0xff]  ;;  %v18510_v28 = vld [vmem:[#allocation31_spill] sm:$0xff] }
 0x360   :  { %5491 = vst.msk [vmem:[#allocation3 + $0xf1] sm:$0xff] %vm31_vm1, %v5426_v13  ;;  %v5424_v59 = vmax.f32 %v5360_v1, 0.0  ;;  %v5363_v55 = vadd.f32 %v15832_v40, %v5292_v45  ;;  %v5290_v0 = vmul.f32 %v15823_v38, %v5219_v50  ;;  %v5224_v52 = vadd.f32 %v13047_v2, %v4674_v37  ;;  %v5650_v29 = vld [vmem:[#allocation3 + $0xc1] sm:$0xff] }
 0x361   :  { %13100 = vmatmul.mubr.msk.bf16.gmra.mxu1 %vm31_vm1, %v5703_v46  ;;  %13166 = vmatmul.mubr.msk.bf16.gmra.mxu0 %vm31_vm1, %v5606_v39  ;;  %v5027_v35 = vpop.f32.mrf.mxu0  ;;  %v3576_v44 = vadd.f32 %v18508_v27, %v18507_v34  ;;  %v4678_v48 = vadd.f32 %v15751_v6, %v18509_v26  ;;  %v4676_v13 = vadd.f32 %v15758_v30, %v15672_v11  ;;  %v5648_v39 = vld [vmem:[#allocation3 + $0xa9] sm:$0xff]  ;;  %v5553_v6 = vld [vmem:[#allocation3 + $0xc0] sm:$0xff] }
 0x362   :  { %5489 = vst.msk [vmem:[#allocation3 + $0xd9] sm:$0xff] %vm31_vm1, %v5424_v59  ;;  %v5427_v5 = vmax.f32 %v5363_v55, 0.0  ;;  %v5361_v60 = vadd.f32 %v15832_v40, %v5290_v0  ;;  %v5295_v49 = vmul.f32 %v15823_v38, %v5224_v52  ;;  %v5222_v15 = vadd.f32 %v5027_v35, %v4672_v7  ;;  %13103 = vmatprep.mubr.msk.bf16.mxu1 %vm31_vm1, %v5704_v57  ;;  %v5551_v57 = vld [vmem:[#allocation3 + $0xa8] sm:$0xff]  ;;  %v16006_v52 = vpop.f32.mrf.mxu1 }
 0x363   :  { %13169 = vmatprep.mubr.msk.bf16.mxu0 %vm31_vm1, %v15969_v9  ;;  %v13048_v63 = vpop.f32.mrf.mxu0  ;;  %v5651_v54 = vld [vmem:[#allocation3 + $0xc9] sm:$0xff]  ;;  %v4127_v17 = vadd.f32 %v18510_v28, %v3576_v44 }
 0x364   :  { %5492 = vst.msk [vmem:[#allocation3 + $0xf9] sm:$0xff] %vm31_vm1, %v5427_v5  ;;  %v5425_v10 = vmax.f32 %v5361_v60, 0.0  ;;  %v5366_v37 = vadd.f32 %v15832_v40, %v5295_v49  ;;  %v5293_v25 = vmul.f32 %v15823_v38, %v5222_v15  ;;  %v5225_v7 = vadd.f32 %v13048_v63, %v4675_v41  ;;  %v5554_v33 = vld [vmem:[#allocation3 + $0xc8] sm:$0xff]  ;;  %v18511_v60 = vld [vmem:[#allocation30_spill] sm:$0xff]  ;;  %v18513_v63 = vld [vmem:[#allocation40_spill] sm:$0xff] }
 0x365   :  { %v5030_v1 = vpop.f32.mrf.mxu0  ;;  %v5649_v45 = vld [vmem:[#allocation3 + $0xb1] sm:$0xff]  ;;  %v5706_v30 = vpack.c.bf16 %v5651_v54, %v5650_v29  ;;  %v16004_v0 = vpack.c.bf16 %v5554_v33, %v5553_v6  ;;  %v4679_v49 = vadd.f32 %v15766_v19, %v18511_v60 }
 0x366   :  { %v5552_v50 = vld [vmem:[#allocation3 + $0xb0] sm:$0xff]  ;;  %5490 = vst.msk [vmem:[#allocation3 + $0xe1] sm:$0xff] %vm31_vm1, %v5425_v10  ;;  %v5430_v18 = vmax.f32 %v5366_v37, 0.0  ;;  %v5364_v14 = vadd.f32 %v15832_v40, %v5293_v25  ;;  %v5296_v2 = vmul.f32 %v15823_v38, %v5225_v7  ;;  %v5223_v46 = vadd.f32 %v5030_v1, %v4673_v20  ;;  %v18512_v19 = vld [vmem:[#allocation39_spill] sm:$0xff]  ;;  %v16025_v7 = vpop.f32.mrf.mxu1  ;;  %v18514_v1 = vld [vmem:[#allocation33_spill] sm:$0xff] }
 0x367   :  { %v13051_v59 = vpop.f32.mrf.mxu0  ;;  %v5705_v55 = vpack.c.bf16 %v5649_v45, %v5648_v39  ;;  %v16002_v11 = vpack.c.bf16 %v5552_v50, %v5551_v57  ;;  %v3580_v10 = vadd.f32 %v18513_v63, %v18512_v19  ;;  %v4677_v37 = vadd.f32 %v15773_v53, %v4127_v17  ;;  %v18515_v50 = vld [vmem:[#allocation51_spill] sm:$0xff]  ;;  %v18516_v53 = vld [vmem:[#allocation53_spill] sm:$0xff] }
 0x368   :  { %5495 = vst.msk [vmem:[#allocation3 + $0x121] sm:$0xff] %vm31_vm1, %v5430_v18  ;;  %v5428_v56 = vmax.f32 %v5364_v14, 0.0  ;;  %v5367_v41 = vadd.f32 %v15832_v40, %v5296_v2  ;;  %v5294_v35 = vmul.f32 %v15823_v38, %v5223_v46  ;;  %v5228_v5 = vadd.f32 %v13051_v59, %v4678_v48  ;;  %v5654_v46 = vld [vmem:[#allocation3 + $0xf1] sm:$0xff]  ;;  %v16042_v60 = vpop.f32.mrf.mxu1 }
 0x369   :  { %13104 = vmatmul.mubr.msk.bf16.gmra.mxu1 %vm31_vm1, %v5705_v55  ;;  %13170 = vmatmul.mubr.msk.bf16.gmra.mxu0 %vm31_vm1, %v16002_v11  ;;  %v5043_v15 = vpop.f32.mrf.mxu0  ;;  %v4682_v45 = vadd.f32 %v15781_v51, %v18514_v1  ;;  %v4680_v29 = vadd.f32 %v15788_v21, %v18515_v50  ;;  %v4131_v17 = vadd.f32 %v18516_v53, %v3580_v10  ;;  %v5652_v55 = vld [vmem:[#allocation3 + $0xd9] sm:$0xff]  ;;  %v5557_v51 = vld [vmem:[#allocation3 + $0xf0] sm:$0xff] }
 0x36a   :  { %5493 = vst.msk [vmem:[#allocation3 + $0x109] sm:$0xff] %vm31_vm1, %v5428_v56  ;;  %v5431_v34 = vmax.f32 %v5367_v41, 0.0  ;;  %v5365_v27 = vadd.f32 %v15832_v40, %v5294_v35  ;;  %v5299_v44 = vmul.f32 %v15823_v38, %v5228_v5  ;;  %v5226_v20 = vadd.f32 %v5043_v15, %v4676_v13  ;;  %13107 = vmatprep.mubr.msk.bf16.mxu1 %vm31_vm1, %v5706_v30  ;;  %v5555_v30 = vld [vmem:[#allocation3 + $0xd8] sm:$0xff] }
 0x36b   :  { %13173 = vmatprep.mubr.msk.bf16.mxu0 %vm31_vm1, %v16004_v0  ;;  %v13052_v25 = vpop.f32.mrf.mxu0  ;;  %v5655_v13 = vld [vmem:[#allocation3 + $0xf9] sm:$0xff] }
 0x36c   :  { %5496 = vst.msk [vmem:[#allocation3 + $0x129] sm:$0xff] %vm31_vm1, %v5431_v34  ;;  %v5429_v54 = vmax.f32 %v5365_v27, 0.0  ;;  %v5370_v33 = vadd.f32 %v15832_v40, %v5299_v44  ;;  %v5297_v26 = vmul.f32 %v15823_v38, %v5226_v20  ;;  %v5229_v48 = vadd.f32 %v13052_v25, %v4679_v49  ;;  %v5558_v28 = vld [vmem:[#allocation3 + $0xf8] sm:$0xff]  ;;  %v18517_v44 = vld [vmem:[#allocation52_spill] sm:$0xff] }
 0x36d   :  { %v5046_v18 = vpop.f32.mrf.mxu0  ;;  %v5653_v14 = vld [vmem:[#allocation3 + $0xe1] sm:$0xff]  ;;  %v5708_v35 = vpack.c.bf16 %v5655_v13, %v5654_v46  ;;  %v16040_v5 = vpack.c.bf16 %v5558_v28, %v5557_v51  ;;  %v4683_v20 = vadd.f32 %v15796_v47, %v18517_v44  ;;  %v16061_v13 = vpop.f32.mrf.mxu1 }
 0x36e   :  { %v5556_v2 = vld [vmem:[#allocation3 + $0xe0] sm:$0xff]  ;;  %5494 = vst.msk [vmem:[#allocation3 + $0x111] sm:$0xff] %vm31_vm1, %v5429_v54  ;;  %v5434_v39 = vmax.f32 %v5370_v33, 0.0  ;;  %v5368_v57 = vadd.f32 %v15832_v40, %v5297_v26  ;;  %v5300_v6 = vmul.f32 %v15823_v38, %v5229_v48  ;;  %v5227_v59 = vadd.f32 %v5046_v18, %v4677_v37  ;;  %v18518_v47 = vld [vmem:[#allocation37_spill] sm:$0xff]  ;;  %v18520_v18 = vld [vmem:[#allocation54_spill] sm:$0xff] }
 0x36f   :  { %v13055_v56 = vpop.f32.mrf.mxu0  ;;  %v5707_v41 = vpack.c.bf16 %v5653_v14, %v5652_v55  ;;  %v16038_v21 = vpack.c.bf16 %v5556_v2, %v5555_v30  ;;  %v18519_v54 = vld [vmem:[#allocation41_spill] sm:$0xff]  ;;  %v4681_v26 = vadd.f32 %v15803_v12, %v4131_v17  ;;  %v4686_v14 = vadd.f32 %v15811_v3, %v18520_v18  ;;  %v18521_v2 = vld [vmem:[#allocation55_spill] sm:$0xff]  ;;  %v5561_v3 = vld [vmem:[#allocation3 + $0x120] sm:$0xff]  ;;  %v16078_v44 = vpop.f32.mrf.mxu1 }
 0x370   :  { %5499 = vst.msk [vmem:[#allocation3 + $0x151] sm:$0xff] %vm31_vm1, %v5434_v39  ;;  %v5432_v49 = vmax.f32 %v5368_v57, 0.0  ;;  %v5371_v15 = vadd.f32 %v15832_v40, %v5300_v6  ;;  %v5298_v34 = vmul.f32 %v15823_v38, %v5227_v59  ;;  %v5232_v27 = vadd.f32 %v13055_v56, %v4682_v45  ;;  %v18522_v12 = vld [vmem:[#allocation57_spill] sm:$0xff] }
 0x371   :  { %13108 = vmatmul.mubr.msk.bf16.gmra.mxu1 %vm31_vm1, %v5707_v41  ;;  %13174 = vmatmul.mubr.msk.bf16.gmra.mxu0 %vm31_vm1, %v16038_v21  ;;  %v5059_v19 = vpop.f32.mrf.mxu0  ;;  %v3584_v33 = vadd.f32 %v18519_v54, %v18518_v47  ;;  %v4684_v46 = vadd.f32 %v15827_v36, %v18521_v2  ;;  %v5658_v59 = vld [vmem:[#allocation3 + $0x121] sm:$0xff]  ;;  %v5656_v41 = vld [vmem:[#allocation3 + $0x109] sm:$0xff] }
 0x372   :  { %5497 = vst.msk [vmem:[#allocation3 + $0x139] sm:$0xff] %vm31_vm1, %v5432_v49  ;;  %v5435_v63 = vmax.f32 %v5371_v15, 0.0  ;;  %v5369_v10 = vadd.f32 %v15832_v40, %v5298_v34  ;;  %v5303_v37 = vmul.f32 %v15823_v38, %v5232_v27  ;;  %v5230_v25 = vadd.f32 %v5059_v19, %v4680_v29  ;;  %13111 = vmatprep.mubr.msk.bf16.mxu1 %vm31_vm1, %v5708_v35  ;;  %v5559_v35 = vld [vmem:[#allocation3 + $0x108] sm:$0xff] }
 0x373   :  { %13177 = vmatprep.mubr.msk.bf16.mxu0 %vm31_vm1, %v16040_v5  ;;  %v13056_v48 = vpop.f32.mrf.mxu0  ;;  %v5659_v29 = vld [vmem:[#allocation3 + $0x129] sm:$0xff]  ;;  %v4135_v17 = vadd.f32 %v18522_v12, %v3584_v33 }
 0x374   :  { %5500 = vst.msk [vmem:[#allocation3 + $0x159] sm:$0xff] %vm31_vm1, %v5435_v63  ;;  %v5433_v28 = vmax.f32 %v5369_v10, 0.0  ;;  %v5374_v1 = vadd.f32 %v15832_v40, %v5303_v37  ;;  %v5301_v45 = vmul.f32 %v15823_v38, %v5230_v25  ;;  %v5233_v50 = vadd.f32 %v13056_v48, %v4683_v20  ;;  %v5562_v53 = vld [vmem:[#allocation3 + $0x128] sm:$0xff]  ;;  %v18523_v37 = vld [vmem:[#allocation56_spill] sm:$0xff] }
 0x375   :  { %v5062_v39 = vpop.f32.mrf.mxu0  ;;  %v5657_v57 = vld [vmem:[#allocation3 + $0x111] sm:$0xff]  ;;  %v5710_v34 = vpack.c.bf16 %v5659_v29, %v5658_v59  ;;  %v16076_v27 = vpack.c.bf16 %v5562_v53, %v5561_v3  ;;  %v4687_v25 = vadd.f32 %v15839_v31, %v18523_v37  ;;  %v16097_v29 = vpop.f32.mrf.mxu1 }
 0x376   :  { %v5560_v6 = vld [vmem:[#allocation3 + $0x110] sm:$0xff]  ;;  %5498 = vst.msk [vmem:[#allocation3 + $0x141] sm:$0xff] %vm31_vm1, %v5433_v28  ;;  %v5438_v55 = vmax.f32 %v5374_v1, 0.0  ;;  %v5372_v30 = vadd.f32 %v15832_v40, %v5301_v45  ;;  %v5304_v51 = vmul.f32 %v15823_v38, %v5233_v50  ;;  %v5231_v56 = vadd.f32 %v5062_v39, %v4681_v26  ;;  %v18524_v31 = vld [vmem:[#allocation43_spill] sm:$0xff]  ;;  %v18525_v28 = vld [vmem:[#allocation44_spill] sm:$0xff] }
 0x377   :  { %v13059_v49 = vpop.f32.mrf.mxu0  ;;  %v5709_v15 = vpack.c.bf16 %v5657_v57, %v5656_v41  ;;  %v16074_v36 = vpack.c.bf16 %v5560_v6, %v5559_v35  ;;  %v3588_v1 = vadd.f32 %v18525_v28, %v18524_v31  ;;  %v4685_v45 = vadd.f32 %v15849_v24, %v4135_v17  ;;  %v18526_v39 = vld [vmem:[#allocation58_spill] sm:$0xff]  ;;  %v18527_v6 = vld [vmem:[#allocation59_spill] sm:$0xff]  ;;  %v18528_v24 = vld [vmem:[#allocation61_spill] sm:$0xff]  ;;  %v16114_v37 = vpop.f32.mrf.mxu1 }
 0x378   :  { %5503 = vst.msk [vmem:[#allocation3 + $0x181] sm:$0xff] %vm31_vm1, %v5438_v55  ;;  %v5436_v20 = vmax.f32 %v5372_v30, 0.0  ;;  %v5375_v19 = vadd.f32 %v15832_v40, %v5304_v51  ;;  %v5302_v63 = vmul.f32 %v15823_v38, %v5231_v56  ;;  %v5236_v10 = vadd.f32 %v13059_v49, %v4686_v14  ;;  %v5662_v56 = vld [vmem:[#allocation3 + $0x151] sm:$0xff] }
 0x379   :  { %13112 = vmatmul.mubr.msk.bf16.gmra.mxu1 %vm31_vm1, %v5709_v15  ;;  %13178 = vmatmul.mubr.msk.bf16.gmra.mxu0 %vm31_vm1, %v16074_v36  ;;  %v5075_v47 = vpop.f32.mrf.mxu0  ;;  %v4690_v57 = vadd.f32 %v15861_v23, %v18526_v39  ;;  %v4688_v59 = vadd.f32 %v15873_v42, %v18527_v6  ;;  %v4139_v17 = vadd.f32 %v18528_v24, %v3588_v1  ;;  %v5660_v15 = vld [vmem:[#allocation3 + $0x139] sm:$0xff]  ;;  %v5565_v23 = vld [vmem:[#allocation3 + $0x150] sm:$0xff] }
 0x37a   :  { %5501 = vst.msk [vmem:[#allocation3 + $0x169] sm:$0xff] %vm31_vm1, %v5436_v20  ;;  %v5439_v54 = vmax.f32 %v5375_v19, 0.0  ;;  %v5373_v33 = vadd.f32 %v15832_v40, %v5302_v63  ;;  %v5307_v26 = vmul.f32 %v15823_v38, %v5236_v10  ;;  %v5234_v48 = vadd.f32 %v5075_v47, %v4684_v46  ;;  %13115 = vmatprep.mubr.msk.bf16.mxu1 %vm31_vm1, %v5710_v34  ;;  %v5563_v34 = vld [vmem:[#allocation3 + $0x138] sm:$0xff]  ;;  %v18530_v24 = vld [vmem:[#allocation42_spill] sm:$0xff] }
 0x37b   :  { %13181 = vmatprep.mubr.msk.bf16.mxu0 %vm31_vm1, %v16076_v27  ;;  %v13060_v50 = vpop.f32.mrf.mxu0  ;;  %v5663_v46 = vld [vmem:[#allocation3 + $0x159] sm:$0xff]  ;;  %v5666_v28 = vld [vmem:[#allocation3 + $0x1b1] sm:$0xff] }
 0x37c   :  { %5504 = vst.msk [vmem:[#allocation3 + $0x189] sm:$0xff] %vm31_vm1, %v5439_v54  ;;  %v5437_v53 = vmax.f32 %v5373_v33, 0.0  ;;  %v5378_v18 = vadd.f32 %v15832_v40, %v5307_v26  ;;  %v5305_v14 = vmul.f32 %v15823_v38, %v5234_v48  ;;  %v5237_v2 = vadd.f32 %v13060_v50, %v4687_v25  ;;  %v5566_v12 = vld [vmem:[#allocation3 + $0x158] sm:$0xff]  ;;  %v18529_v26 = vld [vmem:[#allocation60_spill] sm:$0xff] }
 0x37d   :  { %v5078_v55 = vpop.f32.mrf.mxu0  ;;  %v5661_v30 = vld [vmem:[#allocation3 + $0x141] sm:$0xff]  ;;  %v5712_v63 = vpack.c.bf16 %v5663_v46, %v5662_v56  ;;  %v16112_v10 = vpack.c.bf16 %v5566_v12, %v5565_v23  ;;  %v4691_v48 = vadd.f32 %v15889_v43, %v18529_v26  ;;  %v5667_v43 = vld [vmem:[#allocation3 + $0x1b9] sm:$0xff]  ;;  %v16131_v12 = vpop.f32.mrf.mxu1 }
 0x37e   :  { %v5564_v51 = vld [vmem:[#allocation3 + $0x140] sm:$0xff]  ;;  %5502 = vst.msk [vmem:[#allocation3 + $0x171] sm:$0xff] %vm31_vm1, %v5437_v53  ;;  %v5442_v41 = vmax.f32 %v5378_v18, 0.0  ;;  %v5376_v35 = vadd.f32 %v15832_v40, %v5305_v14  ;;  %v5308_v3 = vmul.f32 %v15823_v38, %v5237_v2  ;;  %v5235_v49 = vadd.f32 %v5078_v55, %v4685_v45  ;;  %v5569_v18 = vld [vmem:[#allocation3 + $0x1b0] sm:$0xff]  ;;  %v5570_v14 = vld [vmem:[#allocation3 + $0x1b8] sm:$0xff] }
 0x37f   :  { %v13063_v20 = vpop.f32.mrf.mxu0  ;;  %v5711_v19 = vpack.c.bf16 %v5661_v30, %v5660_v15  ;;  %v16110_v42 = vpack.c.bf16 %v5564_v51, %v5563_v34  ;;  %v4689_v2 = vadd.f32 %v15904_v8, %v4139_v17  ;;  %v18531_v55 = vld [vmem:[#allocation47_spill] sm:$0xff]  ;;  %v18532_v51 = vld [vmem:[#allocation62_spill] sm:$0xff]  ;;  %v5714_v17 = vpack.c.bf16 %v5667_v43, %v5666_v28 }
 0x380   :  { %5507 = vst.msk [vmem:[#allocation3 + $0x1e1] sm:$0xff] %vm31_vm1, %v5442_v41  ;;  %v5440_v25 = vmax.f32 %v5376_v35, 0.0  ;;  %v5379_v47 = vadd.f32 %v15832_v40, %v5308_v3  ;;  %v5306_v54 = vmul.f32 %v15823_v38, %v5235_v49  ;;  %v5240_v33 = vadd.f32 %v13063_v20, %v4690_v57 }
 0x381   :  { %13116 = vmatmul.mubr.msk.bf16.gmra.mxu1 %vm31_vm1, %v5711_v19  ;;  %13182 = vmatmul.mubr.msk.bf16.gmra.mxu0 %vm31_vm1, %v16110_v42  ;;  %v5091_v31 = vpop.f32.mrf.mxu0  ;;  %v3592_v30 = vadd.f32 %v18531_v55, %v18530_v24  ;;  %v4694_v56 = vadd.f32 %v15925_v22, %v18532_v51  ;;  %v5617_v3 = vpack.c.bf16 %v5570_v14, %v5569_v18  ;;  %v5664_v20 = vld [vmem:[#allocation3 + $0x169] sm:$0xff] }
 0x382   :  { %5505 = vst.msk [vmem:[#allocation3 + $0x1c9] sm:$0xff] %vm31_vm1, %v5440_v25  ;;  %v5443_v1 = vmax.f32 %v5379_v47, 0.0  ;;  %v5377_v45 = vadd.f32 %v15832_v40, %v5306_v54  ;;  %v5311_v50 = vmul.f32 %v15823_v38, %v5240_v33  ;;  %v5238_v53 = vadd.f32 %v5091_v31, %v4688_v59  ;;  %13119 = vmatprep.mubr.msk.bf16.mxu1 %vm31_vm1, %v5712_v63  ;;  %v5567_v19 = vld [vmem:[#allocation3 + $0x168] sm:$0xff]  ;;  %v18534_v47 = vld [vmem:[#allocation63_spill] sm:$0xff] }
 0x383   :  { %13185 = vmatprep.mubr.msk.bf16.mxu0 %vm31_vm1, %v16112_v10  ;;  %v13064_v46 = vpop.f32.mrf.mxu0  ;;  %v18533_v63 = vld [vmem:[#allocation45_spill] sm:$0xff]  ;;  %v4143_v22 = vadd.f32 %v18534_v47, %v3592_v30 }
 0x384   :  { %5508 = vst.msk [vmem:[#allocation3 + $0x1e9] sm:$0xff] %vm31_vm1, %v5443_v1  ;;  %v5441_v39 = vmax.f32 %v5377_v45, 0.0  ;;  %v5382_v57 = vadd.f32 %v15832_v40, %v5311_v50  ;;  %v5309_v6 = vmul.f32 %v15823_v38, %v5238_v53  ;;  %v5241_v59 = vadd.f32 %v13064_v46, %v4691_v48  ;;  %v16148_v48 = vpop.f32.mrf.mxu1  ;;  %v18535_v50 = vld [vmem:[#allocation46_spill] sm:$0xff]  ;;  %v18536_v46 = vld [vmem:[#allocation48_spill] sm:$0xff] }
 0x385   :  { %v5094_v41 = vpop.f32.mrf.mxu0  ;;  %v5665_v35 = vld [vmem:[#allocation3 + $0x171] sm:$0xff]  ;;  %v4692_v25 = vadd.f32 %v15939_v58, %v18533_v63  ;;  %v4695_v53 = vadd.f32 %v15956_v62, %v18535_v50 }
 0x386   :  { %v5568_v8 = vld [vmem:[#allocation3 + $0x170] sm:$0xff]  ;;  %5506 = vst.msk [vmem:[#allocation3 + $0x1d1] sm:$0xff] %vm31_vm1, %v5441_v39  ;;  %v5446_v49 = vmax.f32 %v5382_v57, 0.0  ;;  %v5380_v15 = vadd.f32 %v15832_v40, %v5309_v6  ;;  %v5312_v34 = vmul.f32 %v15823_v38, %v5241_v59  ;;  %v5239_v23 = vadd.f32 %v5094_v41, %v4689_v2  ;;  %v18537_v62 = vld [vmem:[#allocation7_spill] sm:$0xff]  ;;  %v16166_v59 = vpop.f32.mrf.mxu1 }
 0x387   :  { %v13067_v54 = vpop.f32.mrf.mxu0  ;;  %v5713_v33 = vpack.c.bf16 %v5665_v35, %v5664_v20  ;;  %v16146_v26 = vpack.c.bf16 %v5568_v8, %v5567_v19  ;;  %v3596_v39 = vadd.f32 %v18537_v62, %v18536_v46  ;;  %v4693_v57 = vadd.f32 %v15971_v4, %v4143_v22  ;;  %v18538_v35 = vld [vmem:[#allocation49_spill] sm:$0xff]  ;;  %v18540_v4 = vld [vmem:[#allocation64_spill] sm:$0xff] }
 0x388   :  { %5511 = vst.msk [vmem:[#allocation3 + $0x211] sm:$0xff] %vm31_vm1, %v5446_v49  ;;  %v5444_v31 = vmax.f32 %v5380_v15, 0.0  ;;  %v5383_v28 = vadd.f32 %v15832_v40, %v5312_v34  ;;  %v5310_v1 = vmul.f32 %v15823_v38, %v5239_v23  ;;  %v5244_v45 = vadd.f32 %v13067_v54, %v4694_v56  ;;  %v5670_v20 = vld [vmem:[#allocation3 + $0x1e1] sm:$0xff] }
 0x389   :  { %13120 = vmatmul.mubr.msk.bf16.gmra.mxu1 %vm31_vm1, %v5713_v33  ;;  %13186 = vmatmul.mubr.msk.bf16.gmra.mxu0 %vm31_vm1, %v16146_v26  ;;  %v5107_v58 = vpop.f32.mrf.mxu0  ;;  %v4698_v8 = vadd.f32 %v15989_v61, %v18538_v35  ;;  %v4147_v49 = vadd.f32 %v18540_v4, %v3596_v39  ;;  %v5668_v22 = vld [vmem:[#allocation3 + $0x1c9] sm:$0xff]  ;;  %v5573_v61 = vld [vmem:[#allocation3 + $0x1e0] sm:$0xff]  ;;  %v4702_v4 = vadd.f32 %v16061_v13, %v15761_v16 }
 0x38a   :  { %5509 = vst.msk [vmem:[#allocation3 + $0x1f9] sm:$0xff] %vm31_vm1, %v5444_v31  ;;  %v5447_v43 = vmax.f32 %v5383_v28, 0.0  ;;  %v5381_v18 = vadd.f32 %v15832_v40, %v5310_v1  ;;  %v5315_v14 = vmul.f32 %v15823_v38, %v5244_v45  ;;  %v5242_v2 = vadd.f32 %v5107_v58, %v4692_v25  ;;  %13123 = vmatprep.mubr.msk.bf16.mxu1 %vm31_vm1, %v5714_v17  ;;  %v18539_v17 = vld [vmem:[#allocation50_spill] sm:$0xff]  ;;  %v5571_v54 = vld [vmem:[#allocation3 + $0x1c8] sm:$0xff]  ;;  %v16183_v45 = vpop.f32.mrf.mxu1  ;;  %v16222_v16 = vld [vmem:[%s18225_s2] ss:$0 sm:$0xff] }
 0x38b   :  { %13189 = vmatprep.mubr.msk.bf16.mxu0 %vm31_vm1, %v5617_v3  ;;  %v13068_v6 = vpop.f32.mrf.mxu0  ;;  %v5671_v56 = vld [vmem:[#allocation3 + $0x1e9] sm:$0xff]  ;;  %v4696_v3 = vadd.f32 %v16006_v52, %v18539_v17 }
 0x38c   :  { %5512 = vst.msk [vmem:[#allocation3 + $0x219] sm:$0xff] %vm31_vm1, %v5447_v43  ;;  %v5445_v24 = vmax.f32 %v5381_v18, 0.0  ;;  %v5386_v55 = vadd.f32 %v15832_v40, %v5315_v14  ;;  %v5313_v30 = vmul.f32 %v15823_v38, %v5242_v2  ;;  %v5245_v51 = vadd.f32 %v13068_v6, %v4695_v53  ;;  %v5574_v41 = vld [vmem:[#allocation3 + $0x1e8] sm:$0xff]  ;;  %v18541_v18 = vld [vmem:[#allocation4_spill] sm:$0xff] }
 0x38d   :  { %v5110_v15 = vpop.f32.mrf.mxu0  ;;  %v5669_v34 = vld [vmem:[#allocation3 + $0x1d1] sm:$0xff]  ;;  %v5716_v28 = vpack.c.bf16 %v5671_v56, %v5670_v20  ;;  %v16181_v1 = vpack.c.bf16 %v5574_v41, %v5573_v61  ;;  %v4699_v14 = vadd.f32 %v16025_v7, %v18541_v18  ;;  %v18542_v7 = vld [vmem:[#allocation5_spill] sm:$0xff]  ;;  %v18543_v6 = vld [vmem:[#allocation12_spill] sm:$0xff] }
 0x38e   :  { %v5572_v23 = vld [vmem:[#allocation3 + $0x1d0] sm:$0xff]  ;;  %5510 = vst.msk [vmem:[#allocation3 + $0x201] sm:$0xff] %vm31_vm1, %v5445_v24  ;;  %v5450_v19 = vmax.f32 %v5386_v55, 0.0  ;;  %v5384_v63 = vadd.f32 %v15832_v40, %v5313_v30  ;;  %v5316_v25 = vmul.f32 %v15823_v38, %v5245_v51  ;;  %v5243_v47 = vadd.f32 %v5110_v15, %v4693_v57  ;;  %v16202_v51 = vpop.f32.mrf.mxu1  ;;  %v18544_v15 = vld [vmem:[#allocation8_spill] sm:$0xff] }
 0x38f   :  { %v13071_v33 = vpop.f32.mrf.mxu0  ;;  %v5715_v31 = vpack.c.bf16 %v5669_v34, %v5668_v22  ;;  %v16179_v52 = vpack.c.bf16 %v5572_v23, %v5571_v54  ;;  %v3600_v24 = vadd.f32 %v18543_v6, %v18542_v7  ;;  %v4697_v55 = vadd.f32 %v16042_v60, %v4147_v49  ;;  %v18545_v60 = vld [vmem:[#allocation9_spill] sm:$0xff]  ;;  %v5577_v54 = vld [vmem:[#allocation3 + $0x210] sm:$0xff] }
 0x390   :  { %5515 = vst.msk [vmem:[#allocation3 + $0x241] sm:$0xff] %vm31_vm1, %v5450_v19  ;;  %v5448_v50 = vmax.f32 %v5384_v63, 0.0  ;;  %v5387_v53 = vadd.f32 %v15832_v40, %v5316_v25  ;;  %v5314_v58 = vmul.f32 %v15823_v38, %v5243_v47  ;;  %v5248_v43 = vadd.f32 %v13071_v33, %v4698_v8  ;;  %v5674_v63 = vld [vmem:[#allocation3 + $0x211] sm:$0xff] }
 0x391   :  { %13124 = vmatmul.mubr.msk.bf16.gmra.mxu1 %vm31_vm1, %v5715_v31  ;;  %13190 = vmatmul.mubr.msk.bf16.gmra.mxu0 %vm31_vm1, %v16179_v52  ;;  %v5123_v2 = vpop.f32.mrf.mxu0  ;;  %v4700_v34 = vadd.f32 %v16078_v44, %v18544_v15  ;;  %v4151_v49 = vadd.f32 %v18545_v60, %v3600_v24  ;;  %v5672_v47 = vld [vmem:[#allocation3 + $0x1f9] sm:$0xff]  ;;  %v18548_v24 = vld [vmem:[#allocation13_spill] sm:$0xff] }
 0x392   :  { %5513 = vst.msk [vmem:[#allocation3 + $0x229] sm:$0xff] %vm31_vm1, %v5448_v50  ;;  %v5451_v46 = vmax.f32 %v5387_v53, 0.0  ;;  %v5385_v62 = vadd.f32 %v15832_v40, %v5314_v58  ;;  %v5319_v39 = vmul.f32 %v15823_v38, %v5248_v43  ;;  %v5246_v57 = vadd.f32 %v5123_v2, %v4696_v3  ;;  %13127 = vmatprep.mubr.msk.bf16.mxu1 %vm31_vm1, %v5716_v28  ;;  %v5575_v22 = vld [vmem:[#allocation3 + $0x1f8] sm:$0xff]  ;;  %v16229_v53 = vpop.f32.mrf.mxu1  ;;  %v18546_v2 = vld [vmem:[#allocation6_spill] sm:$0xff]  ;;  %v18549_v60 = vld [vmem:[#allocation65_spill] sm:$0xff] }
 0x393   :  { %13193 = vmatprep.mubr.msk.bf16.mxu0 %vm31_vm1, %v16181_v1  ;;  %v13072_v30 = vpop.f32.mrf.mxu0  ;;  %v5675_v17 = vld [vmem:[#allocation3 + $0x219] sm:$0xff] }
 0x394   :  { %5516 = vst.msk [vmem:[#allocation3 + $0x249] sm:$0xff] %vm31_vm1, %v5451_v46  ;;  %v5449_v56 = vmax.f32 %v5385_v62, 0.0  ;;  %v5390_v41 = vadd.f32 %v15832_v40, %v5319_v39  ;;  %v5317_v35 = vmul.f32 %v15823_v38, %v5246_v57  ;;  %v5249_v8 = vadd.f32 %v13072_v30, %v4699_v14  ;;  %v5578_v3 = vld [vmem:[#allocation3 + $0x218] sm:$0xff]  ;;  %v16216_v38 = vld [vmem:[%s18226_s3] ss:$0 sm:$0xff] }
 0x395   :  { %v5126_v23 = vpop.f32.mrf.mxu0  ;;  %v5673_v20 = vld [vmem:[#allocation3 + $0x201] sm:$0xff]  ;;  %v5718_v28 = vpack.c.bf16 %v5675_v17, %v5674_v63  ;;  %v16227_v50 = vpack.c.bf16 %v5578_v3, %v5577_v54  ;;  %v4703_v46 = vadd.f32 %v16097_v29, %v18546_v2  ;;  %v18547_v29 = vld [vmem:[#allocation10_spill] sm:$0xff]  ;;  %v4701_v30 = vadd.f32 %v16114_v37, %v4151_v49  ;;  %v18550_v37 = vld [vmem:[#allocation67_spill] sm:$0xff] }
 0x396   :  { %v5576_v19 = vld [vmem:[#allocation3 + $0x200] sm:$0xff]  ;;  %5514 = vst.msk [vmem:[#allocation3 + $0x231] sm:$0xff] %vm31_vm1, %v5449_v56  ;;  %v5454_v40 = vmax.f32 %v5390_v41, 0.0  ;;  %v5388_v25 = vadd.f32 %v16216_v38, %v5317_v35  ;;  %v5320_v13 = vmul.f32 %v16222_v16, %v5249_v8  ;;  %v5247_v44 = vadd.f32 %v5126_v23, %v4697_v55  ;;  %v16248_v41 = vpop.f32.mrf.mxu1 }
 0x397   :  { %v13075_v61 = vpop.f32.mrf.mxu0  ;;  %v5717_v33 = vpack.c.bf16 %v5673_v20, %v5672_v47  ;;  %v16225_v31 = vpack.c.bf16 %v5576_v19, %v5575_v22  ;;  %v3604_v55 = vadd.f32 %v18548_v24, %v18547_v29  ;;  %v4704_v23 = vadd.f32 %v16148_v48, %v18549_v60  ;;  %v18553_v24 = vld [vmem:[#allocation11_spill] sm:$0xff]  ;;  %v18554_v60 = vld [vmem:[#allocation68_spill] sm:$0xff] }
 0x398   :  { %5519 = vst.msk [vmem:[#allocation3 + $0x271] sm:$0xff] %vm31_vm1, %v5454_v40  ;;  %v5452_v58 = vmax.f32 %v5388_v25, 0.0  ;;  %v5391_v43 = vadd.f32 %v16216_v38, %v5320_v13  ;;  %v5318_v18 = vmul.f32 %v16222_v16, %v5247_v44  ;;  %v5252_v14 = vadd.f32 %v13075_v61, %v4702_v4  ;;  %v5678_v40 = vld [vmem:[#allocation3 + $0x241] sm:$0xff] }
 0x399   :  { %13128 = vmatmul.mubr.msk.bf16.gmra.mxu1 %vm31_vm1, %v5717_v33  ;;  %13194 = vmatmul.mubr.msk.bf16.gmra.mxu0 %vm31_vm1, %v16225_v31  ;;  %v5139_v62 = vpop.f32.mrf.mxu0  ;;  %v4155_v49 = vadd.f32 %v18550_v37, %v3604_v55  ;;  %v5676_v22 = vld [vmem:[#allocation3 + $0x229] sm:$0xff] }
 0x39a   :  { %5517 = vst.msk [vmem:[#allocation3 + $0x259] sm:$0xff] %vm31_vm1, %v5452_v58  ;;  %v5455_v39 = vmax.f32 %v5391_v43, 0.0  ;;  %v5389_v57 = vadd.f32 %v16216_v38, %v5318_v18  ;;  %v5323_v7 = vmul.f32 %v16222_v16, %v5252_v14  ;;  %v5250_v6 = vadd.f32 %v5139_v62, %v4700_v34  ;;  %13131 = vmatprep.mubr.msk.bf16.mxu1 %vm31_vm1, %v5718_v28  ;;  %v5579_v54 = vld [vmem:[#allocation3 + $0x228] sm:$0xff]  ;;  %v16265_v58 = vpop.f32.mrf.mxu1 }
 0x39b   :  { %13197 = vmatprep.mubr.msk.bf16.mxu0 %vm31_vm1, %v16227_v50  ;;  %v13076_v56 = vpop.f32.mrf.mxu0  ;;  %v5679_v4 = vld [vmem:[#allocation3 + $0x249] sm:$0xff]  ;;  %v4706_v34 = vadd.f32 %v16131_v12, %v15776_v32  ;;  %v5581_v32 = vld [vmem:[#allocation3 + $0x240] sm:$0xff] }
 0x39c   :  { %5520 = vst.msk [vmem:[#allocation3 + $0x279] sm:$0xff] %vm31_vm1, %v5455_v39  ;;  %v5453_v35 = vmax.f32 %v5389_v57, 0.0  ;;  %v5394_v8 = vadd.f32 %v16216_v38, %v5323_v7  ;;  %v5321_v17 = vmul.f32 %v16222_v16, %v5250_v6  ;;  %v5253_v3 = vadd.f32 %v13076_v56, %v4703_v46  ;;  %v5582_v15 = vld [vmem:[#allocation3 + $0x248] sm:$0xff]  ;;  %v18551_v46 = vld [vmem:[#allocation66_spill] sm:$0xff] }
 0x39d   :  { %v5142_v20 = vpop.f32.mrf.mxu0  ;;  %v5677_v19 = vld [vmem:[#allocation3 + $0x231] sm:$0xff]  ;;  %v5720_v33 = vpack.c.bf16 %v5679_v4, %v5678_v40  ;;  %v16263_v28 = vpack.c.bf16 %v5582_v15, %v5581_v32  ;;  %v4707_v62 = vadd.f32 %v16166_v59, %v18551_v46  ;;  %v18555_v37 = vld [vmem:[#allocation69_spill] sm:$0xff] }
 0x39e   :  { %v5580_v63 = vld [vmem:[#allocation3 + $0x230] sm:$0xff]  ;;  %5518 = vst.msk [vmem:[#allocation3 + $0x261] sm:$0xff] %vm31_vm1, %v5453_v35  ;;  %v5458_v25 = vmax.f32 %v5394_v8, 0.0  ;;  %v5392_v13 = vadd.f32 %v16216_v38, %v5321_v17  ;;  %v5324_v44 = vmul.f32 %v16222_v16, %v5253_v3  ;;  %v5251_v47 = vadd.f32 %v5142_v20, %v4701_v30  ;;  %v13021_v35 = vpop.f32.mrf.mxu1 }
 0x39f   :  { %v13079_v12 = vpop.f32.mrf.mxu0  ;;  %v5719_v61 = vpack.c.bf16 %v5677_v19, %v5676_v22  ;;  %v16261_v48 = vpack.c.bf16 %v5580_v63, %v5579_v54  ;;  %v18552_v59 = vld [vmem:[#allocation14_spill] sm:$0xff]  ;;  %v4705_v30 = vadd.f32 %v16183_v45, %v4155_v49  ;;  %v4708_v20 = vadd.f32 %v16229_v53, %v18555_v37  ;;  %v18556_v19 = vld [vmem:[#allocation71_spill] sm:$0xff]  ;;  %v18560_v37 = vld [vmem:[#allocation72_spill] sm:$0xff] }
 0x3a0   :  { %5523 = vst.msk [vmem:[#allocation3 + $0x2a1] sm:$0xff] %vm31_vm1, %v5458_v25  ;;  %v5456_v43 = vmax.f32 %v5392_v13, 0.0  ;;  %v5395_v18 = vadd.f32 %v16216_v38, %v5324_v44  ;;  %v5322_v14 = vmul.f32 %v16222_v16, %v5251_v47  ;;  %v5256_v2 = vadd.f32 %v13079_v12, %v4706_v34  ;;  %v5682_v25 = vld [vmem:[#allocation3 + $0x271] sm:$0xff] }
 0x3a1   :  { %13132 = vmatmul.mubr.msk.bf16.gmra.mxu1 %vm31_vm1, %v5719_v61  ;;  %13198 = vmatmul.mubr.msk.bf16.gmra.mxu0 %vm31_vm1, %v16261_v48  ;;  %v5155_v39 = vpop.f32.mrf.mxu0  ;;  %v3608_v55 = vadd.f32 %v18553_v24, %v18552_v59  ;;  %v5680_v54 = vld [vmem:[#allocation3 + $0x259] sm:$0xff] }
 0x3a2   :  { %5521 = vst.msk [vmem:[#allocation3 + $0x289] sm:$0xff] %vm31_vm1, %v5456_v43  ;;  %v5459_v57 = vmax.f32 %v5395_v18, 0.0  ;;  %v5393_v7 = vadd.f32 %v16216_v38, %v5322_v14  ;;  %v5327_v6 = vmul.f32 %v16222_v16, %v5256_v2  ;;  %v5254_v29 = vadd.f32 %v5155_v39, %v4704_v23  ;;  %13135 = vmatprep.mubr.msk.bf16.mxu1 %vm31_vm1, %v5720_v33  ;;  %v5583_v32 = vld [vmem:[#allocation3 + $0x258] sm:$0xff]  ;;  %v4637_v18 = vpop.f32.mrf.mxu1  ;;  %v18557_v39 = vld [vmem:[#allocation70_spill] sm:$0xff] }
 0x3a3   :  { %13201 = vmatprep.mubr.msk.bf16.mxu0 %vm31_vm1, %v16263_v28  ;;  %v13080_v56 = vpop.f32.mrf.mxu0  ;;  %v5683_v15 = vld [vmem:[#allocation3 + $0x279] sm:$0xff]  ;;  %v4710_v23 = vadd.f32 %v16202_v51, %v18554_v60  ;;  %v4159_v45 = vadd.f32 %v18556_v19, %v3608_v55  ;;  %v5585_v51 = vld [vmem:[#allocation3 + $0x270] sm:$0xff]  ;;  %v18561_v19 = vld [vmem:[#allocation73_spill] sm:$0xff] }
 0x3a4   :  { %5524 = vst.msk [vmem:[#allocation3 + $0x2a9] sm:$0xff] %vm31_vm1, %v5459_v57  ;;  %v5457_v8 = vmax.f32 %v5393_v7, 0.0  ;;  %v5398_v17 = vadd.f32 %v16216_v38, %v5327_v6  ;;  %v5325_v3 = vmul.f32 %v16222_v16, %v5254_v29  ;;  %v5257_v4 = vadd.f32 %v13080_v56, %v4707_v62  ;;  %v5586_v34 = vld [vmem:[#allocation3 + $0x278] sm:$0xff]  ;;  %v18559_v55 = vld [vmem:[#allocation16_spill] sm:$0xff] }
 0x3a5   :  { %v5158_v49 = vpop.f32.mrf.mxu0  ;;  %v5681_v63 = vld [vmem:[#allocation3 + $0x261] sm:$0xff]  ;;  %v5722_v33 = vpack.c.bf16 %v5683_v15, %v5682_v25  ;;  %v16297_v43 = vpack.c.bf16 %v5586_v34, %v5585_v51  ;;  %v4711_v57 = vadd.f32 %v16248_v41, %v18557_v39  ;;  %v18558_v41 = vld [vmem:[#allocation15_spill] sm:$0xff]  ;;  %v4709_v56 = vadd.f32 %v16265_v58, %v4159_v45 }
 0x3a6   :  { %v5584_v40 = vld [vmem:[#allocation3 + $0x260] sm:$0xff]  ;;  %5522 = vst.msk [vmem:[#allocation3 + $0x291] sm:$0xff] %vm31_vm1, %v5457_v8  ;;  %v5462_v13 = vmax.f32 %v5398_v17, 0.0  ;;  %v5396_v44 = vadd.f32 %v16216_v38, %v5325_v3  ;;  %v5328_v47 = vmul.f32 %v16222_v16, %v5257_v4  ;;  %v5255_v22 = vadd.f32 %v5158_v49, %v4705_v30  ;;  %v13022_v17 = vpop.f32.mrf.mxu1 }
 0x3a7   :  { %v13083_v12 = vpop.f32.mrf.mxu0  ;;  %v5721_v61 = vpack.c.bf16 %v5681_v63, %v5680_v54  ;;  %v16295_v53 = vpack.c.bf16 %v5584_v40, %v5583_v32  ;;  %v3612_v30 = vadd.f32 %v18559_v55, %v18558_v41  ;;  %v4712_v49 = vadd.f32 %v4637_v18, %v18561_v19  ;;  %v18562_v63 = vld [vmem:[#allocation75_spill] sm:$0xff] }
 0x3a8   :  { %5527 = vst.msk [vmem:[#allocation3 + $0x2d1] sm:$0xff] %vm31_vm1, %v5462_v13  ;;  %v5460_v14 = vmax.f32 %v5396_v44, 0.0  ;;  %v5399_v2 = vadd.f32 %v16216_v38, %v5328_v47  ;;  %v5326_v46 = vmul.f32 %v16222_v16, %v5255_v22  ;;  %v5260_v62 = vadd.f32 %v13083_v12, %v4710_v23  ;;  %v5686_v13 = vld [vmem:[#allocation3 + $0x2a1] sm:$0xff] }
 0x3a9   :  { %13136 = vmatmul.mubr.msk.bf16.gmra.mxu1 %vm31_vm1, %v5721_v61  ;;  %13202 = vmatmul.mubr.msk.bf16.gmra.mxu0 %vm31_vm1, %v16295_v53  ;;  %v5171_v7 = vpop.f32.mrf.mxu0  ;;  %v4163_v40 = vadd.f32 %v18562_v63, %v3612_v30  ;;  %v5684_v32 = vld [vmem:[#allocation3 + $0x289] sm:$0xff]  ;;  %v5589_v12 = vld [vmem:[#allocation3 + $0x2a0] sm:$0xff] }
 0x3aa   :  { %5525 = vst.msk [vmem:[#allocation3 + $0x2b9] sm:$0xff] %vm31_vm1, %v5460_v14  ;;  %v5463_v6 = vmax.f32 %v5399_v2, 0.0  ;;  %v5397_v29 = vadd.f32 %v16216_v38, %v5326_v46  ;;  %v5331_v59 = vmul.f32 %v16222_v16, %v5260_v62  ;;  %v5258_v24 = vadd.f32 %v5171_v7, %v4708_v20  ;;  %13139 = vmatprep.mubr.msk.bf16.mxu1 %vm31_vm1, %v5722_v33  ;;  %v5587_v51 = vld [vmem:[#allocation3 + $0x288] sm:$0xff]  ;;  %v4640_v2 = vpop.f32.mrf.mxu1  ;;  %v18563_v7 = vld [vmem:[#allocation74_spill] sm:$0xff] }
 0x3ab   :  { %13205 = vmatprep.mubr.msk.bf16.mxu0 %vm31_vm1, %v16297_v43  ;;  %v13084_v8 = vpop.f32.mrf.mxu0  ;;  %v5687_v60 = vld [vmem:[#allocation3 + $0x2a9] sm:$0xff]  ;;  %v4714_v20 = vadd.f32 %v13021_v35, %v18560_v37  ;;  %v4713_v30 = vadd.f32 %v4640_v2, %v4163_v40 }
 0x3ac   :  { %5528 = vst.msk [vmem:[#allocation3 + $0x2d9] sm:$0xff] %vm31_vm1, %v5463_v6  ;;  %v5461_v3 = vmax.f32 %v5397_v29, 0.0  ;;  %v5402_v4 = vadd.f32 %v16216_v38, %v5331_v59  ;;  %v5329_v15 = vmul.f32 %v16222_v16, %v5258_v24  ;;  %v5261_v34 = vadd.f32 %v13084_v8, %v4711_v57  ;;  %v5590_v23 = vld [vmem:[#allocation3 + $0x2a8] sm:$0xff] }
 0x3ad   :  { %v5174_v25 = vpop.f32.mrf.mxu0  ;;  %v5685_v58 = vld [vmem:[#allocation3 + $0x291] sm:$0xff]  ;;  %v5724_v18 = vpack.c.bf16 %v5687_v60, %v5686_v13  ;;  %v16327_v14 = vpack.c.bf16 %v5590_v23, %v5589_v12  ;;  %v4715_v6 = vadd.f32 %v13022_v17, %v18563_v7 }
 0x3ae   :  { %v5588_v45 = vld [vmem:[#allocation3 + $0x290] sm:$0xff]  ;;  %5526 = vst.msk [vmem:[#allocation3 + $0x2c1] sm:$0xff] %vm31_vm1, %v5461_v3  ;;  %v5466_v44 = vmax.f32 %v5402_v4, 0.0  ;;  %v5400_v47 = vadd.f32 %v16216_v38, %v5329_v15  ;;  %v5332_v22 = vmul.f32 %v16222_v16, %v5261_v34  ;;  %v5259_v54 = vadd.f32 %v5174_v25, %v4709_v56 }
 0x3af   :  { %v13087_v35 = vpop.f32.mrf.mxu0  ;;  %v5723_v61 = vpack.c.bf16 %v5685_v58, %v5684_v32  ;;  %v16325_v33 = vpack.c.bf16 %v5588_v45, %v5587_v51  ;;  %v5690_v58 = vld [vmem:[#allocation3 + $0x2d1] sm:$0xff] }
 0x3b0   :  { %5531 = vst.msk [vmem:[#allocation3 + $0x301] sm:$0xff] %vm31_vm1, %v5466_v44  ;;  %v5464_v46 = vmax.f32 %v5400_v47, 0.0  ;;  %v5403_v62 = vadd.f32 %v16216_v38, %v5332_v22  ;;  %v5330_v39 = vmul.f32 %v16222_v16, %v5259_v54  ;;  %v5264_v57 = vadd.f32 %v13087_v35, %v4714_v20  ;;  %v5593_v47 = vld [vmem:[#allocation3 + $0x2d0] sm:$0xff] }
 0x3b1   :  { %13140 = vmatmul.mubr.msk.bf16.gmra.mxu1 %vm31_vm1, %v5723_v61  ;;  %13206 = vmatmul.mubr.msk.bf16.gmra.mxu0 %vm31_vm1, %v16325_v33  ;;  %v5187_v29 = vpop.f32.mrf.mxu0  ;;  %v5688_v40 = vld [vmem:[#allocation3 + $0x2b9] sm:$0xff] }
 0x3b2   :  { %5529 = vst.msk [vmem:[#allocation3 + $0x2e9] sm:$0xff] %vm31_vm1, %v5464_v46  ;;  %v5467_v59 = vmax.f32 %v5403_v62, 0.0  ;;  %v5401_v24 = vadd.f32 %v16216_v38, %v5330_v39  ;;  %v5335_v41 = vmul.f32 %v16222_v16, %v5264_v57  ;;  %v5262_v55 = vadd.f32 %v5187_v29, %v4712_v49  ;;  %13143 = vmatprep.mubr.msk.bf16.mxu1 %vm31_vm1, %v5724_v18  ;;  %v5591_v25 = vld [vmem:[#allocation3 + $0x2b8] sm:$0xff] }
 0x3b3   :  { %13209 = vmatprep.mubr.msk.bf16.mxu0 %vm31_vm1, %v16327_v14  ;;  %v13088_v56 = vpop.f32.mrf.mxu0  ;;  %v5691_v15 = vld [vmem:[#allocation3 + $0x2d9] sm:$0xff] }
 0x3b4   :  { %5532 = vst.msk [vmem:[#allocation3 + $0x309] sm:$0xff] %vm31_vm1, %v5467_v59  ;;  %v5465_v8 = vmax.f32 %v5401_v24, 0.0  ;;  %v5406_v17 = vadd.f32 %v16216_v38, %v5335_v41  ;;  %v5333_v3 = vmul.f32 %v16222_v16, %v5262_v55  ;;  %v5265_v4 = vadd.f32 %v13088_v56, %v4715_v6  ;;  %v5594_v37 = vld [vmem:[#allocation3 + $0x2d8] sm:$0xff]  ;;  %v6508_v24 = vld [vmem:[#allocation3 + $0x2] sm:$0xff]  ;;  %v6509_v41 = vld [vmem:[#allocation3 + $0xa] sm:$0xff] }
 0x3b5   :  { %v5190_v34 = vpop.f32.mrf.mxu0  ;;  %v5689_v60 = vld [vmem:[#allocation3 + $0x2c1] sm:$0xff]  ;;  %v5726_v44 = vpack.c.bf16 %v5691_v15, %v5690_v58  ;;  %v16353_v51 = vpack.c.bf16 %v5594_v37, %v5593_v47  ;;  %v6572_v15 = vpack.c.bf16 %v6509_v41, %v6508_v24 }
 0x3b6   :  { %v5592_v23 = vld [vmem:[#allocation3 + $0x2c0] sm:$0xff]  ;;  %5530 = vst.msk [vmem:[#allocation3 + $0x2f1] sm:$0xff] %vm31_vm1, %v5465_v8  ;;  %v5470_v20 = vmax.f32 %v5406_v17, 0.0  ;;  %v5404_v19 = vadd.f32 %v16216_v38, %v5333_v3  ;;  %v5336_v49 = vmul.f32 %v16222_v16, %v5265_v4  ;;  %v5263_v63 = vadd.f32 %v5190_v34, %v4713_v30  ;;  %v7058_v34 = vld [vmem:[#allocation3 + $0x18] sm:$0xff] }
 0x3b7   :  { %v5725_v45 = vpack.c.bf16 %v5689_v60, %v5688_v40  ;;  %v16348_v13 = vpack.c.bf16 %v5592_v23, %v5591_v25  ;;  %v5597_v6 = vld [vmem:[#allocation3 + $0x300] sm:$0xff]  ;;  %v7063_v40 = vld [vmem:[#allocation3 + $0x50] sm:$0xff] }
 0x3b8   :  { %5535 = vst.msk [vmem:[#allocation3 + $0x331] sm:$0xff] %vm31_vm1, %v5470_v20  ;;  %v5468_v22 = vmax.f32 %v5404_v19, 0.0  ;;  %v5407_v54 = vadd.f32 %v16216_v38, %v5336_v49  ;;  %v5334_v32 = vmul.f32 %v16222_v16, %v5263_v63  ;;  %v7059_v30 = vld [vmem:[#allocation3 + $0x20] sm:$0xff]  ;;  %v7061_v20 = vld [vmem:[#allocation3 + $0x38] sm:$0xff]  ;;  %v7060_v63 = vld [vmem:[#allocation3 + $0x30] sm:$0xff] }
 0x3b9   :  { %13144 = vmatmul.mubr.msk.bf16.gmra.mxu1 %vm31_vm1, %v5725_v45  ;;  %13210 = vmatmul.mubr.msk.bf16.gmra.mxu0 %vm31_vm1, %v16348_v13  ;;  %v5692_v61 = vld [vmem:[#allocation3 + $0x2e9] sm:$0xff]  ;;  %v7122_v60 = vpack.c.bf16 %v7059_v30, %v7058_v34  ;;  %v6510_v23 = vld [vmem:[#allocation3 + $0x1a] sm:$0xff]  ;;  %v6512_v19 = vld [vmem:[#allocation3 + $0x32] sm:$0xff]  ;;  %v7123_v45 = vpack.c.bf16 %v7061_v20, %v7060_v63 }
 0x3ba   :  { %5533 = vst.msk [vmem:[#allocation3 + $0x319] sm:$0xff] %vm31_vm1, %v5468_v22  ;;  %v5471_v12 = vmax.f32 %v5407_v54, 0.0  ;;  %v5405_v35 = vadd.f32 %v16216_v38, %v5334_v32  ;;  %13147 = vmatprep.mubr.msk.bf16.mxu1 %vm31_vm1, %v5726_v44  ;;  %13213 = vmatprep.mubr.msk.bf16.mxu0 %vm31_vm1, %v16353_v51  ;;  %v5595_v18 = vld [vmem:[#allocation3 + $0x2e8] sm:$0xff]  ;;  %v6513_v49 = vld [vmem:[#allocation3 + $0x3a] sm:$0xff]  ;;  %v11480_v25 = vld [vmem:[%s18224_s4 + $0x14] sm:$0xf] }
 0x3bb   :  { %v5695_v2 = vld [vmem:[#allocation3 + $0x309] sm:$0xff]  ;;  %v5694_v38 = vld [vmem:[#allocation3 + $0x301] sm:$0xff]  ;;  %13697 = vmatprep.subr.msk.bf16.mxu0 %vm734_vm0, %v11480_v25  ;;  %v16392_v22 = vpack.c.bf16 %v6513_v49, %v6512_v19  ;;  %v8353_v32 = vsel %vm734_vm0, %v11480_v25, 0  ;;  %v6520_v30 = vld [vmem:[#allocation3 + $0x92] sm:$0xff] }
 0x3bc   :  { %5536 = vst.msk [vmem:[#allocation3 + $0x339] sm:$0xff] %vm31_vm1, %v5471_v12  ;;  %v5469_v16 = vmax.f32 %v5405_v35, 0.0  ;;  %v5598_v39 = vld [vmem:[#allocation3 + $0x308] sm:$0xff]  ;;  %v5728_v29 = vpack.c.bf16 %v5695_v2, %v5694_v38  ;;  %v13704_v44 = vld [vmem:[%s18224_s4 + $0x10] sm:$0xf]  ;;  %v6518_v41 = vld [vmem:[#allocation3 + $0x7a] sm:$0xff] }
 0x3bd   :  { %v5693_v46 = vld [vmem:[#allocation3 + $0x2f1] sm:$0xff]  ;;  %v16367_v59 = vpack.c.bf16 %v5598_v39, %v5597_v6  ;;  %v6511_v37 = vld [vmem:[#allocation3 + $0x22] sm:$0xff]  ;;  %v7803_v47 = vsel %vm734_vm0, %v13704_v44, 0  ;;  %v6529_v19 = vld [vmem:[#allocation3 + $0xfa] sm:$0xff] }
 0x3be   :  { %v5596_v62 = vld [vmem:[#allocation3 + $0x2f0] sm:$0xff]  ;;  %5534 = vst.msk [vmem:[#allocation3 + $0x321] sm:$0xff] %vm31_vm1, %v5469_v16  ;;  %v5727_v57 = vpack.c.bf16 %v5693_v46, %v5692_v61  ;;  %v16385_v58 = vpack.c.bf16 %v6511_v37, %v6510_v23  ;;  %v7062_v54 = vld [vmem:[#allocation3 + $0x48] sm:$0xff]  ;;  %v16401_v35 = vld [vmem:[%s18224_s4 + $0x18] sm:$0xf] }
 0x3bf   :  { %v16365_v7 = vpack.c.bf16 %v5596_v62, %v5595_v18  ;;  %v7124_v12 = vpack.c.bf16 %v7063_v40, %v7062_v54  ;;  %v6514_v16 = vld [vmem:[#allocation3 + $0x4a] sm:$0xff]  ;;  %v6515_v61 = vld [vmem:[#allocation3 + $0x52] sm:$0xff]  ;;  %v6516_v2 = vld [vmem:[#allocation3 + $0x62] sm:$0xff] }
 0x3c0   :  { %v7065_v18 = vld [vmem:[#allocation3 + $0x68] sm:$0xff]  ;;  %v7067_v62 = vld [vmem:[#allocation3 + $0x80] sm:$0xff]  ;;  %v7066_v6 = vld [vmem:[#allocation3 + $0x78] sm:$0xff] }
 0x3c1   :  { %13148 = vmatmul.mubr.msk.bf16.gmra.mxu1 %vm31_vm1, %v5727_v57  ;;  %13214 = vmatmul.mubr.msk.bf16.gmra.mxu0 %vm31_vm1, %v16365_v7  ;;  %v5696_v55 = vld [vmem:[#allocation3 + $0x319] sm:$0xff]  ;;  %v6517_v46 = vld [vmem:[#allocation3 + $0x6a] sm:$0xff]  ;;  %v16408_v57 = vpack.c.bf16 %v6515_v61, %v6514_v16  ;;  %v7126_v24 = vpack.c.bf16 %v7067_v62, %v7066_v6  ;;  %v6524_v34 = vld [vmem:[#allocation3 + $0xc2] sm:$0xff] }
 0x3c2   :  { %13151 = vmatprep.mubr.msk.bf16.mxu1 %vm31_vm1, %v5728_v29  ;;  %13217 = vmatprep.mubr.msk.bf16.mxu0 %vm31_vm1, %v16367_v59  ;;  %v5599_v8 = vld [vmem:[#allocation3 + $0x318] sm:$0xff]  ;;  %v7064_v39 = vld [vmem:[#allocation3 + $0x60] sm:$0xff]  ;;  %v16410_v29 = vpack.c.bf16 %v6517_v46, %v6516_v2  ;;  %v6533_v25 = vld [vmem:[#allocation3 + $0x12a] sm:$0xff] }
 0x3c3   :  { %v7125_v38 = vpack.c.bf16 %v7065_v18, %v7064_v39  ;;  %v6528_v20 = vld [vmem:[#allocation3 + $0xf2] sm:$0xff]  ;;  %v6532_v40 = vld [vmem:[#allocation3 + $0x122] sm:$0xff]  ;;  %v6537_v54 = vld [vmem:[#allocation3 + $0x15a] sm:$0xff] }
 0x3c4   :  { %v16444_v63 = vpack.c.bf16 %v6529_v19, %v6528_v20  ;;  %v16456_v44 = vpack.c.bf16 %v6533_v25, %v6532_v40  ;;  %v6538_v16 = vld [vmem:[#allocation3 + $0x16a] sm:$0xff]  ;;  %v6539_v61 = vld [vmem:[#allocation3 + $0x172] sm:$0xff]  ;;  %v7088_v2 = vld [vmem:[#allocation3 + $0x180] sm:$0xff] }
 0x3c5   :  { %v5697_v56 = vld [vmem:[#allocation3 + $0x321] sm:$0xff]  ;;  %v16478_v62 = vpack.c.bf16 %v6539_v61, %v6538_v16  ;;  %v6545_v6 = vld [vmem:[#allocation3 + $0x1ea] sm:$0xff]  ;;  %v6548_v20 = vld [vmem:[#allocation3 + $0x212] sm:$0xff] }
 0x3c6   :  { %v5600_v17 = vld [vmem:[#allocation3 + $0x320] sm:$0xff]  ;;  %v5729_v3 = vpack.c.bf16 %v5697_v56, %v5696_v55  ;;  %v7089_v18 = vld [vmem:[#allocation3 + $0x188] sm:$0xff]  ;;  %v6551_v61 = vld [vmem:[#allocation3 + $0x232] sm:$0xff] }
 0x3c7   :  { %v16375_v4 = vpack.c.bf16 %v5600_v17, %v5599_v8  ;;  %v6519_v55 = vld [vmem:[#allocation3 + $0x82] sm:$0xff]  ;;  %v6521_v56 = vld [vmem:[#allocation3 + $0x9a] sm:$0xff]  ;;  %v7137_v39 = vpack.c.bf16 %v7089_v18, %v7088_v2  ;;  %v6550_v16 = vld [vmem:[#allocation3 + $0x22a] sm:$0xff] }
 0x3c8   :  { %v16418_v8 = vpack.c.bf16 %v6519_v55, %v6518_v41  ;;  %v16420_v17 = vpack.c.bf16 %v6521_v56, %v6520_v30  ;;  %v6549_v19 = vld [vmem:[#allocation3 + $0x21a] sm:$0xff] }
 0x3c9   :  { %13152 = vmatmul.mubr.msk.bf16.gmra.mxu1 %vm31_vm1, %v5729_v3  ;;  %13218 = vmatmul.mubr.msk.bf16.gmra.mxu0 %vm31_vm1, %v16375_v4  ;;  %v6522_v3 = vld [vmem:[#allocation3 + $0xaa] sm:$0xff] }
 0x3ca   :  { %13289 = vmatprep.mubr.msk.bf16.mxu0 %vm31_vm1, %v7122_v60  ;;  %13223 = vmatprep.mubr.msk.bf16.mxu1 %vm31_vm1, %v6572_v15  ;;  %v6523_v15 = vld [vmem:[#allocation3 + $0xb2] sm:$0xff]  ;;  %v6525_v60 = vld [vmem:[#allocation3 + $0xca] sm:$0xff] }
 0x3cb   :  { %v16430_v23 = vpack.c.bf16 %v6523_v15, %v6522_v3  ;;  %v16432_v37 = vpack.c.bf16 %v6525_v60, %v6524_v34  ;;  %v6546_v34 = vld [vmem:[#allocation3 + $0x1fa] sm:$0xff]  ;;  %v6547_v60 = vld [vmem:[#allocation3 + $0x202] sm:$0xff] }
 0x3cc   :  { %v16504_v40 = vpack.c.bf16 %v6547_v60, %v6546_v34 }
 0x3d1   :  { %13224 = vmatmul.mubr.msk.bf16.vlgmr.msra.gmra.mxu1 %vm31_vm1, %v16385_v58  ;;  %13290 = vmatmul.mubr.msk.bf16.vlgmr.msra.gmra.mxu0 %vm31_vm1, %v7123_v45 }
 0x3d2   :  { %13354 = vmatpush3.bf16.msra.mxu1 %v7803_v47  ;;  %13227 = vmatprep.mubr.msk.bf16.mxu1 %vm31_vm1, %v16392_v22  ;;  %v6536_v47 = vld [vmem:[#allocation3 + $0x152] sm:$0xff] }
 0x3d3   :  { %13293 = vmatprep.mubr.msk.bf16.mxu0 %vm31_vm1, %v7124_v12  ;;  %13420 = vmatpush3.bf16.msra.mxu0 %v8353_v32  ;;  %v16468_v12 = vpack.c.bf16 %v6537_v54, %v6536_v47 }
 0x3d4   :  { %13698 = vmatprep.subr.msk.bf16.mxu1 %vm734_vm0, %v16401_v35 }
 0x3d9   :  { %13228 = vmatmul.mubr.msk.bf16.gmra.mxu1 %vm31_vm1, %v16408_v57  ;;  %13294 = vmatmul.mubr.msk.bf16.gmra.mxu0 %vm31_vm1, %v7125_v38  ;;  %v6544_v38 = vld [vmem:[#allocation3 + $0x1e2] sm:$0xff] }
 0x3da   :  { %13231 = vmatprep.mubr.msk.bf16.mxu1 %vm31_vm1, %v16410_v29  ;;  %13297 = vmatprep.mubr.msk.bf16.mxu0 %vm31_vm1, %v7126_v24  ;;  %v16488_v41 = vpack.c.bf16 %v6545_v6, %v6544_v38  ;;  %v16524_v38 = vpack.c.bf16 %v6551_v61, %v6550_v16 }
 0x3e1   :  { %13232 = vmatmul.mubr.msk.bf16.gmra.mxu1 %vm31_vm1, %v16418_v8  ;;  %13298 = vmatmul.mubr.msk.bf16.gmra.mxu0 %vm31_vm1, %v15969_v9  ;;  %v6526_v9 = vld [vmem:[#allocation3 + $0xda] sm:$0xff] }
 0x3e2   :  { %13235 = vmatprep.mubr.msk.bf16.mxu1 %vm31_vm1, %v16420_v17  ;;  %13301 = vmatprep.mubr.msk.bf16.mxu0 %vm31_vm1, %v16002_v11  ;;  %v6527_v11 = vld [vmem:[#allocation3 + $0xe2] sm:$0xff] }
 0x3e3   :  { %v16442_v49 = vpack.c.bf16 %v6527_v11, %v6526_v9 }
 0x3e9   :  { %13236 = vmatmul.mubr.msk.bf16.gmra.mxu1 %vm31_vm1, %v16430_v23  ;;  %13302 = vmatmul.mubr.msk.bf16.gmra.mxu0 %vm31_vm1, %v16004_v0  ;;  %v6530_v0 = vld [vmem:[#allocation3 + $0x10a] sm:$0xff] }
 0x3ea   :  { %13239 = vmatprep.mubr.msk.bf16.mxu1 %vm31_vm1, %v16432_v37  ;;  %13305 = vmatprep.mubr.msk.bf16.mxu0 %vm31_vm1, %v16038_v21  ;;  %v6531_v21 = vld [vmem:[#allocation3 + $0x112] sm:$0xff] }
 0x3eb   :  { %v16454_v45 = vpack.c.bf16 %v6531_v21, %v6530_v0 }
 0x3f1   :  { %13240 = vmatmul.mubr.msk.bf16.gmra.mxu1 %vm31_vm1, %v16442_v49  ;;  %13306 = vmatmul.mubr.msk.bf16.gmra.mxu0 %vm31_vm1, %v16040_v5  ;;  %v6534_v5 = vld [vmem:[#allocation3 + $0x13a] sm:$0xff] }
 0x3f2   :  { %13243 = vmatprep.mubr.msk.bf16.mxu1 %vm31_vm1, %v16444_v63  ;;  %13309 = vmatprep.mubr.msk.bf16.mxu0 %vm31_vm1, %v16074_v36  ;;  %v6535_v36 = vld [vmem:[#allocation3 + $0x142] sm:$0xff] }
 0x3f3   :  { %v16466_v32 = vpack.c.bf16 %v6535_v36, %v6534_v5  ;;  %v16508_v5 = vpack.c.bf16 %v6549_v19, %v6548_v20 }
 0x3f9   :  { %13244 = vmatmul.mubr.msk.bf16.gmra.mxu1 %vm31_vm1, %v16454_v45  ;;  %13310 = vmatmul.mubr.msk.bf16.gmra.mxu0 %vm31_vm1, %v16076_v27  ;;  %v6540_v27 = vld [vmem:[#allocation3 + $0x1b2] sm:$0xff] }
 0x3fa   :  { %13247 = vmatprep.mubr.msk.bf16.mxu1 %vm31_vm1, %v16456_v44  ;;  %13313 = vmatprep.mubr.msk.bf16.mxu0 %vm31_vm1, %v16110_v42  ;;  %v6541_v42 = vld [vmem:[#allocation3 + $0x1ba] sm:$0xff] }
 0x3fb   :  { %v6588_v46 = vpack.c.bf16 %v6541_v42, %v6540_v27 }
 0x401   :  { %13248 = vmatmul.mubr.msk.bf16.gmra.mxu1 %vm31_vm1, %v16466_v32  ;;  %13314 = vmatmul.mubr.msk.bf16.gmra.mxu0 %vm31_vm1, %v16112_v10  ;;  %v6542_v10 = vld [vmem:[#allocation3 + $0x1ca] sm:$0xff] }
 0x402   :  { %13251 = vmatprep.mubr.msk.bf16.mxu1 %vm31_vm1, %v16468_v12  ;;  %13317 = vmatprep.mubr.msk.bf16.mxu0 %vm31_vm1, %v16146_v26  ;;  %v6543_v26 = vld [vmem:[#allocation3 + $0x1d2] sm:$0xff] }
 0x403   :  { %v16486_v24 = vpack.c.bf16 %v6543_v26, %v6542_v10 }
 0x409   :  { %13252 = vmatmul.mubr.msk.bf16.gmra.mxu1 %vm31_vm1, %v16478_v62  ;;  %13318 = vmatmul.mubr.msk.bf16.gmra.mxu0 %vm31_vm1, %v7137_v39  ;;  %v6553_v39 = vld [vmem:[#allocation3 + $0x24a] sm:$0xff] }
 0x40a   :  { %13321 = vmatprep.mubr.msk.bf16.mxu0 %vm31_vm1, %v16179_v52  ;;  %13255 = vmatprep.mubr.msk.bf16.mxu1 %vm31_vm1, %v6588_v46  ;;  %v6552_v46 = vld [vmem:[#allocation3 + $0x242] sm:$0xff] }
 0x411   :  { %v13093_v55 = vpop.f32.mrf.mxu1  ;;  %v13159_v30 = vpop.f32.mrf.mxu0  ;;  %13256 = vmatmul.mubr.msk.bf16.gmra.mxu1 %vm31_vm1, %v16486_v24  ;;  %13322 = vmatmul.mubr.msk.bf16.gmra.mxu0 %vm31_vm1, %v16181_v1 }
 0x412   :  { %v16494_v56 = vadd.f32 %v13159_v30, %v13093_v55  ;;  %13259 = vmatprep.mubr.msk.bf16.mxu1 %vm31_vm1, %v16488_v41  ;;  %13325 = vmatprep.mubr.msk.bf16.mxu0 %vm31_vm1, %v16225_v31  ;;  %v16528_v55 = vpack.c.bf16 %v6553_v39, %v6552_v46 }
 0x413   :  { %v5865_v52 = vpop.f32.mrf.mxu1  ;;  %v6253_v3 = vpop.f32.mrf.mxu0 }
 0x414   :  { %v16500_v15 = vadd.f32 %v6253_v3, %v5865_v52 }
 0x415   :  { %v13094_v9 = vpop.f32.mrf.mxu1  ;;  %v13160_v11 = vpop.f32.mrf.mxu0 }
 0x416   :  { %v16502_v0 = vadd.f32 %v13160_v11, %v13094_v9  ;;  %v6554_v9 = vld [vmem:[#allocation3 + $0x25a] sm:$0xff]  ;;  %v6555_v11 = vld [vmem:[#allocation3 + $0x262] sm:$0xff] }
 0x417   :  { %v5868_v1 = vpop.f32.mrf.mxu1  ;;  %v6256_v21 = vpop.f32.mrf.mxu0 }
 0x418   :  { %v16506_v25 = vadd.f32 %v6256_v21, %v5868_v1  ;;  %v6556_v1 = vld [vmem:[#allocation3 + $0x272] sm:$0xff]  ;;  %v6557_v21 = vld [vmem:[#allocation3 + $0x27a] sm:$0xff] }
 0x419   :  { %v13097_v31 = vpop.f32.mrf.mxu1  ;;  %v13163_v36 = vpop.f32.mrf.mxu0  ;;  %13260 = vmatmul.mubr.msk.bf16.gmra.mxu1 %vm31_vm1, %v16504_v40  ;;  %13326 = vmatmul.mubr.msk.bf16.gmra.mxu0 %vm31_vm1, %v16227_v50  ;;  %v16548_v16 = vpack.c.bf16 %v6557_v21, %v6556_v1 }
 0x41a   :  { %v16514_v47 = vadd.f32 %v13163_v36, %v13097_v31  ;;  %13263 = vmatprep.mubr.msk.bf16.mxu1 %vm31_vm1, %v16508_v5  ;;  %13329 = vmatprep.mubr.msk.bf16.mxu0 %vm31_vm1, %v16261_v48 }
 0x41b   :  { %v5881_v54 = vpop.f32.mrf.mxu1  ;;  %v6269_v27 = vpop.f32.mrf.mxu0 }
 0x41c   :  { %v16520_v42 = vadd.f32 %v6269_v27, %v5881_v54  ;;  %v16544_v54 = vpack.c.bf16 %v6555_v11, %v6554_v9 }
 0x41d   :  { %v13098_v18 = vpop.f32.mrf.mxu1  ;;  %v13164_v2 = vpop.f32.mrf.mxu0 }
 0x41e   :  { %v16522_v10 = vadd.f32 %v13164_v2, %v13098_v18 }
 0x41f   :  { %v5884_v50 = vpop.f32.mrf.mxu1  ;;  %v6272_v26 = vpop.f32.mrf.mxu0 }
 0x420   :  { %v16526_v6 = vadd.f32 %v6272_v26, %v5884_v50  ;;  %v6558_v50 = vld [vmem:[#allocation3 + $0x28a] sm:$0xff]  ;;  %v6559_v26 = vld [vmem:[#allocation3 + $0x292] sm:$0xff] }
 0x421   :  { %v13101_v48 = vpop.f32.mrf.mxu1  ;;  %v13167_v30 = vpop.f32.mrf.mxu0  ;;  %13264 = vmatmul.mubr.msk.bf16.gmra.mxu1 %vm31_vm1, %v16524_v38  ;;  %13330 = vmatmul.mubr.msk.bf16.gmra.mxu0 %vm31_vm1, %v16263_v28 }
 0x422   :  { %v16534_v52 = vadd.f32 %v13167_v30, %v13101_v48  ;;  %13267 = vmatprep.mubr.msk.bf16.mxu1 %vm31_vm1, %v16528_v55  ;;  %13333 = vmatprep.mubr.msk.bf16.mxu0 %vm31_vm1, %v16295_v53 }
 0x423   :  { %v5897_v3 = vpop.f32.mrf.mxu1  ;;  %v6285_v34 = vpop.f32.mrf.mxu0 }
 0x424   :  { %v16540_v60 = vadd.f32 %v6285_v34, %v5897_v3  ;;  %v6560_v3 = vld [vmem:[#allocation3 + $0x2a2] sm:$0xff]  ;;  %v6561_v34 = vld [vmem:[#allocation3 + $0x2aa] sm:$0xff] }
 0x425   :  { %v13102_v20 = vpop.f32.mrf.mxu1  ;;  %v13168_v19 = vpop.f32.mrf.mxu0  ;;  %v16568_v1 = vpack.c.bf16 %v6561_v34, %v6560_v3 }
 0x426   :  { %v16542_v31 = vadd.f32 %v13168_v19, %v13102_v20  ;;  %v16564_v20 = vpack.c.bf16 %v6559_v26, %v6558_v50 }
 0x427   :  { %v5900_v28 = vpop.f32.mrf.mxu1  ;;  %v6288_v36 = vpop.f32.mrf.mxu0 }
 0x428   :  { %v16546_v27 = vadd.f32 %v6288_v36, %v5900_v28 }
 0x429   :  { %v13105_v53 = vpop.f32.mrf.mxu1  ;;  %v13171_v61 = vpop.f32.mrf.mxu0  ;;  %13268 = vmatmul.mubr.msk.bf16.gmra.mxu1 %vm31_vm1, %v16544_v54  ;;  %13334 = vmatmul.mubr.msk.bf16.gmra.mxu0 %vm31_vm1, %v16297_v43 }
 0x42a   :  { %v16554_v18 = vadd.f32 %v13171_v61, %v13105_v53  ;;  %13271 = vmatprep.mubr.msk.bf16.mxu1 %vm31_vm1, %v16548_v16  ;;  %13337 = vmatprep.mubr.msk.bf16.mxu0 %vm31_vm1, %v16325_v33 }
 0x42b   :  { %v5913_v2 = vpop.f32.mrf.mxu1  ;;  %v6301_v46 = vpop.f32.mrf.mxu0 }
 0x42c   :  { %v16560_v39 = vadd.f32 %v6301_v46, %v5913_v2  ;;  %v6562_v2 = vld [vmem:[#allocation3 + $0x2ba] sm:$0xff]  ;;  %v6563_v46 = vld [vmem:[#allocation3 + $0x2c2] sm:$0xff] }
 0x42d   :  { %v13106_v48 = vpop.f32.mrf.mxu1  ;;  %v13172_v30 = vpop.f32.mrf.mxu0 }
 0x42e   :  { %v16562_v9 = vadd.f32 %v13172_v30, %v13106_v48  ;;  %v6564_v48 = vld [vmem:[#allocation3 + $0x2d2] sm:$0xff]  ;;  %v6565_v30 = vld [vmem:[#allocation3 + $0x2da] sm:$0xff] }
 0x42f   :  { %v5916_v43 = vpop.f32.mrf.mxu1  ;;  %v6304_v11 = vpop.f32.mrf.mxu0 }
 0x430   :  { %v16566_v19 = vadd.f32 %v6304_v11, %v5916_v43  ;;  %v16584_v43 = vpack.c.bf16 %v6563_v46, %v6562_v2 }
 0x431   :  { %v13109_v33 = vpop.f32.mrf.mxu1  ;;  %v13175_v21 = vpop.f32.mrf.mxu0  ;;  %13272 = vmatmul.mubr.msk.bf16.gmra.mxu1 %vm31_vm1, %v16564_v20  ;;  %13338 = vmatmul.mubr.msk.bf16.gmra.mxu0 %vm31_vm1, %v16327_v14 }
 0x432   :  { %v16574_v28 = vadd.f32 %v13175_v21, %v13109_v33  ;;  %13275 = vmatprep.mubr.msk.bf16.mxu1 %vm31_vm1, %v16568_v1  ;;  %13341 = vmatprep.mubr.msk.bf16.mxu0 %vm31_vm1, %v16348_v13  ;;  %v16588_v33 = vpack.c.bf16 %v6565_v30, %v6564_v48 }
 0x433   :  { %v5929_v36 = vpop.f32.mrf.mxu1  ;;  %v6317_v53 = vpop.f32.mrf.mxu0 }
 0x434   :  { %v16580_v61 = vadd.f32 %v6317_v53, %v5929_v36  ;;  %18566 = vst [vmem:[#allocation23_spill] sm:$0xff] %v16588_v33 }
 0x435   :  { %v13110_v50 = vpop.f32.mrf.mxu1  ;;  %v13176_v26 = vpop.f32.mrf.mxu0 }
 0x436   :  { %v16582_v3 = vadd.f32 %v13176_v26, %v13110_v50  ;;  %v6566_v50 = vld [vmem:[#allocation3 + $0x2ea] sm:$0xff]  ;;  %v6567_v26 = vld [vmem:[#allocation3 + $0x2f2] sm:$0xff] }
 0x437   :  { %v5932_v14 = vpop.f32.mrf.mxu1  ;;  %v6320_v34 = vpop.f32.mrf.mxu0 }
 0x438   :  { %18564 = vst [vmem:[#allocation18_spill] sm:$0xff] %v16582_v3  ;;  %v16586_v11 = vadd.f32 %v6320_v34, %v5932_v14  ;;  %v6568_v14 = vld [vmem:[#allocation3 + $0x302] sm:$0xff]  ;;  %v6569_v34 = vld [vmem:[#allocation3 + $0x30a] sm:$0xff] }
 0x439   :  { %v13113_v13 = vpop.f32.mrf.mxu1  ;;  %v13179_v21 = vpop.f32.mrf.mxu0  ;;  %13276 = vmatmul.mubr.msk.bf16.gmra.mxu1 %vm31_vm1, %v16584_v43  ;;  %13342 = vmatmul.mubr.msk.bf16.gmra.mxu0 %vm31_vm1, %v16353_v51 }
 0x43a   :  { %18565 = vst [vmem:[#allocation19_spill] sm:$0xff] %v16586_v11  ;;  %v16594_v36 = vadd.f32 %v13179_v21, %v13113_v13  ;;  %13279 = vmatprep.mubr.msk.bf16.mxu1 %vm31_vm1, %v16588_v33  ;;  %13345 = vmatprep.mubr.msk.bf16.mxu0 %vm31_vm1, %v16365_v7  ;;  %v16604_v21 = vpack.c.bf16 %v6567_v26, %v6566_v50 }
 0x43b   :  { %v5945_v53 = vpop.f32.mrf.mxu1  ;;  %v6333_v2 = vpop.f32.mrf.mxu0  ;;  %v16608_v33 = vpack.c.bf16 %v6569_v34, %v6568_v14  ;;  %v7121_v14 = vld [vmem:[#allocation3 + $0x338] sm:$0xff] }
 0x43c   :  { %18567 = vst [vmem:[#allocation17_spill] sm:$0xff] %v16594_v36  ;;  %v16600_v46 = vadd.f32 %v6333_v2, %v5945_v53 }
 0x43d   :  { %v13114_v48 = vpop.f32.mrf.mxu1  ;;  %v13180_v30 = vpop.f32.mrf.mxu0  ;;  %18571 = vst [vmem:[#allocation22_spill] sm:$0xff] %v16608_v33 }
 0x43e   :  { %18568 = vst [vmem:[#allocation28_spill] sm:$0xff] %v16600_v46  ;;  %v16602_v11 = vadd.f32 %v13180_v30, %v13114_v48  ;;  %v6570_v48 = vld [vmem:[#allocation3 + $0x31a] sm:$0xff]  ;;  %v6571_v30 = vld [vmem:[#allocation3 + $0x322] sm:$0xff] }
 0x43f   :  { %v5948_v51 = vpop.f32.mrf.mxu1  ;;  %v6336_v13 = vpop.f32.mrf.mxu0 }
 0x440   :  { %18569 = vst [vmem:[#allocation34_spill] sm:$0xff] %v16602_v11  ;;  %v16606_v36 = vadd.f32 %v6336_v13, %v5948_v51  ;;  %v7609_v13 = vld [vmem:[#allocation3 + $0x21] sm:$0xff]  ;;  %v7608_v11 = vld [vmem:[#allocation3 + $0x19] sm:$0xff] }
 0x441   :  { %v13117_v7 = vpop.f32.mrf.mxu1  ;;  %v13183_v3 = vpop.f32.mrf.mxu0  ;;  %13280 = vmatmul.mubr.msk.bf16.gmra.mxu1 %vm31_vm1, %v16604_v21  ;;  %13346 = vmatmul.mubr.msk.bf16.gmra.mxu0 %vm31_vm1, %v16367_v59  ;;  %v7120_v59 = vld [vmem:[#allocation3 + $0x330] sm:$0xff]  ;;  %v7672_v46 = vpack.c.bf16 %v7609_v13, %v7608_v11 }
 0x442   :  { %18570 = vst [vmem:[#allocation21_spill] sm:$0xff] %v16606_v36  ;;  %v16614_v53 = vadd.f32 %v13183_v3, %v13117_v7  ;;  %13283 = vmatprep.mubr.msk.bf16.mxu1 %vm31_vm1, %v16608_v33  ;;  %13349 = vmatprep.mubr.msk.bf16.mxu0 %vm31_vm1, %v16375_v4  ;;  %v7153_v33 = vpack.c.bf16 %v7121_v14, %v7120_v59  ;;  %v7613_v13 = vld [vmem:[#allocation3 + $0x51] sm:$0xff] }
 0x443   :  { %v5961_v2 = vpop.f32.mrf.mxu1  ;;  %v6349_v50 = vpop.f32.mrf.mxu0 }
 0x444   :  { %18572 = vst [vmem:[#allocation20_spill] sm:$0xff] %v16614_v53  ;;  %v16620_v26 = vadd.f32 %v6349_v50, %v5961_v2  ;;  %v16624_v53 = vpack.c.bf16 %v6571_v30, %v6570_v48 }
 0x445   :  { %v13118_v34 = vpop.f32.mrf.mxu1  ;;  %v13184_v51 = vpop.f32.mrf.mxu0 }
 0x446   :  { %18573 = vst [vmem:[#allocation25_spill] sm:$0xff] %v16620_v26  ;;  %v16622_v36 = vadd.f32 %v13184_v51, %v13118_v34  ;;  %v7611_v34 = vld [vmem:[#allocation3 + $0x39] sm:$0xff] }
 0x447   :  { %v5964_v3 = vpop.f32.mrf.mxu1  ;;  %v6352_v7 = vpop.f32.mrf.mxu0 }
 0x448   :  { %v16626_v4 = vadd.f32 %v6352_v7, %v5964_v3  ;;  %v7610_v3 = vld [vmem:[#allocation3 + $0x31] sm:$0xff] }
 0x449   :  { %v13121_v2 = vpop.f32.mrf.mxu1  ;;  %v13187_v50 = vpop.f32.mrf.mxu0  ;;  %13284 = vmatmul.mubr.msk.bf16.gmra.mxu1 %vm31_vm1, %v16624_v53  ;;  %13350 = vmatmul.mubr.msk.bf16.gmra.mxu0 %vm31_vm1, %v7153_v33 }
 0x44a   :  { %v16631_v26 = vadd.f32 %v13187_v50, %v13121_v2  ;;  %13355 = vmatprep.mubr.msk.bf16.mxu1 %vm31_vm1, %v7672_v46  ;;  %13421 = vmatprep.mubr.msk.bf16.mxu0 %vm31_vm1, %v16385_v58  ;;  %v16640_v2 = vpack.c.bf16 %v7611_v34, %v7610_v3  ;;  %v8904_v46 = vsel %vm734_vm0, %v16401_v35, 0  ;;  %v7612_v50 = vld [vmem:[#allocation3 + $0x49] sm:$0xff] }
 0x44b   :  { %v5977_v48 = vpop.f32.mrf.mxu1  ;;  %v6365_v30 = vpop.f32.mrf.mxu0 }
 0x44c   :  { %18574 = vst [vmem:[#allocation35_spill] sm:$0xff] %v16631_v26  ;;  %v16636_v14 = vadd.f32 %v6365_v30, %v5977_v48  ;;  %v16646_v26 = vpack.c.bf16 %v7613_v13, %v7612_v50  ;;  %v11546_v48 = vld [vmem:[%s18224_s4 + $0x1c] sm:$0xf]  ;;  %v7617_v50 = vld [vmem:[#allocation3 + $0x81] sm:$0xff] }
 0x44d   :  { %v13122_v11 = vpop.f32.mrf.mxu1  ;;  %v13188_v51 = vpop.f32.mrf.mxu0  ;;  %v9454_v34 = vsel %vm734_vm0, %v11546_v48, 0  ;;  %13699 = vmatprep.subr.msk.bf16.mxu0 %vm734_vm0, %v11546_v48 }
 0x44e   :  { %v16638_v59 = vadd.f32 %v13188_v51, %v13122_v11  ;;  %18577 = vst [vmem:[#allocation27_spill] sm:$0xff] %v16646_v26  ;;  %v16663_v51 = vld [vmem:[%s18224_s4 + $0x20] sm:$0xf] }
 0x44f   :  { %v5980_v7 = vpop.f32.mrf.mxu1  ;;  %v6368_v33 = vpop.f32.mrf.mxu0 }
 0x450   :  { %18575 = vst [vmem:[#allocation32_spill] sm:$0xff] %v16638_v59  ;;  %v16644_v58 = vadd.f32 %v6368_v33, %v5980_v7  ;;  %v7615_v7 = vld [vmem:[#allocation3 + $0x69] sm:$0xff] }
 0x451   :  { %v13125_v30 = vpop.f32.mrf.mxu1  ;;  %v13191_v11 = vpop.f32.mrf.mxu0  ;;  %13356 = vmatmul.mubr.msk.bf16.vlgmr.msra.gmra.mxu1 %vm31_vm1, %v16640_v2  ;;  %13422 = vmatmul.mubr.msk.bf16.vlgmr.msra.gmra.mxu0 %vm31_vm1, %v16392_v22 }
 0x452   :  { %18576 = vst [vmem:[#allocation26_spill] sm:$0xff] %v16644_v58  ;;  %v16656_v35 = vadd.f32 %v13191_v11, %v13125_v30  ;;  %13486 = vmatpush3.bf16.msra.mxu1 %v8904_v46  ;;  %13359 = vmatprep.mubr.msk.bf16.mxu1 %vm31_vm1, %v16646_v26  ;;  %v7614_v11 = vld [vmem:[#allocation3 + $0x61] sm:$0xff]  ;;  %v7616_v58 = vld [vmem:[#allocation3 + $0x79] sm:$0xff] }
 0x453   :  { %13425 = vmatprep.mubr.msk.bf16.mxu0 %vm31_vm1, %v16408_v57  ;;  %v5993_v13 = vpop.f32.mrf.mxu1  ;;  %v6381_v3 = vpop.f32.mrf.mxu0  ;;  %13552 = vmatpush3.bf16.msra.mxu0 %v9454_v34  ;;  %v16674_v57 = vpack.c.bf16 %v7615_v7, %v7614_v11  ;;  %v16678_v48 = vpack.c.bf16 %v7617_v50, %v7616_v58  ;;  %v7619_v7 = vld [vmem:[#allocation3 + $0x99] sm:$0xff]  ;;  %v7621_v50 = vld [vmem:[#allocation3 + $0xb1] sm:$0xff] }
 0x454   :  { %18578 = vst [vmem:[#allocation24_spill] sm:$0xff] %v16656_v35  ;;  %v16668_v22 = vadd.f32 %v6381_v3, %v5993_v13  ;;  %13700 = vmatprep.subr.msk.bf16.mxu1 %vm734_vm0, %v16663_v51 }
 0x455   :  { %v13126_v33 = vpop.f32.mrf.mxu1  ;;  %v13192_v46 = vpop.f32.mrf.mxu0  ;;  %18582 = vst [vmem:[#allocation31_spill] sm:$0xff] %v16678_v48 }
 0x456   :  { %18579 = vst [vmem:[#allocation36_spill] sm:$0xff] %v16668_v22  ;;  %v16672_v30 = vadd.f32 %v13192_v46, %v13126_v33 }
 0x457   :  { %v5996_v35 = vpop.f32.mrf.mxu1  ;;  %v6384_v26 = vpop.f32.mrf.mxu0 }
 0x458   :  { %18580 = vst [vmem:[#allocation38_spill] sm:$0xff] %v16672_v30  ;;  %v16676_v59 = vadd.f32 %v6384_v26, %v5996_v35 }
 0x459   :  { %v13129_v13 = vpop.f32.mrf.mxu1  ;;  %v13195_v34 = vpop.f32.mrf.mxu0  ;;  %13360 = vmatmul.mubr.msk.bf16.gmra.mxu1 %vm31_vm1, %v16674_v57  ;;  %13426 = vmatmul.mubr.msk.bf16.gmra.mxu0 %vm31_vm1, %v16410_v29 }
 0x45a   :  { %18581 = vst [vmem:[#allocation29_spill] sm:$0xff] %v16676_v59  ;;  %v16684_v3 = vadd.f32 %v13195_v34, %v13129_v13  ;;  %13363 = vmatprep.mubr.msk.bf16.mxu1 %vm31_vm1, %v16678_v48  ;;  %13429 = vmatprep.mubr.msk.bf16.mxu0 %vm31_vm1, %v16418_v8  ;;  %v7618_v59 = vld [vmem:[#allocation3 + $0x91] sm:$0xff] }
 0x45b   :  { %v6009_v26 = vpop.f32.mrf.mxu1  ;;  %v6397_v35 = vpop.f32.mrf.mxu0  ;;  %v16694_v34 = vpack.c.bf16 %v7619_v7, %v7618_v59  ;;  %v7623_v7 = vld [vmem:[#allocation3 + $0xc9] sm:$0xff] }
 0x45c   :  { %18583 = vst [vmem:[#allocation30_spill] sm:$0xff] %v16684_v3  ;;  %v16690_v58 = vadd.f32 %v6397_v35, %v6009_v26  ;;  %v7620_v3 = vld [vmem:[#allocation3 + $0xa9] sm:$0xff] }
 0x45d   :  { %v13130_v33 = vpop.f32.mrf.mxu1  ;;  %v13196_v46 = vpop.f32.mrf.mxu0  ;;  %v16698_v30 = vpack.c.bf16 %v7621_v50, %v7620_v3  ;;  %v7625_v50 = vld [vmem:[#allocation3 + $0xe1] sm:$0xff] }
 0x45e   :  { %v16692_v11 = vadd.f32 %v13196_v46, %v13130_v33 }
 0x45f   :  { %v6012_v29 = vpop.f32.mrf.mxu1  ;;  %v6400_v13 = vpop.f32.mrf.mxu0  ;;  %18586 = vst [vmem:[#allocation33_spill] sm:$0xff] %v16698_v30 }
 0x460   :  { %18584 = vst [vmem:[#allocation39_spill] sm:$0xff] %v16692_v11  ;;  %v16696_v48 = vadd.f32 %v6400_v13, %v6012_v29  ;;  %v7622_v13 = vld [vmem:[#allocation3 + $0xc1] sm:$0xff] }
 0x461   :  { %v13133_v8 = vpop.f32.mrf.mxu1  ;;  %v13199_v22 = vpop.f32.mrf.mxu0  ;;  %13364 = vmatmul.mubr.msk.bf16.gmra.mxu1 %vm31_vm1, %v16694_v34  ;;  %13430 = vmatmul.mubr.msk.bf16.gmra.mxu0 %vm31_vm1, %v16420_v17 }
 0x462   :  { %18585 = vst [vmem:[#allocation40_spill] sm:$0xff] %v16696_v48  ;;  %v16704_v26 = vadd.f32 %v13199_v22, %v13133_v8  ;;  %13367 = vmatprep.mubr.msk.bf16.mxu1 %vm31_vm1, %v16698_v30  ;;  %13433 = vmatprep.mubr.msk.bf16.mxu0 %vm31_vm1, %v16430_v23  ;;  %v16714_v8 = vpack.c.bf16 %v7623_v7, %v7622_v13  ;;  %v7629_v13 = vld [vmem:[#allocation3 + $0x111] sm:$0xff] }
 0x463   :  { %v6025_v59 = vpop.f32.mrf.mxu1  ;;  %v6413_v35 = vpop.f32.mrf.mxu0 }
 0x464   :  { %18587 = vst [vmem:[#allocation51_spill] sm:$0xff] %v16704_v26  ;;  %v16710_v3 = vadd.f32 %v6413_v35, %v6025_v59  ;;  %v7624_v26 = vld [vmem:[#allocation3 + $0xd9] sm:$0xff] }
 0x465   :  { %v13134_v33 = vpop.f32.mrf.mxu1  ;;  %v13200_v46 = vpop.f32.mrf.mxu0  ;;  %v16718_v48 = vpack.c.bf16 %v7625_v50, %v7624_v26 }
 0x466   :  { %v16712_v29 = vadd.f32 %v13200_v46, %v13134_v33  ;;  %v7627_v33 = vld [vmem:[#allocation3 + $0xf9] sm:$0xff] }
 0x467   :  { %v6028_v17 = vpop.f32.mrf.mxu1  ;;  %v6416_v22 = vpop.f32.mrf.mxu0  ;;  %18590 = vst [vmem:[#allocation37_spill] sm:$0xff] %v16718_v48 }
 0x468   :  { %18588 = vst [vmem:[#allocation53_spill] sm:$0xff] %v16712_v29  ;;  %v16716_v30 = vadd.f32 %v6416_v22, %v6028_v17  ;;  %v7626_v22 = vld [vmem:[#allocation3 + $0xf1] sm:$0xff] }
 0x469   :  { %v13137_v23 = vpop.f32.mrf.mxu1  ;;  %v13203_v11 = vpop.f32.mrf.mxu0  ;;  %13368 = vmatmul.mubr.msk.bf16.gmra.mxu1 %vm31_vm1, %v16714_v8  ;;  %13434 = vmatmul.mubr.msk.bf16.gmra.mxu0 %vm31_vm1, %v16432_v37 }
 0x46a   :  { %18589 = vst [vmem:[#allocation52_spill] sm:$0xff] %v16716_v30  ;;  %v16724_v59 = vadd.f32 %v13203_v11, %v13137_v23  ;;  %13371 = vmatprep.mubr.msk.bf16.mxu1 %vm31_vm1, %v16718_v48  ;;  %13437 = vmatprep.mubr.msk.bf16.mxu0 %vm31_vm1, %v16442_v49  ;;  %v16734_v23 = vpack.c.bf16 %v7627_v33, %v7626_v22  ;;  %v7633_v22 = vld [vmem:[#allocation3 + $0x141] sm:$0xff] }
 0x46b   :  { %v6041_v35 = vpop.f32.mrf.mxu1  ;;  %v6429_v7 = vpop.f32.mrf.mxu0 }
 0x46c   :  { %18591 = vst [vmem:[#allocation41_spill] sm:$0xff] %v16724_v59  ;;  %v16730_v26 = vadd.f32 %v6429_v7, %v6041_v35  ;;  %v7628_v59 = vld [vmem:[#allocation3 + $0x109] sm:$0xff] }
 0x46d   :  { %v13138_v46 = vpop.f32.mrf.mxu1  ;;  %v13204_v50 = vpop.f32.mrf.mxu0  ;;  %v16738_v30 = vpack.c.bf16 %v7629_v13, %v7628_v59 }
 0x46e   :  { %v16732_v17 = vadd.f32 %v13204_v50, %v13138_v46  ;;  %v7631_v46 = vld [vmem:[#allocation3 + $0x129] sm:$0xff] }
 0x46f   :  { %v6044_v37 = vpop.f32.mrf.mxu1  ;;  %v6432_v11 = vpop.f32.mrf.mxu0  ;;  %18594 = vst [vmem:[#allocation57_spill] sm:$0xff] %v16738_v30 }
 0x470   :  { %18592 = vst [vmem:[#allocation54_spill] sm:$0xff] %v16732_v17  ;;  %v16736_v48 = vadd.f32 %v6432_v11, %v6044_v37  ;;  %v7630_v11 = vld [vmem:[#allocation3 + $0x121] sm:$0xff] }
 0x471   :  { %v13141_v49 = vpop.f32.mrf.mxu1  ;;  %v13207_v29 = vpop.f32.mrf.mxu0  ;;  %13372 = vmatmul.mubr.msk.bf16.gmra.mxu1 %vm31_vm1, %v16734_v23  ;;  %13438 = vmatmul.mubr.msk.bf16.gmra.mxu0 %vm31_vm1, %v16444_v63 }
 0x472   :  { %18593 = vst [vmem:[#allocation55_spill] sm:$0xff] %v16736_v48  ;;  %v16744_v35 = vadd.f32 %v13207_v29, %v13141_v49  ;;  %13375 = vmatprep.mubr.msk.bf16.mxu1 %vm31_vm1, %v16738_v30  ;;  %13441 = vmatprep.mubr.msk.bf16.mxu0 %vm31_vm1, %v16454_v45  ;;  %v16754_v49 = vpack.c.bf16 %v7631_v46, %v7630_v11  ;;  %v7637_v11 = vld [vmem:[#allocation3 + $0x171] sm:$0xff] }
 0x473   :  { %v6057_v7 = vpop.f32.mrf.mxu1  ;;  %v6445_v33 = vpop.f32.mrf.mxu0 }
 0x474   :  { %18595 = vst [vmem:[#allocation56_spill] sm:$0xff] %v16744_v35  ;;  %v16750_v59 = vadd.f32 %v6445_v33, %v6057_v7  ;;  %v7632_v35 = vld [vmem:[#allocation3 + $0x139] sm:$0xff] }
 0x475   :  { %v13142_v50 = vpop.f32.mrf.mxu1  ;;  %v13208_v13 = vpop.f32.mrf.mxu0  ;;  %v16758_v48 = vpack.c.bf16 %v7633_v22, %v7632_v35 }
 0x476   :  { %v16752_v37 = vadd.f32 %v13208_v13, %v13142_v50  ;;  %v7635_v50 = vld [vmem:[#allocation3 + $0x159] sm:$0xff] }
 0x477   :  { %v6060_v63 = vpop.f32.mrf.mxu1  ;;  %v6448_v29 = vpop.f32.mrf.mxu0  ;;  %18598 = vst [vmem:[#allocation58_spill] sm:$0xff] %v16758_v48 }
 0x478   :  { %18596 = vst [vmem:[#allocation43_spill] sm:$0xff] %v16752_v37  ;;  %v16756_v30 = vadd.f32 %v6448_v29, %v6060_v63  ;;  %v7634_v29 = vld [vmem:[#allocation3 + $0x151] sm:$0xff] }
 0x479   :  { %v13145_v45 = vpop.f32.mrf.mxu1  ;;  %v13211_v17 = vpop.f32.mrf.mxu0  ;;  %13376 = vmatmul.mubr.msk.bf16.gmra.mxu1 %vm31_vm1, %v16754_v49  ;;  %13442 = vmatmul.mubr.msk.bf16.gmra.mxu0 %vm31_vm1, %v16456_v44 }
 0x47a   :  { %18597 = vst [vmem:[#allocation44_spill] sm:$0xff] %v16756_v30  ;;  %v16764_v7 = vadd.f32 %v13211_v17, %v13145_v45  ;;  %13379 = vmatprep.mubr.msk.bf16.mxu1 %vm31_vm1, %v16758_v48  ;;  %13445 = vmatprep.mubr.msk.bf16.mxu0 %vm31_vm1, %v16466_v32  ;;  %v16774_v45 = vpack.c.bf16 %v7635_v50, %v7634_v29 }
 0x47b   :  { %v6073_v33 = vpop.f32.mrf.mxu1  ;;  %v6461_v46 = vpop.f32.mrf.mxu0 }
 0x47c   :  { %18599 = vst [vmem:[#allocation59_spill] sm:$0xff] %v16764_v7  ;;  %v16770_v35 = vadd.f32 %v6461_v46, %v6073_v33  ;;  %v7636_v7 = vld [vmem:[#allocation3 + $0x169] sm:$0xff] }
 0x47d   :  { %v13146_v13 = vpop.f32.mrf.mxu1  ;;  %v13212_v22 = vpop.f32.mrf.mxu0  ;;  %v16778_v30 = vpack.c.bf16 %v7637_v11, %v7636_v7  ;;  %v8189_v11 = vld [vmem:[#allocation3 + $0x18a] sm:$0xff] }
 0x47e   :  { %18600 = vst [vmem:[#allocation61_spill] sm:$0xff] %v16770_v35  ;;  %v16772_v63 = vadd.f32 %v13212_v22, %v13146_v13  ;;  %v7639_v13 = vld [vmem:[#allocation3 + $0x189] sm:$0xff] }
 0x47f   :  { %v6076_v44 = vpop.f32.mrf.mxu1  ;;  %v6464_v17 = vpop.f32.mrf.mxu0  ;;  %18603 = vst [vmem:[#allocation47_spill] sm:$0xff] %v16778_v30  ;;  %v8188_v22 = vld [vmem:[#allocation3 + $0x182] sm:$0xff] }
 0x480   :  { %18601 = vst [vmem:[#allocation60_spill] sm:$0xff] %v16772_v63  ;;  %v16776_v48 = vadd.f32 %v6464_v17, %v6076_v44  ;;  %v7641_v17 = vld [vmem:[#allocation3 + $0x1d1] sm:$0xff]  ;;  %v7640_v63 = vld [vmem:[#allocation3 + $0x1c9] sm:$0xff] }
 0x481   :  { %v13149_v32 = vpop.f32.mrf.mxu1  ;;  %v13215_v37 = vpop.f32.mrf.mxu0  ;;  %13380 = vmatmul.mubr.msk.bf16.gmra.mxu1 %vm31_vm1, %v16774_v45  ;;  %13446 = vmatmul.mubr.msk.bf16.gmra.mxu0 %vm31_vm1, %v16468_v12  ;;  %v7638_v12 = vld [vmem:[#allocation3 + $0x181] sm:$0xff]  ;;  %v7688_v35 = vpack.c.bf16 %v7641_v17, %v7640_v63 }
 0x482   :  { %18602 = vst [vmem:[#allocation42_spill] sm:$0xff] %v16776_v48  ;;  %v16784_v33 = vadd.f32 %v13215_v37, %v13149_v32  ;;  %13383 = vmatprep.mubr.msk.bf16.mxu1 %vm31_vm1, %v16778_v30  ;;  %13449 = vmatprep.mubr.msk.bf16.mxu0 %vm31_vm1, %v16478_v62  ;;  %v8237_v30 = vpack.c.bf16 %v8189_v11, %v8188_v22  ;;  %v7645_v17 = vld [vmem:[#allocation3 + $0x201] sm:$0xff] }
 0x483   :  { %v6089_v46 = vpop.f32.mrf.mxu1  ;;  %v6477_v50 = vpop.f32.mrf.mxu0 }
 0x484   :  { %18604 = vst [vmem:[#allocation62_spill] sm:$0xff] %v16784_v33  ;;  %v16790_v7 = vadd.f32 %v6477_v50, %v6089_v46  ;;  %v16794_v33 = vpack.c.bf16 %v7639_v13, %v7638_v12 }
 0x485   :  { %v13150_v29 = vpop.f32.mrf.mxu1  ;;  %v13216_v44 = vpop.f32.mrf.mxu0 }
 0x486   :  { %18605 = vst [vmem:[#allocation45_spill] sm:$0xff] %v16790_v7  ;;  %v16792_v48 = vadd.f32 %v13216_v44, %v13150_v29  ;;  %v7643_v29 = vld [vmem:[#allocation3 + $0x1e9] sm:$0xff] }
 0x487   :  { %v6092_v37 = vpop.f32.mrf.mxu1  ;;  %v6480_v32 = vpop.f32.mrf.mxu0 }
 0x488   :  { %v16796_v62 = vadd.f32 %v6480_v32, %v6092_v37  ;;  %v7642_v37 = vld [vmem:[#allocation3 + $0x1e1] sm:$0xff] }
 0x489   :  { %v13153_v46 = vpop.f32.mrf.mxu1  ;;  %v13219_v50 = vpop.f32.mrf.mxu0  ;;  %13384 = vmatmul.mubr.msk.bf16.gmra.mxu1 %vm31_vm1, %v16794_v33  ;;  %13450 = vmatmul.mubr.msk.bf16.gmra.mxu0 %vm31_vm1, %v8237_v30 }
 0x48a   :  { %18606 = vst [vmem:[#allocation63_spill] sm:$0xff] %v16796_v62  ;;  %v16801_v7 = vadd.f32 %v13219_v50, %v13153_v46  ;;  %13387 = vmatprep.mubr.msk.bf16.mxu1 %vm31_vm1, %v7688_v35  ;;  %13453 = vmatprep.mubr.msk.bf16.mxu0 %vm31_vm1, %v16486_v24  ;;  %v16810_v46 = vpack.c.bf16 %v7643_v29, %v7642_v37  ;;  %v7644_v50 = vld [vmem:[#allocation3 + $0x1f9] sm:$0xff] }
 0x48b   :  { %v6105_v13 = vpop.f32.mrf.mxu1  ;;  %v6493_v22 = vpop.f32.mrf.mxu0 }
 0x48c   :  { %18607 = vst [vmem:[#allocation46_spill] sm:$0xff] %v16801_v7  ;;  %v16806_v11 = vadd.f32 %v6493_v22, %v6105_v13  ;;  %v7690_v7 = vpack.c.bf16 %v7645_v17, %v7644_v50  ;;  %v7647_v17 = vld [vmem:[#allocation3 + $0x219] sm:$0xff] }
 0x48d   :  { %v13154_v63 = vpop.f32.mrf.mxu1  ;;  %v13220_v44 = vpop.f32.mrf.mxu0 }
 0x48e   :  { %v16808_v12 = vadd.f32 %v13220_v44, %v13154_v63 }
 0x48f   :  { %v6108_v32 = vpop.f32.mrf.mxu1  ;;  %v6496_v30 = vpop.f32.mrf.mxu0 }
 0x490   :  { %18608 = vst [vmem:[#allocation48_spill] sm:$0xff] %v16808_v12  ;;  %v16812_v35 = vadd.f32 %v6496_v30, %v6108_v32  ;;  %v7649_v30 = vld [vmem:[#allocation3 + $0x231] sm:$0xff] }
 0x491   :  { %v13225_v24 = vpop.f32.mrf.mxu1  ;;  %v13291_v62 = vpop.f32.mrf.mxu0  ;;  %13388 = vmatmul.mubr.msk.bf16.gmra.mxu1 %vm31_vm1, %v16810_v46  ;;  %13454 = vmatmul.mubr.msk.bf16.gmra.mxu0 %vm31_vm1, %v16488_v41 }
 0x492   :  { %18609 = vst [vmem:[#allocation7_spill] sm:$0xff] %v16812_v35  ;;  %v6996_v13 = vadd.f32 %v13225_v24, %v16494_v56  ;;  %13391 = vmatprep.mubr.msk.bf16.mxu1 %vm31_vm1, %v7690_v7  ;;  %13457 = vmatprep.mubr.msk.bf16.mxu0 %vm31_vm1, %v16504_v40  ;;  %v7646_v56 = vld [vmem:[#allocation3 + $0x211] sm:$0xff]  ;;  %v7648_v40 = vld [vmem:[#allocation3 + $0x229] sm:$0xff] }
 0x493   :  { %v6739_v22 = vpop.f32.mrf.mxu1  ;;  %v7289_v29 = vpop.f32.mrf.mxu0  ;;  %v16828_v35 = vpack.c.bf16 %v7647_v17, %v7646_v56  ;;  %v7653_v56 = vld [vmem:[#allocation3 + $0x261] sm:$0xff] }
 0x494   :  { %v16822_v63 = vadd.f32 %v13291_v62, %v6996_v13  ;;  %v6994_v44 = vadd.f32 %v6739_v22, %v16500_v15  ;;  %v7692_v13 = vpack.c.bf16 %v7649_v30, %v7648_v40 }
 0x495   :  { %v13226_v37 = vpop.f32.mrf.mxu1  ;;  %v13292_v32 = vpop.f32.mrf.mxu0 }
 0x496   :  { %v16825_v50 = vadd.f32 %v7289_v29, %v6994_v44  ;;  %v6997_v41 = vadd.f32 %v13226_v37, %v16502_v0 }
 0x497   :  { %v6742_v24 = vpop.f32.mrf.mxu1  ;;  %v7292_v7 = vpop.f32.mrf.mxu0 }
 0x498   :  { %v16830_v12 = vadd.f32 %v13292_v32, %v6997_v41  ;;  %v6995_v62 = vadd.f32 %v6742_v24, %v16506_v25  ;;  %v7651_v32 = vld [vmem:[#allocation3 + $0x249] sm:$0xff] }
 0x499   :  { %v13229_v15 = vpop.f32.mrf.mxu1  ;;  %v13295_v22 = vpop.f32.mrf.mxu0  ;;  %13392 = vmatmul.mubr.msk.bf16.gmra.mxu1 %vm31_vm1, %v16828_v35  ;;  %13458 = vmatmul.mubr.msk.bf16.gmra.mxu0 %vm31_vm1, %v16508_v5 }
 0x49a   :  { %v16837_v0 = vadd.f32 %v7292_v7, %v6995_v62  ;;  %v7000_v29 = vadd.f32 %v13229_v15, %v16514_v47  ;;  %13395 = vmatprep.mubr.msk.bf16.mxu1 %vm31_vm1, %v7692_v13  ;;  %13461 = vmatprep.mubr.msk.bf16.mxu0 %vm31_vm1, %v16524_v38  ;;  %v7650_v47 = vld [vmem:[#allocation3 + $0x241] sm:$0xff]  ;;  %v7652_v38 = vld [vmem:[#allocation3 + $0x259] sm:$0xff] }
 0x49b   :  { %v6755_v44 = vpop.f32.mrf.mxu1  ;;  %v7305_v25 = vpop.f32.mrf.mxu0  ;;  %v16849_v62 = vpack.c.bf16 %v7651_v32, %v7650_v47 }
 0x49c   :  { %v16843_v17 = vadd.f32 %v13295_v22, %v7000_v29  ;;  %v6998_v37 = vadd.f32 %v6755_v44, %v16520_v42  ;;  %v7694_v22 = vpack.c.bf16 %v7653_v56, %v7652_v38 }
 0x49d   :  { %v13230_v30 = vpop.f32.mrf.mxu1  ;;  %v13296_v41 = vpop.f32.mrf.mxu0 }
 0x49e   :  { %v16846_v5 = vadd.f32 %v7305_v25, %v6998_v37  ;;  %v7001_v24 = vadd.f32 %v13230_v30, %v16522_v10  ;;  %v7655_v30 = vld [vmem:[#allocation3 + $0x279] sm:$0xff] }
 0x49f   :  { %v6758_v7 = vpop.f32.mrf.mxu1  ;;  %v7308_v40 = vpop.f32.mrf.mxu0 }
 0x4a0   :  { %v16851_v13 = vadd.f32 %v13296_v41, %v7001_v24  ;;  %v6999_v15 = vadd.f32 %v6758_v7, %v16526_v6  ;;  %v7657_v24 = vld [vmem:[#allocation3 + $0x291] sm:$0xff] }
 0x4a1   :  { %v13233_v42 = vpop.f32.mrf.mxu1  ;;  %v13299_v29 = vpop.f32.mrf.mxu0  ;;  %13396 = vmatmul.mubr.msk.bf16.gmra.mxu1 %vm31_vm1, %v16849_v62  ;;  %13462 = vmatmul.mubr.msk.bf16.gmra.mxu0 %vm31_vm1, %v16528_v55 }
 0x4a2   :  { %v16858_v10 = vadd.f32 %v7308_v40, %v6999_v15  ;;  %v7004_v44 = vadd.f32 %v13233_v42, %v16534_v52  ;;  %13399 = vmatprep.mubr.msk.bf16.mxu1 %vm31_vm1, %v7694_v22  ;;  %13465 = vmatprep.mubr.msk.bf16.mxu0 %vm31_vm1, %v16544_v54  ;;  %v7654_v52 = vld [vmem:[#allocation3 + $0x271] sm:$0xff]  ;;  %v7656_v54 = vld [vmem:[#allocation3 + $0x289] sm:$0xff] }
 0x4a3   :  { %v6771_v25 = vpop.f32.mrf.mxu1  ;;  %v7321_v6 = vpop.f32.mrf.mxu0  ;;  %v16870_v38 = vpack.c.bf16 %v7655_v30, %v7654_v52  ;;  %v7696_v42 = vpack.c.bf16 %v7657_v24, %v7656_v54  ;;  %v7659_v30 = vld [vmem:[#allocation3 + $0x2a9] sm:$0xff]  ;;  %v7661_v24 = vld [vmem:[#allocation3 + $0x2c1] sm:$0xff] }
 0x4a4   :  { %v16864_v37 = vadd.f32 %v13299_v29, %v7004_v44  ;;  %v7002_v32 = vadd.f32 %v6771_v25, %v16540_v60 }
 0x4a5   :  { %v13234_v41 = vpop.f32.mrf.mxu1  ;;  %v13300_v56 = vpop.f32.mrf.mxu0 }
 0x4a6   :  { %v16867_v55 = vadd.f32 %v7321_v6, %v7002_v32  ;;  %v7005_v47 = vadd.f32 %v13234_v41, %v16542_v31 }
 0x4a7   :  { %v6774_v7 = vpop.f32.mrf.mxu1  ;;  %v7324_v40 = vpop.f32.mrf.mxu0 }
 0x4a8   :  { %v16872_v15 = vadd.f32 %v13300_v56, %v7005_v47  ;;  %v7003_v22 = vadd.f32 %v6774_v7, %v16546_v27 }
 0x4a9   :  { %v13237_v60 = vpop.f32.mrf.mxu1  ;;  %v13303_v29 = vpop.f32.mrf.mxu0  ;;  %13400 = vmatmul.mubr.msk.bf16.gmra.mxu1 %vm31_vm1, %v16870_v38  ;;  %13466 = vmatmul.mubr.msk.bf16.gmra.mxu0 %vm31_vm1, %v16548_v16 }
 0x4aa   :  { %v16879_v31 = vadd.f32 %v7324_v40, %v7003_v22  ;;  %v7008_v44 = vadd.f32 %v13237_v60, %v16554_v18  ;;  %13403 = vmatprep.mubr.msk.bf16.mxu1 %vm31_vm1, %v7696_v42  ;;  %13469 = vmatprep.mubr.msk.bf16.mxu0 %vm31_vm1, %v16564_v20  ;;  %v7658_v18 = vld [vmem:[#allocation3 + $0x2a1] sm:$0xff]  ;;  %v7660_v20 = vld [vmem:[#allocation3 + $0x2b9] sm:$0xff] }
 0x4ab   :  { %v6787_v25 = vpop.f32.mrf.mxu1  ;;  %v7337_v27 = vpop.f32.mrf.mxu0  ;;  %v16891_v40 = vpack.c.bf16 %v7659_v30, %v7658_v18  ;;  %v7698_v42 = vpack.c.bf16 %v7661_v24, %v7660_v20  ;;  %v18610_v24 = vld [vmem:[#allocation18_spill] sm:$0xff] }
 0x4ac   :  { %v16885_v6 = vadd.f32 %v13303_v29, %v7008_v44  ;;  %v7006_v32 = vadd.f32 %v6787_v25, %v16560_v39 }
 0x4ad   :  { %v13238_v41 = vpop.f32.mrf.mxu1  ;;  %v13304_v56 = vpop.f32.mrf.mxu0 }
 0x4ae   :  { %v16888_v16 = vadd.f32 %v7337_v27, %v7006_v32  ;;  %v7009_v47 = vadd.f32 %v13238_v41, %v16562_v9  ;;  %v7663_v32 = vld [vmem:[#allocation3 + $0x2d9] sm:$0xff] }
 0x4af   :  { %v6790_v52 = vpop.f32.mrf.mxu1  ;;  %v7340_v7 = vpop.f32.mrf.mxu0 }
 0x4b0   :  { %v16893_v54 = vadd.f32 %v13304_v56, %v7009_v47  ;;  %v7007_v22 = vadd.f32 %v6790_v52, %v16566_v19  ;;  %v7665_v56 = vld [vmem:[#allocation3 + $0x2f1] sm:$0xff] }
 0x4b1   :  { %v13241_v39 = vpop.f32.mrf.mxu1  ;;  %v13307_v60 = vpop.f32.mrf.mxu0  ;;  %13404 = vmatmul.mubr.msk.bf16.gmra.mxu1 %vm31_vm1, %v16891_v40  ;;  %13470 = vmatmul.mubr.msk.bf16.gmra.mxu0 %vm31_vm1, %v16568_v1 }
 0x4b2   :  { %v16900_v9 = vadd.f32 %v7340_v7, %v7007_v22  ;;  %v7012_v29 = vadd.f32 %v13241_v39, %v16574_v28  ;;  %13407 = vmatprep.mubr.msk.bf16.mxu1 %vm31_vm1, %v7698_v42  ;;  %13473 = vmatprep.mubr.msk.bf16.mxu0 %vm31_vm1, %v16584_v43  ;;  %v7662_v28 = vld [vmem:[#allocation3 + $0x2d1] sm:$0xff]  ;;  %v7664_v43 = vld [vmem:[#allocation3 + $0x2e9] sm:$0xff] }
 0x4b3   :  { %v6803_v44 = vpop.f32.mrf.mxu1  ;;  %v7353_v19 = vpop.f32.mrf.mxu0  ;;  %v16912_v7 = vpack.c.bf16 %v7663_v32, %v7662_v28  ;;  %v18611_v22 = vld [vmem:[#allocation19_spill] sm:$0xff]  ;;  %v7700_v39 = vpack.c.bf16 %v7665_v56, %v7664_v43  ;;  %v18616_v56 = vld [vmem:[#allocation28_spill] sm:$0xff] }
 0x4b4   :  { %v16906_v25 = vadd.f32 %v13307_v60, %v7012_v29  ;;  %v7010_v27 = vadd.f32 %v6803_v44, %v16580_v61  ;;  %v18612_v29 = vld [vmem:[#allocation23_spill] sm:$0xff]  ;;  %v7669_v43 = vld [vmem:[#allocation3 + $0x321] sm:$0xff] }
 0x4b5   :  { %v13242_v30 = vpop.f32.mrf.mxu1  ;;  %v13308_v41 = vpop.f32.mrf.mxu0 }
 0x4b6   :  { %v16909_v1 = vadd.f32 %v7353_v19, %v7010_v27  ;;  %v7013_v47 = vadd.f32 %v13242_v30, %v18610_v24  ;;  %v18614_v19 = vld [vmem:[#allocation17_spill] sm:$0xff] }
 0x4b7   :  { %v6806_v18 = vpop.f32.mrf.mxu1  ;;  %v7356_v52 = vpop.f32.mrf.mxu0 }
 0x4b8   :  { %v16914_v20 = vadd.f32 %v13308_v41, %v7013_v47  ;;  %v7011_v42 = vadd.f32 %v6806_v18, %v18611_v22  ;;  %v7667_v47 = vld [vmem:[#allocation3 + $0x309] sm:$0xff] }
 0x4b9   :  { %v13245_v61 = vpop.f32.mrf.mxu1  ;;  %v13311_v60 = vpop.f32.mrf.mxu0  ;;  %13408 = vmatmul.mubr.msk.bf16.gmra.mxu1 %vm31_vm1, %v16912_v7  ;;  %13474 = vmatmul.mubr.msk.bf16.gmra.mxu0 %vm31_vm1, %v18612_v29 }
 0x4ba   :  { %v16921_v44 = vadd.f32 %v7356_v52, %v7011_v42  ;;  %v7016_v27 = vadd.f32 %v13245_v61, %v18614_v19  ;;  %13411 = vmatprep.mubr.msk.bf16.mxu1 %vm31_vm1, %v7700_v39  ;;  %13477 = vmatprep.mubr.msk.bf16.mxu0 %vm31_vm1, %v16604_v21  ;;  %v18618_v52 = vld [vmem:[#allocation34_spill] sm:$0xff]  ;;  %v7666_v61 = vld [vmem:[#allocation3 + $0x301] sm:$0xff]  ;;  %v7668_v21 = vld [vmem:[#allocation3 + $0x319] sm:$0xff] }
 0x4bb   :  { %v6819_v32 = vpop.f32.mrf.mxu1  ;;  %v7369_v30 = vpop.f32.mrf.mxu0  ;;  %v16933_v19 = vpack.c.bf16 %v7667_v47, %v7666_v61 }
 0x4bc   :  { %18613 = vst [vmem:[#allocation49_spill] sm:$0xff] %v16921_v44  ;;  %v16927_v41 = vadd.f32 %v13311_v60, %v7016_v27  ;;  %v7014_v24 = vadd.f32 %v6819_v32, %v18616_v56  ;;  %v18621_v60 = vld [vmem:[#allocation21_spill] sm:$0xff] }
 0x4bd   :  { %v13246_v28 = vpop.f32.mrf.mxu1  ;;  %v13312_v18 = vpop.f32.mrf.mxu0  ;;  %18619 = vst [vmem:[#allocation4_spill] sm:$0xff] %v16933_v19 }
 0x4be   :  { %18615 = vst [vmem:[#allocation50_spill] sm:$0xff] %v16927_v41  ;;  %v16930_v22 = vadd.f32 %v7369_v30, %v7014_v24  ;;  %v7017_v42 = vadd.f32 %v13246_v28, %v18618_v52  ;;  %v7702_v41 = vpack.c.bf16 %v7669_v43, %v7668_v21  ;;  %v18622_v30 = vld [vmem:[#allocation22_spill] sm:$0xff]  ;;  %v18624_v28 = vld [vmem:[#allocation20_spill] sm:$0xff] }
 0x4bf   :  { %v6822_v29 = vpop.f32.mrf.mxu1  ;;  %v7372_v39 = vpop.f32.mrf.mxu0  ;;  %v8220_v21 = vld [vmem:[#allocation3 + $0x332] sm:$0xff] }
 0x4c0   :  { %18617 = vst [vmem:[#allocation64_spill] sm:$0xff] %v16930_v22  ;;  %v16935_v44 = vadd.f32 %v13312_v18, %v7017_v42  ;;  %v7015_v27 = vadd.f32 %v6822_v29, %v18621_v60  ;;  %v18626_v42 = vld [vmem:[#allocation25_spill] sm:$0xff]  ;;  %v7671_v29 = vld [vmem:[#allocation3 + $0x339] sm:$0xff] }
 0x4c1   :  { %v13249_v32 = vpop.f32.mrf.mxu1  ;;  %v13315_v56 = vpop.f32.mrf.mxu0  ;;  %13412 = vmatmul.mubr.msk.bf16.gmra.mxu1 %vm31_vm1, %v16933_v19  ;;  %13478 = vmatmul.mubr.msk.bf16.gmra.mxu0 %vm31_vm1, %v18622_v30  ;;  %v8221_v60 = vld [vmem:[#allocation3 + $0x33a] sm:$0xff] }
 0x4c2   :  { %18620 = vst [vmem:[#allocation5_spill] sm:$0xff] %v16935_v44  ;;  %v16942_v24 = vadd.f32 %v7372_v39, %v7015_v27  ;;  %v7020_v52 = vadd.f32 %v13249_v32, %v18624_v28  ;;  %13415 = vmatprep.mubr.msk.bf16.mxu1 %vm31_vm1, %v7702_v41  ;;  %13481 = vmatprep.mubr.msk.bf16.mxu0 %vm31_vm1, %v16624_v53  ;;  %v8710_v39 = vld [vmem:[#allocation3 + $0x38] sm:$0xff] }
 0x4c3   :  { %v6835_v47 = vpop.f32.mrf.mxu1  ;;  %v7385_v18 = vpop.f32.mrf.mxu0  ;;  %v7670_v41 = vld [vmem:[#allocation3 + $0x331] sm:$0xff]  ;;  %v8253_v22 = vpack.c.bf16 %v8221_v60, %v8220_v21 }
 0x4c4   :  { %18623 = vst [vmem:[#allocation12_spill] sm:$0xff] %v16942_v24  ;;  %v16948_v43 = vadd.f32 %v13315_v56, %v7020_v52  ;;  %v7018_v61 = vadd.f32 %v6835_v47, %v18626_v42  ;;  %v16954_v53 = vpack.c.bf16 %v7671_v29, %v7670_v41  ;;  %v8709_v56 = vld [vmem:[#allocation3 + $0x30] sm:$0xff] }
 0x4c5   :  { %v13250_v44 = vpop.f32.mrf.mxu1  ;;  %v13316_v30 = vpop.f32.mrf.mxu0  ;;  %v8773_v42 = vpack.c.bf16 %v8710_v39, %v8709_v56  ;;  %v8712_v60 = vld [vmem:[#allocation3 + $0x50] sm:$0xff] }
 0x4c6   :  { %18625 = vst [vmem:[#allocation8_spill] sm:$0xff] %v16948_v43  ;;  %v16951_v27 = vadd.f32 %v7385_v18, %v7018_v61  ;;  %v7021_v32 = vadd.f32 %v13250_v44, %v16622_v36  ;;  %v18627_v44 = vld [vmem:[#allocation35_spill] sm:$0xff] }
 0x4c7   :  { %v6838_v28 = vpop.f32.mrf.mxu1  ;;  %v7388_v24 = vpop.f32.mrf.mxu0 }
 0x4c8   :  { %v16956_v52 = vadd.f32 %v13316_v30, %v7021_v32  ;;  %v7019_v47 = vadd.f32 %v6838_v28, %v16626_v4  ;;  %v8714_v32 = vld [vmem:[#allocation3 + $0x68] sm:$0xff] }
 0x4c9   :  { %v13253_v43 = vpop.f32.mrf.mxu1  ;;  %v13319_v19 = vpop.f32.mrf.mxu0  ;;  %13416 = vmatmul.mubr.msk.bf16.gmra.mxu1 %vm31_vm1, %v16954_v53  ;;  %13482 = vmatmul.mubr.msk.bf16.gmra.mxu0 %vm31_vm1, %v8253_v22 }
 0x4ca   :  { %v16962_v36 = vadd.f32 %v7388_v24, %v7019_v47  ;;  %v7024_v18 = vadd.f32 %v13253_v43, %v18627_v44  ;;  %13487 = vmatprep.mubr.msk.bf16.mxu1 %vm31_vm1, %v8773_v42  ;;  %13553 = vmatprep.mubr.msk.bf16.mxu0 %vm31_vm1, %v16640_v2  ;;  %v18629_v24 = vld [vmem:[#allocation32_spill] sm:$0xff]  ;;  %v8711_v43 = vld [vmem:[#allocation3 + $0x48] sm:$0xff]  ;;  %v10004_v2 = vsel %vm734_vm0, %v16663_v51, 0  ;;  %v18630_v44 = vld [vmem:[#allocation26_spill] sm:$0xff] }
 0x4cb   :  { %v6851_v61 = vpop.f32.mrf.mxu1  ;;  %v7401_v29 = vpop.f32.mrf.mxu0  ;;  %v8774_v47 = vpack.c.bf16 %v8712_v60, %v8711_v43  ;;  %v8713_v42 = vld [vmem:[#allocation3 + $0x60] sm:$0xff] }
 0x4cc   :  { %v16968_v4 = vadd.f32 %v13319_v19, %v7024_v18  ;;  %v7022_v21 = vadd.f32 %v6851_v61, %v16636_v14  ;;  %v8775_v18 = vpack.c.bf16 %v8714_v32, %v8713_v42  ;;  %v8716_v43 = vld [vmem:[#allocation3 + $0x80] sm:$0xff]  ;;  %v8718_v42 = vld [vmem:[#allocation3 + $0x98] sm:$0xff] }
 0x4cd   :  { %v13254_v30 = vpop.f32.mrf.mxu1  ;;  %v13320_v39 = vpop.f32.mrf.mxu0 }
 0x4ce   :  { %18628 = vst [vmem:[#allocation9_spill] sm:$0xff] %v16968_v4  ;;  %v16971_v22 = vadd.f32 %v7401_v29, %v7022_v21  ;;  %v7025_v41 = vadd.f32 %v13254_v30, %v18629_v24  ;;  %v18631_v29 = vld [vmem:[#allocation27_spill] sm:$0xff]  ;;  %v18633_v30 = vld [vmem:[#allocation24_spill] sm:$0xff] }
 0x4cf   :  { %v6854_v28 = vpop.f32.mrf.mxu1  ;;  %v7404_v56 = vpop.f32.mrf.mxu0  ;;  %v18635_v24 = vld [vmem:[#allocation36_spill] sm:$0xff] }
 0x4d0   :  { %v16976_v19 = vadd.f32 %v13320_v39, %v7025_v41  ;;  %v7023_v14 = vadd.f32 %v6854_v28, %v18630_v44  ;;  %v18636_v44 = vld [vmem:[#allocation38_spill] sm:$0xff] }
 0x4d1   :  { %v13257_v61 = vpop.f32.mrf.mxu1  ;;  %v13323_v4 = vpop.f32.mrf.mxu0  ;;  %13488 = vmatmul.mubr.msk.bf16.vlgmr.msra.gmra.mxu1 %vm31_vm1, %v8774_v47  ;;  %13554 = vmatmul.mubr.msk.bf16.vlgmr.msra.gmra.mxu0 %vm31_vm1, %v18631_v29 }
 0x4d2   :  { %v16982_v21 = vadd.f32 %v7404_v56, %v7023_v14  ;;  %v7028_v60 = vadd.f32 %v13257_v61, %v18633_v30  ;;  %13618 = vmatpush3.bf16.msra.mxu1 %v10004_v2  ;;  %13491 = vmatprep.mubr.msk.bf16.mxu1 %vm31_vm1, %v8775_v18  ;;  %v8715_v2 = vld [vmem:[#allocation3 + $0x78] sm:$0xff]  ;;  %v8717_v30 = vld [vmem:[#allocation3 + $0x90] sm:$0xff] }
 0x4d3   :  { %13557 = vmatprep.mubr.msk.bf16.mxu0 %vm31_vm1, %v16674_v57  ;;  %v6867_v51 = vpop.f32.mrf.mxu1  ;;  %v7417_v39 = vpop.f32.mrf.mxu0  ;;  %v8776_v29 = vpack.c.bf16 %v8716_v43, %v8715_v2 }
 0x4d4   :  { %18632 = vst [vmem:[#allocation6_spill] sm:$0xff] %v16982_v21  ;;  %v16988_v32 = vadd.f32 %v13323_v4, %v7028_v60  ;;  %v7026_v41 = vadd.f32 %v6867_v51, %v18635_v24  ;;  %v18637_v21 = vld [vmem:[#allocation29_spill] sm:$0xff]  ;;  %v8777_v60 = vpack.c.bf16 %v8718_v42, %v8717_v30  ;;  %v18638_v24 = vld [vmem:[#allocation31_spill] sm:$0xff] }
 0x4d5   :  { %v13258_v28 = vpop.f32.mrf.mxu1  ;;  %v13324_v47 = vpop.f32.mrf.mxu0 }
 0x4d6   :  { %18634 = vst [vmem:[#allocation10_spill] sm:$0xff] %v16988_v32  ;;  %v16991_v56 = vadd.f32 %v7417_v39, %v7026_v41  ;;  %v7029_v14 = vadd.f32 %v13258_v28, %v18636_v44  ;;  %v18640_v41 = vld [vmem:[#allocation30_spill] sm:$0xff] }
 0x4d7   :  { %v6870_v61 = vpop.f32.mrf.mxu1  ;;  %v7420_v18 = vpop.f32.mrf.mxu0  ;;  %v8720_v44 = vld [vmem:[#allocation3 + $0xb0] sm:$0xff] }
 0x4d8   :  { %v16994_v57 = vadd.f32 %v13324_v47, %v7029_v14  ;;  %v7027_v4 = vadd.f32 %v6870_v61, %v18637_v21  ;;  %v8722_v61 = vld [vmem:[#allocation3 + $0xc8] sm:$0xff] }
 0x4d9   :  { %v13261_v32 = vpop.f32.mrf.mxu1  ;;  %v13327_v51 = vpop.f32.mrf.mxu0  ;;  %13492 = vmatmul.mubr.msk.bf16.gmra.mxu1 %vm31_vm1, %v8776_v29  ;;  %13558 = vmatmul.mubr.msk.bf16.gmra.mxu0 %vm31_vm1, %v18638_v24 }
 0x4da   :  { %v17000_v39 = vadd.f32 %v7420_v18, %v7027_v4  ;;  %v7032_v28 = vadd.f32 %v13261_v32, %v18640_v41  ;;  %13495 = vmatprep.mubr.msk.bf16.mxu1 %vm31_vm1, %v8777_v60  ;;  %13561 = vmatprep.mubr.msk.bf16.mxu0 %vm31_vm1, %v16694_v34  ;;  %v18642_v18 = vld [vmem:[#allocation39_spill] sm:$0xff]  ;;  %v8719_v32 = vld [vmem:[#allocation3 + $0xa8] sm:$0xff]  ;;  %v8721_v41 = vld [vmem:[#allocation3 + $0xc0] sm:$0xff] }
 0x4db   :  { %v6883_v43 = vpop.f32.mrf.mxu1  ;;  %v7433_v47 = vpop.f32.mrf.mxu0  ;;  %v8778_v24 = vpack.c.bf16 %v8720_v44, %v8719_v32 }
 0x4dc   :  { %18639 = vst [vmem:[#allocation13_spill] sm:$0xff] %v17000_v39  ;;  %v17006_v21 = vadd.f32 %v13327_v51, %v7032_v28  ;;  %v7030_v42 = vadd.f32 %v6883_v43, %v16690_v58  ;;  %v18643_v39 = vld [vmem:[#allocation40_spill] sm:$0xff]  ;;  %v8779_v28 = vpack.c.bf16 %v8722_v61, %v8721_v41  ;;  %v18644_v43 = vld [vmem:[#allocation33_spill] sm:$0xff] }
 0x4dd   :  { %v13262_v14 = vpop.f32.mrf.mxu1  ;;  %v13328_v2 = vpop.f32.mrf.mxu0 }
 0x4de   :  { %18641 = vst [vmem:[#allocation65_spill] sm:$0xff] %v17006_v21  ;;  %v17009_v29 = vadd.f32 %v7433_v47, %v7030_v42  ;;  %v7033_v30 = vadd.f32 %v13262_v14, %v18642_v18  ;;  %v18646_v42 = vld [vmem:[#allocation51_spill] sm:$0xff]  ;;  %v8724_v18 = vld [vmem:[#allocation3 + $0xe0] sm:$0xff] }
 0x4df   :  { %v6886_v4 = vpop.f32.mrf.mxu1  ;;  %v7436_v60 = vpop.f32.mrf.mxu0 }
 0x4e0   :  { %v17012_v34 = vadd.f32 %v13328_v2, %v7033_v30  ;;  %v7031_v51 = vadd.f32 %v6886_v4, %v18643_v39  ;;  %v8726_v4 = vld [vmem:[#allocation3 + $0xf8] sm:$0xff] }
 0x4e1   :  { %v13265_v21 = vpop.f32.mrf.mxu1  ;;  %v13331_v58 = vpop.f32.mrf.mxu0  ;;  %13496 = vmatmul.mubr.msk.bf16.gmra.mxu1 %vm31_vm1, %v8778_v24  ;;  %13562 = vmatmul.mubr.msk.bf16.gmra.mxu0 %vm31_vm1, %v18644_v43 }
 0x4e2   :  { %v17018_v47 = vadd.f32 %v7436_v60, %v7031_v51  ;;  %v7036_v14 = vadd.f32 %v13265_v21, %v18646_v42  ;;  %13499 = vmatprep.mubr.msk.bf16.mxu1 %vm31_vm1, %v8779_v28  ;;  %13565 = vmatprep.mubr.msk.bf16.mxu0 %vm31_vm1, %v16714_v8  ;;  %v18648_v60 = vld [vmem:[#allocation53_spill] sm:$0xff]  ;;  %v8723_v21 = vld [vmem:[#allocation3 + $0xd8] sm:$0xff]  ;;  %v8725_v42 = vld [vmem:[#allocation3 + $0xf0] sm:$0xff] }
 0x4e3   :  { %v6899_v44 = vpop.f32.mrf.mxu1  ;;  %v7449_v2 = vpop.f32.mrf.mxu0  ;;  %v8780_v43 = vpack.c.bf16 %v8724_v18, %v8723_v21 }
 0x4e4   :  { %18645 = vst [vmem:[#allocation67_spill] sm:$0xff] %v17018_v47  ;;  %v17024_v39 = vadd.f32 %v13331_v58, %v7036_v14  ;;  %v7034_v61 = vadd.f32 %v6899_v44, %v16710_v3  ;;  %v18649_v47 = vld [vmem:[#allocation52_spill] sm:$0xff]  ;;  %v8781_v14 = vpack.c.bf16 %v8726_v4, %v8725_v42  ;;  %v18650_v44 = vld [vmem:[#allocation37_spill] sm:$0xff] }
 0x4e5   :  { %v13266_v30 = vpop.f32.mrf.mxu1  ;;  %v13332_v32 = vpop.f32.mrf.mxu0 }
 0x4e6   :  { %18647 = vst [vmem:[#allocation66_spill] sm:$0xff] %v17024_v39  ;;  %v17027_v24 = vadd.f32 %v7449_v2, %v7034_v61  ;;  %v7037_v41 = vadd.f32 %v13266_v30, %v18648_v60  ;;  %v18652_v61 = vld [vmem:[#allocation41_spill] sm:$0xff]  ;;  %v8728_v60 = vld [vmem:[#allocation3 + $0x110] sm:$0xff] }
 0x4e7   :  { %v6902_v51 = vpop.f32.mrf.mxu1  ;;  %v7452_v28 = vpop.f32.mrf.mxu0 }
 0x4e8   :  { %v17030_v8 = vadd.f32 %v13332_v32, %v7037_v41  ;;  %v7035_v58 = vadd.f32 %v6902_v51, %v18649_v47  ;;  %v8730_v51 = vld [vmem:[#allocation3 + $0x128] sm:$0xff] }
 0x4e9   :  { %v13269_v39 = vpop.f32.mrf.mxu1  ;;  %v13335_v3 = vpop.f32.mrf.mxu0  ;;  %13500 = vmatmul.mubr.msk.bf16.gmra.mxu1 %vm31_vm1, %v8780_v43  ;;  %13566 = vmatmul.mubr.msk.bf16.gmra.mxu0 %vm31_vm1, %v18650_v44 }
 0x4ea   :  { %v17036_v2 = vadd.f32 %v7452_v28, %v7035_v58  ;;  %v7040_v30 = vadd.f32 %v13269_v39, %v18652_v61  ;;  %13503 = vmatprep.mubr.msk.bf16.mxu1 %vm31_vm1, %v8781_v14  ;;  %13569 = vmatprep.mubr.msk.bf16.mxu0 %vm31_vm1, %v16734_v23  ;;  %v18654_v28 = vld [vmem:[#allocation54_spill] sm:$0xff]  ;;  %v8727_v39 = vld [vmem:[#allocation3 + $0x108] sm:$0xff]  ;;  %v8729_v61 = vld [vmem:[#allocation3 + $0x120] sm:$0xff] }
 0x4eb   :  { %v6915_v18 = vpop.f32.mrf.mxu1  ;;  %v7465_v32 = vpop.f32.mrf.mxu0  ;;  %v8782_v44 = vpack.c.bf16 %v8728_v60, %v8727_v39 }
 0x4ec   :  { %18651 = vst [vmem:[#allocation14_spill] sm:$0xff] %v17036_v2  ;;  %v17042_v47 = vadd.f32 %v13335_v3, %v7040_v30  ;;  %v7038_v4 = vadd.f32 %v6915_v18, %v16730_v26  ;;  %v18656_v2 = vld [vmem:[#allocation55_spill] sm:$0xff]  ;;  %v8783_v30 = vpack.c.bf16 %v8730_v51, %v8729_v61  ;;  %v18657_v18 = vld [vmem:[#allocation57_spill] sm:$0xff] }
 0x4ed   :  { %v13270_v41 = vpop.f32.mrf.mxu1  ;;  %v13336_v21 = vpop.f32.mrf.mxu0 }
 0x4ee   :  { %18653 = vst [vmem:[#allocation11_spill] sm:$0xff] %v17042_v47  ;;  %v17045_v43 = vadd.f32 %v7465_v32, %v7038_v4  ;;  %v7041_v42 = vadd.f32 %v13270_v41, %v18654_v28  ;;  %v18659_v4 = vld [vmem:[#allocation56_spill] sm:$0xff] }
 0x4ef   :  { %v6918_v58 = vpop.f32.mrf.mxu1  ;;  %v7468_v14 = vpop.f32.mrf.mxu0  ;;  %v8732_v28 = vld [vmem:[#allocation3 + $0x140] sm:$0xff] }
 0x4f0   :  { %v17048_v23 = vadd.f32 %v13336_v21, %v7041_v42  ;;  %v7039_v3 = vadd.f32 %v6918_v58, %v18656_v2  ;;  %v8734_v58 = vld [vmem:[#allocation3 + $0x158] sm:$0xff] }
 0x4f1   :  { %v13273_v47 = vpop.f32.mrf.mxu1  ;;  %v13339_v26 = vpop.f32.mrf.mxu0  ;;  %13504 = vmatmul.mubr.msk.bf16.gmra.mxu1 %vm31_vm1, %v8782_v44  ;;  %13570 = vmatmul.mubr.msk.bf16.gmra.mxu0 %vm31_vm1, %v18657_v18 }
 0x4f2   :  { %18655 = vst [vmem:[#allocation68_spill] sm:$0xff] %v17048_v23  ;;  %v17054_v32 = vadd.f32 %v7468_v14, %v7039_v3  ;;  %v7044_v41 = vadd.f32 %v13273_v47, %v18659_v4  ;;  %13507 = vmatprep.mubr.msk.bf16.mxu1 %vm31_vm1, %v8783_v30  ;;  %13573 = vmatprep.mubr.msk.bf16.mxu0 %vm31_vm1, %v16754_v49  ;;  %v18662_v14 = vld [vmem:[#allocation43_spill] sm:$0xff]  ;;  %v8733_v4 = vld [vmem:[#allocation3 + $0x150] sm:$0xff] }
 0x4f3   :  { %v6931_v60 = vpop.f32.mrf.mxu1  ;;  %v7481_v21 = vpop.f32.mrf.mxu0  ;;  %v8731_v47 = vld [vmem:[#allocation3 + $0x138] sm:$0xff] }
 0x4f4   :  { %18658 = vst [vmem:[#allocation69_spill] sm:$0xff] %v17054_v32  ;;  %v17060_v2 = vadd.f32 %v13339_v26, %v7044_v41  ;;  %v7042_v51 = vadd.f32 %v6931_v60, %v16750_v59  ;;  %v8784_v18 = vpack.c.bf16 %v8732_v28, %v8731_v47  ;;  %v18664_v32 = vld [vmem:[#allocation44_spill] sm:$0xff]  ;;  %v8785_v41 = vpack.c.bf16 %v8734_v58, %v8733_v4  ;;  %v18665_v60 = vld [vmem:[#allocation58_spill] sm:$0xff]  ;;  %v18669_v58 = vld [vmem:[#allocation61_spill] sm:$0xff] }
 0x4f5   :  { %v13274_v42 = vpop.f32.mrf.mxu1  ;;  %v13340_v39 = vpop.f32.mrf.mxu0 }
 0x4f6   :  { %18660 = vst [vmem:[#allocation71_spill] sm:$0xff] %v17060_v2  ;;  %v17063_v44 = vadd.f32 %v7481_v21, %v7042_v51  ;;  %v7045_v61 = vadd.f32 %v13274_v42, %v18662_v14  ;;  %v18667_v51 = vld [vmem:[#allocation59_spill] sm:$0xff] }
 0x4f7   :  { %v6934_v3 = vpop.f32.mrf.mxu1  ;;  %v7484_v30 = vpop.f32.mrf.mxu0 }
 0x4f8   :  { %18661 = vst [vmem:[#allocation70_spill] sm:$0xff] %v17063_v44  ;;  %v17066_v49 = vadd.f32 %v13340_v39, %v7045_v61  ;;  %v7043_v26 = vadd.f32 %v6934_v3, %v18664_v32  ;;  %v8736_v61 = vld [vmem:[#allocation3 + $0x170] sm:$0xff]  ;;  %v18679_v44 = vld [vmem:[#allocation63_spill] sm:$0xff] }
 0x4f9   :  { %v13277_v2 = vpop.f32.mrf.mxu1  ;;  %v13343_v59 = vpop.f32.mrf.mxu0  ;;  %13508 = vmatmul.mubr.msk.bf16.gmra.mxu1 %vm31_vm1, %v8784_v18  ;;  %13574 = vmatmul.mubr.msk.bf16.gmra.mxu0 %vm31_vm1, %v18665_v60  ;;  %v8738_v18 = vld [vmem:[#allocation3 + $0x188] sm:$0xff] }
 0x4fa   :  { %18663 = vst [vmem:[#allocation15_spill] sm:$0xff] %v17066_v49  ;;  %v17072_v21 = vadd.f32 %v7484_v30, %v7043_v26  ;;  %v7048_v42 = vadd.f32 %v13277_v2, %v18667_v51  ;;  %13511 = vmatprep.mubr.msk.bf16.mxu1 %vm31_vm1, %v8785_v41  ;;  %13577 = vmatprep.mubr.msk.bf16.mxu0 %vm31_vm1, %v16774_v45  ;;  %v18671_v30 = vld [vmem:[#allocation60_spill] sm:$0xff]  ;;  %v8735_v2 = vld [vmem:[#allocation3 + $0x168] sm:$0xff]  ;;  %v18673_v49 = vld [vmem:[#allocation42_spill] sm:$0xff] }
 0x4fb   :  { %v6947_v28 = vpop.f32.mrf.mxu1  ;;  %v7497_v39 = vpop.f32.mrf.mxu0  ;;  %v8786_v51 = vpack.c.bf16 %v8736_v61, %v8735_v2  ;;  %v8740_v61 = vld [vmem:[#allocation3 + $0x1a0] sm:$0xff]  ;;  %v18678_v2 = vld [vmem:[#allocation45_spill] sm:$0xff] }
 0x4fc   :  { %18666 = vst [vmem:[#allocation16_spill] sm:$0xff] %v17072_v21  ;;  %v17078_v32 = vadd.f32 %v13343_v59, %v7048_v42  ;;  %v7046_v14 = vadd.f32 %v6947_v28, %v18669_v58  ;;  %v8737_v21 = vld [vmem:[#allocation3 + $0x180] sm:$0xff]  ;;  %v18674_v58 = vld [vmem:[#allocation47_spill] sm:$0xff] }
 0x4fd   :  { %v13278_v47 = vpop.f32.mrf.mxu1  ;;  %v13344_v3 = vpop.f32.mrf.mxu0  ;;  %v8787_v42 = vpack.c.bf16 %v8738_v18, %v8737_v21  ;;  %v9290_v21 = vld [vmem:[#allocation3 + $0x1a1] sm:$0xff] }
 0x4fe   :  { %18668 = vst [vmem:[#allocation72_spill] sm:$0xff] %v17078_v32  ;;  %v17081_v4 = vadd.f32 %v7497_v39, %v7046_v14  ;;  %v7049_v26 = vadd.f32 %v13278_v47, %v18671_v30  ;;  %v8739_v39 = vld [vmem:[#allocation3 + $0x198] sm:$0xff]  ;;  %v18676_v47 = vld [vmem:[#allocation62_spill] sm:$0xff] }
 0x4ff   :  { %v6950_v60 = vpop.f32.mrf.mxu1  ;;  %v7500_v41 = vpop.f32.mrf.mxu0 }
 0x500   :  { %18670 = vst [vmem:[#allocation73_spill] sm:$0xff] %v17081_v4  ;;  %v17084_v45 = vadd.f32 %v13344_v3, %v7049_v26  ;;  %v7047_v59 = vadd.f32 %v6950_v60, %v18673_v49  ;;  %v9289_v49 = vld [vmem:[#allocation3 + $0x199] sm:$0xff] }
 0x501   :  { %v13281_v32 = vpop.f32.mrf.mxu1  ;;  %v13347_v28 = vpop.f32.mrf.mxu0  ;;  %13512 = vmatmul.mubr.msk.bf16.gmra.mxu1 %vm31_vm1, %v8786_v51  ;;  %13578 = vmatmul.mubr.msk.bf16.gmra.mxu0 %vm31_vm1, %v18674_v58 }
 0x502   :  { %18672 = vst [vmem:[#allocation75_spill] sm:$0xff] %v17084_v45  ;;  %v17090_v14 = vadd.f32 %v7500_v41, %v7047_v59  ;;  %v7052_v30 = vadd.f32 %v13281_v32, %v18676_v47  ;;  %13515 = vmatprep.mubr.msk.bf16.mxu1 %vm31_vm1, %v8787_v42  ;;  %13581 = vmatprep.mubr.msk.bf16.mxu0 %vm31_vm1, %v16794_v33  ;;  %v8741_v45 = vld [vmem:[#allocation3 + $0x1e0] sm:$0xff] }
 0x503   :  { %v6963_v3 = vpop.f32.mrf.mxu1  ;;  %v7513_v18 = vpop.f32.mrf.mxu0  ;;  %v8788_v41 = vpack.c.bf16 %v8740_v61, %v8739_v39  ;;  %v9338_v59 = vpack.c.bf16 %v9290_v21, %v9289_v49  ;;  %v18680_v61 = vld [vmem:[#allocation46_spill] sm:$0xff] }
 0x504   :  { %18675 = vst [vmem:[#allocation74_spill] sm:$0xff] %v17090_v14  ;;  %v17096_v26 = vadd.f32 %v13347_v28, %v7052_v30  ;;  %v7050_v60 = vadd.f32 %v6963_v3, %v18678_v2  ;;  %v8742_v14 = vld [vmem:[#allocation3 + $0x1e8] sm:$0xff] }
 0x505   :  { %v13282_v51 = vpop.f32.mrf.mxu1  ;;  %v13348_v58 = vpop.f32.mrf.mxu0  ;;  %v8789_v28 = vpack.c.bf16 %v8742_v14, %v8741_v45  ;;  %v8744_v45 = vld [vmem:[#allocation3 + $0x200] sm:$0xff] }
 0x506   :  { %18677 = vst [vmem:[#allocation18_spill] sm:$0xff] %v17096_v26  ;;  %v17099_v32 = vadd.f32 %v7513_v18, %v7050_v60  ;;  %v7053_v42 = vadd.f32 %v13282_v51, %v16792_v48  ;;  %v9294_v14 = vld [vmem:[#allocation3 + $0x201] sm:$0xff]  ;;  %v8746_v60 = vld [vmem:[#allocation3 + $0x218] sm:$0xff] }
 0x507   :  { %v6966_v47 = vpop.f32.mrf.mxu1  ;;  %v7516_v33 = vpop.f32.mrf.mxu0  ;;  %v18681_v51 = vld [vmem:[#allocation48_spill] sm:$0xff] }
 0x508   :  { %v17102_v4 = vadd.f32 %v13348_v58, %v7053_v42  ;;  %v7051_v23 = vadd.f32 %v6966_v47, %v18679_v44 }
 0x509   :  { %v13285_v30 = vpop.f32.mrf.mxu1  ;;  %v13351_v26 = vpop.f32.mrf.mxu0  ;;  %13516 = vmatmul.mubr.msk.bf16.gmra.mxu1 %vm31_vm1, %v8788_v41  ;;  %13582 = vmatmul.mubr.msk.bf16.gmra.mxu0 %vm31_vm1, %v9338_v59  ;;  %v8743_v41 = vld [vmem:[#allocation3 + $0x1f8] sm:$0xff] }
 0x50a   :  { %v17107_v39 = vadd.f32 %v7516_v33, %v7051_v23  ;;  %v7056_v49 = vadd.f32 %v13285_v30, %v18680_v61  ;;  %13519 = vmatprep.mubr.msk.bf16.mxu1 %vm31_vm1, %v8789_v28  ;;  %13585 = vmatprep.mubr.msk.bf16.mxu0 %vm31_vm1, %v16810_v46  ;;  %v9293_v59 = vld [vmem:[#allocation3 + $0x1f9] sm:$0xff]  ;;  %v8790_v46 = vpack.c.bf16 %v8744_v45, %v8743_v41  ;;  %v8745_v28 = vld [vmem:[#allocation3 + $0x210] sm:$0xff] }
 0x50b   :  { %v6979_v48 = vpop.f32.mrf.mxu1  ;;  %v7529_v21 = vpop.f32.mrf.mxu0  ;;  %v9340_v33 = vpack.c.bf16 %v9294_v14, %v9293_v59  ;;  %v18682_v30 = vld [vmem:[#allocation7_spill] sm:$0xff]  ;;  %v8791_v61 = vpack.c.bf16 %v8746_v60, %v8745_v28  ;;  %v8748_v60 = vld [vmem:[#allocation3 + $0x230] sm:$0xff]  ;;  %v8750_v59 = vld [vmem:[#allocation3 + $0x248] sm:$0xff] }
 0x50c   :  { %v17113_v3 = vadd.f32 %v13351_v26, %v7056_v49  ;;  %v7054_v44 = vadd.f32 %v6979_v48, %v16806_v11 }
 0x50d   :  { %v13286_v18 = vpop.f32.mrf.mxu1  ;;  %v13352_v2 = vpop.f32.mrf.mxu0 }
 0x50e   :  { %v17116_v23 = vadd.f32 %v7529_v21, %v7054_v44  ;;  %v7057_v58 = vadd.f32 %v13286_v18, %v18681_v51  ;;  %v9298_v51 = vld [vmem:[#allocation3 + $0x231] sm:$0xff] }
 0x50f   :  { %v6982_v42 = vpop.f32.mrf.mxu1  ;;  %v7532_v47 = vpop.f32.mrf.mxu0 }
 0x510   :  { %v17119_v26 = vadd.f32 %v13352_v2, %v7057_v58  ;;  %v7055_v11 = vadd.f32 %v6982_v42, %v18682_v30 }
 0x511   :  { %v13357_v49 = vpop.f32.mrf.mxu1  ;;  %v13423_v48 = vpop.f32.mrf.mxu0  ;;  %13520 = vmatmul.mubr.msk.bf16.gmra.mxu1 %vm31_vm1, %v8790_v46  ;;  %13586 = vmatmul.mubr.msk.bf16.gmra.mxu0 %vm31_vm1, %v9340_v33  ;;  %v9297_v46 = vld [vmem:[#allocation3 + $0x229] sm:$0xff] }
 0x512   :  { %v17124_v21 = vadd.f32 %v7532_v47, %v7055_v11  ;;  %v8096_v44 = vadd.f32 %v13357_v49, %v16822_v63  ;;  %13523 = vmatprep.mubr.msk.bf16.mxu1 %vm31_vm1, %v8791_v61  ;;  %13589 = vmatprep.mubr.msk.bf16.mxu0 %vm31_vm1, %v16828_v35  ;;  %v8747_v47 = vld [vmem:[#allocation3 + $0x228] sm:$0xff]  ;;  %v9342_v30 = vpack.c.bf16 %v9298_v51, %v9297_v46  ;;  %v8749_v11 = vld [vmem:[#allocation3 + $0x240] sm:$0xff]  ;;  %v8751_v46 = vld [vmem:[#allocation3 + $0x258] sm:$0xff] }
 0x513   :  { %v7839_v45 = vpop.f32.mrf.mxu1  ;;  %v8389_v14 = vpop.f32.mrf.mxu0  ;;  %v8792_v35 = vpack.c.bf16 %v8748_v60, %v8747_v47  ;;  %v8793_v49 = vpack.c.bf16 %v8750_v59, %v8749_v11  ;;  %v8752_v51 = vld [vmem:[#allocation3 + $0x260] sm:$0xff]  ;;  %v8753_v11 = vld [vmem:[#allocation3 + $0x270] sm:$0xff] }
 0x514   :  { %v17130_v18 = vadd.f32 %v13423_v48, %v8096_v44  ;;  %v8094_v2 = vadd.f32 %v7839_v45, %v16825_v50 }
 0x515   :  { %v13358_v58 = vpop.f32.mrf.mxu1  ;;  %v13424_v41 = vpop.f32.mrf.mxu0 }
 0x516   :  { %v17133_v42 = vadd.f32 %v8389_v14, %v8094_v2  ;;  %v8097_v63 = vadd.f32 %v13358_v58, %v16830_v12  ;;  %v9302_v58 = vld [vmem:[#allocation3 + $0x261] sm:$0xff] }
 0x517   :  { %v7842_v33 = vpop.f32.mrf.mxu1  ;;  %v8392_v28 = vpop.f32.mrf.mxu0 }
 0x518   :  { %v17136_v61 = vadd.f32 %v13424_v41, %v8097_v63  ;;  %v8095_v50 = vadd.f32 %v7842_v33, %v16837_v0  ;;  %v8754_v63 = vld [vmem:[#allocation3 + $0x278] sm:$0xff] }
 0x519   :  { %v13361_v48 = vpop.f32.mrf.mxu1  ;;  %v13427_v44 = vpop.f32.mrf.mxu0  ;;  %13524 = vmatmul.mubr.msk.bf16.gmra.mxu1 %vm31_vm1, %v8792_v35  ;;  %13590 = vmatmul.mubr.msk.bf16.gmra.mxu0 %vm31_vm1, %v9342_v30  ;;  %v9301_v33 = vld [vmem:[#allocation3 + $0x259] sm:$0xff] }
 0x51a   :  { %v17141_v45 = vadd.f32 %v8392_v28, %v8095_v50  ;;  %v8100_v12 = vadd.f32 %v13361_v48, %v16843_v17  ;;  %13527 = vmatprep.mubr.msk.bf16.mxu1 %vm31_vm1, %v8793_v49  ;;  %13593 = vmatprep.mubr.msk.bf16.mxu0 %vm31_vm1, %v16849_v62  ;;  %v8794_v62 = vpack.c.bf16 %v8752_v51, %v8751_v46  ;;  %v8756_v51 = vld [vmem:[#allocation3 + $0x290] sm:$0xff]  ;;  %v8755_v46 = vld [vmem:[#allocation3 + $0x288] sm:$0xff] }
 0x51b   :  { %v7855_v14 = vpop.f32.mrf.mxu1  ;;  %v8405_v2 = vpop.f32.mrf.mxu0  ;;  %v9344_v30 = vpack.c.bf16 %v9302_v58, %v9301_v33  ;;  %v8795_v49 = vpack.c.bf16 %v8754_v63, %v8753_v11  ;;  %v9306_v58 = vld [vmem:[#allocation3 + $0x291] sm:$0xff]  ;;  %v8758_v63 = vld [vmem:[#allocation3 + $0x2a8] sm:$0xff] }
 0x51c   :  { %v17147_v60 = vadd.f32 %v13427_v44, %v8100_v12  ;;  %v8098_v0 = vadd.f32 %v7855_v14, %v16846_v5  ;;  %v9305_v33 = vld [vmem:[#allocation3 + $0x289] sm:$0xff] }
 0x51d   :  { %v13362_v41 = vpop.f32.mrf.mxu1  ;;  %v13428_v59 = vpop.f32.mrf.mxu0 }
 0x51e   :  { %v17150_v47 = vadd.f32 %v8405_v2, %v8098_v0  ;;  %v8101_v17 = vadd.f32 %v13362_v41, %v16851_v13 }
 0x51f   :  { %v7858_v28 = vpop.f32.mrf.mxu1  ;;  %v8408_v35 = vpop.f32.mrf.mxu0 }
 0x520   :  { %v17153_v50 = vadd.f32 %v13428_v59, %v8101_v17  ;;  %v8099_v5 = vadd.f32 %v7858_v28, %v16858_v10 }
 0x521   :  { %v13365_v48 = vpop.f32.mrf.mxu1  ;;  %v13431_v44 = vpop.f32.mrf.mxu0  ;;  %13528 = vmatmul.mubr.msk.bf16.gmra.mxu1 %vm31_vm1, %v8794_v62  ;;  %13594 = vmatmul.mubr.msk.bf16.gmra.mxu0 %vm31_vm1, %v9344_v30  ;;  %v9346_v62 = vpack.c.bf16 %v9306_v58, %v9305_v33  ;;  %v8757_v30 = vld [vmem:[#allocation3 + $0x2a0] sm:$0xff] }
 0x522   :  { %v17158_v12 = vadd.f32 %v8408_v35, %v8099_v5  ;;  %v8104_v13 = vadd.f32 %v13365_v48, %v16864_v37  ;;  %13531 = vmatprep.mubr.msk.bf16.mxu1 %vm31_vm1, %v8795_v49  ;;  %13597 = vmatprep.mubr.msk.bf16.mxu0 %vm31_vm1, %v16870_v38  ;;  %v8796_v38 = vpack.c.bf16 %v8756_v51, %v8755_v46  ;;  %v9310_v51 = vld [vmem:[#allocation3 + $0x2c1] sm:$0xff]  ;;  %v9309_v46 = vld [vmem:[#allocation3 + $0x2b9] sm:$0xff] }
 0x523   :  { %v7871_v14 = vpop.f32.mrf.mxu1  ;;  %v8421_v2 = vpop.f32.mrf.mxu0  ;;  %v8797_v5 = vpack.c.bf16 %v8758_v63, %v8757_v30 }
 0x524   :  { %v17164_v0 = vadd.f32 %v13431_v44, %v8104_v13  ;;  %v8102_v10 = vadd.f32 %v7871_v14, %v16867_v55 }
 0x525   :  { %v13366_v41 = vpop.f32.mrf.mxu1  ;;  %v13432_v59 = vpop.f32.mrf.mxu0 }
 0x526   :  { %v17167_v17 = vadd.f32 %v8421_v2, %v8102_v10  ;;  %v8105_v37 = vadd.f32 %v13366_v41, %v16872_v15  ;;  %v8760_v10 = vld [vmem:[#allocation3 + $0x2c0] sm:$0xff] }
 0x527   :  { %v7874_v28 = vpop.f32.mrf.mxu1  ;;  %v8424_v35 = vpop.f32.mrf.mxu0 }
 0x528   :  { %v17170_v11 = vadd.f32 %v13432_v59, %v8105_v37  ;;  %v8103_v55 = vadd.f32 %v7874_v28, %v16879_v31  ;;  %v8762_v59 = vld [vmem:[#allocation3 + $0x2d8] sm:$0xff] }
 0x529   :  { %v13369_v49 = vpop.f32.mrf.mxu1  ;;  %v13435_v48 = vpop.f32.mrf.mxu0  ;;  %13532 = vmatmul.mubr.msk.bf16.gmra.mxu1 %vm31_vm1, %v8796_v38  ;;  %13598 = vmatmul.mubr.msk.bf16.gmra.mxu0 %vm31_vm1, %v9346_v62  ;;  %v8759_v37 = vld [vmem:[#allocation3 + $0x2b8] sm:$0xff]  ;;  %v8761_v38 = vld [vmem:[#allocation3 + $0x2d0] sm:$0xff] }
 0x52a   :  { %v17175_v44 = vadd.f32 %v8424_v35, %v8103_v55  ;;  %v8108_v15 = vadd.f32 %v13369_v49, %v16885_v6  ;;  %13535 = vmatprep.mubr.msk.bf16.mxu1 %vm31_vm1, %v8797_v5  ;;  %13601 = vmatprep.mubr.msk.bf16.mxu0 %vm31_vm1, %v16891_v40  ;;  %v8798_v40 = vpack.c.bf16 %v8760_v10, %v8759_v37 }
 0x52b   :  { %v7887_v13 = vpop.f32.mrf.mxu1  ;;  %v8437_v14 = vpop.f32.mrf.mxu0  ;;  %v9348_v35 = vpack.c.bf16 %v9310_v51, %v9309_v46  ;;  %v8799_v30 = vpack.c.bf16 %v8762_v59, %v8761_v38  ;;  %v8763_v59 = vld [vmem:[#allocation3 + $0x2e8] sm:$0xff] }
 0x52c   :  { %v17181_v2 = vadd.f32 %v13435_v48, %v8108_v15  ;;  %v8106_v31 = vadd.f32 %v7887_v13, %v16888_v16 }
 0x52d   :  { %v13370_v58 = vpop.f32.mrf.mxu1  ;;  %v13436_v41 = vpop.f32.mrf.mxu0 }
 0x52e   :  { %v17184_v63 = vadd.f32 %v8437_v14, %v8106_v31  ;;  %v8109_v6 = vadd.f32 %v13370_v58, %v16893_v54  ;;  %v8764_v14 = vld [vmem:[#allocation3 + $0x2f0] sm:$0xff]  ;;  %v8766_v58 = vld [vmem:[#allocation3 + $0x308] sm:$0xff] }
 0x52f   :  { %v7890_v33 = vpop.f32.mrf.mxu1  ;;  %v8440_v28 = vpop.f32.mrf.mxu0  ;;  %v9314_v31 = vld [vmem:[#allocation3 + $0x2f1] sm:$0xff] }
 0x530   :  { %v17187_v62 = vadd.f32 %v13436_v41, %v8109_v6  ;;  %v8107_v16 = vadd.f32 %v7890_v33, %v16900_v9  ;;  %v9313_v6 = vld [vmem:[#allocation3 + $0x2e9] sm:$0xff] }
 0x531   :  { %v13373_v55 = vpop.f32.mrf.mxu1  ;;  %v13439_v5 = vpop.f32.mrf.mxu0  ;;  %13536 = vmatmul.mubr.msk.bf16.gmra.mxu1 %vm31_vm1, %v8798_v40  ;;  %13602 = vmatmul.mubr.msk.bf16.gmra.mxu0 %vm31_vm1, %v9348_v35  ;;  %v9350_v33 = vpack.c.bf16 %v9314_v31, %v9313_v6  ;;  %v18683_v35 = vld [vmem:[#allocation49_spill] sm:$0xff] }
 0x532   :  { %v17192_v49 = vadd.f32 %v8440_v28, %v8107_v16  ;;  %v8112_v54 = vadd.f32 %v13373_v55, %v16906_v25  ;;  %13539 = vmatprep.mubr.msk.bf16.mxu1 %vm31_vm1, %v8799_v30  ;;  %13605 = vmatprep.mubr.msk.bf16.mxu0 %vm31_vm1, %v16912_v7  ;;  %v8800_v7 = vpack.c.bf16 %v8764_v14, %v8763_v59  ;;  %v8765_v28 = vld [vmem:[#allocation3 + $0x300] sm:$0xff]  ;;  %v8770_v59 = vld [vmem:[#allocation3 + $0x338] sm:$0xff] }
 0x533   :  { %v7903_v48 = vpop.f32.mrf.mxu1  ;;  %v8453_v15 = vpop.f32.mrf.mxu0  ;;  %v8801_v38 = vpack.c.bf16 %v8766_v58, %v8765_v28  ;;  %v18686_v14 = vld [vmem:[#allocation64_spill] sm:$0xff] }
 0x534   :  { %v17198_v13 = vadd.f32 %v13439_v5, %v8112_v54  ;;  %v8110_v9 = vadd.f32 %v7903_v48, %v16909_v1  ;;  %v18685_v54 = vld [vmem:[#allocation4_spill] sm:$0xff] }
 0x535   :  { %v13374_v10 = vpop.f32.mrf.mxu1  ;;  %v13440_v51 = vpop.f32.mrf.mxu0 }
 0x536   :  { %v17201_v41 = vadd.f32 %v8453_v15, %v8110_v9  ;;  %v8113_v25 = vadd.f32 %v13374_v10, %v16914_v20  ;;  %v18684_v20 = vld [vmem:[#allocation50_spill] sm:$0xff]  ;;  %v8768_v10 = vld [vmem:[#allocation3 + $0x320] sm:$0xff] }
 0x537   :  { %v7906_v37 = vpop.f32.mrf.mxu1  ;;  %v8456_v46 = vpop.f32.mrf.mxu0 }
 0x538   :  { %v17204_v40 = vadd.f32 %v13440_v51, %v8113_v25  ;;  %v8111_v1 = vadd.f32 %v7906_v37, %v18683_v35  ;;  %v9318_v51 = vld [vmem:[#allocation3 + $0x321] sm:$0xff] }
 0x539   :  { %v13377_v16 = vpop.f32.mrf.mxu1  ;;  %v13443_v30 = vpop.f32.mrf.mxu0  ;;  %13540 = vmatmul.mubr.msk.bf16.gmra.mxu1 %vm31_vm1, %v8800_v7  ;;  %13606 = vmatmul.mubr.msk.bf16.gmra.mxu0 %vm31_vm1, %v9350_v33  ;;  %v18687_v37 = vld [vmem:[#allocation5_spill] sm:$0xff]  ;;  %v8767_v7 = vld [vmem:[#allocation3 + $0x318] sm:$0xff] }
 0x53a   :  { %v17209_v55 = vadd.f32 %v8456_v46, %v8111_v1  ;;  %v8116_v5 = vadd.f32 %v13377_v16, %v18684_v20  ;;  %13543 = vmatprep.mubr.msk.bf16.mxu1 %vm31_vm1, %v8801_v38  ;;  %13609 = vmatprep.mubr.msk.bf16.mxu0 %vm31_vm1, %v18685_v54  ;;  %v9317_v33 = vld [vmem:[#allocation3 + $0x319] sm:$0xff]  ;;  %v8802_v1 = vpack.c.bf16 %v8768_v10, %v8767_v7  ;;  %v8769_v16 = vld [vmem:[#allocation3 + $0x330] sm:$0xff] }
 0x53b   :  { %v7919_v48 = vpop.f32.mrf.mxu1  ;;  %v8469_v15 = vpop.f32.mrf.mxu0  ;;  %v9352_v38 = vpack.c.bf16 %v9318_v51, %v9317_v33  ;;  %v18688_v20 = vld [vmem:[#allocation12_spill] sm:$0xff]  ;;  %v8803_v54 = vpack.c.bf16 %v8770_v59, %v8769_v16  ;;  %v8772_v10 = vld [vmem:[#allocation3 + $0x350] sm:$0xff] }
 0x53c   :  { %v17215_v9 = vadd.f32 %v13443_v30, %v8116_v5  ;;  %v8114_v31 = vadd.f32 %v7919_v48, %v18686_v14  ;;  %v9321_v51 = vld [vmem:[#allocation3 + $0x349] sm:$0xff]  ;;  %v9810_v16 = vld [vmem:[#allocation3 + $0x3a] sm:$0xff] }
 0x53d   :  { %v13378_v58 = vpop.f32.mrf.mxu1  ;;  %v13444_v25 = vpop.f32.mrf.mxu0 }
 0x53e   :  { %v17218_v6 = vadd.f32 %v8469_v15, %v8114_v31  ;;  %v8117_v46 = vadd.f32 %v13378_v58, %v18687_v37  ;;  %v8771_v15 = vld [vmem:[#allocation3 + $0x348] sm:$0xff]  ;;  %v18690_v58 = vld [vmem:[#allocation8_spill] sm:$0xff] }
 0x53f   :  { %v7922_v28 = vpop.f32.mrf.mxu1  ;;  %v8472_v35 = vpop.f32.mrf.mxu0 }
 0x540   :  { %v17221_v30 = vadd.f32 %v13444_v25, %v8117_v46  ;;  %v8115_v5 = vadd.f32 %v7922_v28, %v18688_v20  ;;  %v9322_v25 = vld [vmem:[#allocation3 + $0x351] sm:$0xff] }
 0x541   :  { %v13381_v48 = vpop.f32.mrf.mxu1  ;;  %v13447_v14 = vpop.f32.mrf.mxu0  ;;  %13544 = vmatmul.mubr.msk.bf16.gmra.mxu1 %vm31_vm1, %v8802_v1  ;;  %13610 = vmatmul.mubr.msk.bf16.gmra.mxu0 %vm31_vm1, %v9352_v38  ;;  %v9809_v38 = vld [vmem:[#allocation3 + $0x32] sm:$0xff]  ;;  %v9354_v20 = vpack.c.bf16 %v9322_v25, %v9321_v51 }
 0x542   :  { %v17226_v31 = vadd.f32 %v8472_v35, %v8115_v5  ;;  %v8120_v37 = vadd.f32 %v13381_v48, %v18690_v58  ;;  %13547 = vmatprep.mubr.msk.bf16.mxu1 %vm31_vm1, %v8803_v54  ;;  %13613 = vmatprep.mubr.msk.bf16.mxu0 %vm31_vm1, %v16954_v53  ;;  %v8804_v35 = vpack.c.bf16 %v8772_v10, %v8771_v15  ;;  %v18692_v15 = vld [vmem:[#allocation9_spill] sm:$0xff] }
 0x543   :  { %v7935_v59 = vpop.f32.mrf.mxu1  ;;  %v8485_v46 = vpop.f32.mrf.mxu0 }
 0x544   :  { %18689 = vst [vmem:[#allocation19_spill] sm:$0xff] %v17226_v31  ;;  %v17232_v7 = vadd.f32 %v13447_v14, %v8120_v37  ;;  %v8118_v33 = vadd.f32 %v7935_v59, %v16951_v27  ;;  %v9873_v14 = vpack.c.bf16 %v9810_v16, %v9809_v38 }
 0x545   :  { %v13382_v28 = vpop.f32.mrf.mxu1  ;;  %v13448_v1 = vpop.f32.mrf.mxu0 }
 0x546   :  { %18691 = vst [vmem:[#allocation23_spill] sm:$0xff] %v17232_v7  ;;  %v17235_v5 = vadd.f32 %v8485_v46, %v8118_v33  ;;  %v8121_v54 = vadd.f32 %v13382_v28, %v16956_v52  ;;  %v9812_v46 = vld [vmem:[#allocation3 + $0x52] sm:$0xff] }
 0x547   :  { %v7938_v53 = vpop.f32.mrf.mxu1  ;;  %v8488_v48 = vpop.f32.mrf.mxu0 }
 0x548   :  { %v17238_v58 = vadd.f32 %v13448_v1, %v8121_v54  ;;  %v8119_v31 = vadd.f32 %v7938_v53, %v16962_v36  ;;  %v9811_v36 = vld [vmem:[#allocation3 + $0x4a] sm:$0xff]  ;;  %v9813_v1 = vld [vmem:[#allocation3 + $0x62] sm:$0xff] }
 0x549   :  { %v13385_v37 = vpop.f32.mrf.mxu1  ;;  %v13451_v7 = vpop.f32.mrf.mxu0  ;;  %13548 = vmatmul.mubr.msk.bf16.gmra.mxu1 %vm31_vm1, %v8804_v35  ;;  %13614 = vmatmul.mubr.msk.bf16.gmra.mxu0 %vm31_vm1, %v9354_v20  ;;  %v9814_v35 = vld [vmem:[#allocation3 + $0x6a] sm:$0xff]  ;;  %v9874_v54 = vpack.c.bf16 %v9812_v46, %v9811_v36  ;;  %v9815_v46 = vld [vmem:[#allocation3 + $0x7a] sm:$0xff] }
 0x54a   :  { %v17243_v27 = vadd.f32 %v8488_v48, %v8119_v31  ;;  %v8124_v10 = vadd.f32 %v13385_v37, %v18692_v15  ;;  %13619 = vmatprep.mubr.msk.bf16.mxu1 %vm31_vm1, %v9873_v14  ;;  %v18693_v48 = vld [vmem:[#allocation6_spill] sm:$0xff]  ;;  %v9875_v14 = vpack.c.bf16 %v9814_v35, %v9813_v1 }
 0x54b   :  { %v7951_v52 = vpop.f32.mrf.mxu1  ;;  %v8501_v51 = vpop.f32.mrf.mxu0  ;;  %v9817_v35 = vld [vmem:[#allocation3 + $0x92] sm:$0xff] }
 0x54c   :  { %v17247_v25 = vadd.f32 %v13451_v7, %v8124_v10  ;;  %v8122_v59 = vadd.f32 %v7951_v52, %v16971_v22  ;;  %v18695_v10 = vld [vmem:[#allocation10_spill] sm:$0xff] }
 0x54d   :  { %v13386_v33 = vpop.f32.mrf.mxu1  ;;  %v13452_v28 = vpop.f32.mrf.mxu0 }
 0x54e   :  { %v17250_v38 = vadd.f32 %v8501_v51, %v8122_v59  ;;  %v8125_v31 = vadd.f32 %v13386_v33, %v16976_v19  ;;  %v9816_v33 = vld [vmem:[#allocation3 + $0x82] sm:$0xff] }
 0x54f   :  { %v7954_v16 = vpop.f32.mrf.mxu1  ;;  %v8504_v20 = vpop.f32.mrf.mxu0 }
 0x550   :  { %v17253_v53 = vadd.f32 %v13452_v28, %v8125_v31  ;;  %v8123_v7 = vadd.f32 %v7954_v16, %v18693_v48  ;;  %v9818_v31 = vld [vmem:[#allocation3 + $0x9a] sm:$0xff] }
 0x551   :  { %v13389_v37 = vpop.f32.mrf.mxu1  ;;  %v13455_v22 = vpop.f32.mrf.mxu0  ;;  %13620 = vmatmul.mubr.msk.bf16.vlgmr.msra.gmra.mxu1 %vm31_vm1, %v9874_v54 }
 0x552   :  { %v17257_v15 = vadd.f32 %v8504_v20, %v8123_v7  ;;  %v8128_v52 = vadd.f32 %v13389_v37, %v18695_v10  ;;  %13623 = vmatprep.mubr.msk.bf16.mxu1 %vm31_vm1, %v9875_v14  ;;  %v9876_v7 = vpack.c.bf16 %v9816_v33, %v9815_v46  ;;  %v18697_v37 = vld [vmem:[#allocation13_spill] sm:$0xff]  ;;  %v9877_v10 = vpack.c.bf16 %v9818_v31, %v9817_v35 }
 0x553   :  { %v7967_v51 = vpop.f32.mrf.mxu1  ;;  %v8517_v19 = vpop.f32.mrf.mxu0  ;;  %v9819_v33 = vld [vmem:[#allocation3 + $0xaa] sm:$0xff]  ;;  %v9821_v31 = vld [vmem:[#allocation3 + $0xc2] sm:$0xff] }
 0x554   :  { %18694 = vst [vmem:[#allocation17_spill] sm:$0xff] %v17257_v15  ;;  %v17261_v59 = vadd.f32 %v13455_v22, %v8128_v52  ;;  %v8126_v36 = vadd.f32 %v7967_v51, %v16991_v56 }
 0x555   :  { %v13390_v28 = vpop.f32.mrf.mxu1  ;;  %v13456_v1 = vpop.f32.mrf.mxu0 }
 0x556   :  { %18696 = vst [vmem:[#allocation28_spill] sm:$0xff] %v17261_v59  ;;  %v17264_v16 = vadd.f32 %v8517_v19, %v8126_v36  ;;  %v8129_v20 = vadd.f32 %v13390_v28, %v16994_v57  ;;  %v18699_v59 = vld [vmem:[#allocation65_spill] sm:$0xff]  ;;  %v9820_v28 = vld [vmem:[#allocation3 + $0xb2] sm:$0xff] }
 0x557   :  { %v7970_v54 = vpop.f32.mrf.mxu1  ;;  %v8520_v48 = vpop.f32.mrf.mxu0 }
 0x558   :  { %v17267_v14 = vadd.f32 %v13456_v1, %v8129_v20  ;;  %v8127_v22 = vadd.f32 %v7970_v54, %v18697_v37  ;;  %v9822_v20 = vld [vmem:[#allocation3 + $0xca] sm:$0xff]  ;;  %v9878_v37 = vpack.c.bf16 %v9820_v28, %v9819_v33  ;;  %v9823_v28 = vld [vmem:[#allocation3 + $0xda] sm:$0xff] }
 0x559   :  { %v13393_v52 = vpop.f32.mrf.mxu1  ;;  %v13459_v56 = vpop.f32.mrf.mxu0  ;;  %13624 = vmatmul.mubr.msk.bf16.gmra.mxu1 %vm31_vm1, %v9876_v7 }
 0x55a   :  { %v17271_v51 = vadd.f32 %v8520_v48, %v8127_v22  ;;  %v8132_v15 = vadd.f32 %v13393_v52, %v18699_v59  ;;  %13627 = vmatprep.mubr.msk.bf16.mxu1 %vm31_vm1, %v9877_v10  ;;  %v18701_v10 = vld [vmem:[#allocation67_spill] sm:$0xff]  ;;  %v9879_v52 = vpack.c.bf16 %v9822_v20, %v9821_v31 }
 0x55b   :  { %v7983_v19 = vpop.f32.mrf.mxu1  ;;  %v8533_v57 = vpop.f32.mrf.mxu0  ;;  %v9825_v20 = vld [vmem:[#allocation3 + $0xf2] sm:$0xff] }
 0x55c   :  { %18698 = vst [vmem:[#allocation34_spill] sm:$0xff] %v17271_v51  ;;  %v17275_v36 = vadd.f32 %v13459_v56, %v8132_v15  ;;  %v8130_v46 = vadd.f32 %v7983_v19, %v17009_v29 }
 0x55d   :  { %v13394_v1 = vpop.f32.mrf.mxu1  ;;  %v13460_v35 = vpop.f32.mrf.mxu0 }
 0x55e   :  { %18700 = vst [vmem:[#allocation21_spill] sm:$0xff] %v17275_v36  ;;  %v17278_v54 = vadd.f32 %v8533_v57, %v8130_v46  ;;  %v8133_v48 = vadd.f32 %v13394_v1, %v17012_v34  ;;  %v18703_v36 = vld [vmem:[#allocation66_spill] sm:$0xff]  ;;  %v9824_v1 = vld [vmem:[#allocation3 + $0xe2] sm:$0xff] }
 0x55f   :  { %v7986_v7 = vpop.f32.mrf.mxu1  ;;  %v8536_v59 = vpop.f32.mrf.mxu0 }
 0x560   :  { %v17281_v22 = vadd.f32 %v13460_v35, %v8133_v48  ;;  %v8131_v15 = vadd.f32 %v7986_v7, %v18701_v10  ;;  %v9826_v48 = vld [vmem:[#allocation3 + $0xfa] sm:$0xff]  ;;  %v9880_v10 = vpack.c.bf16 %v9824_v1, %v9823_v28  ;;  %v9827_v1 = vld [vmem:[#allocation3 + $0x10a] sm:$0xff] }
 0x561   :  { %v13397_v56 = vpop.f32.mrf.mxu1  ;;  %v13463_v29 = vpop.f32.mrf.mxu0  ;;  %13628 = vmatmul.mubr.msk.bf16.gmra.mxu1 %vm31_vm1, %v9878_v37 }
 0x562   :  { %v17285_v19 = vadd.f32 %v8536_v59, %v8131_v15  ;;  %v8136_v51 = vadd.f32 %v13397_v56, %v18703_v36  ;;  %13631 = vmatprep.mubr.msk.bf16.mxu1 %vm31_vm1, %v9879_v52  ;;  %v18706_v52 = vld [vmem:[#allocation14_spill] sm:$0xff]  ;;  %v9881_v56 = vpack.c.bf16 %v9826_v48, %v9825_v20  ;;  %v9829_v48 = vld [vmem:[#allocation3 + $0x122] sm:$0xff] }
 0x563   :  { %v7999_v57 = vpop.f32.mrf.mxu1  ;;  %v8549_v34 = vpop.f32.mrf.mxu0 }
 0x564   :  { %18702 = vst [vmem:[#allocation22_spill] sm:$0xff] %v17285_v19  ;;  %v17289_v46 = vadd.f32 %v13463_v29, %v8136_v51  ;;  %v8134_v33 = vadd.f32 %v7999_v57, %v17027_v24 }
 0x565   :  { %v13398_v35 = vpop.f32.mrf.mxu1  ;;  %v13464_v31 = vpop.f32.mrf.mxu0 }
 0x566   :  { %18704 = vst [vmem:[#allocation20_spill] sm:$0xff] %v17289_v46  ;;  %v17292_v7 = vadd.f32 %v8549_v34, %v8134_v33  ;;  %v8137_v59 = vadd.f32 %v13398_v35, %v17030_v8  ;;  %v18708_v46 = vld [vmem:[#allocation11_spill] sm:$0xff] }
 0x567   :  { %v8002_v37 = vpop.f32.mrf.mxu1  ;;  %v8552_v36 = vpop.f32.mrf.mxu0  ;;  %v9828_v35 = vld [vmem:[#allocation3 + $0x112] sm:$0xff] }
 0x568   :  { %v17295_v15 = vadd.f32 %v13464_v31, %v8137_v59  ;;  %v8135_v51 = vadd.f32 %v8002_v37, %v18706_v52  ;;  %v9830_v59 = vld [vmem:[#allocation3 + $0x12a] sm:$0xff] }
 0x569   :  { %v13401_v29 = vpop.f32.mrf.mxu1  ;;  %v13467_v24 = vpop.f32.mrf.mxu0  ;;  %13632 = vmatmul.mubr.msk.bf16.gmra.mxu1 %vm31_vm1, %v9880_v10 }
 0x56a   :  { %18705 = vst [vmem:[#allocation25_spill] sm:$0xff] %v17295_v15  ;;  %v17299_v57 = vadd.f32 %v8552_v36, %v8135_v51  ;;  %v8140_v19 = vadd.f32 %v13401_v29, %v18708_v46  ;;  %13635 = vmatprep.mubr.msk.bf16.mxu1 %vm31_vm1, %v9881_v56  ;;  %v18711_v36 = vld [vmem:[#allocation68_spill] sm:$0xff]  ;;  %v9882_v51 = vpack.c.bf16 %v9828_v35, %v9827_v1  ;;  %v18713_v29 = vld [vmem:[#allocation69_spill] sm:$0xff]  ;;  %v18717_v1 = vld [vmem:[#allocation70_spill] sm:$0xff] }
 0x56b   :  { %v8015_v34 = vpop.f32.mrf.mxu1  ;;  %v8565_v8 = vpop.f32.mrf.mxu0 }
 0x56c   :  { %18707 = vst [vmem:[#allocation35_spill] sm:$0xff] %v17299_v57  ;;  %v17303_v33 = vadd.f32 %v13467_v24, %v8140_v19  ;;  %v8138_v28 = vadd.f32 %v8015_v34, %v17045_v43  ;;  %v9883_v24 = vpack.c.bf16 %v9830_v59, %v9829_v48  ;;  %v18715_v57 = vld [vmem:[#allocation71_spill] sm:$0xff] }
 0x56d   :  { %v13402_v31 = vpop.f32.mrf.mxu1  ;;  %v13468_v20 = vpop.f32.mrf.mxu0  ;;  %v9833_v59 = vld [vmem:[#allocation3 + $0x152] sm:$0xff] }
 0x56e   :  { %18709 = vst [vmem:[#allocation32_spill] sm:$0xff] %v17303_v33  ;;  %v17306_v37 = vadd.f32 %v8565_v8, %v8138_v28  ;;  %v8141_v10 = vadd.f32 %v13402_v31, %v18711_v36  ;;  %v9832_v36 = vld [vmem:[#allocation3 + $0x142] sm:$0xff] }
 0x56f   :  { %v8018_v52 = vpop.f32.mrf.mxu1  ;;  %v8568_v46 = vpop.f32.mrf.mxu0 }
 0x570   :  { %18710 = vst [vmem:[#allocation26_spill] sm:$0xff] %v17306_v37  ;;  %v17309_v56 = vadd.f32 %v13468_v20, %v8141_v10  ;;  %v8139_v19 = vadd.f32 %v8018_v52, %v18713_v29  ;;  %v9831_v20 = vld [vmem:[#allocation3 + $0x13a] sm:$0xff] }
 0x571   :  { %v13405_v33 = vpop.f32.mrf.mxu1  ;;  %v13471_v43 = vpop.f32.mrf.mxu0  ;;  %13636 = vmatmul.mubr.msk.bf16.gmra.mxu1 %vm31_vm1, %v9882_v51  ;;  %v9834_v52 = vld [vmem:[#allocation3 + $0x15a] sm:$0xff] }
 0x572   :  { %18712 = vst [vmem:[#allocation27_spill] sm:$0xff] %v17309_v56  ;;  %v17313_v34 = vadd.f32 %v8568_v46, %v8139_v19  ;;  %v8144_v15 = vadd.f32 %v13405_v33, %v18715_v57  ;;  %13639 = vmatprep.mubr.msk.bf16.mxu1 %vm31_vm1, %v9883_v24  ;;  %v18719_v46 = vld [vmem:[#allocation15_spill] sm:$0xff]  ;;  %v9884_v33 = vpack.c.bf16 %v9832_v36, %v9831_v20  ;;  %v18723_v56 = vld [vmem:[#allocation72_spill] sm:$0xff]  ;;  %v18725_v20 = vld [vmem:[#allocation73_spill] sm:$0xff] }
 0x573   :  { %v8031_v8 = vpop.f32.mrf.mxu1  ;;  %v8581_v28 = vpop.f32.mrf.mxu0 }
 0x574   :  { %18714 = vst [vmem:[#allocation24_spill] sm:$0xff] %v17313_v34  ;;  %v17317_v31 = vadd.f32 %v13471_v43, %v8144_v15  ;;  %v8142_v35 = vadd.f32 %v8031_v8, %v18717_v1  ;;  %v18721_v34 = vld [vmem:[#allocation16_spill] sm:$0xff]  ;;  %v9885_v43 = vpack.c.bf16 %v9834_v52, %v9833_v59 }
 0x575   :  { %v13406_v10 = vpop.f32.mrf.mxu1  ;;  %v13472_v48 = vpop.f32.mrf.mxu0  ;;  %v9837_v52 = vld [vmem:[#allocation3 + $0x182] sm:$0xff] }
 0x576   :  { %18716 = vst [vmem:[#allocation36_spill] sm:$0xff] %v17317_v31  ;;  %v17320_v29 = vadd.f32 %v8581_v28, %v8142_v35  ;;  %v8145_v51 = vadd.f32 %v13406_v10, %v18719_v46  ;;  %v9836_v46 = vld [vmem:[#allocation3 + $0x172] sm:$0xff] }
 0x577   :  { %v8034_v19 = vpop.f32.mrf.mxu1  ;;  %v8584_v57 = vpop.f32.mrf.mxu0 }
 0x578   :  { %18718 = vst [vmem:[#allocation38_spill] sm:$0xff] %v17320_v29  ;;  %v17323_v24 = vadd.f32 %v13472_v48, %v8145_v51  ;;  %v8143_v15 = vadd.f32 %v8034_v19, %v18721_v34  ;;  %v9835_v48 = vld [vmem:[#allocation3 + $0x16a] sm:$0xff] }
 0x579   :  { %v13409_v31 = vpop.f32.mrf.mxu1  ;;  %v13475_v8 = vpop.f32.mrf.mxu0  ;;  %13640 = vmatmul.mubr.msk.bf16.gmra.mxu1 %vm31_vm1, %v9884_v33  ;;  %v9838_v51 = vld [vmem:[#allocation3 + $0x18a] sm:$0xff] }
 0x57a   :  { %18720 = vst [vmem:[#allocation29_spill] sm:$0xff] %v17323_v24  ;;  %v17327_v1 = vadd.f32 %v8584_v57, %v8143_v15  ;;  %v8148_v37 = vadd.f32 %v13409_v31, %v18723_v56  ;;  %13643 = vmatprep.mubr.msk.bf16.mxu1 %vm31_vm1, %v9885_v43  ;;  %v18726_v57 = vld [vmem:[#allocation75_spill] sm:$0xff]  ;;  %v9886_v31 = vpack.c.bf16 %v9836_v46, %v9835_v48  ;;  %v18728_v24 = vld [vmem:[#allocation18_spill] sm:$0xff] }
 0x57b   :  { %v8047_v28 = vpop.f32.mrf.mxu1  ;;  %v8597_v35 = vpop.f32.mrf.mxu0 }
 0x57c   :  { %18722 = vst [vmem:[#allocation31_spill] sm:$0xff] %v17327_v1  ;;  %v17331_v10 = vadd.f32 %v13475_v8, %v8148_v37  ;;  %v8146_v36 = vadd.f32 %v8047_v28, %v18725_v20  ;;  %v18727_v1 = vld [vmem:[#allocation74_spill] sm:$0xff]  ;;  %v9887_v8 = vpack.c.bf16 %v9838_v51, %v9837_v52  ;;  %v9841_v51 = vld [vmem:[#allocation3 + $0x1e2] sm:$0xff] }
 0x57d   :  { %v13410_v34 = vpop.f32.mrf.mxu1  ;;  %v13476_v59 = vpop.f32.mrf.mxu0 }
 0x57e   :  { %18724 = vst [vmem:[#allocation30_spill] sm:$0xff] %v17331_v10  ;;  %v17334_v19 = vadd.f32 %v8597_v35, %v8146_v36  ;;  %v8149_v33 = vadd.f32 %v13410_v34, %v18726_v57  ;;  %v9839_v35 = vld [vmem:[#allocation3 + $0x19a] sm:$0xff]  ;;  %v9840_v36 = vld [vmem:[#allocation3 + $0x1a2] sm:$0xff] }
 0x57f   :  { %v8050_v15 = vpop.f32.mrf.mxu1  ;;  %v8600_v56 = vpop.f32.mrf.mxu0  ;;  %v9888_v52 = vpack.c.bf16 %v9840_v36, %v9839_v35 }
 0x580   :  { %v17337_v43 = vadd.f32 %v13476_v59, %v8149_v33  ;;  %v8147_v37 = vadd.f32 %v8050_v15, %v18727_v1  ;;  %v9842_v33 = vld [vmem:[#allocation3 + $0x1ea] sm:$0xff] }
 0x581   :  { %v13413_v10 = vpop.f32.mrf.mxu1  ;;  %v13479_v28 = vpop.f32.mrf.mxu0  ;;  %13644 = vmatmul.mubr.msk.bf16.gmra.mxu1 %vm31_vm1, %v9886_v31 }
 0x582   :  { %v17341_v20 = vadd.f32 %v8600_v56, %v8147_v37  ;;  %v8152_v29 = vadd.f32 %v13413_v10, %v18728_v24  ;;  %13647 = vmatprep.mubr.msk.bf16.mxu1 %vm31_vm1, %v9887_v8  ;;  %v9889_v8 = vpack.c.bf16 %v9842_v33, %v9841_v51  ;;  %v9845_v51 = vld [vmem:[#allocation3 + $0x212] sm:$0xff]  ;;  %v9846_v33 = vld [vmem:[#allocation3 + $0x21a] sm:$0xff] }
 0x583   :  { %v8063_v34 = vpop.f32.mrf.mxu1  ;;  %v8613_v57 = vpop.f32.mrf.mxu0 }
 0x584   :  { %v17345_v48 = vadd.f32 %v13479_v28, %v8152_v29  ;;  %v8150_v46 = vadd.f32 %v8063_v34, %v17099_v32 }
 0x585   :  { %v13414_v1 = vpop.f32.mrf.mxu1  ;;  %v13480_v59 = vpop.f32.mrf.mxu0 }
 0x586   :  { %v17348_v15 = vadd.f32 %v8613_v57, %v8150_v46  ;;  %v8153_v56 = vadd.f32 %v13414_v1, %v17102_v4  ;;  %v9843_v46 = vld [vmem:[#allocation3 + $0x1fa] sm:$0xff]  ;;  %v9844_v1 = vld [vmem:[#allocation3 + $0x202] sm:$0xff] }
 0x587   :  { %v8066_v24 = vpop.f32.mrf.mxu1  ;;  %v8616_v10 = vpop.f32.mrf.mxu0 }
 0x588   :  { %v17351_v31 = vadd.f32 %v13480_v59, %v8153_v56  ;;  %v8151_v37 = vadd.f32 %v8066_v24, %v17107_v39 }
 0x589   :  { %v13417_v29 = vpop.f32.mrf.mxu1  ;;  %v13483_v28 = vpop.f32.mrf.mxu0  ;;  %13648 = vmatmul.mubr.msk.bf16.gmra.mxu1 %vm31_vm1, %v9888_v52 }
 0x58a   :  { %v17355_v32 = vadd.f32 %v8616_v10, %v8151_v37  ;;  %v8156_v35 = vadd.f32 %v13417_v29, %v17113_v3  ;;  %13651 = vmatprep.mubr.msk.bf16.mxu1 %vm31_vm1, %v9889_v8  ;;  %v9890_v10 = vpack.c.bf16 %v9844_v1, %v9843_v46  ;;  %v9891_v29 = vpack.c.bf16 %v9846_v33, %v9845_v51  ;;  %v9848_v46 = vld [vmem:[#allocation3 + $0x232] sm:$0xff] }
 0x58b   :  { %v8079_v36 = vpop.f32.mrf.mxu1  ;;  %v8629_v34 = vpop.f32.mrf.mxu0 }
 0x58c   :  { %v17359_v4 = vadd.f32 %v13483_v28, %v8156_v35  ;;  %v8154_v57 = vadd.f32 %v8079_v36, %v17116_v23 }
 0x58d   :  { %v13418_v39 = vpop.f32.mrf.mxu1  ;;  %v13484_v59 = vpop.f32.mrf.mxu0 }
 0x58e   :  { %v17362_v56 = vadd.f32 %v8629_v34, %v8154_v57  ;;  %v8157_v52 = vadd.f32 %v13418_v39, %v17119_v26  ;;  %v9849_v39 = vld [vmem:[#allocation3 + $0x242] sm:$0xff] }
 0x58f   :  { %v8082_v24 = vpop.f32.mrf.mxu1  ;;  %v8632_v3 = vpop.f32.mrf.mxu0 }
 0x590   :  { %v17365_v37 = vadd.f32 %v13484_v59, %v8157_v52  ;;  %v8155_v8 = vadd.f32 %v8082_v24, %v17124_v21  ;;  %v9847_v21 = vld [vmem:[#allocation3 + $0x22a] sm:$0xff] }
 0x591   :  { %v13489_v28 = vpop.f32.mrf.mxu1  ;;  %v17368_v23 = vpop.f32.mrf.mxu0  ;;  %13652 = vmatmul.mubr.msk.bf16.gmra.mxu1 %vm31_vm1, %v9890_v10  ;;  %v9850_v59 = vld [vmem:[#allocation3 + $0x24a] sm:$0xff]  ;;  %v9892_v52 = vpack.c.bf16 %v9848_v46, %v9847_v21  ;;  %v9854_v46 = vld [vmem:[#allocation3 + $0x27a] sm:$0xff] }
 0x592   :  { %v17371_v35 = vadd.f32 %v8632_v3, %v8155_v8  ;;  %v17374_v36 = vadd.f32 %v13489_v28, %v17130_v18  ;;  %13655 = vmatprep.mubr.msk.bf16.mxu1 %vm31_vm1, %v9891_v29  ;;  %v9893_v3 = vpack.c.bf16 %v9850_v59, %v9849_v39  ;;  %v9851_v28 = vld [vmem:[#allocation3 + $0x25a] sm:$0xff] }
 0x593   :  { %v8940_v26 = vpop.f32.mrf.mxu1  ;;  %v17380_v57 = vpop.f32.mrf.mxu0 }
 0x594   :  { %v17378_v34 = vadd.f32 %v8940_v26, %v17133_v42  ;;  %v9852_v26 = vld [vmem:[#allocation3 + $0x262] sm:$0xff] }
 0x595   :  { %v13490_v1 = vpop.f32.mrf.mxu1  ;;  %v17385_v18 = vpop.f32.mrf.mxu0  ;;  %v9894_v59 = vpack.c.bf16 %v9852_v26, %v9851_v28  ;;  %v9855_v28 = vld [vmem:[#allocation3 + $0x28a] sm:$0xff]  ;;  %v9856_v26 = vld [vmem:[#allocation3 + $0x292] sm:$0xff] }
 0x596   :  { %v17383_v51 = vadd.f32 %v13490_v1, %v17136_v61 }
 0x597   :  { %v8943_v33 = vpop.f32.mrf.mxu1  ;;  %v17395_v29 = vpop.f32.mrf.mxu0 }
 0x598   :  { %v17388_v24 = vadd.f32 %v8943_v33, %v17141_v45  ;;  %v9853_v45 = vld [vmem:[#allocation3 + $0x272] sm:$0xff] }
 0x599   :  { %v13493_v42 = vpop.f32.mrf.mxu1  ;;  %13656 = vmatmul.mubr.msk.bf16.gmra.mxu1 %vm31_vm1, %v9892_v52  ;;  %v9895_v52 = vpack.c.bf16 %v9854_v46, %v9853_v45 }
 0x59a   :  { %v17392_v10 = vadd.f32 %v13493_v42, %v17147_v60  ;;  %13659 = vmatprep.mubr.msk.bf16.mxu1 %vm31_vm1, %v9893_v3  ;;  %v17403_v60 = vpop.f32.mrf.mxu0 }
 0x59b   :  { %v8956_v8 = vpop.f32.mrf.mxu1 }
 0x59c   :  { %v17398_v61 = vadd.f32 %v8956_v8, %v17150_v47  ;;  %v17413_v8 = vpop.f32.mrf.mxu0 }
 0x59d   :  { %v13494_v21 = vpop.f32.mrf.mxu1 }
 0x59e   :  { %v17401_v1 = vadd.f32 %v13494_v21, %v17153_v50 }
 0x59f   :  { %v8959_v39 = vpop.f32.mrf.mxu1 }
 0x5a0   :  { %v17406_v33 = vadd.f32 %v8959_v39, %v17158_v12  ;;  %v9857_v12 = vld [vmem:[#allocation3 + $0x2a2] sm:$0xff]  ;;  %v9858_v39 = vld [vmem:[#allocation3 + $0x2aa] sm:$0xff] }
 0x5a1   :  { %v13497_v3 = vpop.f32.mrf.mxu1  ;;  %13660 = vmatmul.mubr.msk.bf16.gmra.mxu1 %vm31_vm1, %v9894_v59  ;;  %v9896_v59 = vpack.c.bf16 %v9856_v26, %v9855_v28  ;;  %v9859_v28 = vld [vmem:[#allocation3 + $0x2ba] sm:$0xff]  ;;  %v9860_v26 = vld [vmem:[#allocation3 + $0x2c2] sm:$0xff] }
 0x5a2   :  { %v17410_v47 = vadd.f32 %v13497_v3, %v17164_v0  ;;  %13663 = vmatprep.mubr.msk.bf16.mxu1 %vm31_vm1, %v9895_v52  ;;  %v17421_v0 = vpop.f32.mrf.mxu0  ;;  %v9897_v3 = vpack.c.bf16 %v9858_v39, %v9857_v12 }
 0x5a3   :  { %v8972_v42 = vpop.f32.mrf.mxu1 }
 0x5a4   :  { %18729 = vst [vmem:[#allocation39_spill] sm:$0xff] %v17410_v47  ;;  %v17416_v50 = vadd.f32 %v8972_v42, %v17167_v17 }
 0x5a5   :  { %v13498_v21 = vpop.f32.mrf.mxu1 }
 0x5a6   :  { %18730 = vst [vmem:[#allocation40_spill] sm:$0xff] %v17416_v50  ;;  %v17419_v45 = vadd.f32 %v13498_v21, %v17170_v11  ;;  %v17431_v50 = vpop.f32.mrf.mxu0 }
 0x5a7   :  { %v8975_v46 = vpop.f32.mrf.mxu1 }
 0x5a8   :  { %v17424_v52 = vadd.f32 %v8975_v46, %v17175_v44  ;;  %v9861_v44 = vld [vmem:[#allocation3 + $0x2d2] sm:$0xff]  ;;  %v9862_v46 = vld [vmem:[#allocation3 + $0x2da] sm:$0xff] }
 0x5a9   :  { %v13501_v47 = vpop.f32.mrf.mxu1  ;;  %13664 = vmatmul.mubr.msk.bf16.gmra.mxu1 %vm31_vm1, %v9896_v59  ;;  %v9898_v59 = vpack.c.bf16 %v9860_v26, %v9859_v28  ;;  %v9863_v28 = vld [vmem:[#allocation3 + $0x2ea] sm:$0xff]  ;;  %v9864_v26 = vld [vmem:[#allocation3 + $0x2f2] sm:$0xff] }
 0x5aa   :  { %v17428_v17 = vadd.f32 %v13501_v47, %v17181_v2  ;;  %13667 = vmatprep.mubr.msk.bf16.mxu1 %vm31_vm1, %v9897_v3  ;;  %v17439_v2 = vpop.f32.mrf.mxu0  ;;  %v9899_v3 = vpack.c.bf16 %v9862_v46, %v9861_v44 }
 0x5ab   :  { %v8988_v42 = vpop.f32.mrf.mxu1 }
 0x5ac   :  { %18731 = vst [vmem:[#allocation33_spill] sm:$0xff] %v17428_v17  ;;  %v17434_v11 = vadd.f32 %v8988_v42, %v17184_v63 }
 0x5ad   :  { %v13502_v21 = vpop.f32.mrf.mxu1 }
 0x5ae   :  { %18732 = vst [vmem:[#allocation51_spill] sm:$0xff] %v17434_v11  ;;  %v17437_v12 = vadd.f32 %v13502_v21, %v17187_v62  ;;  %v17449_v11 = vpop.f32.mrf.mxu0 }
 0x5af   :  { %v8991_v39 = vpop.f32.mrf.mxu1 }
 0x5b0   :  { %v17442_v47 = vadd.f32 %v8991_v39, %v17192_v49  ;;  %v9865_v49 = vld [vmem:[#allocation3 + $0x302] sm:$0xff]  ;;  %v9866_v39 = vld [vmem:[#allocation3 + $0x30a] sm:$0xff] }
 0x5b1   :  { %v13505_v17 = vpop.f32.mrf.mxu1  ;;  %13668 = vmatmul.mubr.msk.bf16.gmra.mxu1 %vm31_vm1, %v9898_v59  ;;  %v9900_v59 = vpack.c.bf16 %v9864_v26, %v9863_v28  ;;  %v9867_v28 = vld [vmem:[#allocation3 + $0x31a] sm:$0xff]  ;;  %v9868_v26 = vld [vmem:[#allocation3 + $0x322] sm:$0xff] }
 0x5b2   :  { %v17446_v63 = vadd.f32 %v13505_v17, %v17198_v13  ;;  %13671 = vmatprep.mubr.msk.bf16.mxu1 %vm31_vm1, %v9899_v3  ;;  %v17457_v13 = vpop.f32.mrf.mxu0  ;;  %v9901_v3 = vpack.c.bf16 %v9866_v39, %v9865_v49 }
 0x5b3   :  { %v9004_v42 = vpop.f32.mrf.mxu1 }
 0x5b4   :  { %18733 = vst [vmem:[#allocation53_spill] sm:$0xff] %v17446_v63  ;;  %v17452_v62 = vadd.f32 %v9004_v42, %v17201_v41 }
 0x5b5   :  { %v13506_v21 = vpop.f32.mrf.mxu1 }
 0x5b6   :  { %18734 = vst [vmem:[#allocation52_spill] sm:$0xff] %v17452_v62  ;;  %v17455_v44 = vadd.f32 %v13506_v21, %v17204_v40  ;;  %v17467_v62 = vpop.f32.mrf.mxu0 }
 0x5b7   :  { %v9007_v46 = vpop.f32.mrf.mxu1 }
 0x5b8   :  { %18735 = vst [vmem:[#allocation37_spill] sm:$0xff] %v17455_v44  ;;  %v17460_v17 = vadd.f32 %v9007_v46, %v17209_v55  ;;  %v9869_v55 = vld [vmem:[#allocation3 + $0x332] sm:$0xff]  ;;  %v9870_v46 = vld [vmem:[#allocation3 + $0x33a] sm:$0xff] }
 0x5b9   :  { %v13509_v63 = vpop.f32.mrf.mxu1  ;;  %13672 = vmatmul.mubr.msk.bf16.gmra.mxu1 %vm31_vm1, %v9900_v59  ;;  %v9902_v59 = vpack.c.bf16 %v9868_v26, %v9867_v28  ;;  %v9872_v44 = vld [vmem:[#allocation3 + $0x352] sm:$0xff] }
 0x5ba   :  { %18736 = vst [vmem:[#allocation41_spill] sm:$0xff] %v17460_v17  ;;  %v17464_v41 = vadd.f32 %v13509_v63, %v17215_v9  ;;  %13675 = vmatprep.mubr.msk.bf16.mxu1 %vm31_vm1, %v9901_v3  ;;  %v17475_v9 = vpop.f32.mrf.mxu0  ;;  %v18739_v63 = vld [vmem:[#allocation19_spill] sm:$0xff] }
 0x5bb   :  { %v9020_v42 = vpop.f32.mrf.mxu1 }
 0x5bc   :  { %18737 = vst [vmem:[#allocation54_spill] sm:$0xff] %v17464_v41  ;;  %v17470_v40 = vadd.f32 %v9020_v42, %v17218_v6  ;;  %v9903_v41 = vpack.c.bf16 %v9870_v46, %v9869_v55  ;;  %v18740_v6 = vld [vmem:[#allocation23_spill] sm:$0xff] }
 0x5bd   :  { %v13510_v21 = vpop.f32.mrf.mxu1 }
 0x5be   :  { %18738 = vst [vmem:[#allocation55_spill] sm:$0xff] %v17470_v40  ;;  %v17473_v49 = vadd.f32 %v13510_v21, %v17221_v30  ;;  %v9871_v40 = vld [vmem:[#allocation3 + $0x34a] sm:$0xff]  ;;  %v17485_v21 = vpop.f32.mrf.mxu0 }
 0x5bf   :  { %v9023_v39 = vpop.f32.mrf.mxu1 }
 0x5c0   :  { %v17478_v3 = vadd.f32 %v9023_v39, %v18739_v63  ;;  %v9904_v39 = vpack.c.bf16 %v9872_v44, %v9871_v40 }
 0x5c1   :  { %v13513_v17 = vpop.f32.mrf.mxu1  ;;  %13676 = vmatmul.mubr.msk.bf16.gmra.mxu1 %vm31_vm1, %v9902_v59  ;;  %v17493_v59 = vpop.f32.mrf.mxu0 }
 0x5c2   :  { %v17482_v42 = vadd.f32 %v13513_v17, %v18740_v6  ;;  %13679 = vmatprep.mubr.msk.bf16.mxu1 %vm31_vm1, %v9903_v41 }
 0x5c3   :  { %v9036_v30 = vpop.f32.mrf.mxu1 }
 0x5c4   :  { %18741 = vst [vmem:[#allocation57_spill] sm:$0xff] %v17482_v42  ;;  %v17488_v28 = vadd.f32 %v9036_v30, %v17235_v5  ;;  %v17502_v5 = vpop.f32.mrf.mxu0  ;;  %v18777_v42 = vld [vmem:[#allocation24_spill] sm:$0xff] }
 0x5c5   :  { %v13514_v26 = vpop.f32.mrf.mxu1 }
 0x5c6   :  { %18742 = vst [vmem:[#allocation56_spill] sm:$0xff] %v17488_v28  ;;  %v17491_v55 = vadd.f32 %v13514_v26, %v17238_v58  ;;  %v17510_v26 = vpop.f32.mrf.mxu0  ;;  %v18772_v28 = vld [vmem:[#allocation26_spill] sm:$0xff] }
 0x5c7   :  { %v9039_v46 = vpop.f32.mrf.mxu1 }
 0x5c8   :  { %18743 = vst [vmem:[#allocation43_spill] sm:$0xff] %v17491_v55  ;;  %v17496_v17 = vadd.f32 %v9039_v46, %v17243_v27  ;;  %v18748_v27 = vld [vmem:[#allocation17_spill] sm:$0xff]  ;;  %v18767_v55 = vld [vmem:[#allocation35_spill] sm:$0xff] }
 0x5c9   :  { %v13517_v41 = vpop.f32.mrf.mxu1  ;;  %13680 = vmatmul.mubr.msk.bf16.gmra.mxu1 %vm31_vm1, %v9904_v39 }
 0x5ca   :  { %18744 = vst [vmem:[#allocation44_spill] sm:$0xff] %v17496_v17  ;;  %v17500_v63 = vadd.f32 %v13517_v41, %v17247_v25  ;;  %v18750_v17 = vld [vmem:[#allocation28_spill] sm:$0xff] }
 0x5cb   :  { %v9052_v6 = vpop.f32.mrf.mxu1 }
 0x5cc   :  { %18745 = vst [vmem:[#allocation58_spill] sm:$0xff] %v17500_v63  ;;  %v17505_v44 = vadd.f32 %v9052_v6, %v17250_v38  ;;  %v17518_v63 = vpop.f32.mrf.mxu0 }
 0x5cd   :  { %v13518_v58 = vpop.f32.mrf.mxu1 }
 0x5ce   :  { %18746 = vst [vmem:[#allocation59_spill] sm:$0xff] %v17505_v44  ;;  %v17508_v40 = vadd.f32 %v13518_v58, %v17253_v53  ;;  %v18754_v44 = vld [vmem:[#allocation34_spill] sm:$0xff] }
 0x5cf   :  { %v9055_v30 = vpop.f32.mrf.mxu1 }
 0x5d0   :  { %18747 = vst [vmem:[#allocation61_spill] sm:$0xff] %v17508_v40  ;;  %v17513_v46 = vadd.f32 %v9055_v30, %v18748_v27  ;;  %v17526_v40 = vpop.f32.mrf.mxu0 }
 0x5d1   :  { %v13521_v39 = vpop.f32.mrf.mxu1 }
 0x5d2   :  { %18749 = vst [vmem:[#allocation60_spill] sm:$0xff] %v17513_v46  ;;  %v17516_v25 = vadd.f32 %v13521_v39, %v18750_v17  ;;  %v18756_v46 = vld [vmem:[#allocation21_spill] sm:$0xff] }
 0x5d3   :  { %v9068_v41 = vpop.f32.mrf.mxu1 }
 0x5d4   :  { %18751 = vst [vmem:[#allocation42_spill] sm:$0xff] %v17516_v25  ;;  %v17521_v38 = vadd.f32 %v9068_v41, %v17264_v16  ;;  %v17534_v25 = vpop.f32.mrf.mxu0 }
 0x5d5   :  { %v13522_v6 = vpop.f32.mrf.mxu1 }
 0x5d6   :  { %18752 = vst [vmem:[#allocation47_spill] sm:$0xff] %v17521_v38  ;;  %v17524_v53 = vadd.f32 %v13522_v6, %v17267_v14  ;;  %v18760_v38 = vld [vmem:[#allocation22_spill] sm:$0xff] }
 0x5d7   :  { %v9071_v58 = vpop.f32.mrf.mxu1 }
 0x5d8   :  { %18753 = vst [vmem:[#allocation62_spill] sm:$0xff] %v17524_v53  ;;  %v17529_v30 = vadd.f32 %v9071_v58, %v18754_v44  ;;  %v17542_v53 = vpop.f32.mrf.mxu0 }
 0x5d9   :  { %v13525_v27 = vpop.f32.mrf.mxu1 }
 0x5da   :  { %18755 = vst [vmem:[#allocation45_spill] sm:$0xff] %v17529_v30  ;;  %v17532_v17 = vadd.f32 %v13525_v27, %v18756_v46  ;;  %v18762_v30 = vld [vmem:[#allocation20_spill] sm:$0xff] }
 0x5db   :  { %v9084_v39 = vpop.f32.mrf.mxu1 }
 0x5dc   :  { %18757 = vst [vmem:[#allocation63_spill] sm:$0xff] %v17532_v17  ;;  %v17537_v16 = vadd.f32 %v9084_v39, %v17278_v54  ;;  %v17550_v17 = vpop.f32.mrf.mxu0 }
 0x5dd   :  { %v13526_v41 = vpop.f32.mrf.mxu1 }
 0x5de   :  { %18758 = vst [vmem:[#allocation46_spill] sm:$0xff] %v17537_v16  ;;  %v17540_v14 = vadd.f32 %v13526_v41, %v17281_v22  ;;  %v18765_v16 = vld [vmem:[#allocation25_spill] sm:$0xff] }
 0x5df   :  { %v9087_v6 = vpop.f32.mrf.mxu1 }
 0x5e0   :  { %18759 = vst [vmem:[#allocation48_spill] sm:$0xff] %v17540_v14  ;;  %v17545_v44 = vadd.f32 %v9087_v6, %v18760_v38  ;;  %v17558_v14 = vpop.f32.mrf.mxu0 }
 0x5e1   :  { %v13529_v58 = vpop.f32.mrf.mxu1 }
 0x5e2   :  { %18761 = vst [vmem:[#allocation7_spill] sm:$0xff] %v17545_v44  ;;  %v17548_v46 = vadd.f32 %v13529_v58, %v18762_v30  ;;  %v18769_v44 = vld [vmem:[#allocation32_spill] sm:$0xff] }
 0x5e3   :  { %v9100_v27 = vpop.f32.mrf.mxu1 }
 0x5e4   :  { %18763 = vst [vmem:[#allocation49_spill] sm:$0xff] %v17548_v46  ;;  %v17553_v54 = vadd.f32 %v9100_v27, %v17292_v7  ;;  %v17566_v46 = vpop.f32.mrf.mxu0 }
 0x5e5   :  { %v13530_v39 = vpop.f32.mrf.mxu1  ;;  %18771 = vst [vmem:[#allocation12_spill] sm:$0xff] %v17566_v46  ;;  %v18781_v46 = vld [vmem:[#allocation38_spill] sm:$0xff] }
 0x5e6   :  { %18764 = vst [vmem:[#allocation50_spill] sm:$0xff] %v17553_v54  ;;  %v17556_v22 = vadd.f32 %v13530_v39, %v18765_v16  ;;  %v18774_v54 = vld [vmem:[#allocation27_spill] sm:$0xff] }
 0x5e7   :  { %v9103_v41 = vpop.f32.mrf.mxu1 }
 0x5e8   :  { %18766 = vst [vmem:[#allocation4_spill] sm:$0xff] %v17556_v22  ;;  %v17561_v38 = vadd.f32 %v9103_v41, %v18767_v55  ;;  %v17574_v22 = vpop.f32.mrf.mxu0 }
 0x5e9   :  { %v13533_v6 = vpop.f32.mrf.mxu1  ;;  %18776 = vst [vmem:[#allocation6_spill] sm:$0xff] %v17574_v22  ;;  %v18784_v22 = vld [vmem:[#allocation31_spill] sm:$0xff] }
 0x5ea   :  { %18768 = vst [vmem:[#allocation64_spill] sm:$0xff] %v17561_v38  ;;  %v17564_v30 = vadd.f32 %v13533_v6, %v18769_v44  ;;  %v18779_v38 = vld [vmem:[#allocation36_spill] sm:$0xff] }
 0x5eb   :  { %v9116_v58 = vpop.f32.mrf.mxu1 }
 0x5ec   :  { %18770 = vst [vmem:[#allocation5_spill] sm:$0xff] %v17564_v30  ;;  %v17569_v7 = vadd.f32 %v9116_v58, %v18772_v28  ;;  %v17582_v30 = vpop.f32.mrf.mxu0 }
 0x5ed   :  { %v13534_v27 = vpop.f32.mrf.mxu1 }
 0x5ee   :  { %18773 = vst [vmem:[#allocation8_spill] sm:$0xff] %v17569_v7  ;;  %v17572_v16 = vadd.f32 %v13534_v27, %v18774_v54  ;;  %v18782_v7 = vld [vmem:[#allocation29_spill] sm:$0xff] }
 0x5ef   :  { %v9119_v39 = vpop.f32.mrf.mxu1 }
 0x5f0   :  { %18775 = vst [vmem:[#allocation9_spill] sm:$0xff] %v17572_v16  ;;  %v17577_v55 = vadd.f32 %v9119_v39, %v18777_v42  ;;  %v17590_v16 = vpop.f32.mrf.mxu0 }
 0x5f1   :  { %v13537_v41 = vpop.f32.mrf.mxu1 }
 0x5f2   :  { %18778 = vst [vmem:[#allocation10_spill] sm:$0xff] %v17577_v55  ;;  %v17580_v44 = vadd.f32 %v13537_v41, %v18779_v38  ;;  %v18785_v55 = vld [vmem:[#allocation30_spill] sm:$0xff] }
 0x5f3   :  { %v9132_v6 = vpop.f32.mrf.mxu1 }
 0x5f4   :  { %18780 = vst [vmem:[#allocation13_spill] sm:$0xff] %v17580_v44  ;;  %v17585_v28 = vadd.f32 %v9132_v6, %v18781_v46  ;;  %v17598_v44 = vpop.f32.mrf.mxu0 }
 0x5f5   :  { %v13538_v58 = vpop.f32.mrf.mxu1 }
 0x5f6   :  { %v17588_v54 = vadd.f32 %v13538_v58, %v18782_v7 }
 0x5f7   :  { %v9135_v27 = vpop.f32.mrf.mxu1 }
 0x5f8   :  { %18783 = vst [vmem:[#allocation65_spill] sm:$0xff] %v17588_v54  ;;  %v17593_v42 = vadd.f32 %v9135_v27, %v18784_v22  ;;  %v17606_v54 = vpop.f32.mrf.mxu0 }
 0x5f9   :  { %v13541_v39 = vpop.f32.mrf.mxu1 }
 0x5fa   :  { %v17596_v38 = vadd.f32 %v13541_v39, %v18785_v55 }
 0x5fb   :  { %v9148_v41 = vpop.f32.mrf.mxu1 }
 0x5fc   :  { %18786 = vst [vmem:[#allocation67_spill] sm:$0xff] %v17596_v38  ;;  %v17601_v46 = vadd.f32 %v9148_v41, %v17334_v19  ;;  %v17614_v38 = vpop.f32.mrf.mxu0 }
 0x5fd   :  { %v13542_v6 = vpop.f32.mrf.mxu1 }
 0x5fe   :  { %v17604_v7 = vadd.f32 %v13542_v6, %v17337_v43 }
 0x5ff   :  { %v9151_v58 = vpop.f32.mrf.mxu1 }
 0x600   :  { %18787 = vst [vmem:[#allocation66_spill] sm:$0xff] %v17604_v7  ;;  %v17609_v22 = vadd.f32 %v9151_v58, %v17341_v20  ;;  %v17622_v7 = vpop.f32.mrf.mxu0 }
 0x601   :  { %v13545_v27 = vpop.f32.mrf.mxu1 }
 0x602   :  { %v17612_v55 = vadd.f32 %v13545_v27, %v17345_v48 }
 0x603   :  { %v9164_v39 = vpop.f32.mrf.mxu1 }
 0x604   :  { %18788 = vst [vmem:[#allocation14_spill] sm:$0xff] %v17612_v55  ;;  %v17617_v19 = vadd.f32 %v9164_v39, %v17348_v15  ;;  %v17630_v55 = vpop.f32.mrf.mxu0 }
 0x605   :  { %v13546_v41 = vpop.f32.mrf.mxu1 }
 0x606   :  { %18789 = vst [vmem:[#allocation11_spill] sm:$0xff] %v17617_v19  ;;  %v17620_v43 = vadd.f32 %v13546_v41, %v17351_v31  ;;  %v10504_v19 = vld [vmem:[#allocation2 + $0x39] sm:$0xff] }
 0x607   :  { %v9167_v6 = vpop.f32.mrf.mxu1 }
 0x608   :  { %18790 = vst [vmem:[#allocation68_spill] sm:$0xff] %v17620_v43  ;;  %v17625_v20 = vadd.f32 %v9167_v6, %v17355_v32  ;;  %v9747_v43 = vadd.f32 %v17368_v23, %v17374_v36  ;;  %v17640_v32 = vpop.f32.mrf.mxu0 }
 0x609   :  { %v13549_v58 = vpop.f32.mrf.mxu1 }
 0x60a   :  { %18791 = vst [vmem:[#allocation69_spill] sm:$0xff] %v17625_v20  ;;  %v17628_v48 = vadd.f32 %v13549_v58, %v17359_v4  ;;  %v17648_v58 = vld [vmem:[%s18227_s5] ss:$0 sm:$0xff]  ;;  %v17659_v36 = vpop.f32.mrf.mxu0 }
 0x60b   :  { %v9180_v27 = vpop.f32.mrf.mxu1 }
 0x60c   :  { %18792 = vst [vmem:[#allocation71_spill] sm:$0xff] %v17628_v48  ;;  %v17633_v15 = vadd.f32 %v9180_v27, %v17362_v56  ;;  %v9745_v56 = vadd.f32 %v17380_v57, %v17378_v34  ;;  %v17655_v27 = vld [vmem:[%s18228_s6] ss:$0 sm:$0xff]  ;;  %v9746_v34 = vadd.f32 %v17395_v29, %v17388_v24  ;;  %v17666_v20 = vpop.f32.mrf.mxu0 }
 0x60d   :  { %v13550_v39 = vpop.f32.mrf.mxu1 }
 0x60e   :  { %18793 = vst [vmem:[#allocation70_spill] sm:$0xff] %v17633_v15  ;;  %v17636_v31 = vadd.f32 %v13550_v39, %v17365_v37  ;;  %v10501_v15 = vld [vmem:[#allocation2 + $0x19] sm:$0xff] }
 0x60f   :  { %v9183_v41 = vpop.f32.mrf.mxu1 }
 0x610   :  { %18794 = vst [vmem:[#allocation15_spill] sm:$0xff] %v17636_v31  ;;  %v17643_v6 = vadd.f32 %v9183_v41, %v17371_v35  ;;  %v9748_v35 = vadd.f32 %v17385_v18, %v17383_v51 }
 0x611   :  { %v13621_v4 = vpop.f32.mrf.mxu1 }
 0x612   :  { %18795 = vst [vmem:[#allocation16_spill] sm:$0xff] %v17643_v6  ;;  %v10297_v37 = vadd.f32 %v13621_v4, %v9747_v43  ;;  %v10503_v6 = vld [vmem:[#allocation2 + $0x31] sm:$0xff] }
 0x613   :  { %v10040_v23 = vpop.f32.mrf.mxu1 }
 0x614   :  { %v10368_v39 = vmul.f32 %v17648_v58, %v10297_v37  ;;  %v10295_v41 = vadd.f32 %v10040_v23, %v9745_v56  ;;  %v9751_v23 = vadd.f32 %v17403_v60, %v17392_v10 }
 0x615   :  { %v13622_v31 = vpop.f32.mrf.mxu1 }
 0x616   :  { %v10439_v57 = vadd.f32 %v17655_v27, %v10368_v39  ;;  %v10366_v43 = vmul.f32 %v17648_v58, %v10295_v41  ;;  %v10298_v4 = vadd.f32 %v13622_v31, %v9748_v35  ;;  %v9749_v35 = vadd.f32 %v17413_v8, %v17398_v61 }
 0x617   :  { %v10043_v48 = vpop.f32.mrf.mxu1 }
 0x618   :  { %v10567_v51 = vadd.f32 %v10503_v6, %v10439_v57  ;;  %v10437_v18 = vadd.f32 %v17655_v27, %v10366_v43  ;;  %v10369_v37 = vmul.f32 %v17648_v58, %v10298_v4  ;;  %v10296_v56 = vadd.f32 %v10043_v48, %v9746_v34  ;;  %v10502_v57 = vld [vmem:[#allocation2 + $0x21] sm:$0xff]  ;;  %v17678_v43 = vpop.f32.mrf.mxu0 }
 0x619   :  { %v13625_v24 = vpop.f32.mrf.mxu1  ;;  %v9752_v6 = vadd.f32 %v17421_v0, %v17401_v1 }
 0x61a   :  { %v10631_v29 = vmax.f32 %v10567_v51, 0.0  ;;  %v10565_v39 = vadd.f32 %v10501_v15, %v10437_v18  ;;  %v10440_v41 = vadd.f32 %v17655_v27, %v10369_v37  ;;  %v10367_v31 = vmul.f32 %v17648_v58, %v10296_v56  ;;  %v10507_v56 = vld [vmem:[#allocation2 + $0x61] sm:$0xff] }
 0x61b   :  { %v10301_v48 = vadd.f32 %v13625_v24, %v9751_v23  ;;  %v10056_v34 = vpop.f32.mrf.mxu1  ;;  %v9750_v51 = vadd.f32 %v17431_v50, %v17406_v33 }
 0x61c   :  { %v11680_v10 = vpack.c.bf16 %v10631_v29, %v10631_v29  ;;  %v10629_v60 = vmax.f32 %v10565_v39, 0.0  ;;  %v10568_v4 = vadd.f32 %v10504_v19, %v10440_v41  ;;  %v10438_v15 = vadd.f32 %v17655_v27, %v10367_v31  ;;  %v18796_v19 = vld [vmem:[#allocation39_spill] sm:$0xff]  ;;  %v17692_v39 = vpop.f32.mrf.mxu0 }
 0x61d   :  { %v10372_v18 = vmul.f32 %v17648_v58, %v10301_v48  ;;  %v10299_v61 = vadd.f32 %v10056_v34, %v9749_v35  ;;  %v13626_v8 = vpop.f32.mrf.mxu1  ;;  %v9755_v24 = vadd.f32 %v17439_v2, %v18796_v19  ;;  %v10505_v35 = vld [vmem:[#allocation2 + $0x49] sm:$0xff]  ;;  %v18797_v48 = vld [vmem:[#allocation40_spill] sm:$0xff] }
 0x61e   :  { %10952 = vst.msk [vmem:[%s18229_s7 + $0x8] sm:$0xf] %vm10949_vm3, %v11680_v10  ;;  %v11678_v1 = vpack.c.bf16 %v10629_v60, %v10629_v60  ;;  %v10632_v0 = vmax.f32 %v10568_v4, 0.0  ;;  %v10566_v37 = vadd.f32 %v10502_v57, %v10438_v15  ;;  %v10302_v23 = vadd.f32 %v13626_v8, %v9752_v6  ;;  %v10508_v60 = vld [vmem:[#allocation2 + $0x69] sm:$0xff] }
 0x61f   :  { %v10443_v29 = vadd.f32 %v17655_v27, %v10372_v18  ;;  %v10370_v33 = vmul.f32 %v17648_v58, %v10299_v61  ;;  %v10059_v50 = vpop.f32.mrf.mxu1  ;;  %v9753_v2 = vadd.f32 %v17449_v11, %v18797_v48 }
 0x620   :  { %10950 = vst.msk [vmem:[%s18229_s7] sm:$0xf] %vm10949_vm3, %v11678_v1  ;;  %v11681_v41 = vpack.c.bf16 %v10632_v0, %v10632_v0  ;;  %v10630_v31 = vmax.f32 %v10566_v37, 0.0  ;;  %v10373_v6 = vmul.f32 %v17648_v58, %v10302_v23  ;;  %v10300_v57 = vadd.f32 %v10059_v50, %v9750_v51  ;;  %v10506_v0 = vld [vmem:[#allocation2 + $0x51] sm:$0xff]  ;;  %v17708_v37 = vpop.f32.mrf.mxu0 }
 0x621   :  { %v10571_v34 = vadd.f32 %v10507_v56, %v10443_v29  ;;  %v10441_v10 = vadd.f32 %v17655_v27, %v10370_v33  ;;  %v13629_v4 = vpop.f32.mrf.mxu1 }
 0x622   :  { %10953 = vst.msk [vmem:[%s18229_s7 + $0xc] sm:$0xf] %vm10949_vm3, %v11681_v41  ;;  %v11679_v15 = vpack.c.bf16 %v10630_v31, %v10630_v31  ;;  %v10444_v18 = vadd.f32 %v17655_v27, %v10373_v6  ;;  %v10371_v61 = vmul.f32 %v17648_v58, %v10300_v57  ;;  %v10305_v8 = vadd.f32 %v13629_v4, %v9755_v24  ;;  %v10511_v41 = vld [vmem:[#allocation2 + $0x91] sm:$0xff] }
 0x623   :  { %v10635_v51 = vmax.f32 %v10571_v34, 0.0  ;;  %v10569_v1 = vadd.f32 %v10505_v35, %v10441_v10  ;;  %v10072_v11 = vpop.f32.mrf.mxu1  ;;  %v9756_v24 = vadd.f32 %v17457_v13, %v17419_v45  ;;  %v9754_v34 = vadd.f32 %v17467_v62, %v17424_v52  ;;  %v18798_v10 = vld [vmem:[#allocation33_spill] sm:$0xff]  ;;  %v10509_v13 = vld [vmem:[#allocation2 + $0x79] sm:$0xff] }
 0x624   :  { %10951 = vst.msk [vmem:[%s18229_s7 + $0x4] sm:$0xf] %vm10949_vm3, %v11679_v15  ;;  %v10572_v56 = vadd.f32 %v10508_v60, %v10444_v18  ;;  %v10442_v23 = vadd.f32 %v17655_v27, %v10371_v61  ;;  %v10376_v19 = vmul.f32 %v17648_v58, %v10305_v8  ;;  %v10303_v29 = vadd.f32 %v10072_v11, %v9753_v2  ;;  %v17728_v15 = vpop.f32.mrf.mxu0  ;;  %v18799_v52 = vld [vmem:[#allocation51_spill] sm:$0xff] }
 0x625   :  { %v11684_v33 = vpack.c.bf16 %v10635_v51, %v10635_v51  ;;  %v10633_v50 = vmax.f32 %v10569_v1, 0.0  ;;  %v13630_v31 = vpop.f32.mrf.mxu1  ;;  %v9759_v60 = vadd.f32 %v17475_v9, %v18798_v10  ;;  %v9757_v62 = vadd.f32 %v17485_v21, %v18799_v52  ;;  %v10515_v10 = vld [vmem:[#allocation2 + $0xc1] sm:$0xff] }
 0x626   :  { %v10636_v35 = vmax.f32 %v10572_v56, 0.0  ;;  %v10570_v6 = vadd.f32 %v10506_v0, %v10442_v23  ;;  %v10447_v57 = vadd.f32 %v17655_v27, %v10376_v19  ;;  %v10374_v48 = vmul.f32 %v17648_v58, %v10303_v29  ;;  %v10512_v19 = vld [vmem:[#allocation2 + $0x99] sm:$0xff] }
 0x627   :  { %10956 = vst.msk [vmem:[%s18229_s7 + $0x18] sm:$0xf] %vm10949_vm3, %v11684_v33  ;;  %v11682_v45 = vpack.c.bf16 %v10633_v50, %v10633_v50  ;;  %v10306_v2 = vadd.f32 %v13630_v31, %v9756_v24  ;;  %v10075_v4 = vpop.f32.mrf.mxu1  ;;  %v9760_v21 = vadd.f32 %v17493_v59, %v17437_v12  ;;  %v9758_v12 = vadd.f32 %v17502_v5, %v17442_v47 }
 0x628   :  { %v11685_v18 = vpack.c.bf16 %v10636_v35, %v10636_v35  ;;  %v10634_v61 = vmax.f32 %v10570_v6, 0.0  ;;  %v10575_v8 = vadd.f32 %v10511_v41, %v10447_v57  ;;  %v10445_v51 = vadd.f32 %v17655_v27, %v10374_v48  ;;  %v17746_v41 = vpop.f32.mrf.mxu0  ;;  %v10510_v6 = vld [vmem:[#allocation2 + $0x81] sm:$0xff] }
 0x629   :  { %10954 = vst.msk [vmem:[%s18229_s7 + $0x10] sm:$0xf] %vm10949_vm3, %v11682_v45  ;;  %v10377_v9 = vmul.f32 %v17648_v58, %v10306_v2  ;;  %v10304_v1 = vadd.f32 %v10075_v4, %v9754_v34  ;;  %v13633_v0 = vpop.f32.mrf.mxu1 }
 0x62a   :  { %10957 = vst.msk [vmem:[%s18229_s7 + $0x1c] sm:$0xf] %vm10949_vm3, %v11685_v18  ;;  %v11683_v11 = vpack.c.bf16 %v10634_v61, %v10634_v61  ;;  %v10639_v56 = vmax.f32 %v10575_v8, 0.0  ;;  %v10573_v23 = vadd.f32 %v10509_v13, %v10445_v51  ;;  %v10309_v29 = vadd.f32 %v13633_v0, %v9759_v60  ;;  %v10513_v8 = vld [vmem:[#allocation2 + $0xa9] sm:$0xff]  ;;  %v17762_v5 = vpop.f32.mrf.mxu0 }
 0x62b   :  { %v10448_v24 = vadd.f32 %v17655_v27, %v10377_v9  ;;  %v10375_v33 = vmul.f32 %v17648_v58, %v10304_v1  ;;  %v10088_v50 = vpop.f32.mrf.mxu1  ;;  %v18800_v1 = vld [vmem:[#allocation53_spill] sm:$0xff] }
 0x62c   :  { %10955 = vst.msk [vmem:[%s18229_s7 + $0x14] sm:$0xf] %vm10949_vm3, %v11683_v11  ;;  %v11688_v31 = vpack.c.bf16 %v10639_v56, %v10639_v56  ;;  %v10637_v35 = vmax.f32 %v10573_v23, 0.0  ;;  %v10380_v57 = vmul.f32 %v17648_v58, %v10309_v29  ;;  %v10307_v48 = vadd.f32 %v10088_v50, %v9757_v62  ;;  %v10516_v23 = vld [vmem:[#allocation2 + $0xc9] sm:$0xff]  ;;  %v18801_v50 = vld [vmem:[#allocation52_spill] sm:$0xff] }
 0x62d   :  { %v10576_v59 = vadd.f32 %v10512_v19, %v10448_v24  ;;  %v10446_v34 = vadd.f32 %v17655_v27, %v10375_v33  ;;  %v13634_v60 = vpop.f32.mrf.mxu1  ;;  %v9763_v0 = vadd.f32 %v17510_v26, %v18800_v1 }
 0x62e   :  { %10960 = vst.msk [vmem:[%s18229_s7 + $0x28] sm:$0xf] %vm10949_vm3, %v11688_v31  ;;  %v11686_v45 = vpack.c.bf16 %v10637_v35, %v10637_v35  ;;  %v10451_v13 = vadd.f32 %v17655_v27, %v10380_v57  ;;  %v10378_v2 = vmul.f32 %v17648_v58, %v10307_v48  ;;  %v10310_v4 = vadd.f32 %v13634_v60, %v9760_v21  ;;  %v18802_v35 = vld [vmem:[#allocation37_spill] sm:$0xff]  ;;  %v10514_v57 = vld [vmem:[#allocation2 + $0xb1] sm:$0xff] }
 0x62f   :  { %v10640_v18 = vmax.f32 %v10576_v59, 0.0  ;;  %v10574_v61 = vadd.f32 %v10510_v6, %v10446_v34  ;;  %v10091_v47 = vpop.f32.mrf.mxu1  ;;  %v9761_v31 = vadd.f32 %v17518_v63, %v18801_v50  ;;  %v9764_v6 = vadd.f32 %v17526_v40, %v18802_v35  ;;  %v17782_v59 = vpop.f32.mrf.mxu0  ;;  %v18803_v63 = vld [vmem:[#allocation41_spill] sm:$0xff]  ;;  %v10520_v50 = vld [vmem:[#allocation2 + $0xf9] sm:$0xff] }
 0x630   :  { %10958 = vst.msk [vmem:[%s18229_s7 + $0x20] sm:$0xf] %vm10949_vm3, %v11686_v45  ;;  %v10579_v51 = vadd.f32 %v10515_v10, %v10451_v13  ;;  %v10449_v52 = vadd.f32 %v17655_v27, %v10378_v2  ;;  %v10381_v62 = vmul.f32 %v17648_v58, %v10310_v4  ;;  %v10308_v9 = vadd.f32 %v10091_v47, %v9758_v12  ;;  %v10519_v47 = vld [vmem:[#allocation2 + $0xf1] sm:$0xff] }
 0x631   :  { %v11689_v11 = vpack.c.bf16 %v10640_v18, %v10640_v18  ;;  %v10638_v56 = vmax.f32 %v10574_v61, 0.0  ;;  %v13637_v19 = vpop.f32.mrf.mxu1  ;;  %v9762_v13 = vadd.f32 %v17534_v25, %v18803_v63  ;;  %v18804_v25 = vld [vmem:[#allocation54_spill] sm:$0xff] }
 0x632   :  { %v10643_v29 = vmax.f32 %v10579_v51, 0.0  ;;  %v10577_v21 = vadd.f32 %v10513_v8, %v10449_v52  ;;  %v10452_v24 = vadd.f32 %v17655_v27, %v10381_v62  ;;  %v10379_v33 = vmul.f32 %v17648_v58, %v10308_v9 }
 0x633   :  { %10961 = vst.msk [vmem:[%s18229_s7 + $0x2c] sm:$0xf] %vm10949_vm3, %v11689_v11  ;;  %v11687_v26 = vpack.c.bf16 %v10638_v56, %v10638_v56  ;;  %v10313_v48 = vadd.f32 %v13637_v19, %v9763_v0  ;;  %v10104_v12 = vpop.f32.mrf.mxu1  ;;  %v9767_v52 = vadd.f32 %v17542_v53, %v18804_v25  ;;  %v17800_v0 = vpop.f32.mrf.mxu0 }
 0x634   :  { %v11692_v34 = vpack.c.bf16 %v10643_v29, %v10643_v29  ;;  %v10641_v10 = vmax.f32 %v10577_v21, 0.0  ;;  %v10580_v60 = vadd.f32 %v10516_v23, %v10452_v24  ;;  %v10450_v45 = vadd.f32 %v17655_v27, %v10379_v33  ;;  %v10517_v23 = vld [vmem:[#allocation2 + $0xd9] sm:$0xff] }
 0x635   :  { %10959 = vst.msk [vmem:[%s18229_s7 + $0x24] sm:$0xf] %vm10949_vm3, %v11687_v26  ;;  %v10384_v40 = vmul.f32 %v17648_v58, %v10313_v48  ;;  %v10311_v2 = vadd.f32 %v10104_v12, %v9761_v31  ;;  %v13638_v4 = vpop.f32.mrf.mxu1  ;;  %v18805_v21 = vld [vmem:[#allocation55_spill] sm:$0xff] }
 0x636   :  { %10964 = vst.msk [vmem:[%s18229_s7 + $0x38] sm:$0xf] %vm10949_vm3, %v11692_v34  ;;  %v11690_v18 = vpack.c.bf16 %v10641_v10, %v10641_v10  ;;  %v10644_v61 = vmax.f32 %v10580_v60, 0.0  ;;  %v10578_v8 = vadd.f32 %v10514_v57, %v10450_v45  ;;  %v10314_v51 = vadd.f32 %v13638_v4, %v9764_v6  ;;  %v10518_v34 = vld [vmem:[#allocation2 + $0xe1] sm:$0xff]  ;;  %v17816_v10 = vpop.f32.mrf.mxu0 }
 0x637   :  { %v10455_v62 = vadd.f32 %v17655_v27, %v10384_v40  ;;  %v10382_v9 = vmul.f32 %v17648_v58, %v10311_v2  ;;  %v10107_v1 = vpop.f32.mrf.mxu1  ;;  %v9765_v53 = vadd.f32 %v17550_v17, %v18805_v21  ;;  %v9768_v40 = vadd.f32 %v17558_v14, %v17473_v49  ;;  %v10521_v14 = vld [vmem:[#allocation2 + $0x109] sm:$0xff] }
 0x638   :  { %10962 = vst.msk [vmem:[%s18229_s7 + $0x30] sm:$0xf] %vm10949_vm3, %v11690_v18  ;;  %v11693_v11 = vpack.c.bf16 %v10644_v61, %v10644_v61  ;;  %v10642_v56 = vmax.f32 %v10578_v8, 0.0  ;;  %v10385_v19 = vmul.f32 %v17648_v58, %v10314_v51  ;;  %v10312_v29 = vadd.f32 %v10107_v1, %v9762_v13  ;;  %v10523_v18 = vld [vmem:[#allocation2 + $0x121] sm:$0xff]  ;;  %v18808_v1 = vld [vmem:[#allocation6_spill] sm:$0xff] }
 0x639   :  { %v10583_v24 = vadd.f32 %v10519_v47, %v10455_v62  ;;  %v10453_v33 = vadd.f32 %v17655_v27, %v10382_v9  ;;  %v13641_v31 = vpop.f32.mrf.mxu1  ;;  %v18807_v9 = vld [vmem:[#allocation57_spill] sm:$0xff] }
 0x63a   :  { %10965 = vst.msk [vmem:[%s18229_s7 + $0x3c] sm:$0xf] %vm10949_vm3, %v11693_v11  ;;  %v11691_v35 = vpack.c.bf16 %v10642_v56, %v10642_v56  ;;  %v10456_v6 = vadd.f32 %v17655_v27, %v10385_v19  ;;  %v10383_v26 = vmul.f32 %v17648_v58, %v10312_v29  ;;  %v10317_v57 = vadd.f32 %v13641_v31, %v9767_v52  ;;  %v18806_v52 = vld [vmem:[#allocation12_spill] sm:$0xff]  ;;  %v17836_v19 = vpop.f32.mrf.mxu0 }
 0x63b   :  { %v10647_v48 = vmax.f32 %v10583_v24, 0.0  ;;  %v10581_v12 = vadd.f32 %v10517_v23, %v10453_v33  ;;  %v10120_v17 = vpop.f32.mrf.mxu1  ;;  %v9766_v62 = vadd.f32 %v18806_v52, %v17478_v3  ;;  %v9771_v11 = vadd.f32 %v18808_v1, %v18807_v9  ;;  %v18809_v3 = vld [vmem:[#allocation56_spill] sm:$0xff] }
 0x63c   :  { %10963 = vst.msk [vmem:[%s18229_s7 + $0x34] sm:$0xf] %vm10949_vm3, %v11691_v35  ;;  %v10584_v60 = vadd.f32 %v10520_v50, %v10456_v6  ;;  %v10454_v45 = vadd.f32 %v17655_v27, %v10383_v26  ;;  %v10388_v63 = vmul.f32 %v17648_v58, %v10317_v57  ;;  %v10315_v13 = vadd.f32 %v10120_v17, %v9765_v53 }
 0x63d   :  { %v11696_v2 = vpack.c.bf16 %v10647_v48, %v10647_v48  ;;  %v10645_v4 = vmax.f32 %v10581_v12, 0.0  ;;  %v13642_v61 = vpop.f32.mrf.mxu1  ;;  %v9769_v33 = vadd.f32 %v17582_v30, %v18809_v3  ;;  %v10524_v48 = vld [vmem:[#allocation2 + $0x129] sm:$0xff]  ;;  %v18810_v30 = vld [vmem:[#allocation43_spill] sm:$0xff] }
 0x63e   :  { %v10648_v8 = vmax.f32 %v10584_v60, 0.0  ;;  %v10582_v47 = vadd.f32 %v10518_v34, %v10454_v45  ;;  %v10459_v51 = vadd.f32 %v17655_v27, %v10388_v63  ;;  %v10386_v25 = vmul.f32 %v17648_v58, %v10315_v13  ;;  %v17854_v63 = vpop.f32.mrf.mxu0 }
 0x63f   :  { %10968 = vst.msk [vmem:[%s18229_s7 + $0x48] sm:$0xf] %vm10949_vm3, %v11696_v2  ;;  %v11694_v49 = vpack.c.bf16 %v10645_v4, %v10645_v4  ;;  %v10318_v56 = vadd.f32 %v13642_v61, %v9768_v40  ;;  %v10123_v23 = vpop.f32.mrf.mxu1  ;;  %v9772_v34 = vadd.f32 %v17590_v16, %v18810_v30  ;;  %v10522_v2 = vld [vmem:[#allocation2 + $0x111] sm:$0xff]  ;;  %v18811_v61 = vld [vmem:[#allocation44_spill] sm:$0xff] }
 0x640   :  { %v11697_v29 = vpack.c.bf16 %v10648_v8, %v10648_v8  ;;  %v10646_v21 = vmax.f32 %v10582_v47, 0.0  ;;  %v10587_v53 = vadd.f32 %v10523_v18, %v10459_v51  ;;  %v10457_v24 = vadd.f32 %v17655_v27, %v10386_v25  ;;  %v10527_v51 = vld [vmem:[#allocation2 + $0x151] sm:$0xff] }
 0x641   :  { %10966 = vst.msk [vmem:[%s18229_s7 + $0x40] sm:$0xf] %vm10949_vm3, %v11694_v49  ;;  %v10389_v50 = vmul.f32 %v17648_v58, %v10318_v56  ;;  %v10316_v31 = vadd.f32 %v10123_v23, %v9766_v62  ;;  %v13645_v35 = vpop.f32.mrf.mxu1  ;;  %v9770_v16 = vadd.f32 %v17598_v44, %v18811_v61  ;;  %v17870_v56 = vpop.f32.mrf.mxu0 }
 0x642   :  { %10969 = vst.msk [vmem:[%s18229_s7 + $0x4c] sm:$0xf] %vm10949_vm3, %v11697_v29  ;;  %v11695_v6 = vpack.c.bf16 %v10646_v21, %v10646_v21  ;;  %v10651_v26 = vmax.f32 %v10587_v53, 0.0  ;;  %v10585_v57 = vadd.f32 %v10521_v14, %v10457_v24  ;;  %v10321_v12 = vadd.f32 %v13645_v35, %v9771_v11  ;;  %v10525_v14 = vld [vmem:[#allocation2 + $0x139] sm:$0xff]  ;;  %v18812_v24 = vld [vmem:[#allocation58_spill] sm:$0xff] }
 0x643   :  { %v10460_v17 = vadd.f32 %v17655_v27, %v10389_v50  ;;  %v10387_v60 = vmul.f32 %v17648_v58, %v10316_v31  ;;  %v10136_v45 = vpop.f32.mrf.mxu1  ;;  %v9775_v3 = vadd.f32 %v17606_v54, %v18812_v24  ;;  %v10528_v31 = vld [vmem:[#allocation2 + $0x159] sm:$0xff] }
 0x644   :  { %10967 = vst.msk [vmem:[%s18229_s7 + $0x44] sm:$0xf] %vm10949_vm3, %v11695_v6  ;;  %v11700_v13 = vpack.c.bf16 %v10651_v26, %v10651_v26  ;;  %v10649_v40 = vmax.f32 %v10585_v57, 0.0  ;;  %v10392_v4 = vmul.f32 %v17648_v58, %v10321_v12  ;;  %v10319_v18 = vadd.f32 %v10136_v45, %v9769_v33  ;;  %v18813_v12 = vld [vmem:[#allocation59_spill] sm:$0xff] }
 0x645   :  { %v10588_v8 = vadd.f32 %v10524_v48, %v10460_v17  ;;  %v10458_v47 = vadd.f32 %v17655_v27, %v10387_v60  ;;  %v13646_v25 = vpop.f32.mrf.mxu1  ;;  %v9773_v30 = vadd.f32 %v17614_v38, %v18813_v12  ;;  %v10526_v60 = vld [vmem:[#allocation2 + $0x141] sm:$0xff] }
 0x646   :  { %10972 = vst.msk [vmem:[%s18229_s7 + $0x58] sm:$0xf] %vm10949_vm3, %v11700_v13  ;;  %v11698_v52 = vpack.c.bf16 %v10649_v40, %v10649_v40  ;;  %v10463_v62 = vadd.f32 %v17655_v27, %v10392_v4  ;;  %v10390_v9 = vmul.f32 %v17648_v58, %v10319_v18  ;;  %v10322_v1 = vadd.f32 %v13646_v25, %v9772_v34  ;;  %v18814_v34 = vld [vmem:[#allocation61_spill] sm:$0xff]  ;;  %v17890_v40 = vpop.f32.mrf.mxu0  ;;  %v18815_v38 = vld [vmem:[#allocation60_spill] sm:$0xff] }
 0x647   :  { %v10652_v11 = vmax.f32 %v10588_v8, 0.0  ;;  %v10586_v49 = vadd.f32 %v10522_v2, %v10458_v47  ;;  %v10139_v44 = vpop.f32.mrf.mxu1  ;;  %v9776_v17 = vadd.f32 %v17622_v7, %v18814_v34  ;;  %v10530_v34 = vld [vmem:[#allocation2 + $0x171] sm:$0xff] }
 0x648   :  { %10970 = vst.msk [vmem:[%s18229_s7 + $0x50] sm:$0xf] %vm10949_vm3, %v11698_v52  ;;  %v10591_v23 = vadd.f32 %v10527_v51, %v10463_v62  ;;  %v10461_v29 = vadd.f32 %v17655_v27, %v10390_v9  ;;  %v10393_v21 = vmul.f32 %v17648_v58, %v10322_v1  ;;  %v10320_v53 = vadd.f32 %v10139_v44, %v9770_v16  ;;  %v10531_v62 = vld [vmem:[#allocation2 + $0x181] sm:$0xff]  ;;  %v17908_v44 = vpop.f32.mrf.mxu0 }
 0x649   :  { %v11701_v33 = vpack.c.bf16 %v10652_v11, %v10652_v11  ;;  %v10650_v50 = vmax.f32 %v10586_v49, 0.0  ;;  %v13649_v35 = vpop.f32.mrf.mxu1  ;;  %v9774_v16 = vadd.f32 %v17630_v55, %v18815_v38  ;;  %v18816_v55 = vld [vmem:[#allocation42_spill] sm:$0xff]  ;;  %v10535_v38 = vld [vmem:[#allocation2 + $0x1e1] sm:$0xff] }
 0x64a   :  { %v10655_v6 = vmax.f32 %v10591_v23, 0.0  ;;  %v10589_v26 = vadd.f32 %v10525_v14, %v10461_v29  ;;  %v10464_v57 = vadd.f32 %v17655_v27, %v10393_v21  ;;  %v10391_v48 = vmul.f32 %v17648_v58, %v10320_v53  ;;  %v10529_v21 = vld [vmem:[#allocation2 + $0x169] sm:$0xff] }
 0x64b   :  { %10973 = vst.msk [vmem:[%s18229_s7 + $0x5c] sm:$0xf] %vm10949_vm3, %v11701_v33  ;;  %v11699_v54 = vpack.c.bf16 %v10650_v50, %v10650_v50  ;;  %v10325_v45 = vadd.f32 %v13649_v35, %v9775_v3  ;;  %v10152_v13 = vpop.f32.mrf.mxu1  ;;  %v9779_v1 = vadd.f32 %v17640_v32, %v18816_v55  ;;  %v18817_v3 = vld [vmem:[#allocation47_spill] sm:$0xff]  ;;  %v10533_v55 = vld [vmem:[#allocation2 + $0x1c9] sm:$0xff] }
 0x64c   :  { %v11704_v2 = vpack.c.bf16 %v10655_v6, %v10655_v6  ;;  %v10653_v4 = vmax.f32 %v10589_v26, 0.0  ;;  %v10592_v18 = vadd.f32 %v10528_v31, %v10464_v57  ;;  %v10462_v61 = vadd.f32 %v17655_v27, %v10391_v48  ;;  %v10532_v31 = vld [vmem:[#allocation2 + $0x189] sm:$0xff] }
 0x64d   :  { %10971 = vst.msk [vmem:[%s18229_s7 + $0x54] sm:$0xf] %vm10949_vm3, %v11699_v54  ;;  %v10396_v7 = vmul.f32 %v17648_v58, %v10325_v45  ;;  %v10323_v8 = vadd.f32 %v10152_v13, %v9773_v30  ;;  %v13650_v47 = vpop.f32.mrf.mxu1  ;;  %v9777_v32 = vadd.f32 %v17659_v36, %v18817_v3 }
 0x64e   :  { %10976 = vst.msk [vmem:[%s18229_s7 + $0x68] sm:$0xf] %vm10949_vm3, %v11704_v2  ;;  %v11702_v51 = vpack.c.bf16 %v10653_v4, %v10653_v4  ;;  %v10656_v25 = vmax.f32 %v10592_v18, 0.0  ;;  %v10590_v52 = vadd.f32 %v10526_v60, %v10462_v61  ;;  %v10326_v9 = vadd.f32 %v13650_v47, %v9776_v17  ;;  %v17924_v17 = vpop.f32.mrf.mxu0  ;;  %v18818_v2 = vld [vmem:[#allocation62_spill] sm:$0xff] }
 0x64f   :  { %v10467_v11 = vadd.f32 %v17655_v27, %v10396_v7  ;;  %v10394_v49 = vmul.f32 %v17648_v58, %v10323_v8  ;;  %v10155_v14 = vpop.f32.mrf.mxu1  ;;  %v9780_v4 = vadd.f32 %v17666_v20, %v18818_v2 }
 0x650   :  { %10974 = vst.msk [vmem:[%s18229_s7 + $0x60] sm:$0xf] %vm10949_vm3, %v11702_v51  ;;  %v11705_v23 = vpack.c.bf16 %v10656_v25, %v10656_v25  ;;  %v10654_v29 = vmax.f32 %v10590_v52, 0.0  ;;  %v10397_v53 = vmul.f32 %v17648_v58, %v10326_v9  ;;  %v10324_v24 = vadd.f32 %v10155_v14, %v9774_v16  ;;  %v18819_v25 = vld [vmem:[#allocation45_spill] sm:$0xff] }
 0x651   :  { %v10595_v33 = vadd.f32 %v10531_v62, %v10467_v11  ;;  %v10465_v50 = vadd.f32 %v17655_v27, %v10394_v49  ;;  %v13653_v35 = vpop.f32.mrf.mxu1  ;;  %v9778_v52 = vadd.f32 %v17678_v43, %v18819_v25  ;;  %v18820_v62 = vld [vmem:[#allocation63_spill] sm:$0xff]  ;;  %v17944_v49 = vpop.f32.mrf.mxu0  ;;  %v18821_v43 = vld [vmem:[#allocation46_spill] sm:$0xff] }
 0x652   :  { %10977 = vst.msk [vmem:[%s18229_s7 + $0x6c] sm:$0xf] %vm10949_vm3, %v11705_v23  ;;  %v11703_v6 = vpack.c.bf16 %v10654_v29, %v10654_v29  ;;  %v10468_v26 = vadd.f32 %v17655_v27, %v10397_v53  ;;  %v10395_v57 = vmul.f32 %v17648_v58, %v10324_v24  ;;  %v10329_v48 = vadd.f32 %v13653_v35, %v9779_v1 }
 0x653   :  { %v10659_v12 = vmax.f32 %v10595_v33, 0.0  ;;  %v10593_v30 = vadd.f32 %v10529_v21, %v10465_v50  ;;  %v10168_v36 = vpop.f32.mrf.mxu1  ;;  %v9783_v9 = vadd.f32 %v17692_v39, %v18820_v62  ;;  %v9781_v53 = vadd.f32 %v17708_v37, %v18821_v43  ;;  %v18822_v37 = vld [vmem:[#allocation48_spill] sm:$0xff] }
 0x654   :  { %10975 = vst.msk [vmem:[%s18229_s7 + $0x64] sm:$0xf] %vm10949_vm3, %v11703_v6  ;;  %v10596_v54 = vadd.f32 %v10532_v31, %v10468_v26  ;;  %v10466_v60 = vadd.f32 %v17655_v27, %v10395_v57  ;;  %v10400_v45 = vmul.f32 %v17648_v58, %v10329_v48  ;;  %v10327_v13 = vadd.f32 %v10168_v36, %v9777_v32  ;;  %v10536_v31 = vld [vmem:[#allocation2 + $0x1e9] sm:$0xff]  ;;  %v10534_v36 = vld [vmem:[#allocation2 + $0x1d1] sm:$0xff] }
 0x655   :  { %v11708_v18 = vpack.c.bf16 %v10659_v12, %v10659_v12  ;;  %v10657_v61 = vmax.f32 %v10593_v30, 0.0  ;;  %v13654_v16 = vpop.f32.mrf.mxu1  ;;  %v9784_v6 = vadd.f32 %v17728_v15, %v18822_v37  ;;  %v17962_v12 = vpop.f32.mrf.mxu0 }
 0x656   :  { %v10660_v7 = vmax.f32 %v10596_v54, 0.0  ;;  %v10594_v8 = vadd.f32 %v10530_v34, %v10466_v60  ;;  %v10471_v47 = vadd.f32 %v17655_v27, %v10400_v45  ;;  %v10398_v51 = vmul.f32 %v17648_v58, %v10327_v13  ;;  %v18823_v45 = vld [vmem:[#allocation7_spill] sm:$0xff] }
 0x657   :  { %10980 = vst.msk [vmem:[%s18229_s7 + $0x78] sm:$0xf] %vm10949_vm3, %v11708_v18  ;;  %v11706_v20 = vpack.c.bf16 %v10657_v61, %v10657_v61  ;;  %v10330_v1 = vadd.f32 %v13654_v16, %v9780_v4  ;;  %v10171_v11 = vpop.f32.mrf.mxu1  ;;  %v9782_v15 = vadd.f32 %v17746_v41, %v18823_v45  ;;  %v10539_v4 = vld [vmem:[#allocation2 + $0x211] sm:$0xff]  ;;  %v17978_v25 = vpop.f32.mrf.mxu0 }
 0x658   :  { %v11709_v14 = vpack.c.bf16 %v10660_v7, %v10660_v7  ;;  %v10658_v23 = vmax.f32 %v10594_v8, 0.0  ;;  %v10599_v29 = vadd.f32 %v10535_v38, %v10471_v47  ;;  %v10469_v21 = vadd.f32 %v17655_v27, %v10398_v51  ;;  %v10537_v51 = vld [vmem:[#allocation2 + $0x1f9] sm:$0xff] }
 0x659   :  { %10978 = vst.msk [vmem:[%s18229_s7 + $0x70] sm:$0xf] %vm10949_vm3, %v11706_v20  ;;  %v10401_v39 = vmul.f32 %v17648_v58, %v10330_v1  ;;  %v10328_v24 = vadd.f32 %v10171_v11, %v9778_v52  ;;  %v13657_v3 = vpop.f32.mrf.mxu1  ;;  %v17998_v37 = vpop.f32.mrf.mxu0 }
 0x65a   :  { %10981 = vst.msk [vmem:[%s18229_s7 + $0x7c] sm:$0xf] %vm10949_vm3, %v11709_v14  ;;  %v11707_v32 = vpack.c.bf16 %v10658_v23, %v10658_v23  ;;  %v10663_v33 = vmax.f32 %v10599_v29, 0.0  ;;  %v10597_v50 = vadd.f32 %v10533_v55, %v10469_v21  ;;  %v10333_v35 = vadd.f32 %v13657_v3, %v9783_v9  ;;  %v18824_v55 = vld [vmem:[#allocation49_spill] sm:$0xff]  ;;  %v10540_v23 = vld [vmem:[#allocation2 + $0x219] sm:$0xff] }
 0x65b   :  { %v10472_v26 = vadd.f32 %v17655_v27, %v10401_v39  ;;  %v10399_v57 = vmul.f32 %v17648_v58, %v10328_v24  ;;  %v10184_v48 = vpop.f32.mrf.mxu1  ;;  %v9787_v1 = vadd.f32 %v17762_v5, %v18824_v55  ;;  %v18825_v24 = vld [vmem:[#allocation50_spill] sm:$0xff] }
 0x65c   :  { %10979 = vst.msk [vmem:[%s18229_s7 + $0x74] sm:$0xf] %vm10949_vm3, %v11707_v32  ;;  %v11712_v30 = vpack.c.bf16 %v10663_v33, %v10663_v33  ;;  %v10661_v34 = vmax.f32 %v10597_v50, 0.0  ;;  %v10404_v54 = vmul.f32 %v17648_v58, %v10333_v35  ;;  %v10331_v60 = vadd.f32 %v10184_v48, %v9781_v53  ;;  %v18826_v32 = vld [vmem:[#allocation4_spill] sm:$0xff] }
 0x65d   :  { %v10600_v13 = vadd.f32 %v10536_v31, %v10472_v26  ;;  %v10470_v2 = vadd.f32 %v17655_v27, %v10399_v57  ;;  %v13658_v18 = vpop.f32.mrf.mxu1  ;;  %v9785_v3 = vadd.f32 %v17782_v59, %v18825_v24  ;;  %v9788_v33 = vadd.f32 %v17800_v0, %v18826_v32  ;;  %v10538_v50 = vld [vmem:[#allocation2 + $0x201] sm:$0xff] }
 0x65e   :  { %10984 = vst.msk [vmem:[%s18229_s7 + $0x88] sm:$0xf] %vm10949_vm3, %v11712_v30  ;;  %v11710_v61 = vpack.c.bf16 %v10661_v34, %v10661_v34  ;;  %v10475_v38 = vadd.f32 %v17655_v27, %v10404_v54  ;;  %v10402_v16 = vmul.f32 %v17648_v58, %v10331_v60  ;;  %v10334_v7 = vadd.f32 %v13658_v18, %v9784_v6  ;;  %v18827_v59 = vld [vmem:[#allocation64_spill] sm:$0xff]  ;;  %v18830_v32 = vld [vmem:[#allocation9_spill] sm:$0xff] }
 0x65f   :  { %v10664_v8 = vmax.f32 %v10600_v13, 0.0  ;;  %v10598_v47 = vadd.f32 %v10534_v36, %v10470_v2  ;;  %v10187_v41 = vpop.f32.mrf.mxu1  ;;  %v9786_v30 = vadd.f32 %v17816_v10, %v18827_v59  ;;  %v18828_v10 = vld [vmem:[#allocation5_spill] sm:$0xff]  ;;  %v18831_v59 = vld [vmem:[#allocation10_spill] sm:$0xff] }
 0x660   :  { %10982 = vst.msk [vmem:[%s18229_s7 + $0x80] sm:$0xf] %vm10949_vm3, %v11710_v61  ;;  %v10603_v52 = vadd.f32 %v10539_v4, %v10475_v38  ;;  %v10473_v62 = vadd.f32 %v17655_v27, %v10402_v16  ;;  %v10405_v9 = vmul.f32 %v17648_v58, %v10334_v7  ;;  %v10332_v20 = vadd.f32 %v10187_v41, %v9782_v15  ;;  %v10543_v15 = vld [vmem:[#allocation2 + $0x241] sm:$0xff]  ;;  %v18016_v38 = vpop.f32.mrf.mxu0 }
 0x661   :  { %v11713_v11 = vpack.c.bf16 %v10664_v8, %v10664_v8  ;;  %v10662_v14 = vmax.f32 %v10598_v47, 0.0  ;;  %v13661_v29 = vpop.f32.mrf.mxu1  ;;  %v9791_v2 = vadd.f32 %v17836_v19, %v18828_v10  ;;  %v10541_v8 = vld [vmem:[#allocation2 + $0x229] sm:$0xff]  ;;  %v18829_v41 = vld [vmem:[#allocation8_spill] sm:$0xff] }
 0x662   :  { %v10667_v21 = vmax.f32 %v10603_v52, 0.0  ;;  %v10601_v43 = vadd.f32 %v10537_v51, %v10473_v62  ;;  %v10476_v53 = vadd.f32 %v17655_v27, %v10405_v9  ;;  %v10403_v39 = vmul.f32 %v17648_v58, %v10332_v20  ;;  %v10544_v9 = vld [vmem:[#allocation2 + $0x249] sm:$0xff] }
 0x663   :  { %10985 = vst.msk [vmem:[%s18229_s7 + $0x8c] sm:$0xf] %vm10949_vm3, %v11713_v11  ;;  %v11711_v5 = vpack.c.bf16 %v10662_v14, %v10662_v14  ;;  %v10337_v31 = vadd.f32 %v13661_v29, %v9787_v1  ;;  %v10200_v35 = vpop.f32.mrf.mxu1  ;;  %v9789_v19 = vadd.f32 %v17854_v63, %v18829_v41 }
 0x664   :  { %v11716_v6 = vpack.c.bf16 %v10667_v21, %v10667_v21  ;;  %v10665_v26 = vmax.f32 %v10601_v43, 0.0  ;;  %v10604_v57 = vadd.f32 %v10540_v23, %v10476_v53  ;;  %v10474_v48 = vadd.f32 %v17655_v27, %v10403_v39  ;;  %v10542_v21 = vld [vmem:[#allocation2 + $0x231] sm:$0xff]  ;;  %v18032_v43 = vpop.f32.mrf.mxu0 }
 0x665   :  { %10983 = vst.msk [vmem:[%s18229_s7 + $0x84] sm:$0xf] %vm10949_vm3, %v11711_v5  ;;  %v10408_v0 = vmul.f32 %v17648_v58, %v10337_v31  ;;  %v10335_v34 = vadd.f32 %v10200_v35, %v9785_v3  ;;  %v13662_v36 = vpop.f32.mrf.mxu1  ;;  %v10547_v31 = vld [vmem:[#allocation2 + $0x271] sm:$0xff] }
 0x666   :  { %10988 = vst.msk [vmem:[%s18229_s7 + $0x98] sm:$0xf] %vm10949_vm3, %v11716_v6  ;;  %v11714_v54 = vpack.c.bf16 %v10665_v26, %v10665_v26  ;;  %v10668_v60 = vmax.f32 %v10604_v57, 0.0  ;;  %v10602_v45 = vadd.f32 %v10538_v50, %v10474_v48  ;;  %v10338_v13 = vadd.f32 %v13662_v36, %v9788_v33  ;;  %v10545_v36 = vld [vmem:[#allocation2 + $0x259] sm:$0xff] }
 0x667   :  { %v10479_v4 = vadd.f32 %v17655_v27, %v10408_v0  ;;  %v10406_v18 = vmul.f32 %v17648_v58, %v10335_v34  ;;  %v10203_v61 = vpop.f32.mrf.mxu1  ;;  %v9792_v33 = vadd.f32 %v17870_v56, %v18830_v32  ;;  %v18832_v0 = vld [vmem:[#allocation13_spill] sm:$0xff] }
 0x668   :  { %10986 = vst.msk [vmem:[%s18229_s7 + $0x90] sm:$0xf] %vm10949_vm3, %v11714_v54  ;;  %v11717_v16 = vpack.c.bf16 %v10668_v60, %v10668_v60  ;;  %v10666_v7 = vmax.f32 %v10602_v45, 0.0  ;;  %v10409_v47 = vmul.f32 %v17648_v58, %v10338_v13  ;;  %v10336_v51 = vadd.f32 %v10203_v61, %v9786_v30  ;;  %v18052_v45 = vpop.f32.mrf.mxu0  ;;  %v10549_v32 = vld [vmem:[#allocation2 + $0x289] sm:$0xff] }
 0x669   :  { %v10607_v52 = vadd.f32 %v10543_v15, %v10479_v4  ;;  %v10477_v62 = vadd.f32 %v17655_v27, %v10406_v18  ;;  %v13665_v20 = vpop.f32.mrf.mxu1  ;;  %v9790_v30 = vadd.f32 %v17890_v40, %v18831_v59  ;;  %v9795_v34 = vadd.f32 %v17908_v44, %v18832_v0 }
 0x66a   :  { %10989 = vst.msk [vmem:[%s18229_s7 + $0x9c] sm:$0xf] %vm10949_vm3, %v11717_v16  ;;  %v11715_v55 = vpack.c.bf16 %v10666_v7, %v10666_v7  ;;  %v10480_v1 = vadd.f32 %v17655_v27, %v10409_v47  ;;  %v10407_v11 = vmul.f32 %v17648_v58, %v10336_v51  ;;  %v10341_v14 = vadd.f32 %v13665_v20, %v9791_v2  ;;  %v10546_v20 = vld [vmem:[#allocation2 + $0x261] sm:$0xff] }
 0x66b   :  { %v10671_v23 = vmax.f32 %v10607_v52, 0.0  ;;  %v10605_v29 = vadd.f32 %v10541_v8, %v10477_v62  ;;  %v10216_v63 = vpop.f32.mrf.mxu1  ;;  %v9793_v40 = vadd.f32 %v17924_v17, %v17585_v28  ;;  %v10548_v8 = vld [vmem:[#allocation2 + $0x279] sm:$0xff]  ;;  %v18833_v28 = vld [vmem:[#allocation65_spill] sm:$0xff]  ;;  %v18070_v52 = vpop.f32.mrf.mxu0 }
 0x66c   :  { %10987 = vst.msk [vmem:[%s18229_s7 + $0x94] sm:$0xf] %vm10949_vm3, %v11715_v55  ;;  %v10608_v53 = vadd.f32 %v10544_v9, %v10480_v1  ;;  %v10478_v39 = vadd.f32 %v17655_v27, %v10407_v11  ;;  %v10412_v24 = vmul.f32 %v17648_v58, %v10341_v14  ;;  %v10339_v3 = vadd.f32 %v10216_v63, %v9789_v19 }
 0x66d   :  { %v11720_v5 = vpack.c.bf16 %v10671_v23, %v10671_v23  ;;  %v10669_v50 = vmax.f32 %v10605_v29, 0.0  ;;  %v13666_v35 = vpop.f32.mrf.mxu1  ;;  %v9796_v17 = vadd.f32 %v17944_v49, %v18833_v28  ;;  %v9794_v49 = vadd.f32 %v17962_v12, %v17593_v42  ;;  %v10551_v23 = vld [vmem:[#allocation2 + $0x2a1] sm:$0xff]  ;;  %v18086_v12 = vpop.f32.mrf.mxu0  ;;  %v10555_v28 = vld [vmem:[#allocation2 + $0x2d1] sm:$0xff] }
 0x66e   :  { %v10672_v6 = vmax.f32 %v10608_v53, 0.0  ;;  %v10606_v26 = vadd.f32 %v10542_v21, %v10478_v39  ;;  %v10483_v57 = vadd.f32 %v17655_v27, %v10412_v24  ;;  %v10410_v48 = vmul.f32 %v17648_v58, %v10339_v3 }
 0x66f   :  { %10992 = vst.msk [vmem:[%s18229_s7 + $0xa8] sm:$0xf] %vm10949_vm3, %v11720_v5  ;;  %v11718_v56 = vpack.c.bf16 %v10669_v50, %v10669_v50  ;;  %v10342_v54 = vadd.f32 %v13666_v35, %v9792_v33  ;;  %v10219_v60 = vpop.f32.mrf.mxu1  ;;  %v18095_v5 = vld [vmem:[%s18228_s6] ss:$0 sm:$0xff]  ;;  %v18834_v35 = vld [vmem:[#allocation67_spill] sm:$0xff] }
 0x670   :  { %v11721_v15 = vpack.c.bf16 %v10672_v6, %v10672_v6  ;;  %v10670_v13 = vmax.f32 %v10606_v26, 0.0  ;;  %v10611_v10 = vadd.f32 %v10547_v31, %v10483_v57  ;;  %v10481_v2 = vadd.f32 %v17655_v27, %v10410_v48  ;;  %v10552_v48 = vld [vmem:[#allocation2 + $0x2a9] sm:$0xff] }
 0x671   :  { %10990 = vst.msk [vmem:[%s18229_s7 + $0xa0] sm:$0xf] %vm10949_vm3, %v11718_v56  ;;  %v10413_v44 = vmul.f32 %v17648_v58, %v10342_v54  ;;  %v10340_v4 = vadd.f32 %v10219_v60, %v9790_v30  ;;  %v13669_v18 = vpop.f32.mrf.mxu1  ;;  %v9799_v6 = vadd.f32 %v17978_v25, %v18834_v35  ;;  %v18835_v54 = vld [vmem:[#allocation66_spill] sm:$0xff]  ;;  %v18838_v35 = vld [vmem:[#allocation68_spill] sm:$0xff] }
 0x672   :  { %10993 = vst.msk [vmem:[%s18229_s7 + $0xac] sm:$0xf] %vm10949_vm3, %v11721_v15  ;;  %v11719_v61 = vpack.c.bf16 %v10670_v13, %v10670_v13  ;;  %v10675_v16 = vmax.f32 %v10611_v10, 0.0  ;;  %v10609_v7 = vadd.f32 %v10545_v36, %v10481_v2  ;;  %v10345_v47 = vadd.f32 %v13669_v18, %v9795_v34  ;;  %v10550_v15 = vld [vmem:[#allocation2 + $0x291] sm:$0xff]  ;;  %v9717_v2 = vpop.f32.mrf.mxu0 }
 0x673   :  { %v10484_v51 = vadd.f32 %v17655_v27, %v10413_v44  ;;  %v10411_v41 = vmul.f32 %v17648_v58, %v10340_v4  ;;  %v10232_v19 = vpop.f32.mrf.mxu1  ;;  %v9797_v36 = vadd.f32 %v17998_v37, %v17601_v46  ;;  %v9800_v60 = vadd.f32 %v18016_v38, %v18835_v54  ;;  %v18839_v54 = vld [vmem:[#allocation69_spill] sm:$0xff] }
 0x674   :  { %10991 = vst.msk [vmem:[%s18229_s7 + $0xa4] sm:$0xf] %vm10949_vm3, %v11719_v61  ;;  %v11724_v62 = vpack.c.bf16 %v10675_v16, %v10675_v16  ;;  %v10673_v9 = vmax.f32 %v10609_v7, 0.0  ;;  %v10416_v55 = vmul.f32 %v17648_v58, %v10345_v47  ;;  %v10343_v1 = vadd.f32 %v10232_v19, %v9793_v40  ;;  %v13615_v16 = vpop.f32.mrf.mxu0 }
 0x675   :  { %v10612_v11 = vadd.f32 %v10548_v8, %v10484_v51  ;;  %v10482_v14 = vadd.f32 %v17655_v27, %v10411_v41  ;;  %v13670_v29 = vpop.f32.mrf.mxu1  ;;  %v9798_v46 = vadd.f32 %v18032_v43, %v17609_v22  ;;  %v18836_v43 = vld [vmem:[#allocation14_spill] sm:$0xff] }
 0x676   :  { %10996 = vst.msk [vmem:[%s18229_s7 + $0xb8] sm:$0xf] %vm10949_vm3, %v11724_v62  ;;  %v11722_v21 = vpack.c.bf16 %v10673_v9, %v10673_v9  ;;  %v10487_v63 = vadd.f32 %v17655_v27, %v10416_v55  ;;  %v10414_v53 = vmul.f32 %v17648_v58, %v10343_v1  ;;  %v10346_v39 = vadd.f32 %v13670_v29, %v9796_v17  ;;  %v18101_v27 = vld [vmem:[%s18227_s5] ss:$0 sm:$0xff] }
 0x677   :  { %v10676_v24 = vmax.f32 %v10612_v11, 0.0  ;;  %v10610_v3 = vadd.f32 %v10546_v20, %v10482_v14  ;;  %v10235_v42 = vpop.f32.mrf.mxu1  ;;  %v9803_v17 = vadd.f32 %v18052_v45, %v18836_v43  ;;  %v10553_v20 = vld [vmem:[#allocation2 + $0x2b9] sm:$0xff] }
 0x678   :  { %10994 = vst.msk [vmem:[%s18229_s7 + $0xb0] sm:$0xf] %vm10949_vm3, %v11722_v21  ;;  %v10615_v33 = vadd.f32 %v10551_v23, %v10487_v63  ;;  %v10485_v58 = vadd.f32 %v18095_v5, %v10414_v53  ;;  %v10417_v50 = vmul.f32 %v18101_v27, %v10346_v39  ;;  %v10344_v31 = vadd.f32 %v10235_v42, %v9794_v49  ;;  %v18837_v49 = vld [vmem:[#allocation11_spill] sm:$0xff]  ;;  %v9730_v21 = vpop.f32.mrf.mxu0 }
 0x679   :  { %v11725_v26 = vpack.c.bf16 %v10676_v24, %v10676_v24  ;;  %v10674_v57 = vmax.f32 %v10610_v3, 0.0  ;;  %v13673_v59 = vpop.f32.mrf.mxu1  ;;  %v9801_v11 = vadd.f32 %v18070_v52, %v18837_v49  ;;  %v10556_v23 = vld [vmem:[#allocation2 + $0x2d9] sm:$0xff]  ;;  %v10554_v52 = vld [vmem:[#allocation2 + $0x2c1] sm:$0xff] }
 0x67a   :  { %v10679_v30 = vmax.f32 %v10615_v33, 0.0  ;;  %v10613_v0 = vadd.f32 %v10549_v32, %v10485_v58  ;;  %v10488_v34 = vadd.f32 %v18095_v5, %v10417_v50  ;;  %v10415_v56 = vmul.f32 %v18101_v27, %v10344_v31 }
 0x67b   :  { %10997 = vst.msk [vmem:[%s18229_s7 + $0xbc] sm:$0xf] %vm10949_vm3, %v11725_v26  ;;  %v11723_v25 = vpack.c.bf16 %v10674_v57, %v10674_v57  ;;  %v10349_v13 = vadd.f32 %v13673_v59, %v9799_v6  ;;  %v10248_v10 = vpop.f32.mrf.mxu1  ;;  %v9804_v6 = vadd.f32 %v18086_v12, %v18838_v35 }
 0x67c   :  { %v11728_v40 = vpack.c.bf16 %v10679_v30, %v10679_v30  ;;  %v10677_v44 = vmax.f32 %v10613_v0, 0.0  ;;  %v10616_v4 = vadd.f32 %v10552_v48, %v10488_v34  ;;  %v10486_v18 = vadd.f32 %v18095_v5, %v10415_v56  ;;  %v10559_v48 = vld [vmem:[#allocation2 + $0x301] sm:$0xff]  ;;  %v13616_v30 = vpop.f32.mrf.mxu0 }
 0x67d   :  { %10995 = vst.msk [vmem:[%s18229_s7 + $0xb4] sm:$0xf] %vm10949_vm3, %v11723_v25  ;;  %v10420_v37 = vmul.f32 %v18101_v27, %v10349_v13  ;;  %v10347_v38 = vadd.f32 %v10248_v10, %v9797_v36  ;;  %v13674_v61 = vpop.f32.mrf.mxu1  ;;  %v18840_v25 = vld [vmem:[#allocation71_spill] sm:$0xff]  ;;  %v10557_v13 = vld [vmem:[#allocation2 + $0x2e9] sm:$0xff] }
 0x67e   :  { %11000 = vst.msk [vmem:[%s18229_s7 + $0xc8] sm:$0xf] %vm10949_vm3, %v11728_v40  ;;  %v11726_v7 = vpack.c.bf16 %v10677_v44, %v10677_v44  ;;  %v10680_v8 = vmax.f32 %v10616_v4, 0.0  ;;  %v10614_v47 = vadd.f32 %v10550_v15, %v10486_v18  ;;  %v10350_v22 = vadd.f32 %v13674_v61, %v9800_v60 }
 0x67f   :  { %v10491_v51 = vadd.f32 %v18095_v5, %v10420_v37  ;;  %v10418_v41 = vmul.f32 %v18101_v27, %v10347_v38  ;;  %v10251_v19 = vpop.f32.mrf.mxu1  ;;  %v9802_v60 = vadd.f32 %v9717_v2, %v18839_v54  ;;  %v9807_v15 = vadd.f32 %v13615_v16, %v18840_v25  ;;  %v18841_v37 = vld [vmem:[#allocation70_spill] sm:$0xff] }
 0x680   :  { %10998 = vst.msk [vmem:[%s18229_s7 + $0xc0] sm:$0xf] %vm10949_vm3, %v11726_v7  ;;  %v11729_v62 = vpack.c.bf16 %v10680_v8, %v10680_v8  ;;  %v10678_v9 = vmax.f32 %v10614_v47, 0.0  ;;  %v10421_v55 = vmul.f32 %v18101_v27, %v10350_v22  ;;  %v10348_v1 = vadd.f32 %v10251_v19, %v9798_v46  ;;  %v9733_v7 = vpop.f32.mrf.mxu0  ;;  %v10560_v22 = vld [vmem:[#allocation2 + $0x309] sm:$0xff] }
 0x681   :  { %v10619_v45 = vadd.f32 %v10555_v28, %v10491_v51  ;;  %v10489_v14 = vadd.f32 %v18095_v5, %v10418_v41  ;;  %v13677_v29 = vpop.f32.mrf.mxu1  ;;  %v9805_v38 = vadd.f32 %v9730_v21, %v18841_v37 }
 0x682   :  { %11001 = vst.msk [vmem:[%s18229_s7 + $0xcc] sm:$0xf] %vm10949_vm3, %v11729_v62  ;;  %v11727_v63 = vpack.c.bf16 %v10678_v9, %v10678_v9  ;;  %v10492_v53 = vadd.f32 %v18095_v5, %v10421_v55  ;;  %v10419_v39 = vmul.f32 %v18101_v27, %v10348_v1  ;;  %v10353_v24 = vadd.f32 %v13677_v29, %v9803_v17  ;;  %v18842_v17 = vld [vmem:[#allocation15_spill] sm:$0xff] }
 0x683   :  { %v10683_v3 = vmax.f32 %v10619_v45, 0.0  ;;  %v10617_v32 = vadd.f32 %v10553_v20, %v10489_v14  ;;  %v10264_v42 = vpop.f32.mrf.mxu1  ;;  %v9808_v51 = vadd.f32 %v13616_v30, %v18842_v17  ;;  %v10558_v55 = vld [vmem:[#allocation2 + $0x2f1] sm:$0xff] }
 0x684   :  { %10999 = vst.msk [vmem:[%s18229_s7 + $0xc4] sm:$0xf] %vm10949_vm3, %v11727_v63  ;;  %v10620_v33 = vadd.f32 %v10556_v23, %v10492_v53  ;;  %v10490_v58 = vadd.f32 %v18095_v5, %v10419_v39  ;;  %v10424_v50 = vmul.f32 %v18101_v27, %v10353_v24  ;;  %v10351_v31 = vadd.f32 %v10264_v42, %v9801_v11  ;;  %v18843_v11 = vld [vmem:[#allocation16_spill] sm:$0xff]  ;;  %v10563_v29 = vld [vmem:[#allocation2 + $0x331] sm:$0xff] }
 0x685   :  { %v11732_v26 = vpack.c.bf16 %v10683_v3, %v10683_v3  ;;  %v10681_v57 = vmax.f32 %v10617_v32, 0.0  ;;  %v13678_v59 = vpop.f32.mrf.mxu1  ;;  %v9806_v45 = vadd.f32 %v9733_v7, %v18843_v11 }
 0x686   :  { %v10684_v0 = vmax.f32 %v10620_v33, 0.0  ;;  %v10618_v34 = vadd.f32 %v10554_v52, %v10490_v58  ;;  %v10495_v56 = vadd.f32 %v18095_v5, %v10424_v50  ;;  %v10422_v36 = vmul.f32 %v18101_v27, %v10351_v31  ;;  %v10561_v52 = vld [vmem:[#allocation2 + $0x319] sm:$0xff] }
 0x687   :  { %11004 = vst.msk [vmem:[%s18229_s7 + $0xd8] sm:$0xf] %vm10949_vm3, %v11732_v26  ;;  %v11730_v12 = vpack.c.bf16 %v10681_v57, %v10681_v57  ;;  %v10354_v10 = vadd.f32 %v13678_v59, %v9804_v6  ;;  %v10267_v40 = vpop.f32.mrf.mxu1  ;;  %v10564_v26 = vld [vmem:[#allocation2 + $0x339] sm:$0xff] }
 0x688   :  { %v11733_v44 = vpack.c.bf16 %v10684_v0, %v10684_v0  ;;  %v10682_v4 = vmax.f32 %v10618_v34, 0.0  ;;  %v10623_v18 = vadd.f32 %v10559_v48, %v10495_v56  ;;  %v10493_v46 = vadd.f32 %v18095_v5, %v10422_v36  ;;  %v10562_v34 = vld [vmem:[#allocation2 + $0x321] sm:$0xff] }
 0x689   :  { %11002 = vst.msk [vmem:[%s18229_s7 + $0xd0] sm:$0xf] %vm10949_vm3, %v11730_v12  ;;  %v10425_v2 = vmul.f32 %v18101_v27, %v10354_v10  ;;  %v10352_v61 = vadd.f32 %v10267_v40, %v9802_v60  ;;  %v13681_v16 = vpop.f32.mrf.mxu1 }
 0x68a   :  { %11005 = vst.msk [vmem:[%s18229_s7 + $0xdc] sm:$0xf] %vm10949_vm3, %v11733_v44  ;;  %v11731_v8 = vpack.c.bf16 %v10682_v4, %v10682_v4  ;;  %v10687_v47 = vmax.f32 %v10623_v18, 0.0  ;;  %v10621_v28 = vadd.f32 %v10557_v13, %v10493_v46  ;;  %v10357_v43 = vadd.f32 %v13681_v16, %v9807_v15 }
 0x68b   :  { %v10496_v41 = vadd.f32 %v18095_v5, %v10425_v2  ;;  %v10423_v19 = vmul.f32 %v18101_v27, %v10352_v61  ;;  %v10280_v62 = vpop.f32.mrf.mxu1 }
 0x68c   :  { %11003 = vst.msk [vmem:[%s18229_s7 + $0xd4] sm:$0xf] %vm10949_vm3, %v11731_v8  ;;  %v11736_v9 = vpack.c.bf16 %v10687_v47, %v10687_v47  ;;  %v10685_v20 = vmax.f32 %v10621_v28, 0.0  ;;  %v10428_v1 = vmul.f32 %v18101_v27, %v10357_v43  ;;  %v10355_v49 = vadd.f32 %v10280_v62, %v9805_v38 }
 0x68d   :  { %v10624_v14 = vadd.f32 %v10560_v22, %v10496_v41  ;;  %v10494_v23 = vadd.f32 %v18095_v5, %v10423_v19  ;;  %v13682_v21 = vpop.f32.mrf.mxu1 }
 0x68e   :  { %11008 = vst.msk [vmem:[%s18229_s7 + $0xe8] sm:$0xf] %vm10949_vm3, %v11736_v9  ;;  %v11734_v63 = vpack.c.bf16 %v10685_v20, %v10685_v20  ;;  %v10499_v53 = vadd.f32 %v18095_v5, %v10428_v1  ;;  %v10426_v39 = vmul.f32 %v18101_v27, %v10355_v49  ;;  %v10358_v24 = vadd.f32 %v13682_v21, %v9808_v51 }
 0x68f   :  { %v10688_v3 = vmax.f32 %v10624_v14, 0.0  ;;  %v10622_v32 = vadd.f32 %v10558_v55, %v10494_v23  ;;  %v10283_v42 = vpop.f32.mrf.mxu1 }
 0x690   :  { %11006 = vst.msk [vmem:[%s18229_s7 + $0xe0] sm:$0xf] %vm10949_vm3, %v11734_v63  ;;  %v10627_v33 = vadd.f32 %v10563_v29, %v10499_v53  ;;  %v10497_v58 = vadd.f32 %v18095_v5, %v10426_v39  ;;  %v10429_v50 = vmul.f32 %v18101_v27, %v10358_v24  ;;  %v10356_v31 = vadd.f32 %v10283_v42, %v9806_v45 }
 0x691   :  { %v11737_v35 = vpack.c.bf16 %v10688_v3, %v10688_v3  ;;  %v10686_v6 = vmax.f32 %v10622_v32, 0.0 }
 0x692   :  { %v10691_v57 = vmax.f32 %v10627_v33, 0.0  ;;  %v10625_v48 = vadd.f32 %v10561_v52, %v10497_v58  ;;  %v10500_v59 = vadd.f32 %v18095_v5, %v10429_v50  ;;  %v10427_v30 = vmul.f32 %v18101_v27, %v10356_v31 }
 0x693   :  { %11009 = vst.msk [vmem:[%s18229_s7 + $0xec] sm:$0xf] %vm10949_vm3, %v11737_v35  ;;  %v11735_v0 = vpack.c.bf16 %v10686_v6, %v10686_v6 }
 0x694   :  { %v11740_v56 = vpack.c.bf16 %v10691_v57, %v10691_v57  ;;  %v10689_v36 = vmax.f32 %v10625_v48, 0.0  ;;  %v10628_v54 = vadd.f32 %v10564_v26, %v10500_v59  ;;  %v10498_v60 = vadd.f32 %v18095_v5, %v10427_v30 }
 0x695   :  { %11007 = vst.msk [vmem:[%s18229_s7 + $0xe4] sm:$0xf] %vm10949_vm3, %v11735_v0 }
 0x696   :  { %11012 = vst.msk [vmem:[%s18229_s7 + $0xf8] sm:$0xf] %vm10949_vm3, %v11740_v56  ;;  %v11738_v27 = vpack.c.bf16 %v10689_v36, %v10689_v36  ;;  %v10692_v25 = vmax.f32 %v10628_v54, 0.0  ;;  %v10626_v15 = vadd.f32 %v10562_v34, %v10498_v60 }
 0x698   :  { %11010 = vst.msk [vmem:[%s18229_s7 + $0xf0] sm:$0xf] %vm10949_vm3, %v11738_v27  ;;  %v11741_v12 = vpack.c.bf16 %v10692_v25, %v10692_v25  ;;  %v10690_v5 = vmax.f32 %v10626_v15, 0.0 }
 0x69a   :  { %11013 = vst.msk [vmem:[%s18229_s7 + $0xfc] sm:$0xf] %vm10949_vm3, %v11741_v12  ;;  %v11739_v13 = vpack.c.bf16 %v10690_v5, %v10690_v5 }
 0x69c   :  { %11011 = vst.msk [vmem:[%s18229_s7 + $0xf4] sm:$0xf] %vm10949_vm3, %v11739_v13 }

</bundles_post_ra>
